<compile_context>
chip_gen: v5e
topology: v5e:2x2
jax: 0.10.0
libtpu: 0.0.40
codegen_flags: <defaults>
</compile_context>

<pallas_src>
import jax
import jax.numpy as jnp
import numpy as np
from jax.experimental import pallas as pl
from jax.experimental.pallas import tpu as pltpu

EPS = 1e-5
LANES = 128
_VMEM_LIMIT = 48 * 1024 * 1024


def _round_up(x, m):
    return (x + m - 1) // m * m


def _divisor_leq(n, target):
    t = max(1, min(n, int(target)))
    while n % t:
        t -= 1
    return t


# --------------------------------------------------------------------------
# Phase 1: fused 3x3x3 conv (im2col done in-kernel) + bias + partial BN stats
# --------------------------------------------------------------------------
def _conv3d_kernel(w_ref, b_ref, x0_ref, x1_ref, x2_ref, out_ref, stats_ref):
    # w_ref:     (27, Cin, Cout) bf16, tap-major (kd, kh, kw); resident in VMEM
    # b_ref:     (1, Cout)       f32 ; resident
    # xk_ref:    (1, 1, H+2, W+2, Cin) bf16  -- padded input plane at depth d+kd
    # out_ref:   (1, 1, H*W, Cout) f32       -- pre-BN conv output for plane (n, d)
    # stats_ref: (1, 1, 2, Cout)   f32       -- per-plane [sum, sum-of-squares]
    hp2, wp2, cin = x0_ref.shape[2], x0_ref.shape[3], x0_ref.shape[4]
    h, wd = hp2 - 2, wp2 - 2
    m = h * wd
    cout = out_ref.shape[3]

    acc = jnp.zeros((m, cout), jnp.float32)
    for kd, x_ref in enumerate((x0_ref, x1_ref, x2_ref)):
        for kh in range(3):
            for kw in range(3):
                patch = x_ref[0, 0, kh:kh + h, kw:kw + wd, :].reshape(m, cin)
                tap = w_ref[kd * 9 + kh * 3 + kw]            # (Cin, Cout) bf16
                acc = acc + jnp.dot(patch, tap,
                                    preferred_element_type=jnp.float32)
    acc = acc + b_ref[...]                                   # bias (broadcast)

    out_ref[0, 0, :, :] = acc
    # Partial per-channel stats for the global (two-phase) BatchNorm.
    # Padded channels are identically zero -> their stats are zero (harmless).
    stats_ref[0, 0, 0:1, :] = jnp.sum(acc, axis=0, keepdims=True)
    stats_ref[0, 0, 1:2, :] = jnp.sum(acc * acc, axis=0, keepdims=True)


def _conv3d(x_pad, w_taps, bias):
    """x_pad: (N, D+2, H+2, W+2, Cin) bf16; w_taps: (27, Cin, Cout) bf16;
    bias: (1, Cout) f32.  Returns (pre-BN output (N, D, H*W, Cout) f32,
    per-plane stats (N, D, 2, Cout) f32)."""
    n, dp2, hp2, wp2, cin = x_pad.shape
    d, h, wd = dp2 - 2, hp2 - 2, wp2 - 2
    cout = w_taps.shape[-1]

    plane_block = (1, 1, hp2, wp2, cin)
    out, stats = pl.pallas_call(
        _conv3d_kernel,
        out_shape=(jax.ShapeDtypeStruct((n, d, h * wd, cout), jnp.float32),
                   jax.ShapeDtypeStruct((n, d, 2, cout), jnp.float32)),
        grid=(n, d),
        in_specs=[
            pl.BlockSpec((27, cin, cout), lambda ni, di: (0, 0, 0)),  # resident weight
            pl.BlockSpec((1, cout), lambda ni, di: (0, 0)),           # resident bias
            pl.BlockSpec(plane_block, lambda ni, di: (ni, di, 0, 0, 0)),      # kd = 0
            pl.BlockSpec(plane_block, lambda ni, di: (ni, di + 1, 0, 0, 0)),  # kd = 1
            pl.BlockSpec(plane_block, lambda ni, di: (ni, di + 2, 0, 0, 0)),  # kd = 2
        ],
        out_specs=(
            pl.BlockSpec((1, 1, h * wd, cout), lambda ni, di: (ni, di, 0, 0)),
            pl.BlockSpec((1, 1, 2, cout), lambda ni, di: (ni, di, 0, 0)),
        ),
        compiler_params=pltpu.CompilerParams(
            dimension_semantics=("parallel", "parallel"),
            vmem_limit_bytes=_VMEM_LIMIT),
    )(w_taps, bias, x_pad, x_pad, x_pad)
    return out, stats


# --------------------------------------------------------------------------
# Phase 2: apply global BatchNorm (scale/shift) + ReLU, tiled over M
# --------------------------------------------------------------------------
def _bn_relu_kernel(x_ref, scale_ref, shift_ref, out_ref):
    y = x_ref[...] * scale_ref[...] + shift_ref[...]
    out_ref[...] = jnp.maximum(y, 0.0).astype(out_ref.dtype)


def _bn_relu_apply(y, stats, out_dtype):
    """y: (N, D, H*W, Cpad) f32 pre-BN conv output; stats: (N, D, 2, Cpad).
    Global parameter-free training-mode BN over all N*D*H*W positions + ReLU."""
    n, d, hw, cpad = y.shape
    m = n * d * hw
    s = jnp.sum(stats, axis=(0, 1))                       # tiny (2, Cpad) reduce
    mean = s[0] / m
    var = jnp.maximum(s[1] / m - mean * mean, 0.0)
    scale = jax.lax.rsqrt(var + EPS)
    shift = -mean * scale

    planes = n * d
    kp = _divisor_leq(planes, max(1, 2048 // hw))         # ~2048-row tiles
    y3 = y.reshape(planes, hw, cpad)
    out = pl.pallas_call(
        _bn_relu_kernel,
        out_shape=jax.ShapeDtypeStruct((planes, hw, cpad), out_dtype),
        grid=(planes // kp,),
        in_specs=[
            pl.BlockSpec((kp, hw, cpad), lambda i: (i, 0, 0)),
            pl.BlockSpec((1, 1, cpad), lambda i: (0, 0, 0)),
            pl.BlockSpec((1, 1, cpad), lambda i: (0, 0, 0)),
        ],
        out_specs=pl.BlockSpec((kp, hw, cpad), lambda i: (i, 0, 0)),
        compiler_params=pltpu.CompilerParams(
            dimension_semantics=("parallel",),
            vmem_limit_bytes=_VMEM_LIMIT),
    )(y3, scale.reshape(1, 1, cpad), shift.reshape(1, 1, cpad))
    return out.reshape(n, d, hw, cpad)


# --------------------------------------------------------------------------
# Parameter packing
# --------------------------------------------------------------------------
def _prep_weight(w, cin_pad, cout_pad):
    """PyTorch Conv3d weight (Cout, Cin, 3,3,3) -> (27, cin_pad, cout_pad) bf16,
    tap-major (kd, kh, kw), zero-padded channels."""
    cout, cin = w.shape[0], w.shape[1]
    wt = jnp.transpose(w, (2, 3, 4, 1, 0)).reshape(27, cin, cout)
    wt = jnp.pad(wt, ((0, 0), (0, cin_pad - cin), (0, cout_pad - cout)))
    return wt.astype(jnp.bfloat16)


def _prep_bias(b, cout_pad):
    cout = b.shape[0]
    return jnp.pad(b.astype(jnp.float32).reshape(1, cout),
                   ((0, 0), (0, cout_pad - cout)))


# --------------------------------------------------------------------------
# Full forward pass
# --------------------------------------------------------------------------
def custom_conv_block_forward(x_ncdhw, params):
    """Forward pass of custom_conv_block.  Input/output: NCDHW (PyTorch)."""
    w1, b1, w2, b2 = params
    n, cin, d, h, w = x_ncdhw.shape
    cout = w1.shape[0]
    cpad = _round_up(cout, LANES)

    # NCDHW -> NDHWC (channels-last = lane-dense), bf16 for the MXU.
    x = jnp.transpose(x_ncdhw, (0, 2, 3, 4, 1)).astype(jnp.bfloat16)
    xp = jnp.pad(x, ((0, 0), (1, 1), (1, 1), (1, 1), (0, 0)))

    # conv1 + RandomBatchNorm + ReLU
    y, st1 = _conv3d(xp, _prep_weight(w1, cin, cpad), _prep_bias(b1, cpad))
    a1 = _bn_relu_apply(y, st1, jnp.bfloat16).reshape(n, d, h, w, cpad)
    a1p = jnp.pad(a1, ((0, 0), (1, 1), (1, 1), (1, 1), (0, 0)))

    # conv2 + RandomBatchNorm + ReLU (channels stay 128-padded throughout;
    # padded channels are exactly zero and their weight rows are zero).
    z, st2 = _conv3d(a1p, _prep_weight(w2, cpad, cpad), _prep_bias(b2, cpad))
    a2 = _bn_relu_apply(z, st2, jnp.float32).reshape(n, d, h, w, cpad)

    return jnp.transpose(a2[..., :cout], (0, 4, 1, 2, 3))   # NDHWC -> NCDHW


def init_params(key, in_c, out_c):
    """Deterministic Conv3d params (PyTorch default uniform init bounds)."""
    k1, k2, k3, k4 = jax.random.split(key, 4)
    bound1 = 1.0 / np.sqrt(in_c * 27)
    w1 = jax.random.uniform(k1, (out_c, in_c, 3, 3, 3), jnp.float32, -bound1, bound1)
    b1 = jax.random.uniform(k2, (out_c,), jnp.float32, -bound1, bound1)
    bound2 = 1.0 / np.sqrt(out_c * 27)
    w2 = jax.random.uniform(k3, (out_c, out_c, 3, 3, 3), jnp.float32, -bound2, bound2)
    b2 = jax.random.uniform(k4, (out_c,), jnp.float32, -bound2, bound2)
    return w1, b1, w2, b2


def reference_forward(x_ncdhw, params):
    """Pure-JAX f32 reference (lax.conv) for numerical sanity check."""
    w1, b1, w2, b2 = params

    def conv(x, w, b):
        y = jax.lax.conv_general_dilated(
            x, w, window_strides=(1, 1, 1),
            padding=((1, 1), (1, 1), (1, 1)),
            dimension_numbers=("NCDHW", "OIDHW", "NCDHW"))
        return y + b[None, :, None, None, None]

    def bn_relu(x):
        mean = jnp.mean(x, axis=(0, 2, 3, 4), keepdims=True)
        var = jnp.mean((x - mean) ** 2, axis=(0, 2, 3, 4), keepdims=True)
        return jnp.maximum((x - mean) * jax.lax.rsqrt(var + EPS), 0.0)

    x = bn_relu(conv(x_ncdhw, w1, b1))
    x = bn_relu(conv(x, w2, b2))
    return x


if __name__ == "__main__":
    key = jax.random.PRNGKey(0)
    k_x, k_p = jax.random.split(key)

    N, IN_C, OUT_C, D, H, W = 2, 4, 8, 8, 8, 8
    x = jax.random.normal(k_x, (N, IN_C, D, H, W), dtype=jnp.float32)
    params = init_params(k_p, IN_C, OUT_C)

    fwd = jax.jit(custom_conv_block_forward)
    out = jax.block_until_ready(fwd(x, params))
    ref = jax.block_until_ready(reference_forward(x, params))

    assert out.shape == (N, OUT_C, D, H, W), out.shape
    # Tolerance accounts for bf16 MXU inputs (reference is pure f32).
    err = float(np.max(np.abs(np.asarray(out) - np.asarray(ref))))
    assert np.allclose(np.asarray(out), np.asarray(ref), atol=7e-2, rtol=7e-2), err

    print("KERNEL_OK")
</pallas_src>

<mosaic_0001>
module attributes {stable_mosaic.version = 11 : i64} {
  func.func @_conv3d_kernel(%arg0: i32, %arg1: i32, %arg2: memref<27x4x128xbf16, #tpu.memory_space<vmem>>, %arg3: memref<1x128xf32, #tpu.memory_space<vmem>>, %arg4: memref<1x1x10x10x4xbf16, #tpu.memory_space<vmem>>, %arg5: memref<1x1x10x10x4xbf16, #tpu.memory_space<vmem>>, %arg6: memref<1x1x10x10x4xbf16, #tpu.memory_space<vmem>>, %arg7: memref<1x1x64x128xf32, #tpu.memory_space<vmem>>, %arg8: memref<1x1x2x128xf32, #tpu.memory_space<vmem>>) attributes {dimension_semantics = [#tpu.dimension_semantics<parallel>, #tpu.dimension_semantics<parallel>], iteration_bounds = array<i64: 2, 8>, scalar_prefetch = 0 : i64, scratch_operands = 0 : i64, tpu.core_type = #tpu.core_type<tc>, window_params = [{pipeline_mode = #tpu.pipeline_mode<synchronous>, transform_indices = @transform_0, window_bounds = array<i64: 27, 4, 128>}, {pipeline_mode = #tpu.pipeline_mode<synchronous>, transform_indices = @transform_1, window_bounds = array<i64: 1, 128>}, {transform_indices = @transform_2, window_bounds = array<i64: 1, 1, 10, 10, 4>}, {transform_indices = @transform_3, window_bounds = array<i64: 1, 1, 10, 10, 4>}, {transform_indices = @transform_4, window_bounds = array<i64: 1, 1, 10, 10, 4>}, {transform_indices = @transform_5, window_bounds = array<i64: 1, 1, 64, 128>}, {transform_indices = @transform_6, window_bounds = array<i64: 1, 1, 2, 128>}]} {
    %cst = arith.constant 0.000000e+00 : f32
    %0 = vector.broadcast %cst : f32 to vector<64x128xf32>
    %c0 = arith.constant 0 : index
    %c0_0 = arith.constant 0 : index
    %c0_1 = arith.constant 0 : index
    %c0_2 = arith.constant 0 : index
    %c0_3 = arith.constant 0 : index
    %1 = vector.load %arg4[%c0, %c0_0, %c0_1, %c0_2, %c0_3] : memref<1x1x10x10x4xbf16, #tpu.memory_space<vmem>>, vector<1x1x8x8x4xbf16>
    %2 = vector.shape_cast %1 : vector<1x1x8x8x4xbf16> to vector<8x8x4xbf16>
    %3 = vector.shape_cast %2 : vector<8x8x4xbf16> to vector<64x4xbf16>
    %c0_4 = arith.constant 0 : index
    %c0_5 = arith.constant 0 : index
    %c0_6 = arith.constant 0 : index
    %4 = vector.load %arg2[%c0_4, %c0_5, %c0_6] : memref<27x4x128xbf16, #tpu.memory_space<vmem>>, vector<1x4x128xbf16>
    %5 = vector.shape_cast %4 : vector<1x4x128xbf16> to vector<4x128xbf16>
    %cst_7 = arith.constant dense<0.000000e+00> : vector<64x128xf32>
    %6 = tpu.matmul %3, %5, %cst_7 {dimension_numbers = #tpu.dot_dimension_numbers<[1], [0], [0], [1], [0, 0, 1, 1], [], []>} : vector<64x4xbf16>, vector<4x128xbf16>, vector<64x128xf32> -> vector<64x128xf32>
    %7 = arith.addf %0, %6 : vector<64x128xf32>
    %c0_8 = arith.constant 0 : index
    %c0_9 = arith.constant 0 : index
    %c0_10 = arith.constant 0 : index
    %c1 = arith.constant 1 : index
    %c0_11 = arith.constant 0 : index
    %8 = vector.load %arg4[%c0_8, %c0_9, %c0_10, %c1, %c0_11] : memref<1x1x10x10x4xbf16, #tpu.memory_space<vmem>>, vector<1x1x8x8x4xbf16>
    %9 = vector.shape_cast %8 : vector<1x1x8x8x4xbf16> to vector<8x8x4xbf16>
    %10 = vector.shape_cast %9 : vector<8x8x4xbf16> to vector<64x4xbf16>
    %c1_12 = arith.constant 1 : index
    %c0_13 = arith.constant 0 : index
    %c0_14 = arith.constant 0 : index
    %11 = vector.load %arg2[%c1_12, %c0_13, %c0_14] : memref<27x4x128xbf16, #tpu.memory_space<vmem>>, vector<1x4x128xbf16>
    %12 = vector.shape_cast %11 : vector<1x4x128xbf16> to vector<4x128xbf16>
    %cst_15 = arith.constant dense<0.000000e+00> : vector<64x128xf32>
    %13 = tpu.matmul %10, %12, %cst_15 {dimension_numbers = #tpu.dot_dimension_numbers<[1], [0], [0], [1], [0, 0, 1, 1], [], []>} : vector<64x4xbf16>, vector<4x128xbf16>, vector<64x128xf32> -> vector<64x128xf32>
    %14 = arith.addf %7, %13 : vector<64x128xf32>
    %c0_16 = arith.constant 0 : index
    %c0_17 = arith.constant 0 : index
    %c0_18 = arith.constant 0 : index
    %c2 = arith.constant 2 : index
    %c0_19 = arith.constant 0 : index
    %15 = vector.load %arg4[%c0_16, %c0_17, %c0_18, %c2, %c0_19] : memref<1x1x10x10x4xbf16, #tpu.memory_space<vmem>>, vector<1x1x8x8x4xbf16>
    %16 = vector.shape_cast %15 : vector<1x1x8x8x4xbf16> to vector<8x8x4xbf16>
    %17 = vector.shape_cast %16 : vector<8x8x4xbf16> to vector<64x4xbf16>
    %c2_20 = arith.constant 2 : index
    %c0_21 = arith.constant 0 : index
    %c0_22 = arith.constant 0 : index
    %18 = vector.load %arg2[%c2_20, %c0_21, %c0_22] : memref<27x4x128xbf16, #tpu.memory_space<vmem>>, vector<1x4x128xbf16>
    %19 = vector.shape_cast %18 : vector<1x4x128xbf16> to vector<4x128xbf16>
    %cst_23 = arith.constant dense<0.000000e+00> : vector<64x128xf32>
    %20 = tpu.matmul %17, %19, %cst_23 {dimension_numbers = #tpu.dot_dimension_numbers<[1], [0], [0], [1], [0, 0, 1, 1], [], []>} : vector<64x4xbf16>, vector<4x128xbf16>, vector<64x128xf32> -> vector<64x128xf32>
    %21 = arith.addf %14, %20 : vector<64x128xf32>
    %c0_24 = arith.constant 0 : index
    %c0_25 = arith.constant 0 : index
    %c1_26 = arith.constant 1 : index
    %c0_27 = arith.constant 0 : index
    %c0_28 = arith.constant 0 : index
    %22 = vector.load %arg4[%c0_24, %c0_25, %c1_26, %c0_27, %c0_28] : memref<1x1x10x10x4xbf16, #tpu.memory_space<vmem>>, vector<1x1x8x8x4xbf16>
    %23 = vector.shape_cast %22 : vector<1x1x8x8x4xbf16> to vector<8x8x4xbf16>
    %24 = vector.shape_cast %23 : vector<8x8x4xbf16> to vector<64x4xbf16>
    %c3 = arith.constant 3 : index
    %c0_29 = arith.constant 0 : index
    %c0_30 = arith.constant 0 : index
    %25 = vector.load %arg2[%c3, %c0_29, %c0_30] : memref<27x4x128xbf16, #tpu.memory_space<vmem>>, vector<1x4x128xbf16>
    %26 = vector.shape_cast %25 : vector<1x4x128xbf16> to vector<4x128xbf16>
    %cst_31 = arith.constant dense<0.000000e+00> : vector<64x128xf32>
    %27 = tpu.matmul %24, %26, %cst_31 {dimension_numbers = #tpu.dot_dimension_numbers<[1], [0], [0], [1], [0, 0, 1, 1], [], []>} : vector<64x4xbf16>, vector<4x128xbf16>, vector<64x128xf32> -> vector<64x128xf32>
    %28 = arith.addf %21, %27 : vector<64x128xf32>
    %c0_32 = arith.constant 0 : index
    %c0_33 = arith.constant 0 : index
    %c1_34 = arith.constant 1 : index
    %c1_35 = arith.constant 1 : index
    %c0_36 = arith.constant 0 : index
    %29 = vector.load %arg4[%c0_32, %c0_33, %c1_34, %c1_35, %c0_36] : memref<1x1x10x10x4xbf16, #tpu.memory_space<vmem>>, vector<1x1x8x8x4xbf16>
    %30 = vector.shape_cast %29 : vector<1x1x8x8x4xbf16> to vector<8x8x4xbf16>
    %31 = vector.shape_cast %30 : vector<8x8x4xbf16> to vector<64x4xbf16>
    %c4 = arith.constant 4 : index
    %c0_37 = arith.constant 0 : index
    %c0_38 = arith.constant 0 : index
    %32 = vector.load %arg2[%c4, %c0_37, %c0_38] : memref<27x4x128xbf16, #tpu.memory_space<vmem>>, vector<1x4x128xbf16>
    %33 = vector.shape_cast %32 : vector<1x4x128xbf16> to vector<4x128xbf16>
    %cst_39 = arith.constant dense<0.000000e+00> : vector<64x128xf32>
    %34 = tpu.matmul %31, %33, %cst_39 {dimension_numbers = #tpu.dot_dimension_numbers<[1], [0], [0], [1], [0, 0, 1, 1], [], []>} : vector<64x4xbf16>, vector<4x128xbf16>, vector<64x128xf32> -> vector<64x128xf32>
    %35 = arith.addf %28, %34 : vector<64x128xf32>
    %c0_40 = arith.constant 0 : index
    %c0_41 = arith.constant 0 : index
    %c1_42 = arith.constant 1 : index
    %c2_43 = arith.constant 2 : index
    %c0_44 = arith.constant 0 : index
    %36 = vector.load %arg4[%c0_40, %c0_41, %c1_42, %c2_43, %c0_44] : memref<1x1x10x10x4xbf16, #tpu.memory_space<vmem>>, vector<1x1x8x8x4xbf16>
    %37 = vector.shape_cast %36 : vector<1x1x8x8x4xbf16> to vector<8x8x4xbf16>
    %38 = vector.shape_cast %37 : vector<8x8x4xbf16> to vector<64x4xbf16>
    %c5 = arith.constant 5 : index
    %c0_45 = arith.constant 0 : index
    %c0_46 = arith.constant 0 : index
    %39 = vector.load %arg2[%c5, %c0_45, %c0_46] : memref<27x4x128xbf16, #tpu.memory_space<vmem>>, vector<1x4x128xbf16>
    %40 = vector.shape_cast %39 : vector<1x4x128xbf16> to vector<4x128xbf16>
    %cst_47 = arith.constant dense<0.000000e+00> : vector<64x128xf32>
    %41 = tpu.matmul %38, %40, %cst_47 {dimension_numbers = #tpu.dot_dimension_numbers<[1], [0], [0], [1], [0, 0, 1, 1], [], []>} : vector<64x4xbf16>, vector<4x128xbf16>, vector<64x128xf32> -> vector<64x128xf32>
    %42 = arith.addf %35, %41 : vector<64x128xf32>
    %c0_48 = arith.constant 0 : index
    %c0_49 = arith.constant 0 : index
    %c2_50 = arith.constant 2 : index
    %c0_51 = arith.constant 0 : index
    %c0_52 = arith.constant 0 : index
    %43 = vector.load %arg4[%c0_48, %c0_49, %c2_50, %c0_51, %c0_52] : memref<1x1x10x10x4xbf16, #tpu.memory_space<vmem>>, vector<1x1x8x8x4xbf16>
    %44 = vector.shape_cast %43 : vector<1x1x8x8x4xbf16> to vector<8x8x4xbf16>
    %45 = vector.shape_cast %44 : vector<8x8x4xbf16> to vector<64x4xbf16>
    %c6 = arith.constant 6 : index
    %c0_53 = arith.constant 0 : index
    %c0_54 = arith.constant 0 : index
    %46 = vector.load %arg2[%c6, %c0_53, %c0_54] : memref<27x4x128xbf16, #tpu.memory_space<vmem>>, vector<1x4x128xbf16>
    %47 = vector.shape_cast %46 : vector<1x4x128xbf16> to vector<4x128xbf16>
    %cst_55 = arith.constant dense<0.000000e+00> : vector<64x128xf32>
    %48 = tpu.matmul %45, %47, %cst_55 {dimension_numbers = #tpu.dot_dimension_numbers<[1], [0], [0], [1], [0, 0, 1, 1], [], []>} : vector<64x4xbf16>, vector<4x128xbf16>, vector<64x128xf32> -> vector<64x128xf32>
    %49 = arith.addf %42, %48 : vector<64x128xf32>
    %c0_56 = arith.constant 0 : index
    %c0_57 = arith.constant 0 : index
    %c2_58 = arith.constant 2 : index
    %c1_59 = arith.constant 1 : index
    %c0_60 = arith.constant 0 : index
    %50 = vector.load %arg4[%c0_56, %c0_57, %c2_58, %c1_59, %c0_60] : memref<1x1x10x10x4xbf16, #tpu.memory_space<vmem>>, vector<1x1x8x8x4xbf16>
    %51 = vector.shape_cast %50 : vector<1x1x8x8x4xbf16> to vector<8x8x4xbf16>
    %52 = vector.shape_cast %51 : vector<8x8x4xbf16> to vector<64x4xbf16>
    %c7 = arith.constant 7 : index
    %c0_61 = arith.constant 0 : index
    %c0_62 = arith.constant 0 : index
    %53 = vector.load %arg2[%c7, %c0_61, %c0_62] : memref<27x4x128xbf16, #tpu.memory_space<vmem>>, vector<1x4x128xbf16>
    %54 = vector.shape_cast %53 : vector<1x4x128xbf16> to vector<4x128xbf16>
    %cst_63 = arith.constant dense<0.000000e+00> : vector<64x128xf32>
    %55 = tpu.matmul %52, %54, %cst_63 {dimension_numbers = #tpu.dot_dimension_numbers<[1], [0], [0], [1], [0, 0, 1, 1], [], []>} : vector<64x4xbf16>, vector<4x128xbf16>, vector<64x128xf32> -> vector<64x128xf32>
    %56 = arith.addf %49, %55 : vector<64x128xf32>
    %c0_64 = arith.constant 0 : index
    %c0_65 = arith.constant 0 : index
    %c2_66 = arith.constant 2 : index
    %c2_67 = arith.constant 2 : index
    %c0_68 = arith.constant 0 : index
    %57 = vector.load %arg4[%c0_64, %c0_65, %c2_66, %c2_67, %c0_68] : memref<1x1x10x10x4xbf16, #tpu.memory_space<vmem>>, vector<1x1x8x8x4xbf16>
    %58 = vector.shape_cast %57 : vector<1x1x8x8x4xbf16> to vector<8x8x4xbf16>
    %59 = vector.shape_cast %58 : vector<8x8x4xbf16> to vector<64x4xbf16>
    %c8 = arith.constant 8 : index
    %c0_69 = arith.constant 0 : index
    %c0_70 = arith.constant 0 : index
    %60 = vector.load %arg2[%c8, %c0_69, %c0_70] : memref<27x4x128xbf16, #tpu.memory_space<vmem>>, vector<1x4x128xbf16>
    %61 = vector.shape_cast %60 : vector<1x4x128xbf16> to vector<4x128xbf16>
    %cst_71 = arith.constant dense<0.000000e+00> : vector<64x128xf32>
    %62 = tpu.matmul %59, %61, %cst_71 {dimension_numbers = #tpu.dot_dimension_numbers<[1], [0], [0], [1], [0, 0, 1, 1], [], []>} : vector<64x4xbf16>, vector<4x128xbf16>, vector<64x128xf32> -> vector<64x128xf32>
    %63 = arith.addf %56, %62 : vector<64x128xf32>
    %c0_72 = arith.constant 0 : index
    %c0_73 = arith.constant 0 : index
    %c0_74 = arith.constant 0 : index
    %c0_75 = arith.constant 0 : index
    %c0_76 = arith.constant 0 : index
    %64 = vector.load %arg5[%c0_72, %c0_73, %c0_74, %c0_75, %c0_76] : memref<1x1x10x10x4xbf16, #tpu.memory_space<vmem>>, vector<1x1x8x8x4xbf16>
    %65 = vector.shape_cast %64 : vector<1x1x8x8x4xbf16> to vector<8x8x4xbf16>
    %66 = vector.shape_cast %65 : vector<8x8x4xbf16> to vector<64x4xbf16>
    %c9 = arith.constant 9 : index
    %c0_77 = arith.constant 0 : index
    %c0_78 = arith.constant 0 : index
    %67 = vector.load %arg2[%c9, %c0_77, %c0_78] : memref<27x4x128xbf16, #tpu.memory_space<vmem>>, vector<1x4x128xbf16>
    %68 = vector.shape_cast %67 : vector<1x4x128xbf16> to vector<4x128xbf16>
    %cst_79 = arith.constant dense<0.000000e+00> : vector<64x128xf32>
    %69 = tpu.matmul %66, %68, %cst_79 {dimension_numbers = #tpu.dot_dimension_numbers<[1], [0], [0], [1], [0, 0, 1, 1], [], []>} : vector<64x4xbf16>, vector<4x128xbf16>, vector<64x128xf32> -> vector<64x128xf32>
    %70 = arith.addf %63, %69 : vector<64x128xf32>
    %c0_80 = arith.constant 0 : index
    %c0_81 = arith.constant 0 : index
    %c0_82 = arith.constant 0 : index
    %c1_83 = arith.constant 1 : index
    %c0_84 = arith.constant 0 : index
    %71 = vector.load %arg5[%c0_80, %c0_81, %c0_82, %c1_83, %c0_84] : memref<1x1x10x10x4xbf16, #tpu.memory_space<vmem>>, vector<1x1x8x8x4xbf16>
    %72 = vector.shape_cast %71 : vector<1x1x8x8x4xbf16> to vector<8x8x4xbf16>
    %73 = vector.shape_cast %72 : vector<8x8x4xbf16> to vector<64x4xbf16>
    %c10 = arith.constant 10 : index
    %c0_85 = arith.constant 0 : index
    %c0_86 = arith.constant 0 : index
    %74 = vector.load %arg2[%c10, %c0_85, %c0_86] : memref<27x4x128xbf16, #tpu.memory_space<vmem>>, vector<1x4x128xbf16>
    %75 = vector.shape_cast %74 : vector<1x4x128xbf16> to vector<4x128xbf16>
    %cst_87 = arith.constant dense<0.000000e+00> : vector<64x128xf32>
    %76 = tpu.matmul %73, %75, %cst_87 {dimension_numbers = #tpu.dot_dimension_numbers<[1], [0], [0], [1], [0, 0, 1, 1], [], []>} : vector<64x4xbf16>, vector<4x128xbf16>, vector<64x128xf32> -> vector<64x128xf32>
    %77 = arith.addf %70, %76 : vector<64x128xf32>
    %c0_88 = arith.constant 0 : index
    %c0_89 = arith.constant 0 : index
    %c0_90 = arith.constant 0 : index
    %c2_91 = arith.constant 2 : index
    %c0_92 = arith.constant 0 : index
    %78 = vector.load %arg5[%c0_88, %c0_89, %c0_90, %c2_91, %c0_92] : memref<1x1x10x10x4xbf16, #tpu.memory_space<vmem>>, vector<1x1x8x8x4xbf16>
    %79 = vector.shape_cast %78 : vector<1x1x8x8x4xbf16> to vector<8x8x4xbf16>
    %80 = vector.shape_cast %79 : vector<8x8x4xbf16> to vector<64x4xbf16>
    %c11 = arith.constant 11 : index
    %c0_93 = arith.constant 0 : index
    %c0_94 = arith.constant 0 : index
    %81 = vector.load %arg2[%c11, %c0_93, %c0_94] : memref<27x4x128xbf16, #tpu.memory_space<vmem>>, vector<1x4x128xbf16>
    %82 = vector.shape_cast %81 : vector<1x4x128xbf16> to vector<4x128xbf16>
    %cst_95 = arith.constant dense<0.000000e+00> : vector<64x128xf32>
    %83 = tpu.matmul %80, %82, %cst_95 {dimension_numbers = #tpu.dot_dimension_numbers<[1], [0], [0], [1], [0, 0, 1, 1], [], []>} : vector<64x4xbf16>, vector<4x128xbf16>, vector<64x128xf32> -> vector<64x128xf32>
    %84 = arith.addf %77, %83 : vector<64x128xf32>
    %c0_96 = arith.constant 0 : index
    %c0_97 = arith.constant 0 : index
    %c1_98 = arith.constant 1 : index
    %c0_99 = arith.constant 0 : index
    %c0_100 = arith.constant 0 : index
    %85 = vector.load %arg5[%c0_96, %c0_97, %c1_98, %c0_99, %c0_100] : memref<1x1x10x10x4xbf16, #tpu.memory_space<vmem>>, vector<1x1x8x8x4xbf16>
    %86 = vector.shape_cast %85 : vector<1x1x8x8x4xbf16> to vector<8x8x4xbf16>
    %87 = vector.shape_cast %86 : vector<8x8x4xbf16> to vector<64x4xbf16>
    %c12 = arith.constant 12 : index
    %c0_101 = arith.constant 0 : index
    %c0_102 = arith.constant 0 : index
    %88 = vector.load %arg2[%c12, %c0_101, %c0_102] : memref<27x4x128xbf16, #tpu.memory_space<vmem>>, vector<1x4x128xbf16>
    %89 = vector.shape_cast %88 : vector<1x4x128xbf16> to vector<4x128xbf16>
    %cst_103 = arith.constant dense<0.000000e+00> : vector<64x128xf32>
    %90 = tpu.matmul %87, %89, %cst_103 {dimension_numbers = #tpu.dot_dimension_numbers<[1], [0], [0], [1], [0, 0, 1, 1], [], []>} : vector<64x4xbf16>, vector<4x128xbf16>, vector<64x128xf32> -> vector<64x128xf32>
    %91 = arith.addf %84, %90 : vector<64x128xf32>
    %c0_104 = arith.constant 0 : index
    %c0_105 = arith.constant 0 : index
    %c1_106 = arith.constant 1 : index
    %c1_107 = arith.constant 1 : index
    %c0_108 = arith.constant 0 : index
    %92 = vector.load %arg5[%c0_104, %c0_105, %c1_106, %c1_107, %c0_108] : memref<1x1x10x10x4xbf16, #tpu.memory_space<vmem>>, vector<1x1x8x8x4xbf16>
    %93 = vector.shape_cast %92 : vector<1x1x8x8x4xbf16> to vector<8x8x4xbf16>
    %94 = vector.shape_cast %93 : vector<8x8x4xbf16> to vector<64x4xbf16>
    %c13 = arith.constant 13 : index
    %c0_109 = arith.constant 0 : index
    %c0_110 = arith.constant 0 : index
    %95 = vector.load %arg2[%c13, %c0_109, %c0_110] : memref<27x4x128xbf16, #tpu.memory_space<vmem>>, vector<1x4x128xbf16>
    %96 = vector.shape_cast %95 : vector<1x4x128xbf16> to vector<4x128xbf16>
    %cst_111 = arith.constant dense<0.000000e+00> : vector<64x128xf32>
    %97 = tpu.matmul %94, %96, %cst_111 {dimension_numbers = #tpu.dot_dimension_numbers<[1], [0], [0], [1], [0, 0, 1, 1], [], []>} : vector<64x4xbf16>, vector<4x128xbf16>, vector<64x128xf32> -> vector<64x128xf32>
    %98 = arith.addf %91, %97 : vector<64x128xf32>
    %c0_112 = arith.constant 0 : index
    %c0_113 = arith.constant 0 : index
    %c1_114 = arith.constant 1 : index
    %c2_115 = arith.constant 2 : index
    %c0_116 = arith.constant 0 : index
    %99 = vector.load %arg5[%c0_112, %c0_113, %c1_114, %c2_115, %c0_116] : memref<1x1x10x10x4xbf16, #tpu.memory_space<vmem>>, vector<1x1x8x8x4xbf16>
    %100 = vector.shape_cast %99 : vector<1x1x8x8x4xbf16> to vector<8x8x4xbf16>
    %101 = vector.shape_cast %100 : vector<8x8x4xbf16> to vector<64x4xbf16>
    %c14 = arith.constant 14 : index
    %c0_117 = arith.constant 0 : index
    %c0_118 = arith.constant 0 : index
    %102 = vector.load %arg2[%c14, %c0_117, %c0_118] : memref<27x4x128xbf16, #tpu.memory_space<vmem>>, vector<1x4x128xbf16>
    %103 = vector.shape_cast %102 : vector<1x4x128xbf16> to vector<4x128xbf16>
    %cst_119 = arith.constant dense<0.000000e+00> : vector<64x128xf32>
    %104 = tpu.matmul %101, %103, %cst_119 {dimension_numbers = #tpu.dot_dimension_numbers<[1], [0], [0], [1], [0, 0, 1, 1], [], []>} : vector<64x4xbf16>, vector<4x128xbf16>, vector<64x128xf32> -> vector<64x128xf32>
    %105 = arith.addf %98, %104 : vector<64x128xf32>
    %c0_120 = arith.constant 0 : index
    %c0_121 = arith.constant 0 : index
    %c2_122 = arith.constant 2 : index
    %c0_123 = arith.constant 0 : index
    %c0_124 = arith.constant 0 : index
    %106 = vector.load %arg5[%c0_120, %c0_121, %c2_122, %c0_123, %c0_124] : memref<1x1x10x10x4xbf16, #tpu.memory_space<vmem>>, vector<1x1x8x8x4xbf16>
    %107 = vector.shape_cast %106 : vector<1x1x8x8x4xbf16> to vector<8x8x4xbf16>
    %108 = vector.shape_cast %107 : vector<8x8x4xbf16> to vector<64x4xbf16>
    %c15 = arith.constant 15 : index
    %c0_125 = arith.constant 0 : index
    %c0_126 = arith.constant 0 : index
    %109 = vector.load %arg2[%c15, %c0_125, %c0_126] : memref<27x4x128xbf16, #tpu.memory_space<vmem>>, vector<1x4x128xbf16>
    %110 = vector.shape_cast %109 : vector<1x4x128xbf16> to vector<4x128xbf16>
    %cst_127 = arith.constant dense<0.000000e+00> : vector<64x128xf32>
    %111 = tpu.matmul %108, %110, %cst_127 {dimension_numbers = #tpu.dot_dimension_numbers<[1], [0], [0], [1], [0, 0, 1, 1], [], []>} : vector<64x4xbf16>, vector<4x128xbf16>, vector<64x128xf32> -> vector<64x128xf32>
    %112 = arith.addf %105, %111 : vector<64x128xf32>
    %c0_128 = arith.constant 0 : index
    %c0_129 = arith.constant 0 : index
    %c2_130 = arith.constant 2 : index
    %c1_131 = arith.constant 1 : index
    %c0_132 = arith.constant 0 : index
    %113 = vector.load %arg5[%c0_128, %c0_129, %c2_130, %c1_131, %c0_132] : memref<1x1x10x10x4xbf16, #tpu.memory_space<vmem>>, vector<1x1x8x8x4xbf16>
    %114 = vector.shape_cast %113 : vector<1x1x8x8x4xbf16> to vector<8x8x4xbf16>
    %115 = vector.shape_cast %114 : vector<8x8x4xbf16> to vector<64x4xbf16>
    %c16 = arith.constant 16 : index
    %c0_133 = arith.constant 0 : index
    %c0_134 = arith.constant 0 : index
    %116 = vector.load %arg2[%c16, %c0_133, %c0_134] : memref<27x4x128xbf16, #tpu.memory_space<vmem>>, vector<1x4x128xbf16>
    %117 = vector.shape_cast %116 : vector<1x4x128xbf16> to vector<4x128xbf16>
    %cst_135 = arith.constant dense<0.000000e+00> : vector<64x128xf32>
    %118 = tpu.matmul %115, %117, %cst_135 {dimension_numbers = #tpu.dot_dimension_numbers<[1], [0], [0], [1], [0, 0, 1, 1], [], []>} : vector<64x4xbf16>, vector<4x128xbf16>, vector<64x128xf32> -> vector<64x128xf32>
    %119 = arith.addf %112, %118 : vector<64x128xf32>
    %c0_136 = arith.constant 0 : index
    %c0_137 = arith.constant 0 : index
    %c2_138 = arith.constant 2 : index
    %c2_139 = arith.constant 2 : index
    %c0_140 = arith.constant 0 : index
    %120 = vector.load %arg5[%c0_136, %c0_137, %c2_138, %c2_139, %c0_140] : memref<1x1x10x10x4xbf16, #tpu.memory_space<vmem>>, vector<1x1x8x8x4xbf16>
    %121 = vector.shape_cast %120 : vector<1x1x8x8x4xbf16> to vector<8x8x4xbf16>
    %122 = vector.shape_cast %121 : vector<8x8x4xbf16> to vector<64x4xbf16>
    %c17 = arith.constant 17 : index
    %c0_141 = arith.constant 0 : index
    %c0_142 = arith.constant 0 : index
    %123 = vector.load %arg2[%c17, %c0_141, %c0_142] : memref<27x4x128xbf16, #tpu.memory_space<vmem>>, vector<1x4x128xbf16>
    %124 = vector.shape_cast %123 : vector<1x4x128xbf16> to vector<4x128xbf16>
    %cst_143 = arith.constant dense<0.000000e+00> : vector<64x128xf32>
    %125 = tpu.matmul %122, %124, %cst_143 {dimension_numbers = #tpu.dot_dimension_numbers<[1], [0], [0], [1], [0, 0, 1, 1], [], []>} : vector<64x4xbf16>, vector<4x128xbf16>, vector<64x128xf32> -> vector<64x128xf32>
    %126 = arith.addf %119, %125 : vector<64x128xf32>
    %c0_144 = arith.constant 0 : index
    %c0_145 = arith.constant 0 : index
    %c0_146 = arith.constant 0 : index
    %c0_147 = arith.constant 0 : index
    %c0_148 = arith.constant 0 : index
    %127 = vector.load %arg6[%c0_144, %c0_145, %c0_146, %c0_147, %c0_148] : memref<1x1x10x10x4xbf16, #tpu.memory_space<vmem>>, vector<1x1x8x8x4xbf16>
    %128 = vector.shape_cast %127 : vector<1x1x8x8x4xbf16> to vector<8x8x4xbf16>
    %129 = vector.shape_cast %128 : vector<8x8x4xbf16> to vector<64x4xbf16>
    %c18 = arith.constant 18 : index
    %c0_149 = arith.constant 0 : index
    %c0_150 = arith.constant 0 : index
    %130 = vector.load %arg2[%c18, %c0_149, %c0_150] : memref<27x4x128xbf16, #tpu.memory_space<vmem>>, vector<1x4x128xbf16>
    %131 = vector.shape_cast %130 : vector<1x4x128xbf16> to vector<4x128xbf16>
    %cst_151 = arith.constant dense<0.000000e+00> : vector<64x128xf32>
    %132 = tpu.matmul %129, %131, %cst_151 {dimension_numbers = #tpu.dot_dimension_numbers<[1], [0], [0], [1], [0, 0, 1, 1], [], []>} : vector<64x4xbf16>, vector<4x128xbf16>, vector<64x128xf32> -> vector<64x128xf32>
    %133 = arith.addf %126, %132 : vector<64x128xf32>
    %c0_152 = arith.constant 0 : index
    %c0_153 = arith.constant 0 : index
    %c0_154 = arith.constant 0 : index
    %c1_155 = arith.constant 1 : index
    %c0_156 = arith.constant 0 : index
    %134 = vector.load %arg6[%c0_152, %c0_153, %c0_154, %c1_155, %c0_156] : memref<1x1x10x10x4xbf16, #tpu.memory_space<vmem>>, vector<1x1x8x8x4xbf16>
    %135 = vector.shape_cast %134 : vector<1x1x8x8x4xbf16> to vector<8x8x4xbf16>
    %136 = vector.shape_cast %135 : vector<8x8x4xbf16> to vector<64x4xbf16>
    %c19 = arith.constant 19 : index
    %c0_157 = arith.constant 0 : index
    %c0_158 = arith.constant 0 : index
    %137 = vector.load %arg2[%c19, %c0_157, %c0_158] : memref<27x4x128xbf16, #tpu.memory_space<vmem>>, vector<1x4x128xbf16>
    %138 = vector.shape_cast %137 : vector<1x4x128xbf16> to vector<4x128xbf16>
    %cst_159 = arith.constant dense<0.000000e+00> : vector<64x128xf32>
    %139 = tpu.matmul %136, %138, %cst_159 {dimension_numbers = #tpu.dot_dimension_numbers<[1], [0], [0], [1], [0, 0, 1, 1], [], []>} : vector<64x4xbf16>, vector<4x128xbf16>, vector<64x128xf32> -> vector<64x128xf32>
    %140 = arith.addf %133, %139 : vector<64x128xf32>
    %c0_160 = arith.constant 0 : index
    %c0_161 = arith.constant 0 : index
    %c0_162 = arith.constant 0 : index
    %c2_163 = arith.constant 2 : index
    %c0_164 = arith.constant 0 : index
    %141 = vector.load %arg6[%c0_160, %c0_161, %c0_162, %c2_163, %c0_164] : memref<1x1x10x10x4xbf16, #tpu.memory_space<vmem>>, vector<1x1x8x8x4xbf16>
    %142 = vector.shape_cast %141 : vector<1x1x8x8x4xbf16> to vector<8x8x4xbf16>
    %143 = vector.shape_cast %142 : vector<8x8x4xbf16> to vector<64x4xbf16>
    %c20 = arith.constant 20 : index
    %c0_165 = arith.constant 0 : index
    %c0_166 = arith.constant 0 : index
    %144 = vector.load %arg2[%c20, %c0_165, %c0_166] : memref<27x4x128xbf16, #tpu.memory_space<vmem>>, vector<1x4x128xbf16>
    %145 = vector.shape_cast %144 : vector<1x4x128xbf16> to vector<4x128xbf16>
    %cst_167 = arith.constant dense<0.000000e+00> : vector<64x128xf32>
    %146 = tpu.matmul %143, %145, %cst_167 {dimension_numbers = #tpu.dot_dimension_numbers<[1], [0], [0], [1], [0, 0, 1, 1], [], []>} : vector<64x4xbf16>, vector<4x128xbf16>, vector<64x128xf32> -> vector<64x128xf32>
    %147 = arith.addf %140, %146 : vector<64x128xf32>
    %c0_168 = arith.constant 0 : index
    %c0_169 = arith.constant 0 : index
    %c1_170 = arith.constant 1 : index
    %c0_171 = arith.constant 0 : index
    %c0_172 = arith.constant 0 : index
    %148 = vector.load %arg6[%c0_168, %c0_169, %c1_170, %c0_171, %c0_172] : memref<1x1x10x10x4xbf16, #tpu.memory_space<vmem>>, vector<1x1x8x8x4xbf16>
    %149 = vector.shape_cast %148 : vector<1x1x8x8x4xbf16> to vector<8x8x4xbf16>
    %150 = vector.shape_cast %149 : vector<8x8x4xbf16> to vector<64x4xbf16>
    %c21 = arith.constant 21 : index
    %c0_173 = arith.constant 0 : index
    %c0_174 = arith.constant 0 : index
    %151 = vector.load %arg2[%c21, %c0_173, %c0_174] : memref<27x4x128xbf16, #tpu.memory_space<vmem>>, vector<1x4x128xbf16>
    %152 = vector.shape_cast %151 : vector<1x4x128xbf16> to vector<4x128xbf16>
    %cst_175 = arith.constant dense<0.000000e+00> : vector<64x128xf32>
    %153 = tpu.matmul %150, %152, %cst_175 {dimension_numbers = #tpu.dot_dimension_numbers<[1], [0], [0], [1], [0, 0, 1, 1], [], []>} : vector<64x4xbf16>, vector<4x128xbf16>, vector<64x128xf32> -> vector<64x128xf32>
    %154 = arith.addf %147, %153 : vector<64x128xf32>
    %c0_176 = arith.constant 0 : index
    %c0_177 = arith.constant 0 : index
    %c1_178 = arith.constant 1 : index
    %c1_179 = arith.constant 1 : index
    %c0_180 = arith.constant 0 : index
    %155 = vector.load %arg6[%c0_176, %c0_177, %c1_178, %c1_179, %c0_180] : memref<1x1x10x10x4xbf16, #tpu.memory_space<vmem>>, vector<1x1x8x8x4xbf16>
    %156 = vector.shape_cast %155 : vector<1x1x8x8x4xbf16> to vector<8x8x4xbf16>
    %157 = vector.shape_cast %156 : vector<8x8x4xbf16> to vector<64x4xbf16>
    %c22 = arith.constant 22 : index
    %c0_181 = arith.constant 0 : index
    %c0_182 = arith.constant 0 : index
    %158 = vector.load %arg2[%c22, %c0_181, %c0_182] : memref<27x4x128xbf16, #tpu.memory_space<vmem>>, vector<1x4x128xbf16>
    %159 = vector.shape_cast %158 : vector<1x4x128xbf16> to vector<4x128xbf16>
    %cst_183 = arith.constant dense<0.000000e+00> : vector<64x128xf32>
    %160 = tpu.matmul %157, %159, %cst_183 {dimension_numbers = #tpu.dot_dimension_numbers<[1], [0], [0], [1], [0, 0, 1, 1], [], []>} : vector<64x4xbf16>, vector<4x128xbf16>, vector<64x128xf32> -> vector<64x128xf32>
    %161 = arith.addf %154, %160 : vector<64x128xf32>
    %c0_184 = arith.constant 0 : index
    %c0_185 = arith.constant 0 : index
    %c1_186 = arith.constant 1 : index
    %c2_187 = arith.constant 2 : index
    %c0_188 = arith.constant 0 : index
    %162 = vector.load %arg6[%c0_184, %c0_185, %c1_186, %c2_187, %c0_188] : memref<1x1x10x10x4xbf16, #tpu.memory_space<vmem>>, vector<1x1x8x8x4xbf16>
    %163 = vector.shape_cast %162 : vector<1x1x8x8x4xbf16> to vector<8x8x4xbf16>
    %164 = vector.shape_cast %163 : vector<8x8x4xbf16> to vector<64x4xbf16>
    %c23 = arith.constant 23 : index
    %c0_189 = arith.constant 0 : index
    %c0_190 = arith.constant 0 : index
    %165 = vector.load %arg2[%c23, %c0_189, %c0_190] : memref<27x4x128xbf16, #tpu.memory_space<vmem>>, vector<1x4x128xbf16>
    %166 = vector.shape_cast %165 : vector<1x4x128xbf16> to vector<4x128xbf16>
    %cst_191 = arith.constant dense<0.000000e+00> : vector<64x128xf32>
    %167 = tpu.matmul %164, %166, %cst_191 {dimension_numbers = #tpu.dot_dimension_numbers<[1], [0], [0], [1], [0, 0, 1, 1], [], []>} : vector<64x4xbf16>, vector<4x128xbf16>, vector<64x128xf32> -> vector<64x128xf32>
    %168 = arith.addf %161, %167 : vector<64x128xf32>
    %c0_192 = arith.constant 0 : index
    %c0_193 = arith.constant 0 : index
    %c2_194 = arith.constant 2 : index
    %c0_195 = arith.constant 0 : index
    %c0_196 = arith.constant 0 : index
    %169 = vector.load %arg6[%c0_192, %c0_193, %c2_194, %c0_195, %c0_196] : memref<1x1x10x10x4xbf16, #tpu.memory_space<vmem>>, vector<1x1x8x8x4xbf16>
    %170 = vector.shape_cast %169 : vector<1x1x8x8x4xbf16> to vector<8x8x4xbf16>
    %171 = vector.shape_cast %170 : vector<8x8x4xbf16> to vector<64x4xbf16>
    %c24 = arith.constant 24 : index
    %c0_197 = arith.constant 0 : index
    %c0_198 = arith.constant 0 : index
    %172 = vector.load %arg2[%c24, %c0_197, %c0_198] : memref<27x4x128xbf16, #tpu.memory_space<vmem>>, vector<1x4x128xbf16>
    %173 = vector.shape_cast %172 : vector<1x4x128xbf16> to vector<4x128xbf16>
    %cst_199 = arith.constant dense<0.000000e+00> : vector<64x128xf32>
    %174 = tpu.matmul %171, %173, %cst_199 {dimension_numbers = #tpu.dot_dimension_numbers<[1], [0], [0], [1], [0, 0, 1, 1], [], []>} : vector<64x4xbf16>, vector<4x128xbf16>, vector<64x128xf32> -> vector<64x128xf32>
    %175 = arith.addf %168, %174 : vector<64x128xf32>
    %c0_200 = arith.constant 0 : index
    %c0_201 = arith.constant 0 : index
    %c2_202 = arith.constant 2 : index
    %c1_203 = arith.constant 1 : index
    %c0_204 = arith.constant 0 : index
    %176 = vector.load %arg6[%c0_200, %c0_201, %c2_202, %c1_203, %c0_204] : memref<1x1x10x10x4xbf16, #tpu.memory_space<vmem>>, vector<1x1x8x8x4xbf16>
    %177 = vector.shape_cast %176 : vector<1x1x8x8x4xbf16> to vector<8x8x4xbf16>
    %178 = vector.shape_cast %177 : vector<8x8x4xbf16> to vector<64x4xbf16>
    %c25 = arith.constant 25 : index
    %c0_205 = arith.constant 0 : index
    %c0_206 = arith.constant 0 : index
    %179 = vector.load %arg2[%c25, %c0_205, %c0_206] : memref<27x4x128xbf16, #tpu.memory_space<vmem>>, vector<1x4x128xbf16>
    %180 = vector.shape_cast %179 : vector<1x4x128xbf16> to vector<4x128xbf16>
    %cst_207 = arith.constant dense<0.000000e+00> : vector<64x128xf32>
    %181 = tpu.matmul %178, %180, %cst_207 {dimension_numbers = #tpu.dot_dimension_numbers<[1], [0], [0], [1], [0, 0, 1, 1], [], []>} : vector<64x4xbf16>, vector<4x128xbf16>, vector<64x128xf32> -> vector<64x128xf32>
    %182 = arith.addf %175, %181 : vector<64x128xf32>
    %c0_208 = arith.constant 0 : index
    %c0_209 = arith.constant 0 : index
    %c2_210 = arith.constant 2 : index
    %c2_211 = arith.constant 2 : index
    %c0_212 = arith.constant 0 : index
    %183 = vector.load %arg6[%c0_208, %c0_209, %c2_210, %c2_211, %c0_212] : memref<1x1x10x10x4xbf16, #tpu.memory_space<vmem>>, vector<1x1x8x8x4xbf16>
    %184 = vector.shape_cast %183 : vector<1x1x8x8x4xbf16> to vector<8x8x4xbf16>
    %185 = vector.shape_cast %184 : vector<8x8x4xbf16> to vector<64x4xbf16>
    %c26 = arith.constant 26 : index
    %c0_213 = arith.constant 0 : index
    %c0_214 = arith.constant 0 : index
    %186 = vector.load %arg2[%c26, %c0_213, %c0_214] : memref<27x4x128xbf16, #tpu.memory_space<vmem>>, vector<1x4x128xbf16>
    %187 = vector.shape_cast %186 : vector<1x4x128xbf16> to vector<4x128xbf16>
    %cst_215 = arith.constant dense<0.000000e+00> : vector<64x128xf32>
    %188 = tpu.matmul %185, %187, %cst_215 {dimension_numbers = #tpu.dot_dimension_numbers<[1], [0], [0], [1], [0, 0, 1, 1], [], []>} : vector<64x4xbf16>, vector<4x128xbf16>, vector<64x128xf32> -> vector<64x128xf32>
    %189 = arith.addf %182, %188 : vector<64x128xf32>
    %c0_216 = arith.constant 0 : index
    %c0_217 = arith.constant 0 : index
    %190 = vector.load %arg3[%c0_216, %c0_217] : memref<1x128xf32, #tpu.memory_space<vmem>>, vector<1x128xf32>
    %191 = vector.broadcast %190 : vector<1x128xf32> to vector<64x128xf32>
    %192 = arith.addf %189, %191 : vector<64x128xf32>
    %c0_218 = arith.constant 0 : index
    %c0_219 = arith.constant 0 : index
    %c0_220 = arith.constant 0 : index
    %c0_221 = arith.constant 0 : index
    %193 = vector.load %arg7[%c0_218, %c0_219, %c0_220, %c0_221] : memref<1x1x64x128xf32, #tpu.memory_space<vmem>>, vector<1x1x64x128xf32>
    %194 = vector.shape_cast %193 : vector<1x1x64x128xf32> to vector<64x128xf32>
    %195 = vector.shape_cast %192 : vector<64x128xf32> to vector<1x1x64x128xf32>
    tpu.vector_store %arg7[%c0_218, %c0_219, %c0_220, %c0_221], %195 {strides = array<i32>} : memref<1x1x64x128xf32, #tpu.memory_space<vmem>>, vector<1x1x64x128xf32>,
    %cst_222 = arith.constant dense<0.000000e+00> : vector<128xf32>
    %196 = vector.multi_reduction <add>, %192, %cst_222 [0] : vector<64x128xf32> to vector<128xf32>
    %197 = vector.shape_cast %196 : vector<128xf32> to vector<1x128xf32>
    %c0_223 = arith.constant 0 : index
    %c0_224 = arith.constant 0 : index
    %c0_225 = arith.constant 0 : index
    %c0_226 = arith.constant 0 : index
    %198 = vector.load %arg8[%c0_223, %c0_224, %c0_225, %c0_226] : memref<1x1x2x128xf32, #tpu.memory_space<vmem>>, vector<1x1x1x128xf32>
    %199 = vector.shape_cast %198 : vector<1x1x1x128xf32> to vector<1x128xf32>
    %200 = vector.shape_cast %197 : vector<1x128xf32> to vector<1x1x1x128xf32>
    tpu.vector_store %arg8[%c0_223, %c0_224, %c0_225, %c0_226], %200 {strides = array<i32>} : memref<1x1x2x128xf32, #tpu.memory_space<vmem>>, vector<1x1x1x128xf32>,
    %201 = arith.mulf %192, %192 : vector<64x128xf32>
    %cst_227 = arith.constant dense<0.000000e+00> : vector<128xf32>
    %202 = vector.multi_reduction <add>, %201, %cst_227 [0] : vector<64x128xf32> to vector<128xf32>
    %203 = vector.shape_cast %202 : vector<128xf32> to vector<1x128xf32>
    %c0_228 = arith.constant 0 : index
    %c0_229 = arith.constant 0 : index
    %c1_230 = arith.constant 1 : index
    %c0_231 = arith.constant 0 : index
    %204 = vector.load %arg8[%c0_228, %c0_229, %c1_230, %c0_231] : memref<1x1x2x128xf32, #tpu.memory_space<vmem>>, vector<1x1x1x128xf32>
    %205 = vector.shape_cast %204 : vector<1x1x1x128xf32> to vector<1x128xf32>
    %206 = vector.shape_cast %203 : vector<1x128xf32> to vector<1x1x1x128xf32>
    tpu.vector_store %arg8[%c0_228, %c0_229, %c1_230, %c0_231], %206 {strides = array<i32>} : memref<1x1x2x128xf32, #tpu.memory_space<vmem>>, vector<1x1x1x128xf32>,
    return
  }
  func.func @transform_0(%arg0: i32, %arg1: i32) -> (i32, i32, i32) {
    %c0_i32 = arith.constant 0 : i32
    %c0_i32_0 = arith.constant 0 : i32
    %c0_i32_1 = arith.constant 0 : i32
    %c0_i32_2 = arith.constant 0 : i32
    return %c0_i32, %c0_i32_0, %c0_i32_1 : i32, i32, i32
  }
  func.func @transform_1(%arg0: i32, %arg1: i32) -> (i32, i32) {
    %c0_i32 = arith.constant 0 : i32
    %c0_i32_0 = arith.constant 0 : i32
    %c0_i32_1 = arith.constant 0 : i32
    return %c0_i32, %c0_i32_0 : i32, i32
  }
  func.func @transform_2(%arg0: i32, %arg1: i32) -> (i32, i32, i32, i32, i32) {
    %c0_i32 = arith.constant 0 : i32
    %c0_i32_0 = arith.constant 0 : i32
    %c0_i32_1 = arith.constant 0 : i32
    %c0_i32_2 = arith.constant 0 : i32
    return %arg0, %arg1, %c0_i32, %c0_i32_0, %c0_i32_1 : i32, i32, i32, i32, i32
  }
  func.func @transform_3(%arg0: i32, %arg1: i32) -> (i32, i32, i32, i32, i32) {
    %c1_i32 = arith.constant 1 : i32
    %0 = arith.addi %arg1, %c1_i32 : i32
    %c0_i32 = arith.constant 0 : i32
    %c0_i32_0 = arith.constant 0 : i32
    %c0_i32_1 = arith.constant 0 : i32
    %c0_i32_2 = arith.constant 0 : i32
    return %arg0, %0, %c0_i32, %c0_i32_0, %c0_i32_1 : i32, i32, i32, i32, i32
  }
  func.func @transform_4(%arg0: i32, %arg1: i32) -> (i32, i32, i32, i32, i32) {
    %c2_i32 = arith.constant 2 : i32
    %0 = arith.addi %arg1, %c2_i32 : i32
    %c0_i32 = arith.constant 0 : i32
    %c0_i32_0 = arith.constant 0 : i32
    %c0_i32_1 = arith.constant 0 : i32
    %c0_i32_2 = arith.constant 0 : i32
    return %arg0, %0, %c0_i32, %c0_i32_0, %c0_i32_1 : i32, i32, i32, i32, i32
  }
  func.func @transform_5(%arg0: i32, %arg1: i32) -> (i32, i32, i32, i32) {
    %c0_i32 = arith.constant 0 : i32
    %c0_i32_0 = arith.constant 0 : i32
    %c0_i32_1 = arith.constant 0 : i32
    return %arg0, %arg1, %c0_i32, %c0_i32_0 : i32, i32, i32, i32
  }
  func.func @transform_6(%arg0: i32, %arg1: i32) -> (i32, i32, i32, i32) {
    %c0_i32 = arith.constant 0 : i32
    %c0_i32_0 = arith.constant 0 : i32
    %c0_i32_1 = arith.constant 0 : i32
    return %arg0, %arg1, %c0_i32, %c0_i32_0 : i32, i32, i32, i32
  }
}

module attributes {stable_mosaic.version = 11 : i64} {
  func.func @_bn_relu_kernel(%arg0: i32, %arg1: memref<16x64x128xf32, #tpu.memory_space<vmem>>, %arg2: memref<1x1x128xf32, #tpu.memory_space<vmem>>, %arg3: memref<1x1x128xf32, #tpu.memory_space<vmem>>, %arg4: memref<16x64x128xbf16, #tpu.memory_space<vmem>>) attributes {dimension_semantics = [#tpu.dimension_semantics<parallel>], iteration_bounds = array<i64: 1>, scalar_prefetch = 0 : i64, scratch_operands = 0 : i64, tpu.core_type = #tpu.core_type<tc>, window_params = [{transform_indices = @transform_0, window_bounds = array<i64: 16, 64, 128>}, {pipeline_mode = #tpu.pipeline_mode<synchronous>, transform_indices = @transform_1, window_bounds = array<i64: 1, 1, 128>}, {pipeline_mode = #tpu.pipeline_mode<synchronous>, transform_indices = @transform_2, window_bounds = array<i64: 1, 1, 128>}, {transform_indices = @transform_3, window_bounds = array<i64: 16, 64, 128>}]} {
    %c0 = arith.constant 0 : index
    %c0_0 = arith.constant 0 : index
    %c0_1 = arith.constant 0 : index
    %0 = vector.load %arg1[%c0, %c0_0, %c0_1] : memref<16x64x128xf32, #tpu.memory_space<vmem>>, vector<16x64x128xf32>
    %c0_2 = arith.constant 0 : index
    %c0_3 = arith.constant 0 : index
    %c0_4 = arith.constant 0 : index
    %1 = vector.load %arg2[%c0_2, %c0_3, %c0_4] : memref<1x1x128xf32, #tpu.memory_space<vmem>>, vector<1x1x128xf32>
    %2 = vector.broadcast %1 : vector<1x1x128xf32> to vector<16x64x128xf32>
    %3 = arith.mulf %0, %2 : vector<16x64x128xf32>
    %c0_5 = arith.constant 0 : index
    %c0_6 = arith.constant 0 : index
    %c0_7 = arith.constant 0 : index
    %4 = vector.load %arg3[%c0_5, %c0_6, %c0_7] : memref<1x1x128xf32, #tpu.memory_space<vmem>>, vector<1x1x128xf32>
    %5 = vector.broadcast %4 : vector<1x1x128xf32> to vector<16x64x128xf32>
    %6 = arith.addf %3, %5 : vector<16x64x128xf32>
    %cst = arith.constant 0.000000e+00 : f32
    %7 = vector.broadcast %cst : f32 to vector<16x64x128xf32>
    %8 = arith.maximumf %6, %7 : vector<16x64x128xf32>
    %9 = arith.truncf %8 : vector<16x64x128xf32> to vector<16x64x128xbf16>
    %c0_8 = arith.constant 0 : index
    %c0_9 = arith.constant 0 : index
    %c0_10 = arith.constant 0 : index
    %10 = vector.load %arg4[%c0_8, %c0_9, %c0_10] : memref<16x64x128xbf16, #tpu.memory_space<vmem>>, vector<16x64x128xbf16>
    tpu.vector_store %arg4[%c0_8, %c0_9, %c0_10], %9 {strides = array<i32>} : memref<16x64x128xbf16, #tpu.memory_space<vmem>>, vector<16x64x128xbf16>,
    return
  }
  func.func @transform_0(%arg0: i32) -> (i32, i32, i32) {
    %c0_i32 = arith.constant 0 : i32
    %c0_i32_0 = arith.constant 0 : i32
    %c0_i32_1 = arith.constant 0 : i32
    return %arg0, %c0_i32, %c0_i32_0 : i32, i32, i32
  }
  func.func @transform_1(%arg0: i32) -> (i32, i32, i32) {
    %c0_i32 = arith.constant 0 : i32
    %c0_i32_0 = arith.constant 0 : i32
    %c0_i32_1 = arith.constant 0 : i32
    %c0_i32_2 = arith.constant 0 : i32
    return %c0_i32, %c0_i32_0, %c0_i32_1 : i32, i32, i32
  }
  func.func @transform_2(%arg0: i32) -> (i32, i32, i32) {
    %c0_i32 = arith.constant 0 : i32
    %c0_i32_0 = arith.constant 0 : i32
    %c0_i32_1 = arith.constant 0 : i32
    %c0_i32_2 = arith.constant 0 : i32
    return %c0_i32, %c0_i32_0, %c0_i32_1 : i32, i32, i32
  }
  func.func @transform_3(%arg0: i32) -> (i32, i32, i32) {
    %c0_i32 = arith.constant 0 : i32
    %c0_i32_0 = arith.constant 0 : i32
    %c0_i32_1 = arith.constant 0 : i32
    return %arg0, %c0_i32, %c0_i32_0 : i32, i32, i32
  }
}

module attributes {stable_mosaic.version = 11 : i64} {
  func.func @_conv3d_kernel(%arg0: i32, %arg1: i32, %arg2: memref<27x128x128xbf16, #tpu.memory_space<vmem>>, %arg3: memref<1x128xf32, #tpu.memory_space<vmem>>, %arg4: memref<1x1x10x10x128xbf16, #tpu.memory_space<vmem>>, %arg5: memref<1x1x10x10x128xbf16, #tpu.memory_space<vmem>>, %arg6: memref<1x1x10x10x128xbf16, #tpu.memory_space<vmem>>, %arg7: memref<1x1x64x128xf32, #tpu.memory_space<vmem>>, %arg8: memref<1x1x2x128xf32, #tpu.memory_space<vmem>>) attributes {dimension_semantics = [#tpu.dimension_semantics<parallel>, #tpu.dimension_semantics<parallel>], iteration_bounds = array<i64: 2, 8>, scalar_prefetch = 0 : i64, scratch_operands = 0 : i64, tpu.core_type = #tpu.core_type<tc>, window_params = [{pipeline_mode = #tpu.pipeline_mode<synchronous>, transform_indices = @transform_0, window_bounds = array<i64: 27, 128, 128>}, {pipeline_mode = #tpu.pipeline_mode<synchronous>, transform_indices = @transform_1, window_bounds = array<i64: 1, 128>}, {transform_indices = @transform_2, window_bounds = array<i64: 1, 1, 10, 10, 128>}, {transform_indices = @transform_3, window_bounds = array<i64: 1, 1, 10, 10, 128>}, {transform_indices = @transform_4, window_bounds = array<i64: 1, 1, 10, 10, 128>}, {transform_indices = @transform_5, window_bounds = array<i64: 1, 1, 64, 128>}, {transform_indices = @transform_6, window_bounds = array<i64: 1, 1, 2, 128>}]} {
    %cst = arith.constant 0.000000e+00 : f32
    %0 = vector.broadcast %cst : f32 to vector<64x128xf32>
    %c0 = arith.constant 0 : index
    %c0_0 = arith.constant 0 : index
    %c0_1 = arith.constant 0 : index
    %c0_2 = arith.constant 0 : index
    %c0_3 = arith.constant 0 : index
    %1 = vector.load %arg4[%c0, %c0_0, %c0_1, %c0_2, %c0_3] : memref<1x1x10x10x128xbf16, #tpu.memory_space<vmem>>, vector<1x1x8x8x128xbf16>
    %2 = vector.shape_cast %1 : vector<1x1x8x8x128xbf16> to vector<8x8x128xbf16>
    %3 = vector.shape_cast %2 : vector<8x8x128xbf16> to vector<64x128xbf16>
    %c0_4 = arith.constant 0 : index
    %c0_5 = arith.constant 0 : index
    %c0_6 = arith.constant 0 : index
    %4 = vector.load %arg2[%c0_4, %c0_5, %c0_6] : memref<27x128x128xbf16, #tpu.memory_space<vmem>>, vector<1x128x128xbf16>
    %5 = vector.shape_cast %4 : vector<1x128x128xbf16> to vector<128x128xbf16>
    %cst_7 = arith.constant dense<0.000000e+00> : vector<64x128xf32>
    %6 = tpu.matmul %3, %5, %cst_7 {dimension_numbers = #tpu.dot_dimension_numbers<[1], [0], [0], [1], [0, 0, 1, 1], [], []>} : vector<64x128xbf16>, vector<128x128xbf16>, vector<64x128xf32> -> vector<64x128xf32>
    %7 = arith.addf %0, %6 : vector<64x128xf32>
    %c0_8 = arith.constant 0 : index
    %c0_9 = arith.constant 0 : index
    %c0_10 = arith.constant 0 : index
    %c1 = arith.constant 1 : index
    %c0_11 = arith.constant 0 : index
    %8 = vector.load %arg4[%c0_8, %c0_9, %c0_10, %c1, %c0_11] : memref<1x1x10x10x128xbf16, #tpu.memory_space<vmem>>, vector<1x1x8x8x128xbf16>
    %9 = vector.shape_cast %8 : vector<1x1x8x8x128xbf16> to vector<8x8x128xbf16>
    %10 = vector.shape_cast %9 : vector<8x8x128xbf16> to vector<64x128xbf16>
    %c1_12 = arith.constant 1 : index
    %c0_13 = arith.constant 0 : index
    %c0_14 = arith.constant 0 : index
    %11 = vector.load %arg2[%c1_12, %c0_13, %c0_14] : memref<27x128x128xbf16, #tpu.memory_space<vmem>>, vector<1x128x128xbf16>
    %12 = vector.shape_cast %11 : vector<1x128x128xbf16> to vector<128x128xbf16>
    %cst_15 = arith.constant dense<0.000000e+00> : vector<64x128xf32>
    %13 = tpu.matmul %10, %12, %cst_15 {dimension_numbers = #tpu.dot_dimension_numbers<[1], [0], [0], [1], [0, 0, 1, 1], [], []>} : vector<64x128xbf16>, vector<128x128xbf16>, vector<64x128xf32> -> vector<64x128xf32>
    %14 = arith.addf %7, %13 : vector<64x128xf32>
    %c0_16 = arith.constant 0 : index
    %c0_17 = arith.constant 0 : index
    %c0_18 = arith.constant 0 : index
    %c2 = arith.constant 2 : index
    %c0_19 = arith.constant 0 : index
    %15 = vector.load %arg4[%c0_16, %c0_17, %c0_18, %c2, %c0_19] : memref<1x1x10x10x128xbf16, #tpu.memory_space<vmem>>, vector<1x1x8x8x128xbf16>
    %16 = vector.shape_cast %15 : vector<1x1x8x8x128xbf16> to vector<8x8x128xbf16>
    %17 = vector.shape_cast %16 : vector<8x8x128xbf16> to vector<64x128xbf16>
    %c2_20 = arith.constant 2 : index
    %c0_21 = arith.constant 0 : index
    %c0_22 = arith.constant 0 : index
    %18 = vector.load %arg2[%c2_20, %c0_21, %c0_22] : memref<27x128x128xbf16, #tpu.memory_space<vmem>>, vector<1x128x128xbf16>
    %19 = vector.shape_cast %18 : vector<1x128x128xbf16> to vector<128x128xbf16>
    %cst_23 = arith.constant dense<0.000000e+00> : vector<64x128xf32>
    %20 = tpu.matmul %17, %19, %cst_23 {dimension_numbers = #tpu.dot_dimension_numbers<[1], [0], [0], [1], [0, 0, 1, 1], [], []>} : vector<64x128xbf16>, vector<128x128xbf16>, vector<64x128xf32> -> vector<64x128xf32>
    %21 = arith.addf %14, %20 : vector<64x128xf32>
    %c0_24 = arith.constant 0 : index
    %c0_25 = arith.constant 0 : index
    %c1_26 = arith.constant 1 : index
    %c0_27 = arith.constant 0 : index
    %c0_28 = arith.constant 0 : index
    %22 = vector.load %arg4[%c0_24, %c0_25, %c1_26, %c0_27, %c0_28] : memref<1x1x10x10x128xbf16, #tpu.memory_space<vmem>>, vector<1x1x8x8x128xbf16>
    %23 = vector.shape_cast %22 : vector<1x1x8x8x128xbf16> to vector<8x8x128xbf16>
    %24 = vector.shape_cast %23 : vector<8x8x128xbf16> to vector<64x128xbf16>
    %c3 = arith.constant 3 : index
    %c0_29 = arith.constant 0 : index
    %c0_30 = arith.constant 0 : index
    %25 = vector.load %arg2[%c3, %c0_29, %c0_30] : memref<27x128x128xbf16, #tpu.memory_space<vmem>>, vector<1x128x128xbf16>
    %26 = vector.shape_cast %25 : vector<1x128x128xbf16> to vector<128x128xbf16>
    %cst_31 = arith.constant dense<0.000000e+00> : vector<64x128xf32>
    %27 = tpu.matmul %24, %26, %cst_31 {dimension_numbers = #tpu.dot_dimension_numbers<[1], [0], [0], [1], [0, 0, 1, 1], [], []>} : vector<64x128xbf16>, vector<128x128xbf16>, vector<64x128xf32> -> vector<64x128xf32>
    %28 = arith.addf %21, %27 : vector<64x128xf32>
    %c0_32 = arith.constant 0 : index
    %c0_33 = arith.constant 0 : index
    %c1_34 = arith.constant 1 : index
    %c1_35 = arith.constant 1 : index
    %c0_36 = arith.constant 0 : index
    %29 = vector.load %arg4[%c0_32, %c0_33, %c1_34, %c1_35, %c0_36] : memref<1x1x10x10x128xbf16, #tpu.memory_space<vmem>>, vector<1x1x8x8x128xbf16>
    %30 = vector.shape_cast %29 : vector<1x1x8x8x128xbf16> to vector<8x8x128xbf16>
    %31 = vector.shape_cast %30 : vector<8x8x128xbf16> to vector<64x128xbf16>
    %c4 = arith.constant 4 : index
    %c0_37 = arith.constant 0 : index
    %c0_38 = arith.constant 0 : index
    %32 = vector.load %arg2[%c4, %c0_37, %c0_38] : memref<27x128x128xbf16, #tpu.memory_space<vmem>>, vector<1x128x128xbf16>
    %33 = vector.shape_cast %32 : vector<1x128x128xbf16> to vector<128x128xbf16>
    %cst_39 = arith.constant dense<0.000000e+00> : vector<64x128xf32>
    %34 = tpu.matmul %31, %33, %cst_39 {dimension_numbers = #tpu.dot_dimension_numbers<[1], [0], [0], [1], [0, 0, 1, 1], [], []>} : vector<64x128xbf16>, vector<128x128xbf16>, vector<64x128xf32> -> vector<64x128xf32>
    %35 = arith.addf %28, %34 : vector<64x128xf32>
    %c0_40 = arith.constant 0 : index
    %c0_41 = arith.constant 0 : index
    %c1_42 = arith.constant 1 : index
    %c2_43 = arith.constant 2 : index
    %c0_44 = arith.constant 0 : index
    %36 = vector.load %arg4[%c0_40, %c0_41, %c1_42, %c2_43, %c0_44] : memref<1x1x10x10x128xbf16, #tpu.memory_space<vmem>>, vector<1x1x8x8x128xbf16>
    %37 = vector.shape_cast %36 : vector<1x1x8x8x128xbf16> to vector<8x8x128xbf16>
    %38 = vector.shape_cast %37 : vector<8x8x128xbf16> to vector<64x128xbf16>
    %c5 = arith.constant 5 : index
    %c0_45 = arith.constant 0 : index
    %c0_46 = arith.constant 0 : index
    %39 = vector.load %arg2[%c5, %c0_45, %c0_46] : memref<27x128x128xbf16, #tpu.memory_space<vmem>>, vector<1x128x128xbf16>
    %40 = vector.shape_cast %39 : vector<1x128x128xbf16> to vector<128x128xbf16>
    %cst_47 = arith.constant dense<0.000000e+00> : vector<64x128xf32>
    %41 = tpu.matmul %38, %40, %cst_47 {dimension_numbers = #tpu.dot_dimension_numbers<[1], [0], [0], [1], [0, 0, 1, 1], [], []>} : vector<64x128xbf16>, vector<128x128xbf16>, vector<64x128xf32> -> vector<64x128xf32>
    %42 = arith.addf %35, %41 : vector<64x128xf32>
    %c0_48 = arith.constant 0 : index
    %c0_49 = arith.constant 0 : index
    %c2_50 = arith.constant 2 : index
    %c0_51 = arith.constant 0 : index
    %c0_52 = arith.constant 0 : index
    %43 = vector.load %arg4[%c0_48, %c0_49, %c2_50, %c0_51, %c0_52] : memref<1x1x10x10x128xbf16, #tpu.memory_space<vmem>>, vector<1x1x8x8x128xbf16>
    %44 = vector.shape_cast %43 : vector<1x1x8x8x128xbf16> to vector<8x8x128xbf16>
    %45 = vector.shape_cast %44 : vector<8x8x128xbf16> to vector<64x128xbf16>
    %c6 = arith.constant 6 : index
    %c0_53 = arith.constant 0 : index
    %c0_54 = arith.constant 0 : index
    %46 = vector.load %arg2[%c6, %c0_53, %c0_54] : memref<27x128x128xbf16, #tpu.memory_space<vmem>>, vector<1x128x128xbf16>
    %47 = vector.shape_cast %46 : vector<1x128x128xbf16> to vector<128x128xbf16>
    %cst_55 = arith.constant dense<0.000000e+00> : vector<64x128xf32>
    %48 = tpu.matmul %45, %47, %cst_55 {dimension_numbers = #tpu.dot_dimension_numbers<[1], [0], [0], [1], [0, 0, 1, 1], [], []>} : vector<64x128xbf16>, vector<128x128xbf16>, vector<64x128xf32> -> vector<64x128xf32>
    %49 = arith.addf %42, %48 : vector<64x128xf32>
    %c0_56 = arith.constant 0 : index
    %c0_57 = arith.constant 0 : index
    %c2_58 = arith.constant 2 : index
    %c1_59 = arith.constant 1 : index
    %c0_60 = arith.constant 0 : index
    %50 = vector.load %arg4[%c0_56, %c0_57, %c2_58, %c1_59, %c0_60] : memref<1x1x10x10x128xbf16, #tpu.memory_space<vmem>>, vector<1x1x8x8x128xbf16>
    %51 = vector.shape_cast %50 : vector<1x1x8x8x128xbf16> to vector<8x8x128xbf16>
    %52 = vector.shape_cast %51 : vector<8x8x128xbf16> to vector<64x128xbf16>
    %c7 = arith.constant 7 : index
    %c0_61 = arith.constant 0 : index
    %c0_62 = arith.constant 0 : index
    %53 = vector.load %arg2[%c7, %c0_61, %c0_62] : memref<27x128x128xbf16, #tpu.memory_space<vmem>>, vector<1x128x128xbf16>
    %54 = vector.shape_cast %53 : vector<1x128x128xbf16> to vector<128x128xbf16>
    %cst_63 = arith.constant dense<0.000000e+00> : vector<64x128xf32>
    %55 = tpu.matmul %52, %54, %cst_63 {dimension_numbers = #tpu.dot_dimension_numbers<[1], [0], [0], [1], [0, 0, 1, 1], [], []>} : vector<64x128xbf16>, vector<128x128xbf16>, vector<64x128xf32> -> vector<64x128xf32>
    %56 = arith.addf %49, %55 : vector<64x128xf32>
    %c0_64 = arith.constant 0 : index
    %c0_65 = arith.constant 0 : index
    %c2_66 = arith.constant 2 : index
    %c2_67 = arith.constant 2 : index
    %c0_68 = arith.constant 0 : index
    %57 = vector.load %arg4[%c0_64, %c0_65, %c2_66, %c2_67, %c0_68] : memref<1x1x10x10x128xbf16, #tpu.memory_space<vmem>>, vector<1x1x8x8x128xbf16>
    %58 = vector.shape_cast %57 : vector<1x1x8x8x128xbf16> to vector<8x8x128xbf16>
    %59 = vector.shape_cast %58 : vector<8x8x128xbf16> to vector<64x128xbf16>
    %c8 = arith.constant 8 : index
    %c0_69 = arith.constant 0 : index
    %c0_70 = arith.constant 0 : index
    %60 = vector.load %arg2[%c8, %c0_69, %c0_70] : memref<27x128x128xbf16, #tpu.memory_space<vmem>>, vector<1x128x128xbf16>
    %61 = vector.shape_cast %60 : vector<1x128x128xbf16> to vector<128x128xbf16>
    %cst_71 = arith.constant dense<0.000000e+00> : vector<64x128xf32>
    %62 = tpu.matmul %59, %61, %cst_71 {dimension_numbers = #tpu.dot_dimension_numbers<[1], [0], [0], [1], [0, 0, 1, 1], [], []>} : vector<64x128xbf16>, vector<128x128xbf16>, vector<64x128xf32> -> vector<64x128xf32>
    %63 = arith.addf %56, %62 : vector<64x128xf32>
    %c0_72 = arith.constant 0 : index
    %c0_73 = arith.constant 0 : index
    %c0_74 = arith.constant 0 : index
    %c0_75 = arith.constant 0 : index
    %c0_76 = arith.constant 0 : index
    %64 = vector.load %arg5[%c0_72, %c0_73, %c0_74, %c0_75, %c0_76] : memref<1x1x10x10x128xbf16, #tpu.memory_space<vmem>>, vector<1x1x8x8x128xbf16>
    %65 = vector.shape_cast %64 : vector<1x1x8x8x128xbf16> to vector<8x8x128xbf16>
    %66 = vector.shape_cast %65 : vector<8x8x128xbf16> to vector<64x128xbf16>
    %c9 = arith.constant 9 : index
    %c0_77 = arith.constant 0 : index
    %c0_78 = arith.constant 0 : index
    %67 = vector.load %arg2[%c9, %c0_77, %c0_78] : memref<27x128x128xbf16, #tpu.memory_space<vmem>>, vector<1x128x128xbf16>
    %68 = vector.shape_cast %67 : vector<1x128x128xbf16> to vector<128x128xbf16>
    %cst_79 = arith.constant dense<0.000000e+00> : vector<64x128xf32>
    %69 = tpu.matmul %66, %68, %cst_79 {dimension_numbers = #tpu.dot_dimension_numbers<[1], [0], [0], [1], [0, 0, 1, 1], [], []>} : vector<64x128xbf16>, vector<128x128xbf16>, vector<64x128xf32> -> vector<64x128xf32>
    %70 = arith.addf %63, %69 : vector<64x128xf32>
    %c0_80 = arith.constant 0 : index
    %c0_81 = arith.constant 0 : index
    %c0_82 = arith.constant 0 : index
    %c1_83 = arith.constant 1 : index
    %c0_84 = arith.constant 0 : index
    %71 = vector.load %arg5[%c0_80, %c0_81, %c0_82, %c1_83, %c0_84] : memref<1x1x10x10x128xbf16, #tpu.memory_space<vmem>>, vector<1x1x8x8x128xbf16>
    %72 = vector.shape_cast %71 : vector<1x1x8x8x128xbf16> to vector<8x8x128xbf16>
    %73 = vector.shape_cast %72 : vector<8x8x128xbf16> to vector<64x128xbf16>
    %c10 = arith.constant 10 : index
    %c0_85 = arith.constant 0 : index
    %c0_86 = arith.constant 0 : index
    %74 = vector.load %arg2[%c10, %c0_85, %c0_86] : memref<27x128x128xbf16, #tpu.memory_space<vmem>>, vector<1x128x128xbf16>
    %75 = vector.shape_cast %74 : vector<1x128x128xbf16> to vector<128x128xbf16>
    %cst_87 = arith.constant dense<0.000000e+00> : vector<64x128xf32>
    %76 = tpu.matmul %73, %75, %cst_87 {dimension_numbers = #tpu.dot_dimension_numbers<[1], [0], [0], [1], [0, 0, 1, 1], [], []>} : vector<64x128xbf16>, vector<128x128xbf16>, vector<64x128xf32> -> vector<64x128xf32>
    %77 = arith.addf %70, %76 : vector<64x128xf32>
    %c0_88 = arith.constant 0 : index
    %c0_89 = arith.constant 0 : index
    %c0_90 = arith.constant 0 : index
    %c2_91 = arith.constant 2 : index
    %c0_92 = arith.constant 0 : index
    %78 = vector.load %arg5[%c0_88, %c0_89, %c0_90, %c2_91, %c0_92] : memref<1x1x10x10x128xbf16, #tpu.memory_space<vmem>>, vector<1x1x8x8x128xbf16>
    %79 = vector.shape_cast %78 : vector<1x1x8x8x128xbf16> to vector<8x8x128xbf16>
    %80 = vector.shape_cast %79 : vector<8x8x128xbf16> to vector<64x128xbf16>
    %c11 = arith.constant 11 : index
    %c0_93 = arith.constant 0 : index
    %c0_94 = arith.constant 0 : index
    %81 = vector.load %arg2[%c11, %c0_93, %c0_94] : memref<27x128x128xbf16, #tpu.memory_space<vmem>>, vector<1x128x128xbf16>
    %82 = vector.shape_cast %81 : vector<1x128x128xbf16> to vector<128x128xbf16>
    %cst_95 = arith.constant dense<0.000000e+00> : vector<64x128xf32>
    %83 = tpu.matmul %80, %82, %cst_95 {dimension_numbers = #tpu.dot_dimension_numbers<[1], [0], [0], [1], [0, 0, 1, 1], [], []>} : vector<64x128xbf16>, vector<128x128xbf16>, vector<64x128xf32> -> vector<64x128xf32>
    %84 = arith.addf %77, %83 : vector<64x128xf32>
    %c0_96 = arith.constant 0 : index
    %c0_97 = arith.constant 0 : index
    %c1_98 = arith.constant 1 : index
    %c0_99 = arith.constant 0 : index
    %c0_100 = arith.constant 0 : index
    %85 = vector.load %arg5[%c0_96, %c0_97, %c1_98, %c0_99, %c0_100] : memref<1x1x10x10x128xbf16, #tpu.memory_space<vmem>>, vector<1x1x8x8x128xbf16>
    %86 = vector.shape_cast %85 : vector<1x1x8x8x128xbf16> to vector<8x8x128xbf16>
    %87 = vector.shape_cast %86 : vector<8x8x128xbf16> to vector<64x128xbf16>
    %c12 = arith.constant 12 : index
    %c0_101 = arith.constant 0 : index
    %c0_102 = arith.constant 0 : index
    %88 = vector.load %arg2[%c12, %c0_101, %c0_102] : memref<27x128x128xbf16, #tpu.memory_space<vmem>>, vector<1x128x128xbf16>
    %89 = vector.shape_cast %88 : vector<1x128x128xbf16> to vector<128x128xbf16>
    %cst_103 = arith.constant dense<0.000000e+00> : vector<64x128xf32>
    %90 = tpu.matmul %87, %89, %cst_103 {dimension_numbers = #tpu.dot_dimension_numbers<[1], [0], [0], [1], [0, 0, 1, 1], [], []>} : vector<64x128xbf16>, vector<128x128xbf16>, vector<64x128xf32> -> vector<64x128xf32>
    %91 = arith.addf %84, %90 : vector<64x128xf32>
    %c0_104 = arith.constant 0 : index
    %c0_105 = arith.constant 0 : index
    %c1_106 = arith.constant 1 : index
    %c1_107 = arith.constant 1 : index
    %c0_108 = arith.constant 0 : index
    %92 = vector.load %arg5[%c0_104, %c0_105, %c1_106, %c1_107, %c0_108] : memref<1x1x10x10x128xbf16, #tpu.memory_space<vmem>>, vector<1x1x8x8x128xbf16>
    %93 = vector.shape_cast %92 : vector<1x1x8x8x128xbf16> to vector<8x8x128xbf16>
    %94 = vector.shape_cast %93 : vector<8x8x128xbf16> to vector<64x128xbf16>
    %c13 = arith.constant 13 : index
    %c0_109 = arith.constant 0 : index
    %c0_110 = arith.constant 0 : index
    %95 = vector.load %arg2[%c13, %c0_109, %c0_110] : memref<27x128x128xbf16, #tpu.memory_space<vmem>>, vector<1x128x128xbf16>
    %96 = vector.shape_cast %95 : vector<1x128x128xbf16> to vector<128x128xbf16>
    %cst_111 = arith.constant dense<0.000000e+00> : vector<64x128xf32>
    %97 = tpu.matmul %94, %96, %cst_111 {dimension_numbers = #tpu.dot_dimension_numbers<[1], [0], [0], [1], [0, 0, 1, 1], [], []>} : vector<64x128xbf16>, vector<128x128xbf16>, vector<64x128xf32> -> vector<64x128xf32>
    %98 = arith.addf %91, %97 : vector<64x128xf32>
    %c0_112 = arith.constant 0 : index
    %c0_113 = arith.constant 0 : index
    %c1_114 = arith.constant 1 : index
    %c2_115 = arith.constant 2 : index
    %c0_116 = arith.constant 0 : index
    %99 = vector.load %arg5[%c0_112, %c0_113, %c1_114, %c2_115, %c0_116] : memref<1x1x10x10x128xbf16, #tpu.memory_space<vmem>>, vector<1x1x8x8x128xbf16>
    %100 = vector.shape_cast %99 : vector<1x1x8x8x128xbf16> to vector<8x8x128xbf16>
    %101 = vector.shape_cast %100 : vector<8x8x128xbf16> to vector<64x128xbf16>
    %c14 = arith.constant 14 : index
    %c0_117 = arith.constant 0 : index
    %c0_118 = arith.constant 0 : index
    %102 = vector.load %arg2[%c14, %c0_117, %c0_118] : memref<27x128x128xbf16, #tpu.memory_space<vmem>>, vector<1x128x128xbf16>
    %103 = vector.shape_cast %102 : vector<1x128x128xbf16> to vector<128x128xbf16>
    %cst_119 = arith.constant dense<0.000000e+00> : vector<64x128xf32>
    %104 = tpu.matmul %101, %103, %cst_119 {dimension_numbers = #tpu.dot_dimension_numbers<[1], [0], [0], [1], [0, 0, 1, 1], [], []>} : vector<64x128xbf16>, vector<128x128xbf16>, vector<64x128xf32> -> vector<64x128xf32>
    %105 = arith.addf %98, %104 : vector<64x128xf32>
    %c0_120 = arith.constant 0 : index
    %c0_121 = arith.constant 0 : index
    %c2_122 = arith.constant 2 : index
    %c0_123 = arith.constant 0 : index
    %c0_124 = arith.constant 0 : index
    %106 = vector.load %arg5[%c0_120, %c0_121, %c2_122, %c0_123, %c0_124] : memref<1x1x10x10x128xbf16, #tpu.memory_space<vmem>>, vector<1x1x8x8x128xbf16>
    %107 = vector.shape_cast %106 : vector<1x1x8x8x128xbf16> to vector<8x8x128xbf16>
    %108 = vector.shape_cast %107 : vector<8x8x128xbf16> to vector<64x128xbf16>
    %c15 = arith.constant 15 : index
    %c0_125 = arith.constant 0 : index
    %c0_126 = arith.constant 0 : index
    %109 = vector.load %arg2[%c15, %c0_125, %c0_126] : memref<27x128x128xbf16, #tpu.memory_space<vmem>>, vector<1x128x128xbf16>
    %110 = vector.shape_cast %109 : vector<1x128x128xbf16> to vector<128x128xbf16>
    %cst_127 = arith.constant dense<0.000000e+00> : vector<64x128xf32>
    %111 = tpu.matmul %108, %110, %cst_127 {dimension_numbers = #tpu.dot_dimension_numbers<[1], [0], [0], [1], [0, 0, 1, 1], [], []>} : vector<64x128xbf16>, vector<128x128xbf16>, vector<64x128xf32> -> vector<64x128xf32>
    %112 = arith.addf %105, %111 : vector<64x128xf32>
    %c0_128 = arith.constant 0 : index
    %c0_129 = arith.constant 0 : index
    %c2_130 = arith.constant 2 : index
    %c1_131 = arith.constant 1 : index
    %c0_132 = arith.constant 0 : index
    %113 = vector.load %arg5[%c0_128, %c0_129, %c2_130, %c1_131, %c0_132] : memref<1x1x10x10x128xbf16, #tpu.memory_space<vmem>>, vector<1x1x8x8x128xbf16>
    %114 = vector.shape_cast %113 : vector<1x1x8x8x128xbf16> to vector<8x8x128xbf16>
    %115 = vector.shape_cast %114 : vector<8x8x128xbf16> to vector<64x128xbf16>
    %c16 = arith.constant 16 : index
    %c0_133 = arith.constant 0 : index
    %c0_134 = arith.constant 0 : index
    %116 = vector.load %arg2[%c16, %c0_133, %c0_134] : memref<27x128x128xbf16, #tpu.memory_space<vmem>>, vector<1x128x128xbf16>
    %117 = vector.shape_cast %116 : vector<1x128x128xbf16> to vector<128x128xbf16>
    %cst_135 = arith.constant dense<0.000000e+00> : vector<64x128xf32>
    %118 = tpu.matmul %115, %117, %cst_135 {dimension_numbers = #tpu.dot_dimension_numbers<[1], [0], [0], [1], [0, 0, 1, 1], [], []>} : vector<64x128xbf16>, vector<128x128xbf16>, vector<64x128xf32> -> vector<64x128xf32>
    %119 = arith.addf %112, %118 : vector<64x128xf32>
    %c0_136 = arith.constant 0 : index
    %c0_137 = arith.constant 0 : index
    %c2_138 = arith.constant 2 : index
    %c2_139 = arith.constant 2 : index
    %c0_140 = arith.constant 0 : index
    %120 = vector.load %arg5[%c0_136, %c0_137, %c2_138, %c2_139, %c0_140] : memref<1x1x10x10x128xbf16, #tpu.memory_space<vmem>>, vector<1x1x8x8x128xbf16>
    %121 = vector.shape_cast %120 : vector<1x1x8x8x128xbf16> to vector<8x8x128xbf16>
    %122 = vector.shape_cast %121 : vector<8x8x128xbf16> to vector<64x128xbf16>
    %c17 = arith.constant 17 : index
    %c0_141 = arith.constant 0 : index
    %c0_142 = arith.constant 0 : index
    %123 = vector.load %arg2[%c17, %c0_141, %c0_142] : memref<27x128x128xbf16, #tpu.memory_space<vmem>>, vector<1x128x128xbf16>
    %124 = vector.shape_cast %123 : vector<1x128x128xbf16> to vector<128x128xbf16>
    %cst_143 = arith.constant dense<0.000000e+00> : vector<64x128xf32>
    %125 = tpu.matmul %122, %124, %cst_143 {dimension_numbers = #tpu.dot_dimension_numbers<[1], [0], [0], [1], [0, 0, 1, 1], [], []>} : vector<64x128xbf16>, vector<128x128xbf16>, vector<64x128xf32> -> vector<64x128xf32>
    %126 = arith.addf %119, %125 : vector<64x128xf32>
    %c0_144 = arith.constant 0 : index
    %c0_145 = arith.constant 0 : index
    %c0_146 = arith.constant 0 : index
    %c0_147 = arith.constant 0 : index
    %c0_148 = arith.constant 0 : index
    %127 = vector.load %arg6[%c0_144, %c0_145, %c0_146, %c0_147, %c0_148] : memref<1x1x10x10x128xbf16, #tpu.memory_space<vmem>>, vector<1x1x8x8x128xbf16>
    %128 = vector.shape_cast %127 : vector<1x1x8x8x128xbf16> to vector<8x8x128xbf16>
    %129 = vector.shape_cast %128 : vector<8x8x128xbf16> to vector<64x128xbf16>
    %c18 = arith.constant 18 : index
    %c0_149 = arith.constant 0 : index
    %c0_150 = arith.constant 0 : index
    %130 = vector.load %arg2[%c18, %c0_149, %c0_150] : memref<27x128x128xbf16, #tpu.memory_space<vmem>>, vector<1x128x128xbf16>
    %131 = vector.shape_cast %130 : vector<1x128x128xbf16> to vector<128x128xbf16>
    %cst_151 = arith.constant dense<0.000000e+00> : vector<64x128xf32>
    %132 = tpu.matmul %129, %131, %cst_151 {dimension_numbers = #tpu.dot_dimension_numbers<[1], [0], [0], [1], [0, 0, 1, 1], [], []>} : vector<64x128xbf16>, vector<128x128xbf16>, vector<64x128xf32> -> vector<64x128xf32>
    %133 = arith.addf %126, %132 : vector<64x128xf32>
    %c0_152 = arith.constant 0 : index
    %c0_153 = arith.constant 0 : index
    %c0_154 = arith.constant 0 : index
    %c1_155 = arith.constant 1 : index
    %c0_156 = arith.constant 0 : index
    %134 = vector.load %arg6[%c0_152, %c0_153, %c0_154, %c1_155, %c0_156] : memref<1x1x10x10x128xbf16, #tpu.memory_space<vmem>>, vector<1x1x8x8x128xbf16>
    %135 = vector.shape_cast %134 : vector<1x1x8x8x128xbf16> to vector<8x8x128xbf16>
    %136 = vector.shape_cast %135 : vector<8x8x128xbf16> to vector<64x128xbf16>
    %c19 = arith.constant 19 : index
    %c0_157 = arith.constant 0 : index
    %c0_158 = arith.constant 0 : index
    %137 = vector.load %arg2[%c19, %c0_157, %c0_158] : memref<27x128x128xbf16, #tpu.memory_space<vmem>>, vector<1x128x128xbf16>
    %138 = vector.shape_cast %137 : vector<1x128x128xbf16> to vector<128x128xbf16>
    %cst_159 = arith.constant dense<0.000000e+00> : vector<64x128xf32>
    %139 = tpu.matmul %136, %138, %cst_159 {dimension_numbers = #tpu.dot_dimension_numbers<[1], [0], [0], [1], [0, 0, 1, 1], [], []>} : vector<64x128xbf16>, vector<128x128xbf16>, vector<64x128xf32> -> vector<64x128xf32>
    %140 = arith.addf %133, %139 : vector<64x128xf32>
    %c0_160 = arith.constant 0 : index
    %c0_161 = arith.constant 0 : index
    %c0_162 = arith.constant 0 : index
    %c2_163 = arith.constant 2 : index
    %c0_164 = arith.constant 0 : index
    %141 = vector.load %arg6[%c0_160, %c0_161, %c0_162, %c2_163, %c0_164] : memref<1x1x10x10x128xbf16, #tpu.memory_space<vmem>>, vector<1x1x8x8x128xbf16>
    %142 = vector.shape_cast %141 : vector<1x1x8x8x128xbf16> to vector<8x8x128xbf16>
    %143 = vector.shape_cast %142 : vector<8x8x128xbf16> to vector<64x128xbf16>
    %c20 = arith.constant 20 : index
    %c0_165 = arith.constant 0 : index
    %c0_166 = arith.constant 0 : index
    %144 = vector.load %arg2[%c20, %c0_165, %c0_166] : memref<27x128x128xbf16, #tpu.memory_space<vmem>>, vector<1x128x128xbf16>
    %145 = vector.shape_cast %144 : vector<1x128x128xbf16> to vector<128x128xbf16>
    %cst_167 = arith.constant dense<0.000000e+00> : vector<64x128xf32>
    %146 = tpu.matmul %143, %145, %cst_167 {dimension_numbers = #tpu.dot_dimension_numbers<[1], [0], [0], [1], [0, 0, 1, 1], [], []>} : vector<64x128xbf16>, vector<128x128xbf16>, vector<64x128xf32> -> vector<64x128xf32>
    %147 = arith.addf %140, %146 : vector<64x128xf32>
    %c0_168 = arith.constant 0 : index
    %c0_169 = arith.constant 0 : index
    %c1_170 = arith.constant 1 : index
    %c0_171 = arith.constant 0 : index
    %c0_172 = arith.constant 0 : index
    %148 = vector.load %arg6[%c0_168, %c0_169, %c1_170, %c0_171, %c0_172] : memref<1x1x10x10x128xbf16, #tpu.memory_space<vmem>>, vector<1x1x8x8x128xbf16>
    %149 = vector.shape_cast %148 : vector<1x1x8x8x128xbf16> to vector<8x8x128xbf16>
    %150 = vector.shape_cast %149 : vector<8x8x128xbf16> to vector<64x128xbf16>
    %c21 = arith.constant 21 : index
    %c0_173 = arith.constant 0 : index
    %c0_174 = arith.constant 0 : index
    %151 = vector.load %arg2[%c21, %c0_173, %c0_174] : memref<27x128x128xbf16, #tpu.memory_space<vmem>>, vector<1x128x128xbf16>
    %152 = vector.shape_cast %151 : vector<1x128x128xbf16> to vector<128x128xbf16>
    %cst_175 = arith.constant dense<0.000000e+00> : vector<64x128xf32>
    %153 = tpu.matmul %150, %152, %cst_175 {dimension_numbers = #tpu.dot_dimension_numbers<[1], [0], [0], [1], [0, 0, 1, 1], [], []>} : vector<64x128xbf16>, vector<128x128xbf16>, vector<64x128xf32> -> vector<64x128xf32>
    %154 = arith.addf %147, %153 : vector<64x128xf32>
    %c0_176 = arith.constant 0 : index
    %c0_177 = arith.constant 0 : index
    %c1_178 = arith.constant 1 : index
    %c1_179 = arith.constant 1 : index
    %c0_180 = arith.constant 0 : index
    %155 = vector.load %arg6[%c0_176, %c0_177, %c1_178, %c1_179, %c0_180] : memref<1x1x10x10x128xbf16, #tpu.memory_space<vmem>>, vector<1x1x8x8x128xbf16>
    %156 = vector.shape_cast %155 : vector<1x1x8x8x128xbf16> to vector<8x8x128xbf16>
    %157 = vector.shape_cast %156 : vector<8x8x128xbf16> to vector<64x128xbf16>
    %c22 = arith.constant 22 : index
    %c0_181 = arith.constant 0 : index
    %c0_182 = arith.constant 0 : index
    %158 = vector.load %arg2[%c22, %c0_181, %c0_182] : memref<27x128x128xbf16, #tpu.memory_space<vmem>>, vector<1x128x128xbf16>
    %159 = vector.shape_cast %158 : vector<1x128x128xbf16> to vector<128x128xbf16>
    %cst_183 = arith.constant dense<0.000000e+00> : vector<64x128xf32>
    %160 = tpu.matmul %157, %159, %cst_183 {dimension_numbers = #tpu.dot_dimension_numbers<[1], [0], [0], [1], [0, 0, 1, 1], [], []>} : vector<64x128xbf16>, vector<128x128xbf16>, vector<64x128xf32> -> vector<64x128xf32>
    %161 = arith.addf %154, %160 : vector<64x128xf32>
    %c0_184 = arith.constant 0 : index
    %c0_185 = arith.constant 0 : index
    %c1_186 = arith.constant 1 : index
    %c2_187 = arith.constant 2 : index
    %c0_188 = arith.constant 0 : index
    %162 = vector.load %arg6[%c0_184, %c0_185, %c1_186, %c2_187, %c0_188] : memref<1x1x10x10x128xbf16, #tpu.memory_space<vmem>>, vector<1x1x8x8x128xbf16>
    %163 = vector.shape_cast %162 : vector<1x1x8x8x128xbf16> to vector<8x8x128xbf16>
    %164 = vector.shape_cast %163 : vector<8x8x128xbf16> to vector<64x128xbf16>
    %c23 = arith.constant 23 : index
    %c0_189 = arith.constant 0 : index
    %c0_190 = arith.constant 0 : index
    %165 = vector.load %arg2[%c23, %c0_189, %c0_190] : memref<27x128x128xbf16, #tpu.memory_space<vmem>>, vector<1x128x128xbf16>
    %166 = vector.shape_cast %165 : vector<1x128x128xbf16> to vector<128x128xbf16>
    %cst_191 = arith.constant dense<0.000000e+00> : vector<64x128xf32>
    %167 = tpu.matmul %164, %166, %cst_191 {dimension_numbers = #tpu.dot_dimension_numbers<[1], [0], [0], [1], [0, 0, 1, 1], [], []>} : vector<64x128xbf16>, vector<128x128xbf16>, vector<64x128xf32> -> vector<64x128xf32>
    %168 = arith.addf %161, %167 : vector<64x128xf32>
    %c0_192 = arith.constant 0 : index
    %c0_193 = arith.constant 0 : index
    %c2_194 = arith.constant 2 : index
    %c0_195 = arith.constant 0 : index
    %c0_196 = arith.constant 0 : index
    %169 = vector.load %arg6[%c0_192, %c0_193, %c2_194, %c0_195, %c0_196] : memref<1x1x10x10x128xbf16, #tpu.memory_space<vmem>>, vector<1x1x8x8x128xbf16>
    %170 = vector.shape_cast %169 : vector<1x1x8x8x128xbf16> to vector<8x8x128xbf16>
    %171 = vector.shape_cast %170 : vector<8x8x128xbf16> to vector<64x128xbf16>
    %c24 = arith.constant 24 : index
    %c0_197 = arith.constant 0 : index
    %c0_198 = arith.constant 0 : index
    %172 = vector.load %arg2[%c24, %c0_197, %c0_198] : memref<27x128x128xbf16, #tpu.memory_space<vmem>>, vector<1x128x128xbf16>
    %173 = vector.shape_cast %172 : vector<1x128x128xbf16> to vector<128x128xbf16>
    %cst_199 = arith.constant dense<0.000000e+00> : vector<64x128xf32>
    %174 = tpu.matmul %171, %173, %cst_199 {dimension_numbers = #tpu.dot_dimension_numbers<[1], [0], [0], [1], [0, 0, 1, 1], [], []>} : vector<64x128xbf16>, vector<128x128xbf16>, vector<64x128xf32> -> vector<64x128xf32>
    %175 = arith.addf %168, %174 : vector<64x128xf32>
    %c0_200 = arith.constant 0 : index
    %c0_201 = arith.constant 0 : index
    %c2_202 = arith.constant 2 : index
    %c1_203 = arith.constant 1 : index
    %c0_204 = arith.constant 0 : index
    %176 = vector.load %arg6[%c0_200, %c0_201, %c2_202, %c1_203, %c0_204] : memref<1x1x10x10x128xbf16, #tpu.memory_space<vmem>>, vector<1x1x8x8x128xbf16>
    %177 = vector.shape_cast %176 : vector<1x1x8x8x128xbf16> to vector<8x8x128xbf16>
    %178 = vector.shape_cast %177 : vector<8x8x128xbf16> to vector<64x128xbf16>
    %c25 = arith.constant 25 : index
    %c0_205 = arith.constant 0 : index
    %c0_206 = arith.constant 0 : index
    %179 = vector.load %arg2[%c25, %c0_205, %c0_206] : memref<27x128x128xbf16, #tpu.memory_space<vmem>>, vector<1x128x128xbf16>
    %180 = vector.shape_cast %179 : vector<1x128x128xbf16> to vector<128x128xbf16>
    %cst_207 = arith.constant dense<0.000000e+00> : vector<64x128xf32>
    %181 = tpu.matmul %178, %180, %cst_207 {dimension_numbers = #tpu.dot_dimension_numbers<[1], [0], [0], [1], [0, 0, 1, 1], [], []>} : vector<64x128xbf16>, vector<128x128xbf16>, vector<64x128xf32> -> vector<64x128xf32>
    %182 = arith.addf %175, %181 : vector<64x128xf32>
    %c0_208 = arith.constant 0 : index
    %c0_209 = arith.constant 0 : index
    %c2_210 = arith.constant 2 : index
    %c2_211 = arith.constant 2 : index
    %c0_212 = arith.constant 0 : index
    %183 = vector.load %arg6[%c0_208, %c0_209, %c2_210, %c2_211, %c0_212] : memref<1x1x10x10x128xbf16, #tpu.memory_space<vmem>>, vector<1x1x8x8x128xbf16>
    %184 = vector.shape_cast %183 : vector<1x1x8x8x128xbf16> to vector<8x8x128xbf16>
    %185 = vector.shape_cast %184 : vector<8x8x128xbf16> to vector<64x128xbf16>
    %c26 = arith.constant 26 : index
    %c0_213 = arith.constant 0 : index
    %c0_214 = arith.constant 0 : index
    %186 = vector.load %arg2[%c26, %c0_213, %c0_214] : memref<27x128x128xbf16, #tpu.memory_space<vmem>>, vector<1x128x128xbf16>
    %187 = vector.shape_cast %186 : vector<1x128x128xbf16> to vector<128x128xbf16>
    %cst_215 = arith.constant dense<0.000000e+00> : vector<64x128xf32>
    %188 = tpu.matmul %185, %187, %cst_215 {dimension_numbers = #tpu.dot_dimension_numbers<[1], [0], [0], [1], [0, 0, 1, 1], [], []>} : vector<64x128xbf16>, vector<128x128xbf16>, vector<64x128xf32> -> vector<64x128xf32>
    %189 = arith.addf %182, %188 : vector<64x128xf32>
    %c0_216 = arith.constant 0 : index
    %c0_217 = arith.constant 0 : index
    %190 = vector.load %arg3[%c0_216, %c0_217] : memref<1x128xf32, #tpu.memory_space<vmem>>, vector<1x128xf32>
    %191 = vector.broadcast %190 : vector<1x128xf32> to vector<64x128xf32>
    %192 = arith.addf %189, %191 : vector<64x128xf32>
    %c0_218 = arith.constant 0 : index
    %c0_219 = arith.constant 0 : index
    %c0_220 = arith.constant 0 : index
    %c0_221 = arith.constant 0 : index
    %193 = vector.load %arg7[%c0_218, %c0_219, %c0_220, %c0_221] : memref<1x1x64x128xf32, #tpu.memory_space<vmem>>, vector<1x1x64x128xf32>
    %194 = vector.shape_cast %193 : vector<1x1x64x128xf32> to vector<64x128xf32>
    %195 = vector.shape_cast %192 : vector<64x128xf32> to vector<1x1x64x128xf32>
    tpu.vector_store %arg7[%c0_218, %c0_219, %c0_220, %c0_221], %195 {strides = array<i32>} : memref<1x1x64x128xf32, #tpu.memory_space<vmem>>, vector<1x1x64x128xf32>,
    %cst_222 = arith.constant dense<0.000000e+00> : vector<128xf32>
    %196 = vector.multi_reduction <add>, %192, %cst_222 [0] : vector<64x128xf32> to vector<128xf32>
    %197 = vector.shape_cast %196 : vector<128xf32> to vector<1x128xf32>
    %c0_223 = arith.constant 0 : index
    %c0_224 = arith.constant 0 : index
    %c0_225 = arith.constant 0 : index
    %c0_226 = arith.constant 0 : index
    %198 = vector.load %arg8[%c0_223, %c0_224, %c0_225, %c0_226] : memref<1x1x2x128xf32, #tpu.memory_space<vmem>>, vector<1x1x1x128xf32>
    %199 = vector.shape_cast %198 : vector<1x1x1x128xf32> to vector<1x128xf32>
    %200 = vector.shape_cast %197 : vector<1x128xf32> to vector<1x1x1x128xf32>
    tpu.vector_store %arg8[%c0_223, %c0_224, %c0_225, %c0_226], %200 {strides = array<i32>} : memref<1x1x2x128xf32, #tpu.memory_space<vmem>>, vector<1x1x1x128xf32>,
    %201 = arith.mulf %192, %192 : vector<64x128xf32>
    %cst_227 = arith.constant dense<0.000000e+00> : vector<128xf32>
    %202 = vector.multi_reduction <add>, %201, %cst_227 [0] : vector<64x128xf32> to vector<128xf32>
    %203 = vector.shape_cast %202 : vector<128xf32> to vector<1x128xf32>
    %c0_228 = arith.constant 0 : index
    %c0_229 = arith.constant 0 : index
    %c1_230 = arith.constant 1 : index
    %c0_231 = arith.constant 0 : index
    %204 = vector.load %arg8[%c0_228, %c0_229, %c1_230, %c0_231] : memref<1x1x2x128xf32, #tpu.memory_space<vmem>>, vector<1x1x1x128xf32>
    %205 = vector.shape_cast %204 : vector<1x1x1x128xf32> to vector<1x128xf32>
    %206 = vector.shape_cast %203 : vector<1x128xf32> to vector<1x1x1x128xf32>
    tpu.vector_store %arg8[%c0_228, %c0_229, %c1_230, %c0_231], %206 {strides = array<i32>} : memref<1x1x2x128xf32, #tpu.memory_space<vmem>>, vector<1x1x1x128xf32>,
    return
  }
  func.func @transform_0(%arg0: i32, %arg1: i32) -> (i32, i32, i32) {
    %c0_i32 = arith.constant 0 : i32
    %c0_i32_0 = arith.constant 0 : i32
    %c0_i32_1 = arith.constant 0 : i32
    %c0_i32_2 = arith.constant 0 : i32
    return %c0_i32, %c0_i32_0, %c0_i32_1 : i32, i32, i32
  }
  func.func @transform_1(%arg0: i32, %arg1: i32) -> (i32, i32) {
    %c0_i32 = arith.constant 0 : i32
    %c0_i32_0 = arith.constant 0 : i32
    %c0_i32_1 = arith.constant 0 : i32
    return %c0_i32, %c0_i32_0 : i32, i32
  }
  func.func @transform_2(%arg0: i32, %arg1: i32) -> (i32, i32, i32, i32, i32) {
    %c0_i32 = arith.constant 0 : i32
    %c0_i32_0 = arith.constant 0 : i32
    %c0_i32_1 = arith.constant 0 : i32
    %c0_i32_2 = arith.constant 0 : i32
    return %arg0, %arg1, %c0_i32, %c0_i32_0, %c0_i32_1 : i32, i32, i32, i32, i32
  }
  func.func @transform_3(%arg0: i32, %arg1: i32) -> (i32, i32, i32, i32, i32) {
    %c1_i32 = arith.constant 1 : i32
    %0 = arith.addi %arg1, %c1_i32 : i32
    %c0_i32 = arith.constant 0 : i32
    %c0_i32_0 = arith.constant 0 : i32
    %c0_i32_1 = arith.constant 0 : i32
    %c0_i32_2 = arith.constant 0 : i32
    return %arg0, %0, %c0_i32, %c0_i32_0, %c0_i32_1 : i32, i32, i32, i32, i32
  }
  func.func @transform_4(%arg0: i32, %arg1: i32) -> (i32, i32, i32, i32, i32) {
    %c2_i32 = arith.constant 2 : i32
    %0 = arith.addi %arg1, %c2_i32 : i32
    %c0_i32 = arith.constant 0 : i32
    %c0_i32_0 = arith.constant 0 : i32
    %c0_i32_1 = arith.constant 0 : i32
    %c0_i32_2 = arith.constant 0 : i32
    return %arg0, %0, %c0_i32, %c0_i32_0, %c0_i32_1 : i32, i32, i32, i32, i32
  }
  func.func @transform_5(%arg0: i32, %arg1: i32) -> (i32, i32, i32, i32) {
    %c0_i32 = arith.constant 0 : i32
    %c0_i32_0 = arith.constant 0 : i32
    %c0_i32_1 = arith.constant 0 : i32
    return %arg0, %arg1, %c0_i32, %c0_i32_0 : i32, i32, i32, i32
  }
  func.func @transform_6(%arg0: i32, %arg1: i32) -> (i32, i32, i32, i32) {
    %c0_i32 = arith.constant 0 : i32
    %c0_i32_0 = arith.constant 0 : i32
    %c0_i32_1 = arith.constant 0 : i32
    return %arg0, %arg1, %c0_i32, %c0_i32_0 : i32, i32, i32, i32
  }
}

module attributes {stable_mosaic.version = 11 : i64} {
  func.func @_bn_relu_kernel(%arg0: i32, %arg1: memref<16x64x128xf32, #tpu.memory_space<vmem>>, %arg2: memref<1x1x128xf32, #tpu.memory_space<vmem>>, %arg3: memref<1x1x128xf32, #tpu.memory_space<vmem>>, %arg4: memref<16x64x128xf32, #tpu.memory_space<vmem>>) attributes {dimension_semantics = [#tpu.dimension_semantics<parallel>], iteration_bounds = array<i64: 1>, scalar_prefetch = 0 : i64, scratch_operands = 0 : i64, tpu.core_type = #tpu.core_type<tc>, window_params = [{transform_indices = @transform_0, window_bounds = array<i64: 16, 64, 128>}, {pipeline_mode = #tpu.pipeline_mode<synchronous>, transform_indices = @transform_1, window_bounds = array<i64: 1, 1, 128>}, {pipeline_mode = #tpu.pipeline_mode<synchronous>, transform_indices = @transform_2, window_bounds = array<i64: 1, 1, 128>}, {transform_indices = @transform_3, window_bounds = array<i64: 16, 64, 128>}]} {
    %c0 = arith.constant 0 : index
    %c0_0 = arith.constant 0 : index
    %c0_1 = arith.constant 0 : index
    %0 = vector.load %arg1[%c0, %c0_0, %c0_1] : memref<16x64x128xf32, #tpu.memory_space<vmem>>, vector<16x64x128xf32>
    %c0_2 = arith.constant 0 : index
    %c0_3 = arith.constant 0 : index
    %c0_4 = arith.constant 0 : index
    %1 = vector.load %arg2[%c0_2, %c0_3, %c0_4] : memref<1x1x128xf32, #tpu.memory_space<vmem>>, vector<1x1x128xf32>
    %2 = vector.broadcast %1 : vector<1x1x128xf32> to vector<16x64x128xf32>
    %3 = arith.mulf %0, %2 : vector<16x64x128xf32>
    %c0_5 = arith.constant 0 : index
    %c0_6 = arith.constant 0 : index
    %c0_7 = arith.constant 0 : index
    %4 = vector.load %arg3[%c0_5, %c0_6, %c0_7] : memref<1x1x128xf32, #tpu.memory_space<vmem>>, vector<1x1x128xf32>
    %5 = vector.broadcast %4 : vector<1x1x128xf32> to vector<16x64x128xf32>
    %6 = arith.addf %3, %5 : vector<16x64x128xf32>
    %cst = arith.constant 0.000000e+00 : f32
    %7 = vector.broadcast %cst : f32 to vector<16x64x128xf32>
    %8 = arith.maximumf %6, %7 : vector<16x64x128xf32>
    %c0_8 = arith.constant 0 : index
    %c0_9 = arith.constant 0 : index
    %c0_10 = arith.constant 0 : index
    %9 = vector.load %arg4[%c0_8, %c0_9, %c0_10] : memref<16x64x128xf32, #tpu.memory_space<vmem>>, vector<16x64x128xf32>
    tpu.vector_store %arg4[%c0_8, %c0_9, %c0_10], %8 {strides = array<i32>} : memref<16x64x128xf32, #tpu.memory_space<vmem>>, vector<16x64x128xf32>,
    return
  }
  func.func @transform_0(%arg0: i32) -> (i32, i32, i32) {
    %c0_i32 = arith.constant 0 : i32
    %c0_i32_0 = arith.constant 0 : i32
    %c0_i32_1 = arith.constant 0 : i32
    return %arg0, %c0_i32, %c0_i32_0 : i32, i32, i32
  }
  func.func @transform_1(%arg0: i32) -> (i32, i32, i32) {
    %c0_i32 = arith.constant 0 : i32
    %c0_i32_0 = arith.constant 0 : i32
    %c0_i32_1 = arith.constant 0 : i32
    %c0_i32_2 = arith.constant 0 : i32
    return %c0_i32, %c0_i32_0, %c0_i32_1 : i32, i32, i32
  }
  func.func @transform_2(%arg0: i32) -> (i32, i32, i32) {
    %c0_i32 = arith.constant 0 : i32
    %c0_i32_0 = arith.constant 0 : i32
    %c0_i32_1 = arith.constant 0 : i32
    %c0_i32_2 = arith.constant 0 : i32
    return %c0_i32, %c0_i32_0, %c0_i32_1 : i32, i32, i32
  }
  func.func @transform_3(%arg0: i32) -> (i32, i32, i32) {
    %c0_i32 = arith.constant 0 : i32
    %c0_i32_0 = arith.constant 0 : i32
    %c0_i32_1 = arith.constant 0 : i32
    return %arg0, %c0_i32, %c0_i32_0 : i32, i32, i32
  }
}

</mosaic_0001>

<bundles_post_ra>
// kernel: custom_conv_block_forward.5
= control target key start
LH: loop header
LB: loop body
LE: loop exit
PB: predicated region body
PF: predicated region fallthrough
CT: control target
= control target key end

     0   :  { %s2053_s0 = inlined_call_operand.vmem [shape: f32[16,64,128], index: 0, kind: input, shape index: {}]   ;;  %s2054_s1 = inlined_call_operand.vmem [shape: f32[1,1,128], index: 1, kind: input, shape index: {}]   ;;  %s2055_s2 = inlined_call_operand.vmem [shape: f32[1,1,128], index: 2, kind: input, shape index: {}]   ;;  %s2056_s3 = inlined_call_operand.vmem [shape: bf16[16,64,128], index: 3, kind: output, shape index: {}]  }
   0x1   :  { %v14_v0 = vld [vmem:[%s2053_s0] sm:$0xff]  ;;  %v15_v1 = vld [vmem:[%s2053_s0 + $0x8] sm:$0xff]  ;;  %v16_v4 = vld [vmem:[%s2053_s0 + $0x10] sm:$0xff] }
   0x2   :  { %v1210_v2 = vld [vmem:[%s2054_s1] ss:$0 sm:$0xff]  ;;  %v17_v5 = vld [vmem:[%s2053_s0 + $0x18] sm:$0xff]  ;;  %v19_v11 = vld [vmem:[%s2053_s0 + $0x28] sm:$0xff] }
   0x3   :  { %v1215_v3 = vld [vmem:[%s2055_s2] ss:$0 sm:$0xff]  ;;  %v146_v7 = vmul.f32 %v1210_v2, %v14_v0  ;;  %v147_v8 = vmul.f32 %v1210_v2, %v15_v1  ;;  %v148_v9 = vmul.f32 %v1210_v2, %v16_v4  ;;  %v149_v10 = vmul.f32 %v1210_v2, %v17_v5  ;;  %v20_v12 = vld [vmem:[%s2053_s0 + $0x30] sm:$0xff]  ;;  %v21_v13 = vld [vmem:[%s2053_s0 + $0x38] sm:$0xff] }
   0x4   :  { %v18_v6 = vld [vmem:[%s2053_s0 + $0x20] sm:$0xff]  ;;  %v151_v15 = vmul.f32 %v1210_v2, %v19_v11  ;;  %v152_v16 = vmul.f32 %v1210_v2, %v20_v12  ;;  %v153_v17 = vmul.f32 %v1210_v2, %v21_v13  ;;  %v23_v27 = vld [vmem:[%s2053_s0 + $0x48] sm:$0xff]  ;;  %v24_v32 = vld [vmem:[%s2053_s0 + $0x50] sm:$0xff] }
   0x5   :  { %v150_v14 = vmul.f32 %v1210_v2, %v18_v6  ;;  %v278_v18 = vadd.f32 %v1215_v3, %v146_v7  ;;  %v279_v19 = vadd.f32 %v1215_v3, %v147_v8  ;;  %v280_v20 = vadd.f32 %v1215_v3, %v148_v9  ;;  %v22_v26 = vld [vmem:[%s2053_s0 + $0x40] sm:$0xff]  ;;  %v25_v33 = vld [vmem:[%s2053_s0 + $0x58] sm:$0xff]  ;;  %v27_v39 = vld [vmem:[%s2053_s0 + $0x68] sm:$0xff] }
   0x6   :  { %v281_v21 = vadd.f32 %v1215_v3, %v149_v10  ;;  %v283_v23 = vadd.f32 %v1215_v3, %v151_v15  ;;  %v284_v24 = vadd.f32 %v1215_v3, %v152_v16  ;;  %v285_v25 = vadd.f32 %v1215_v3, %v153_v17  ;;  %v26_v38 = vld [vmem:[%s2053_s0 + $0x60] sm:$0xff]  ;;  %v28_v44 = vld [vmem:[%s2053_s0 + $0x70] sm:$0xff]  ;;  %v29_v45 = vld [vmem:[%s2053_s0 + $0x78] sm:$0xff] }
   0x7   :  { %v282_v22 = vadd.f32 %v1215_v3, %v150_v14  ;;  %v406_v28 = vmax.f32 %v278_v18, 0.0  ;;  %v407_v29 = vmax.f32 %v279_v19, 0.0  ;;  %v408_v30 = vmax.f32 %v280_v20, 0.0  ;;  %v30_v58 = vld [vmem:[%s2053_s0 + $0x80] sm:$0xff]  ;;  %v31_v63 = vld [vmem:[%s2053_s0 + $0x88] sm:$0xff]  ;;  %v32_v6 = vld [vmem:[%s2053_s0 + $0x90] sm:$0xff] }
   0x8   :  { %v409_v31 = vmax.f32 %v281_v21, 0.0  ;;  %v411_v35 = vmax.f32 %v283_v23, 0.0  ;;  %v412_v36 = vmax.f32 %v284_v24, 0.0  ;;  %v413_v37 = vmax.f32 %v285_v25, 0.0  ;;  %v33_v7 = vld [vmem:[%s2053_s0 + $0x98] sm:$0xff]  ;;  %v34_v12 = vld [vmem:[%s2053_s0 + $0xa0] sm:$0xff] }
   0x9   :  { %v410_v34 = vmax.f32 %v282_v22, 0.0  ;;  %v797_v40 = vpack.c.bf16 %v407_v29, %v406_v28  ;;  %v154_v42 = vmul.f32 %v1210_v2, %v22_v26  ;;  %v155_v43 = vmul.f32 %v1210_v2, %v23_v27  ;;  %v35_v13 = vld [vmem:[%s2053_s0 + $0xa8] sm:$0xff]  ;;  %v36_v18 = vld [vmem:[%s2053_s0 + $0xb0] sm:$0xff]  ;;  %v37_v23 = vld [vmem:[%s2053_s0 + $0xb8] sm:$0xff] }
   0xa   :  { %v802_v41 = vpack.c.bf16 %v409_v31, %v408_v30  ;;  %v812_v47 = vpack.c.bf16 %v413_v37, %v412_v36  ;;  %v156_v48 = vmul.f32 %v1210_v2, %v24_v32  ;;  %v157_v49 = vmul.f32 %v1210_v2, %v25_v33  ;;  %v38_v28 = vld [vmem:[%s2053_s0 + $0xc0] sm:$0xff]  ;;  %v39_v37 = vld [vmem:[%s2053_s0 + $0xc8] sm:$0xff] }
   0xb   :  { %v807_v46 = vpack.c.bf16 %v411_v35, %v410_v34  ;;  %798 = vst [vmem:[%s2056_s3] sm:$0xff] %v797_v40   ;;  %v286_v50 = vadd.f32 %v1215_v3, %v154_v42  ;;  %v287_v51 = vadd.f32 %v1215_v3, %v155_v43  ;;  %v158_v52 = vmul.f32 %v1210_v2, %v26_v38  ;;  %v40_v42 = vld [vmem:[%s2053_s0 + $0xd0] sm:$0xff]  ;;  %v41_v43 = vld [vmem:[%s2053_s0 + $0xd8] sm:$0xff] }
   0xc   :  { %v159_v53 = vmul.f32 %v1210_v2, %v27_v39  ;;  %1114 = vst [vmem:[%s2056_s3 + $0x8] sm:$0xff] %v802_v41   ;;  %v288_v54 = vadd.f32 %v1215_v3, %v156_v48  ;;  %v289_v55 = vadd.f32 %v1215_v3, %v157_v49  ;;  %v160_v56 = vmul.f32 %v1210_v2, %v28_v44  ;;  %v42_v48 = vld [vmem:[%s2053_s0 + $0xe0] sm:$0xff]  ;;  %v43_v49 = vld [vmem:[%s2053_s0 + $0xe8] sm:$0xff] }
   0xd   :  { %v161_v57 = vmul.f32 %v1210_v2, %v29_v45  ;;  %1115 = vst [vmem:[%s2056_s3 + $0x10] sm:$0xff] %v807_v46   ;;  %v414_v59 = vmax.f32 %v286_v50, 0.0  ;;  %v415_v60 = vmax.f32 %v287_v51, 0.0  ;;  %v290_v61 = vadd.f32 %v1215_v3, %v158_v52 }
   0xe   :  { %v291_v62 = vadd.f32 %v1215_v3, %v159_v53  ;;  %1116 = vst [vmem:[%s2056_s3 + $0x18] sm:$0xff] %v812_v47   ;;  %v416_v0 = vmax.f32 %v288_v54, 0.0  ;;  %v417_v1 = vmax.f32 %v289_v55, 0.0  ;;  %v292_v4 = vadd.f32 %v1215_v3, %v160_v56  ;;  %v44_v54 = vld [vmem:[%s2053_s0 + $0xf0] sm:$0xff] }
   0xf   :  { %v293_v5 = vadd.f32 %v1215_v3, %v161_v57  ;;  %v817_v8 = vpack.c.bf16 %v415_v60, %v414_v59  ;;  %v418_v9 = vmax.f32 %v290_v61, 0.0  ;;  %v162_v11 = vmul.f32 %v1210_v2, %v30_v58  ;;  %v45_v59 = vld [vmem:[%s2053_s0 + $0xf8] sm:$0xff] }
  0x10   :  { %v419_v10 = vmax.f32 %v291_v62, 0.0  ;;  %v822_v14 = vpack.c.bf16 %v417_v1, %v416_v0  ;;  %v420_v15 = vmax.f32 %v292_v4, 0.0  ;;  %v163_v17 = vmul.f32 %v1210_v2, %v31_v63  ;;  %v46_v0 = vld [vmem:[%s2053_s0 + $0x100] sm:$0xff] }
  0x11   :  { %v421_v16 = vmax.f32 %v293_v5, 0.0  ;;  %1117 = vst [vmem:[%s2056_s3 + $0x20] sm:$0xff] %v817_v8   ;;  %v294_v20 = vadd.f32 %v1215_v3, %v162_v11  ;;  %v164_v21 = vmul.f32 %v1210_v2, %v32_v6  ;;  %v165_v22 = vmul.f32 %v1210_v2, %v33_v7  ;;  %v47_v11 = vld [vmem:[%s2053_s0 + $0x108] sm:$0xff] }
  0x12   :  { %v827_v19 = vpack.c.bf16 %v419_v10, %v418_v9  ;;  %1118 = vst [vmem:[%s2056_s3 + $0x28] sm:$0xff] %v822_v14   ;;  %v295_v25 = vadd.f32 %v1215_v3, %v163_v17  ;;  %v166_v26 = vmul.f32 %v1210_v2, %v34_v12  ;;  %v167_v27 = vmul.f32 %v1210_v2, %v35_v13  ;;  %v49_v17 = vld [vmem:[%s2053_s0 + $0x118] sm:$0xff] }
  0x13   :  { %v832_v24 = vpack.c.bf16 %v421_v16, %v420_v15  ;;  %v422_v29 = vmax.f32 %v294_v20, 0.0  ;;  %v296_v30 = vadd.f32 %v1215_v3, %v164_v21  ;;  %v297_v31 = vadd.f32 %v1215_v3, %v165_v22  ;;  %v48_v16 = vld [vmem:[%s2053_s0 + $0x110] sm:$0xff]  ;;  %v50_v22 = vld [vmem:[%s2053_s0 + $0x120] sm:$0xff] }
  0x14   :  { %1119 = vst [vmem:[%s2056_s3 + $0x30] sm:$0xff] %v827_v19   ;;  %v168_v32 = vmul.f32 %v1210_v2, %v36_v18  ;;  %v423_v33 = vmax.f32 %v295_v25, 0.0  ;;  %v298_v34 = vadd.f32 %v1215_v3, %v166_v26  ;;  %v299_v35 = vadd.f32 %v1215_v3, %v167_v27 }
  0x15   :  { %1120 = vst [vmem:[%s2056_s3 + $0x38] sm:$0xff] %v832_v24   ;;  %v169_v36 = vmul.f32 %v1210_v2, %v37_v23  ;;  %v424_v38 = vmax.f32 %v296_v30, 0.0  ;;  %v425_v39 = vmax.f32 %v297_v31, 0.0  ;;  %v170_v41 = vmul.f32 %v1210_v2, %v38_v28  ;;  %v51_v23 = vld [vmem:[%s2053_s0 + $0x128] sm:$0xff]  ;;  %v52_v28 = vld [vmem:[%s2053_s0 + $0x130] sm:$0xff] }
  0x16   :  { %v300_v40 = vadd.f32 %v1215_v3, %v168_v32  ;;  %v837_v44 = vpack.c.bf16 %v423_v33, %v422_v29  ;;  %v426_v45 = vmax.f32 %v298_v34, 0.0  ;;  %v427_v46 = vmax.f32 %v299_v35, 0.0  ;;  %v53_v33 = vld [vmem:[%s2053_s0 + $0x138] sm:$0xff] }
  0x17   :  { %v301_v47 = vadd.f32 %v1215_v3, %v169_v36  ;;  %v842_v50 = vpack.c.bf16 %v425_v39, %v424_v38  ;;  %v171_v52 = vmul.f32 %v1210_v2, %v39_v37  ;;  %v302_v53 = vadd.f32 %v1215_v3, %v170_v41  ;;  %v54_v38 = vld [vmem:[%s2053_s0 + $0x140] sm:$0xff] }
  0x18   :  { %v428_v51 = vmax.f32 %v300_v40, 0.0  ;;  %1121 = vst [vmem:[%s2056_s3 + $0x40] sm:$0xff] %v837_v44   ;;  %v847_v55 = vpack.c.bf16 %v427_v46, %v426_v45  ;;  %v172_v57 = vmul.f32 %v1210_v2, %v40_v42  ;;  %v173_v58 = vmul.f32 %v1210_v2, %v41_v43 }
  0x19   :  { %v429_v56 = vmax.f32 %v301_v47, 0.0  ;;  %1122 = vst [vmem:[%s2056_s3 + $0x48] sm:$0xff] %v842_v50   ;;  %v303_v60 = vadd.f32 %v1215_v3, %v171_v52  ;;  %v430_v61 = vmax.f32 %v302_v53, 0.0  ;;  %v174_v62 = vmul.f32 %v1210_v2, %v42_v48  ;;  %v55_v47 = vld [vmem:[%s2053_s0 + $0x148] sm:$0xff]  ;;  %v56_v52 = vld [vmem:[%s2053_s0 + $0x150] sm:$0xff]  ;;  %v57_v53 = vld [vmem:[%s2053_s0 + $0x158] sm:$0xff] }
  0x1a   :  { %v175_v63 = vmul.f32 %v1210_v2, %v43_v49  ;;  %1123 = vst [vmem:[%s2056_s3 + $0x50] sm:$0xff] %v847_v55   ;;  %v304_v4 = vadd.f32 %v1215_v3, %v172_v57  ;;  %v305_v5 = vadd.f32 %v1215_v3, %v173_v58  ;;  %v176_v6 = vmul.f32 %v1210_v2, %v44_v54  ;;  %v58_v58 = vld [vmem:[%s2053_s0 + $0x160] sm:$0xff] }
  0x1b   :  { %v852_v1 = vpack.c.bf16 %v429_v56, %v428_v51  ;;  %v431_v7 = vmax.f32 %v303_v60, 0.0  ;;  %v306_v8 = vadd.f32 %v1215_v3, %v174_v62  ;;  %v177_v10 = vmul.f32 %v1210_v2, %v45_v59  ;;  %v59_v59 = vld [vmem:[%s2053_s0 + $0x168] sm:$0xff] }
  0x1c   :  { %v307_v9 = vadd.f32 %v1215_v3, %v175_v63  ;;  %v432_v12 = vmax.f32 %v304_v4, 0.0  ;;  %v433_v13 = vmax.f32 %v305_v5, 0.0  ;;  %v308_v14 = vadd.f32 %v1215_v3, %v176_v6 }
  0x1d   :  { %1124 = vst [vmem:[%s2056_s3 + $0x58] sm:$0xff] %v852_v1   ;;  %v178_v15 = vmul.f32 %v1210_v2, %v46_v0  ;;  %v857_v18 = vpack.c.bf16 %v431_v7, %v430_v61  ;;  %v434_v19 = vmax.f32 %v306_v8, 0.0  ;;  %v309_v21 = vadd.f32 %v1215_v3, %v177_v10  ;;  %v60_v0 = vld [vmem:[%s2053_s0 + $0x170] sm:$0xff]  ;;  %v61_v7 = vld [vmem:[%s2053_s0 + $0x178] sm:$0xff] }
  0x1e   :  { %v435_v20 = vmax.f32 %v307_v9, 0.0  ;;  %v862_v24 = vpack.c.bf16 %v433_v13, %v432_v12  ;;  %v436_v25 = vmax.f32 %v308_v14, 0.0  ;;  %v179_v26 = vmul.f32 %v1210_v2, %v47_v11  ;;  %v62_v12 = vld [vmem:[%s2053_s0 + $0x180] sm:$0xff] }
  0x1f   :  { %v310_v27 = vadd.f32 %v1215_v3, %v178_v15  ;;  %1125 = vst [vmem:[%s2056_s3 + $0x60] sm:$0xff] %v857_v18   ;;  %v437_v30 = vmax.f32 %v309_v21, 0.0  ;;  %v180_v31 = vmul.f32 %v1210_v2, %v48_v16  ;;  %v181_v32 = vmul.f32 %v1210_v2, %v49_v17  ;;  %v63_v21 = vld [vmem:[%s2053_s0 + $0x188] sm:$0xff] }
  0x20   :  { %v867_v29 = vpack.c.bf16 %v435_v20, %v434_v19  ;;  %1126 = vst [vmem:[%s2056_s3 + $0x68] sm:$0xff] %v862_v24   ;;  %v311_v34 = vadd.f32 %v1215_v3, %v179_v26  ;;  %v182_v36 = vmul.f32 %v1210_v2, %v50_v22  ;;  %v183_v37 = vmul.f32 %v1210_v2, %v51_v23  ;;  %v64_v26 = vld [vmem:[%s2053_s0 + $0x190] sm:$0xff] }
  0x21   :  { %v438_v35 = vmax.f32 %v310_v27, 0.0  ;;  %v872_v39 = vpack.c.bf16 %v437_v30, %v436_v25  ;;  %v312_v40 = vadd.f32 %v1215_v3, %v180_v31  ;;  %v313_v41 = vadd.f32 %v1215_v3, %v181_v32  ;;  %v65_v27 = vld [vmem:[%s2053_s0 + $0x198] sm:$0xff]  ;;  %v66_v32 = vld [vmem:[%s2053_s0 + $0x1a0] sm:$0xff] }
  0x22   :  { %1127 = vst [vmem:[%s2056_s3 + $0x70] sm:$0xff] %v867_v29   ;;  %v184_v42 = vmul.f32 %v1210_v2, %v52_v28  ;;  %v439_v43 = vmax.f32 %v311_v34, 0.0  ;;  %v314_v44 = vadd.f32 %v1215_v3, %v182_v36  ;;  %v315_v45 = vadd.f32 %v1215_v3, %v183_v37 }
  0x23   :  { %v185_v46 = vmul.f32 %v1210_v2, %v53_v33  ;;  %1128 = vst [vmem:[%s2056_s3 + $0x78] sm:$0xff] %v872_v39   ;;  %v440_v48 = vmax.f32 %v312_v40, 0.0  ;;  %v441_v49 = vmax.f32 %v313_v41, 0.0  ;;  %v186_v51 = vmul.f32 %v1210_v2, %v54_v38  ;;  %v67_v33 = vld [vmem:[%s2053_s0 + $0x1a8] sm:$0xff]  ;;  %v68_v38 = vld [vmem:[%s2053_s0 + $0x1b0] sm:$0xff] }
  0x24   :  { %v316_v50 = vadd.f32 %v1215_v3, %v184_v42  ;;  %v877_v54 = vpack.c.bf16 %v439_v43, %v438_v35  ;;  %v442_v55 = vmax.f32 %v314_v44, 0.0  ;;  %v443_v56 = vmax.f32 %v315_v45, 0.0  ;;  %v69_v43 = vld [vmem:[%s2053_s0 + $0x1b8] sm:$0xff] }
  0x25   :  { %v317_v57 = vadd.f32 %v1215_v3, %v185_v46  ;;  %v882_v60 = vpack.c.bf16 %v441_v49, %v440_v48  ;;  %v187_v62 = vmul.f32 %v1210_v2, %v55_v47  ;;  %v318_v63 = vadd.f32 %v1215_v3, %v186_v51  ;;  %v70_v48 = vld [vmem:[%s2053_s0 + $0x1c0] sm:$0xff] }
  0x26   :  { %v444_v61 = vmax.f32 %v316_v50, 0.0  ;;  %1129 = vst [vmem:[%s2056_s3 + $0x80] sm:$0xff] %v877_v54   ;;  %v887_v1 = vpack.c.bf16 %v443_v56, %v442_v55  ;;  %v188_v5 = vmul.f32 %v1210_v2, %v56_v52  ;;  %v189_v6 = vmul.f32 %v1210_v2, %v57_v53 }
  0x27   :  { %v445_v4 = vmax.f32 %v317_v57, 0.0  ;;  %1130 = vst [vmem:[%s2056_s3 + $0x88] sm:$0xff] %v882_v60   ;;  %v319_v8 = vadd.f32 %v1215_v3, %v187_v62  ;;  %v446_v9 = vmax.f32 %v318_v63, 0.0  ;;  %v190_v10 = vmul.f32 %v1210_v2, %v58_v58  ;;  %v71_v57 = vld [vmem:[%s2053_s0 + $0x1c8] sm:$0xff]  ;;  %v72_v62 = vld [vmem:[%s2053_s0 + $0x1d0] sm:$0xff]  ;;  %v73_v63 = vld [vmem:[%s2053_s0 + $0x1d8] sm:$0xff] }
  0x28   :  { %v191_v11 = vmul.f32 %v1210_v2, %v59_v59  ;;  %1131 = vst [vmem:[%s2056_s3 + $0x90] sm:$0xff] %v887_v1   ;;  %v320_v14 = vadd.f32 %v1215_v3, %v188_v5  ;;  %v321_v15 = vadd.f32 %v1215_v3, %v189_v6  ;;  %v192_v16 = vmul.f32 %v1210_v2, %v60_v0  ;;  %v74_v6 = vld [vmem:[%s2053_s0 + $0x1e0] sm:$0xff] }
  0x29   :  { %v892_v13 = vpack.c.bf16 %v445_v4, %v444_v61  ;;  %v447_v17 = vmax.f32 %v319_v8, 0.0  ;;  %v322_v18 = vadd.f32 %v1215_v3, %v190_v10  ;;  %v193_v20 = vmul.f32 %v1210_v2, %v61_v7  ;;  %v75_v7 = vld [vmem:[%s2053_s0 + $0x1e8] sm:$0xff] }
  0x2a   :  { %v323_v19 = vadd.f32 %v1215_v3, %v191_v11  ;;  %v448_v22 = vmax.f32 %v320_v14, 0.0  ;;  %v449_v23 = vmax.f32 %v321_v15, 0.0  ;;  %v324_v24 = vadd.f32 %v1215_v3, %v192_v16 }
  0x2b   :  { %1132 = vst [vmem:[%s2056_s3 + $0x98] sm:$0xff] %v892_v13   ;;  %v194_v25 = vmul.f32 %v1210_v2, %v62_v12  ;;  %v897_v28 = vpack.c.bf16 %v447_v17, %v446_v9  ;;  %v450_v29 = vmax.f32 %v322_v18, 0.0  ;;  %v325_v31 = vadd.f32 %v1215_v3, %v193_v20  ;;  %v76_v12 = vld [vmem:[%s2053_s0 + $0x1f0] sm:$0xff]  ;;  %v77_v17 = vld [vmem:[%s2053_s0 + $0x1f8] sm:$0xff] }
  0x2c   :  { %v451_v30 = vmax.f32 %v323_v19, 0.0  ;;  %v902_v34 = vpack.c.bf16 %v449_v23, %v448_v22  ;;  %v452_v35 = vmax.f32 %v324_v24, 0.0  ;;  %v195_v36 = vmul.f32 %v1210_v2, %v63_v21  ;;  %v78_v22 = vld [vmem:[%s2053_s0 + $0x200] sm:$0xff] }
  0x2d   :  { %v326_v37 = vadd.f32 %v1215_v3, %v194_v25  ;;  %1133 = vst [vmem:[%s2056_s3 + $0xa0] sm:$0xff] %v897_v28   ;;  %v453_v40 = vmax.f32 %v325_v31, 0.0  ;;  %v196_v41 = vmul.f32 %v1210_v2, %v64_v26  ;;  %v197_v42 = vmul.f32 %v1210_v2, %v65_v27  ;;  %v79_v31 = vld [vmem:[%s2053_s0 + $0x208] sm:$0xff] }
  0x2e   :  { %v907_v39 = vpack.c.bf16 %v451_v30, %v450_v29  ;;  %1134 = vst [vmem:[%s2056_s3 + $0xa8] sm:$0xff] %v902_v34   ;;  %v327_v44 = vadd.f32 %v1215_v3, %v195_v36  ;;  %v198_v46 = vmul.f32 %v1210_v2, %v66_v32  ;;  %v199_v47 = vmul.f32 %v1210_v2, %v67_v33  ;;  %v80_v36 = vld [vmem:[%s2053_s0 + $0x210] sm:$0xff] }
  0x2f   :  { %v454_v45 = vmax.f32 %v326_v37, 0.0  ;;  %v912_v49 = vpack.c.bf16 %v453_v40, %v452_v35  ;;  %v328_v50 = vadd.f32 %v1215_v3, %v196_v41  ;;  %v329_v51 = vadd.f32 %v1215_v3, %v197_v42  ;;  %v81_v37 = vld [vmem:[%s2053_s0 + $0x218] sm:$0xff]  ;;  %v82_v42 = vld [vmem:[%s2053_s0 + $0x220] sm:$0xff] }
  0x30   :  { %1135 = vst [vmem:[%s2056_s3 + $0xb0] sm:$0xff] %v907_v39   ;;  %v200_v52 = vmul.f32 %v1210_v2, %v68_v38  ;;  %v455_v53 = vmax.f32 %v327_v44, 0.0  ;;  %v330_v54 = vadd.f32 %v1215_v3, %v198_v46  ;;  %v331_v55 = vadd.f32 %v1215_v3, %v199_v47 }
  0x31   :  { %v201_v56 = vmul.f32 %v1210_v2, %v69_v43  ;;  %1136 = vst [vmem:[%s2056_s3 + $0xb8] sm:$0xff] %v912_v49   ;;  %v456_v58 = vmax.f32 %v328_v50, 0.0  ;;  %v457_v59 = vmax.f32 %v329_v51, 0.0  ;;  %v202_v61 = vmul.f32 %v1210_v2, %v70_v48  ;;  %v83_v43 = vld [vmem:[%s2053_s0 + $0x228] sm:$0xff]  ;;  %v84_v48 = vld [vmem:[%s2053_s0 + $0x230] sm:$0xff] }
  0x32   :  { %v332_v60 = vadd.f32 %v1215_v3, %v200_v52  ;;  %v917_v0 = vpack.c.bf16 %v455_v53, %v454_v45  ;;  %v458_v1 = vmax.f32 %v330_v54, 0.0  ;;  %v459_v4 = vmax.f32 %v331_v55, 0.0  ;;  %v85_v53 = vld [vmem:[%s2053_s0 + $0x238] sm:$0xff] }
  0x33   :  { %v333_v5 = vadd.f32 %v1215_v3, %v201_v56  ;;  %v922_v8 = vpack.c.bf16 %v457_v59, %v456_v58  ;;  %v203_v10 = vmul.f32 %v1210_v2, %v71_v57  ;;  %v334_v11 = vadd.f32 %v1215_v3, %v202_v61  ;;  %v86_v58 = vld [vmem:[%s2053_s0 + $0x240] sm:$0xff] }
  0x34   :  { %v460_v9 = vmax.f32 %v332_v60, 0.0  ;;  %1137 = vst [vmem:[%s2056_s3 + $0xc0] sm:$0xff] %v917_v0   ;;  %v927_v13 = vpack.c.bf16 %v459_v4, %v458_v1  ;;  %v204_v15 = vmul.f32 %v1210_v2, %v72_v62  ;;  %v205_v16 = vmul.f32 %v1210_v2, %v73_v63 }
  0x35   :  { %v461_v14 = vmax.f32 %v333_v5, 0.0  ;;  %1138 = vst [vmem:[%s2056_s3 + $0xc8] sm:$0xff] %v922_v8   ;;  %v335_v18 = vadd.f32 %v1215_v3, %v203_v10  ;;  %v462_v19 = vmax.f32 %v334_v11, 0.0  ;;  %v206_v20 = vmul.f32 %v1210_v2, %v74_v6  ;;  %v87_v5 = vld [vmem:[%s2053_s0 + $0x248] sm:$0xff]  ;;  %v88_v10 = vld [vmem:[%s2053_s0 + $0x250] sm:$0xff]  ;;  %v89_v11 = vld [vmem:[%s2053_s0 + $0x258] sm:$0xff] }
  0x36   :  { %v207_v21 = vmul.f32 %v1210_v2, %v75_v7  ;;  %1139 = vst [vmem:[%s2056_s3 + $0xd0] sm:$0xff] %v927_v13   ;;  %v336_v24 = vadd.f32 %v1215_v3, %v204_v15  ;;  %v337_v25 = vadd.f32 %v1215_v3, %v205_v16  ;;  %v208_v26 = vmul.f32 %v1210_v2, %v76_v12  ;;  %v90_v16 = vld [vmem:[%s2053_s0 + $0x260] sm:$0xff] }
  0x37   :  { %v932_v23 = vpack.c.bf16 %v461_v14, %v460_v9  ;;  %v463_v27 = vmax.f32 %v335_v18, 0.0  ;;  %v338_v28 = vadd.f32 %v1215_v3, %v206_v20  ;;  %v209_v30 = vmul.f32 %v1210_v2, %v77_v17  ;;  %v91_v17 = vld [vmem:[%s2053_s0 + $0x268] sm:$0xff] }
  0x38   :  { %v339_v29 = vadd.f32 %v1215_v3, %v207_v21  ;;  %v464_v32 = vmax.f32 %v336_v24, 0.0  ;;  %v465_v33 = vmax.f32 %v337_v25, 0.0  ;;  %v340_v34 = vadd.f32 %v1215_v3, %v208_v26 }
  0x39   :  { %1140 = vst [vmem:[%s2056_s3 + $0xd8] sm:$0xff] %v932_v23   ;;  %v210_v35 = vmul.f32 %v1210_v2, %v78_v22  ;;  %v937_v38 = vpack.c.bf16 %v463_v27, %v462_v19  ;;  %v466_v39 = vmax.f32 %v338_v28, 0.0  ;;  %v341_v41 = vadd.f32 %v1215_v3, %v209_v30  ;;  %v92_v22 = vld [vmem:[%s2053_s0 + $0x270] sm:$0xff]  ;;  %v93_v27 = vld [vmem:[%s2053_s0 + $0x278] sm:$0xff] }
  0x3a   :  { %v467_v40 = vmax.f32 %v339_v29, 0.0  ;;  %v942_v44 = vpack.c.bf16 %v465_v33, %v464_v32  ;;  %v468_v45 = vmax.f32 %v340_v34, 0.0  ;;  %v211_v46 = vmul.f32 %v1210_v2, %v79_v31  ;;  %v94_v32 = vld [vmem:[%s2053_s0 + $0x280] sm:$0xff] }
  0x3b   :  { %v342_v47 = vadd.f32 %v1215_v3, %v210_v35  ;;  %1141 = vst [vmem:[%s2056_s3 + $0xe0] sm:$0xff] %v937_v38   ;;  %v469_v50 = vmax.f32 %v341_v41, 0.0  ;;  %v212_v51 = vmul.f32 %v1210_v2, %v80_v36  ;;  %v213_v52 = vmul.f32 %v1210_v2, %v81_v37  ;;  %v95_v41 = vld [vmem:[%s2053_s0 + $0x288] sm:$0xff] }
  0x3c   :  { %v947_v49 = vpack.c.bf16 %v467_v40, %v466_v39  ;;  %1142 = vst [vmem:[%s2056_s3 + $0xe8] sm:$0xff] %v942_v44   ;;  %v343_v54 = vadd.f32 %v1215_v3, %v211_v46  ;;  %v214_v56 = vmul.f32 %v1210_v2, %v82_v42  ;;  %v215_v57 = vmul.f32 %v1210_v2, %v83_v43  ;;  %v96_v46 = vld [vmem:[%s2053_s0 + $0x290] sm:$0xff] }
  0x3d   :  { %v470_v55 = vmax.f32 %v342_v47, 0.0  ;;  %v952_v59 = vpack.c.bf16 %v469_v50, %v468_v45  ;;  %v344_v60 = vadd.f32 %v1215_v3, %v212_v51  ;;  %v345_v61 = vadd.f32 %v1215_v3, %v213_v52  ;;  %v97_v47 = vld [vmem:[%s2053_s0 + $0x298] sm:$0xff]  ;;  %v98_v52 = vld [vmem:[%s2053_s0 + $0x2a0] sm:$0xff] }
  0x3e   :  { %1143 = vst [vmem:[%s2056_s3 + $0xf0] sm:$0xff] %v947_v49   ;;  %v216_v62 = vmul.f32 %v1210_v2, %v84_v48  ;;  %v471_v63 = vmax.f32 %v343_v54, 0.0  ;;  %v346_v0 = vadd.f32 %v1215_v3, %v214_v56  ;;  %v347_v1 = vadd.f32 %v1215_v3, %v215_v57 }
  0x3f   :  { %v217_v4 = vmul.f32 %v1210_v2, %v85_v53  ;;  %1144 = vst [vmem:[%s2056_s3 + $0xf8] sm:$0xff] %v952_v59   ;;  %v472_v6 = vmax.f32 %v344_v60, 0.0  ;;  %v473_v7 = vmax.f32 %v345_v61, 0.0  ;;  %v218_v9 = vmul.f32 %v1210_v2, %v86_v58  ;;  %v99_v53 = vld [vmem:[%s2053_s0 + $0x2a8] sm:$0xff]  ;;  %v100_v58 = vld [vmem:[%s2053_s0 + $0x2b0] sm:$0xff] }
  0x40   :  { %v348_v8 = vadd.f32 %v1215_v3, %v216_v62  ;;  %v957_v12 = vpack.c.bf16 %v471_v63, %v470_v55  ;;  %v474_v13 = vmax.f32 %v346_v0, 0.0  ;;  %v475_v14 = vmax.f32 %v347_v1, 0.0  ;;  %v101_v63 = vld [vmem:[%s2053_s0 + $0x2b8] sm:$0xff] }
  0x41   :  { %v349_v15 = vadd.f32 %v1215_v3, %v217_v4  ;;  %v962_v18 = vpack.c.bf16 %v473_v7, %v472_v6  ;;  %v219_v20 = vmul.f32 %v1210_v2, %v87_v5  ;;  %v350_v21 = vadd.f32 %v1215_v3, %v218_v9  ;;  %v102_v6 = vld [vmem:[%s2053_s0 + $0x2c0] sm:$0xff] }
  0x42   :  { %v476_v19 = vmax.f32 %v348_v8, 0.0  ;;  %1145 = vst [vmem:[%s2056_s3 + $0x100] sm:$0xff] %v957_v12   ;;  %v967_v23 = vpack.c.bf16 %v475_v14, %v474_v13  ;;  %v220_v25 = vmul.f32 %v1210_v2, %v88_v10  ;;  %v221_v26 = vmul.f32 %v1210_v2, %v89_v11 }
  0x43   :  { %v477_v24 = vmax.f32 %v349_v15, 0.0  ;;  %1146 = vst [vmem:[%s2056_s3 + $0x108] sm:$0xff] %v962_v18   ;;  %v351_v28 = vadd.f32 %v1215_v3, %v219_v20  ;;  %v478_v29 = vmax.f32 %v350_v21, 0.0  ;;  %v222_v30 = vmul.f32 %v1210_v2, %v90_v16  ;;  %v103_v15 = vld [vmem:[%s2053_s0 + $0x2c8] sm:$0xff]  ;;  %v104_v20 = vld [vmem:[%s2053_s0 + $0x2d0] sm:$0xff]  ;;  %v105_v21 = vld [vmem:[%s2053_s0 + $0x2d8] sm:$0xff] }
  0x44   :  { %v223_v31 = vmul.f32 %v1210_v2, %v91_v17  ;;  %1147 = vst [vmem:[%s2056_s3 + $0x110] sm:$0xff] %v967_v23   ;;  %v352_v34 = vadd.f32 %v1215_v3, %v220_v25  ;;  %v353_v35 = vadd.f32 %v1215_v3, %v221_v26  ;;  %v224_v36 = vmul.f32 %v1210_v2, %v92_v22  ;;  %v106_v26 = vld [vmem:[%s2053_s0 + $0x2e0] sm:$0xff] }
  0x45   :  { %v972_v33 = vpack.c.bf16 %v477_v24, %v476_v19  ;;  %v479_v37 = vmax.f32 %v351_v28, 0.0  ;;  %v354_v38 = vadd.f32 %v1215_v3, %v222_v30  ;;  %v225_v40 = vmul.f32 %v1210_v2, %v93_v27  ;;  %v107_v27 = vld [vmem:[%s2053_s0 + $0x2e8] sm:$0xff] }
  0x46   :  { %v355_v39 = vadd.f32 %v1215_v3, %v223_v31  ;;  %v480_v42 = vmax.f32 %v352_v34, 0.0  ;;  %v481_v43 = vmax.f32 %v353_v35, 0.0  ;;  %v356_v44 = vadd.f32 %v1215_v3, %v224_v36 }
  0x47   :  { %1148 = vst [vmem:[%s2056_s3 + $0x118] sm:$0xff] %v972_v33   ;;  %v226_v45 = vmul.f32 %v1210_v2, %v94_v32  ;;  %v977_v48 = vpack.c.bf16 %v479_v37, %v478_v29  ;;  %v482_v49 = vmax.f32 %v354_v38, 0.0  ;;  %v357_v51 = vadd.f32 %v1215_v3, %v225_v40  ;;  %v108_v32 = vld [vmem:[%s2053_s0 + $0x2f0] sm:$0xff]  ;;  %v109_v37 = vld [vmem:[%s2053_s0 + $0x2f8] sm:$0xff] }
  0x48   :  { %v483_v50 = vmax.f32 %v355_v39, 0.0  ;;  %v982_v54 = vpack.c.bf16 %v481_v43, %v480_v42  ;;  %v484_v55 = vmax.f32 %v356_v44, 0.0  ;;  %v227_v56 = vmul.f32 %v1210_v2, %v95_v41  ;;  %v110_v42 = vld [vmem:[%s2053_s0 + $0x300] sm:$0xff] }
  0x49   :  { %v358_v57 = vadd.f32 %v1215_v3, %v226_v45  ;;  %1149 = vst [vmem:[%s2056_s3 + $0x120] sm:$0xff] %v977_v48   ;;  %v485_v60 = vmax.f32 %v357_v51, 0.0  ;;  %v228_v61 = vmul.f32 %v1210_v2, %v96_v46  ;;  %v229_v62 = vmul.f32 %v1210_v2, %v97_v47  ;;  %v111_v51 = vld [vmem:[%s2053_s0 + $0x308] sm:$0xff] }
  0x4a   :  { %v987_v59 = vpack.c.bf16 %v483_v50, %v482_v49  ;;  %1150 = vst [vmem:[%s2056_s3 + $0x128] sm:$0xff] %v982_v54   ;;  %v359_v0 = vadd.f32 %v1215_v3, %v227_v56  ;;  %v230_v4 = vmul.f32 %v1210_v2, %v98_v52  ;;  %v231_v5 = vmul.f32 %v1210_v2, %v99_v53  ;;  %v112_v56 = vld [vmem:[%s2053_s0 + $0x310] sm:$0xff] }
  0x4b   :  { %v486_v1 = vmax.f32 %v358_v57, 0.0  ;;  %v992_v7 = vpack.c.bf16 %v485_v60, %v484_v55  ;;  %v360_v8 = vadd.f32 %v1215_v3, %v228_v61  ;;  %v361_v9 = vadd.f32 %v1215_v3, %v229_v62  ;;  %v113_v57 = vld [vmem:[%s2053_s0 + $0x318] sm:$0xff]  ;;  %v114_v62 = vld [vmem:[%s2053_s0 + $0x320] sm:$0xff] }
  0x4c   :  { %1151 = vst [vmem:[%s2056_s3 + $0x130] sm:$0xff] %v987_v59   ;;  %v232_v10 = vmul.f32 %v1210_v2, %v100_v58  ;;  %v487_v11 = vmax.f32 %v359_v0, 0.0  ;;  %v362_v12 = vadd.f32 %v1215_v3, %v230_v4  ;;  %v363_v13 = vadd.f32 %v1215_v3, %v231_v5 }
  0x4d   :  { %v233_v14 = vmul.f32 %v1210_v2, %v101_v63  ;;  %1152 = vst [vmem:[%s2056_s3 + $0x138] sm:$0xff] %v992_v7   ;;  %v488_v16 = vmax.f32 %v360_v8, 0.0  ;;  %v489_v17 = vmax.f32 %v361_v9, 0.0  ;;  %v234_v19 = vmul.f32 %v1210_v2, %v102_v6  ;;  %v115_v63 = vld [vmem:[%s2053_s0 + $0x328] sm:$0xff]  ;;  %v116_v6 = vld [vmem:[%s2053_s0 + $0x330] sm:$0xff] }
  0x4e   :  { %v364_v18 = vadd.f32 %v1215_v3, %v232_v10  ;;  %v997_v22 = vpack.c.bf16 %v487_v11, %v486_v1  ;;  %v490_v23 = vmax.f32 %v362_v12, 0.0  ;;  %v491_v24 = vmax.f32 %v363_v13, 0.0  ;;  %v117_v11 = vld [vmem:[%s2053_s0 + $0x338] sm:$0xff] }
  0x4f   :  { %v365_v25 = vadd.f32 %v1215_v3, %v233_v14  ;;  %v1002_v28 = vpack.c.bf16 %v489_v17, %v488_v16  ;;  %v235_v30 = vmul.f32 %v1210_v2, %v103_v15  ;;  %v366_v31 = vadd.f32 %v1215_v3, %v234_v19  ;;  %v118_v16 = vld [vmem:[%s2053_s0 + $0x340] sm:$0xff] }
  0x50   :  { %v492_v29 = vmax.f32 %v364_v18, 0.0  ;;  %1153 = vst [vmem:[%s2056_s3 + $0x140] sm:$0xff] %v997_v22   ;;  %v1007_v33 = vpack.c.bf16 %v491_v24, %v490_v23  ;;  %v236_v35 = vmul.f32 %v1210_v2, %v104_v20  ;;  %v237_v36 = vmul.f32 %v1210_v2, %v105_v21 }
  0x51   :  { %v493_v34 = vmax.f32 %v365_v25, 0.0  ;;  %1154 = vst [vmem:[%s2056_s3 + $0x148] sm:$0xff] %v1002_v28   ;;  %v367_v38 = vadd.f32 %v1215_v3, %v235_v30  ;;  %v494_v39 = vmax.f32 %v366_v31, 0.0  ;;  %v238_v40 = vmul.f32 %v1210_v2, %v106_v26  ;;  %v119_v25 = vld [vmem:[%s2053_s0 + $0x348] sm:$0xff]  ;;  %v120_v30 = vld [vmem:[%s2053_s0 + $0x350] sm:$0xff]  ;;  %v121_v31 = vld [vmem:[%s2053_s0 + $0x358] sm:$0xff] }
  0x52   :  { %v239_v41 = vmul.f32 %v1210_v2, %v107_v27  ;;  %1155 = vst [vmem:[%s2056_s3 + $0x150] sm:$0xff] %v1007_v33   ;;  %v368_v44 = vadd.f32 %v1215_v3, %v236_v35  ;;  %v369_v45 = vadd.f32 %v1215_v3, %v237_v36  ;;  %v240_v46 = vmul.f32 %v1210_v2, %v108_v32  ;;  %v1890_v35 = vld [vmem:[%s2055_s2] ss:$0 sm:$0xff]  ;;  %v123_v36 = vld [vmem:[%s2053_s0 + $0x368] sm:$0xff] }
  0x53   :  { %v1012_v43 = vpack.c.bf16 %v493_v34, %v492_v29  ;;  %v495_v47 = vmax.f32 %v367_v38, 0.0  ;;  %v370_v48 = vadd.f32 %v1215_v3, %v238_v40  ;;  %v241_v50 = vmul.f32 %v1210_v2, %v109_v37 }
  0x54   :  { %v371_v49 = vadd.f32 %v1215_v3, %v239_v41  ;;  %v496_v52 = vmax.f32 %v368_v44, 0.0  ;;  %v497_v53 = vmax.f32 %v369_v45, 0.0  ;;  %v372_v54 = vadd.f32 %v1215_v3, %v240_v46 }
  0x55   :  { %1156 = vst [vmem:[%s2056_s3 + $0x158] sm:$0xff] %v1012_v43   ;;  %v242_v55 = vmul.f32 %v1210_v2, %v110_v42  ;;  %v1017_v58 = vpack.c.bf16 %v495_v47, %v494_v39  ;;  %v498_v59 = vmax.f32 %v370_v48, 0.0  ;;  %v373_v61 = vadd.f32 %v1215_v3, %v241_v50  ;;  %v1902_v39 = vld [vmem:[%s2054_s1] ss:$0 sm:$0xff]  ;;  %v124_v42 = vld [vmem:[%s2053_s0 + $0x370] sm:$0xff]  ;;  %v125_v47 = vld [vmem:[%s2053_s0 + $0x378] sm:$0xff] }
  0x56   :  { %v499_v60 = vmax.f32 %v371_v49, 0.0  ;;  %v1022_v0 = vpack.c.bf16 %v497_v53, %v496_v52  ;;  %v500_v1 = vmax.f32 %v372_v54, 0.0  ;;  %v243_v4 = vmul.f32 %v1210_v2, %v111_v51  ;;  %v126_v52 = vld [vmem:[%s2053_s0 + $0x380] sm:$0xff] }
  0x57   :  { %v374_v5 = vadd.f32 %v1215_v3, %v242_v55  ;;  %1157 = vst [vmem:[%s2056_s3 + $0x160] sm:$0xff] %v1017_v58   ;;  %v501_v8 = vmax.f32 %v373_v61, 0.0  ;;  %v244_v9 = vmul.f32 %v1210_v2, %v112_v56  ;;  %v245_v10 = vmul.f32 %v1210_v2, %v113_v57  ;;  %v127_v61 = vld [vmem:[%s2053_s0 + $0x388] sm:$0xff] }
  0x58   :  { %v1027_v7 = vpack.c.bf16 %v499_v60, %v498_v59  ;;  %1158 = vst [vmem:[%s2056_s3 + $0x168] sm:$0xff] %v1022_v0   ;;  %v375_v12 = vadd.f32 %v1215_v3, %v243_v4  ;;  %v246_v14 = vmul.f32 %v1210_v2, %v114_v62  ;;  %v247_v15 = vmul.f32 %v1210_v2, %v115_v63  ;;  %v128_v4 = vld [vmem:[%s2053_s0 + $0x390] sm:$0xff] }
  0x59   :  { %v502_v13 = vmax.f32 %v374_v5, 0.0  ;;  %v1032_v17 = vpack.c.bf16 %v501_v8, %v500_v1  ;;  %v376_v18 = vadd.f32 %v1215_v3, %v244_v9  ;;  %v377_v19 = vadd.f32 %v1215_v3, %v245_v10  ;;  %v129_v5 = vld [vmem:[%s2053_s0 + $0x398] sm:$0xff]  ;;  %v130_v10 = vld [vmem:[%s2053_s0 + $0x3a0] sm:$0xff] }
  0x5a   :  { %1159 = vst [vmem:[%s2056_s3 + $0x170] sm:$0xff] %v1027_v7   ;;  %v248_v20 = vmul.f32 %v1210_v2, %v116_v6  ;;  %v503_v21 = vmax.f32 %v375_v12, 0.0  ;;  %v378_v22 = vadd.f32 %v1215_v3, %v246_v14  ;;  %v379_v23 = vadd.f32 %v1215_v3, %v247_v15 }
  0x5b   :  { %v249_v24 = vmul.f32 %v1210_v2, %v117_v11  ;;  %1160 = vst [vmem:[%s2056_s3 + $0x178] sm:$0xff] %v1032_v17   ;;  %v504_v26 = vmax.f32 %v376_v18, 0.0  ;;  %v505_v27 = vmax.f32 %v377_v19, 0.0  ;;  %v250_v29 = vmul.f32 %v1210_v2, %v118_v16  ;;  %v122_v2 = vld [vmem:[%s2053_s0 + $0x360] sm:$0xff]  ;;  %v131_v11 = vld [vmem:[%s2053_s0 + $0x3a8] sm:$0xff]  ;;  %v132_v16 = vld [vmem:[%s2053_s0 + $0x3b0] sm:$0xff] }
  0x5c   :  { %v380_v28 = vadd.f32 %v1215_v3, %v248_v20  ;;  %v1037_v32 = vpack.c.bf16 %v503_v21, %v502_v13  ;;  %v506_v33 = vmax.f32 %v378_v22, 0.0  ;;  %v507_v34 = vmax.f32 %v379_v23, 0.0  ;;  %v133_v21 = vld [vmem:[%s2053_s0 + $0x3b8] sm:$0xff] }
  0x5d   :  { %v381_v3 = vadd.f32 %v1890_v35, %v249_v24  ;;  %v1042_v37 = vpack.c.bf16 %v505_v27, %v504_v26  ;;  %v251_v40 = vmul.f32 %v1902_v39, %v119_v25  ;;  %v382_v41 = vadd.f32 %v1890_v35, %v250_v29  ;;  %v134_v26 = vld [vmem:[%s2053_s0 + $0x3c0] sm:$0xff] }
  0x5e   :  { %v508_v38 = vmax.f32 %v380_v28, 0.0  ;;  %1161 = vst [vmem:[%s2056_s3 + $0x180] sm:$0xff] %v1037_v32   ;;  %v1047_v43 = vpack.c.bf16 %v507_v34, %v506_v33  ;;  %v252_v45 = vmul.f32 %v1902_v39, %v120_v30  ;;  %v253_v46 = vmul.f32 %v1902_v39, %v121_v31 }
  0x5f   :  { %v509_v44 = vmax.f32 %v381_v3, 0.0  ;;  %1162 = vst [vmem:[%s2056_s3 + $0x188] sm:$0xff] %v1042_v37   ;;  %v383_v48 = vadd.f32 %v1890_v35, %v251_v40  ;;  %v510_v49 = vmax.f32 %v382_v41, 0.0  ;;  %v254_v50 = vmul.f32 %v1902_v39, %v122_v2  ;;  %v135_v3 = vld [vmem:[%s2053_s0 + $0x3c8] sm:$0xff]  ;;  %v136_v40 = vld [vmem:[%s2053_s0 + $0x3d0] sm:$0xff]  ;;  %v137_v41 = vld [vmem:[%s2053_s0 + $0x3d8] sm:$0xff] }
  0x60   :  { %v255_v51 = vmul.f32 %v1902_v39, %v123_v36  ;;  %1163 = vst [vmem:[%s2056_s3 + $0x190] sm:$0xff] %v1047_v43   ;;  %v384_v54 = vadd.f32 %v1890_v35, %v252_v45  ;;  %v385_v55 = vadd.f32 %v1890_v35, %v253_v46  ;;  %v256_v56 = vmul.f32 %v1902_v39, %v124_v42  ;;  %v138_v46 = vld [vmem:[%s2053_s0 + $0x3e0] sm:$0xff] }
  0x61   :  { %v1052_v53 = vpack.c.bf16 %v509_v44, %v508_v38  ;;  %v511_v57 = vmax.f32 %v383_v48, 0.0  ;;  %v386_v58 = vadd.f32 %v1890_v35, %v254_v50  ;;  %v257_v60 = vmul.f32 %v1902_v39, %v125_v47  ;;  %v139_v47 = vld [vmem:[%s2053_s0 + $0x3e8] sm:$0xff] }
  0x62   :  { %v387_v59 = vadd.f32 %v1890_v35, %v255_v51  ;;  %v512_v62 = vmax.f32 %v384_v54, 0.0  ;;  %v513_v63 = vmax.f32 %v385_v55, 0.0  ;;  %v388_v0 = vadd.f32 %v1890_v35, %v256_v56 }
  0x63   :  { %1164 = vst [vmem:[%s2056_s3 + $0x198] sm:$0xff] %v1052_v53   ;;  %v258_v1 = vmul.f32 %v1902_v39, %v126_v52  ;;  %v1057_v6 = vpack.c.bf16 %v511_v57, %v510_v49  ;;  %v514_v7 = vmax.f32 %v386_v58, 0.0  ;;  %v389_v9 = vadd.f32 %v1890_v35, %v257_v60  ;;  %v140_v52 = vld [vmem:[%s2053_s0 + $0x3f0] sm:$0xff]  ;;  %v141_v57 = vld [vmem:[%s2053_s0 + $0x3f8] sm:$0xff] }
  0x64   :  { %v515_v8 = vmax.f32 %v387_v59, 0.0  ;;  %v1062_v12 = vpack.c.bf16 %v513_v63, %v512_v62  ;;  %v516_v13 = vmax.f32 %v388_v0, 0.0  ;;  %v259_v14 = vmul.f32 %v1902_v39, %v127_v61 }
  0x65   :  { %v390_v15 = vadd.f32 %v1890_v35, %v258_v1  ;;  %1165 = vst [vmem:[%s2056_s3 + $0x1a0] sm:$0xff] %v1057_v6   ;;  %v517_v18 = vmax.f32 %v389_v9, 0.0  ;;  %v260_v19 = vmul.f32 %v1902_v39, %v128_v4  ;;  %v261_v20 = vmul.f32 %v1902_v39, %v129_v5 }
  0x66   :  { %v1067_v17 = vpack.c.bf16 %v515_v8, %v514_v7  ;;  %1166 = vst [vmem:[%s2056_s3 + $0x1a8] sm:$0xff] %v1062_v12   ;;  %v391_v22 = vadd.f32 %v1890_v35, %v259_v14  ;;  %v262_v24 = vmul.f32 %v1902_v39, %v130_v10  ;;  %v263_v25 = vmul.f32 %v1902_v39, %v131_v11 }
  0x67   :  { %v518_v23 = vmax.f32 %v390_v15, 0.0  ;;  %v1072_v27 = vpack.c.bf16 %v517_v18, %v516_v13  ;;  %v392_v28 = vadd.f32 %v1890_v35, %v260_v19  ;;  %v393_v29 = vadd.f32 %v1890_v35, %v261_v20 }
  0x68   :  { %1167 = vst [vmem:[%s2056_s3 + $0x1b0] sm:$0xff] %v1067_v17   ;;  %v264_v30 = vmul.f32 %v1902_v39, %v132_v16  ;;  %v519_v31 = vmax.f32 %v391_v22, 0.0  ;;  %v394_v32 = vadd.f32 %v1890_v35, %v262_v24  ;;  %v395_v33 = vadd.f32 %v1890_v35, %v263_v25 }
  0x69   :  { %v265_v34 = vmul.f32 %v1902_v39, %v133_v21  ;;  %1168 = vst [vmem:[%s2056_s3 + $0x1b8] sm:$0xff] %v1072_v27   ;;  %v520_v2 = vmax.f32 %v392_v28, 0.0  ;;  %v521_v36 = vmax.f32 %v393_v29, 0.0  ;;  %v266_v38 = vmul.f32 %v1902_v39, %v134_v26 }
  0x6a   :  { %v396_v37 = vadd.f32 %v1890_v35, %v264_v30  ;;  %v1077_v42 = vpack.c.bf16 %v519_v31, %v518_v23  ;;  %v522_v43 = vmax.f32 %v394_v32, 0.0  ;;  %v523_v44 = vmax.f32 %v395_v33, 0.0 }
  0x6b   :  { %v397_v45 = vadd.f32 %v1890_v35, %v265_v34  ;;  %v1082_v48 = vpack.c.bf16 %v521_v36, %v520_v2  ;;  %v267_v50 = vmul.f32 %v1902_v39, %v135_v3  ;;  %v398_v51 = vadd.f32 %v1890_v35, %v266_v38 }
  0x6c   :  { %v524_v49 = vmax.f32 %v396_v37, 0.0  ;;  %1169 = vst [vmem:[%s2056_s3 + $0x1c0] sm:$0xff] %v1077_v42   ;;  %v1087_v53 = vpack.c.bf16 %v523_v44, %v522_v43  ;;  %v268_v55 = vmul.f32 %v1902_v39, %v136_v40  ;;  %v269_v56 = vmul.f32 %v1902_v39, %v137_v41 }
  0x6d   :  { %v525_v54 = vmax.f32 %v397_v45, 0.0  ;;  %1170 = vst [vmem:[%s2056_s3 + $0x1c8] sm:$0xff] %v1082_v48   ;;  %v399_v58 = vadd.f32 %v1890_v35, %v267_v50  ;;  %v526_v59 = vmax.f32 %v398_v51, 0.0  ;;  %v270_v60 = vmul.f32 %v1902_v39, %v138_v46 }
  0x6e   :  { %v271_v61 = vmul.f32 %v1902_v39, %v139_v47  ;;  %1171 = vst [vmem:[%s2056_s3 + $0x1d0] sm:$0xff] %v1087_v53   ;;  %v400_v63 = vadd.f32 %v1890_v35, %v268_v55  ;;  %v401_v0 = vadd.f32 %v1890_v35, %v269_v56  ;;  %v272_v1 = vmul.f32 %v1902_v39, %v140_v52 }
  0x6f   :  { %v1092_v62 = vpack.c.bf16 %v525_v54, %v524_v49  ;;  %v527_v4 = vmax.f32 %v399_v58, 0.0  ;;  %v402_v5 = vadd.f32 %v1890_v35, %v270_v60  ;;  %v273_v7 = vmul.f32 %v1902_v39, %v141_v57 }
  0x70   :  { %v403_v6 = vadd.f32 %v1890_v35, %v271_v61  ;;  %v528_v8 = vmax.f32 %v400_v63, 0.0  ;;  %v529_v9 = vmax.f32 %v401_v0, 0.0  ;;  %v404_v10 = vadd.f32 %v1890_v35, %v272_v1 }
  0x71   :  { %1172 = vst [vmem:[%s2056_s3 + $0x1d8] sm:$0xff] %v1092_v62   ;;  %v1097_v11 = vpack.c.bf16 %v527_v4, %v526_v59  ;;  %v530_v12 = vmax.f32 %v402_v5, 0.0  ;;  %v405_v14 = vadd.f32 %v1890_v35, %v273_v7 }
  0x72   :  { %v531_v13 = vmax.f32 %v403_v6, 0.0  ;;  %v1102_v15 = vpack.c.bf16 %v529_v9, %v528_v8  ;;  %v532_v16 = vmax.f32 %v404_v10, 0.0 }
  0x73   :  { %1173 = vst [vmem:[%s2056_s3 + $0x1e0] sm:$0xff] %v1097_v11   ;;  %v533_v17 = vmax.f32 %v405_v14, 0.0 }
  0x74   :  { %v1107_v39 = vpack.c.bf16 %v531_v13, %v530_v12  ;;  %1174 = vst [vmem:[%s2056_s3 + $0x1e8] sm:$0xff] %v1102_v15  }
  0x75   :  { %v1112_v18 = vpack.c.bf16 %v533_v17, %v532_v16 }
  0x76   :  { %1175 = vst [vmem:[%s2056_s3 + $0x1f0] sm:$0xff] %v1107_v39  }
  0x77   :  { %1176 = vst [vmem:[%s2056_s3 + $0x1f8] sm:$0xff] %v1112_v18  }

// kernel: custom_conv_block_forward.4
= control target key start
LH: loop header
LB: loop body
LE: loop exit
PB: predicated region body
PF: predicated region fallthrough
CT: control target
= control target key end

     0   :  { %s4919_s21 = smov 0   ;;  %s4921_s22 = smov 0   ;;  %s6417_s0 = inlined_call_operand.vmem [shape: bf16[27,4,128], index: 0, kind: input, shape index: {}]   ;;  %s6418_s1 = inlined_call_operand.vmem [shape: f32[1,128], index: 1, kind: input, shape index: {}]   ;;  %s6419_s2 = inlined_call_operand.vmem [shape: bf16[2,10,10,10,4], index: 2, kind: input, shape index: {}, may-alias: {2,3,4}]   ;;  %s6420_s3 = inlined_call_operand.vmem [shape: bf16[2,10,10,10,4], index: 3, kind: input, shape index: {}, may-alias: {2,3,4}]   ;;  %s6421_s4 = inlined_call_operand.vmem [shape: bf16[2,10,10,10,4], index: 4, kind: input, shape index: {}, may-alias: {2,3,4}]   ;;  %s6422_s5 = inlined_call_operand.vmem [shape: f32[2,8,64,128], index: 5, kind: output, shape index: {0}]   ;;  %s6423_s6 = inlined_call_operand.vmem [shape: f32[2,8,2,128], index: 6, kind: output, shape index: {1}]  }
   0x1   :  { %s4923_s23 = smov 0   ;;  %s4925_s24 = smov 0  }
   0x2   :  { %s4927_s25 = smov 0  }
   0x3 LB: > { %s26_s26 = sadd.s32 1, %s4874_s23  ;;  %s29_s27 = sadd.s32 1, %s4878_s24  ;;  %s4882_s25 = sphi %s4927_s25, %s17_s25   ;;  %s4878_s24 = sphi %s4925_s24, %s6432_s24   ;;  %s4874_s23 = sphi %s4923_s23, %s6431_s23   ;;  %s4870_s22 = sphi %s4921_s22, %s6430_s22   ;;  %s4866_s21 = sphi %s4919_s21, %s6429_s21  }
   0x4   : > { %p27_p0 = scmp.ge.s32.totalorder %s26_s26, 8  ;;  %p4207_p1 = scmp.ge.s32.totalorder %s4882_s25, 1 }
   0x5   : > { %p277_p2 = scmp.lt.s32.totalorder %s4882_s25, 17 }
   0x6   : > { %s6434_s26 = smov (%p27_p0, %s26_s26), 0  ;;  %s6436_s27 = smov (!%p27_p0, %s29_s27), %s4878_s24 }
   0x7   : > { %p278_p3 = pnand %p4207_p1, %p277_p2  ;;  %p31_p4 = scmp.ge.s32.totalorder %s6436_s27, 2 }
   0x8   : > { %p343_p5 = scmp.lt.s32.totalorder (!%p278_p3), %s4870_s22, 1  ;;  %p345_p6 = scmp.lt.s32.totalorder (!%p278_p3), %s4866_s21, 9 }
   0x9   : > { %s6438_s27 = smov (%p31_p4, %s6436_s27), 0  ;;  %281 = sbr.rel (%p278_p3) target bundleno = 626 (0x272), region = 40 }
   0xa   : > { %s352_s18 = sadd.s32 (!%p278_p3), 1, %s4866_s21  ;;  %s363_s11 = sadd.s32 (!%p278_p3), 2, %s4866_s21 }
   0xb   : > { %p5150_p7 = scmp.lt.s32.totalorder (!%p278_p3), %s352_s18, 9  ;;  %p366_p8 = scmp.lt.s32.totalorder (!%p278_p3), %s363_s11, 9 }
   0xc   : > { %p376_p9 = scmp.lt.s32.totalorder (!%p278_p3), %s4866_s21, 7 }
   0xe   : > { %vm551_vm0 = vcmask 1041408   ;;  %v4249_v0 = vld [vmem:[%s6417_s0 + $0x4] sm:$0x3]  ;;  %v4216_v1 = vld [vmem:[%s6417_s0 + $0x2] sm:$0x3]  ;;  %s6440_s22 = smov (!%p343_p5, %s4870_s22), 1 }
   0xf   : > { %v4958_v2 = vsel %vm551_vm0, %v4249_v0, 0  ;;  %v553_v3 = vsel %vm551_vm0, %v4216_v1, 0  ;;  %v400_v4 = vld [vmem:[%s6417_s0] sm:$0x3]  ;;  %s346_s10 = scalar_select %p345_p6, %s4866_s21, 9  ;;  %vm672_vm1 = vcmask 1042432  }
  0x10   : > { %4798 = vmatpush.bf16.msra.mxu2 %v4958_v2  ;;  %562 = vmatpush.bf16.msra.mxu0 %v553_v3  ;;  %v617_v5 = vsel %vm551_vm0, %v400_v4, 0  ;;  %v4262_v6 = vld [vmem:[%s6417_s0 + $0x6] sm:$0x3]  ;;  %s4974_s13 = smul.u32 200, %s6440_s22  ;;  %v4333_v8 = vld [vmem:[%s6417_s0 + $0xc] sm:$0x3] }
  0x11   : > { %4796 = vmatpush.bf16.msra.mxu3 %v553_v3  ;;  %4797 = vmatpush.bf16.msra.mxu1 %v617_v5  ;;  %v817_v7 = vsel %vm551_vm0, %v4262_v6, 0  ;;  %s4799_s16 = smul.u32 20, %s346_s10  ;;  %v1216_v9 = vsel %vm551_vm0, %v4333_v8, 0  ;;  %v4320_v10 = vld [vmem:[%s6417_s0 + $0xa] sm:$0x3]  ;;  %vm673_vm2 = vcmask 1046532  }
  0x12   : > { %v1133_v11 = vsel %vm551_vm0, %v4320_v10, 0  ;;  %vm538_vm3 = vcmask 31744   ;;  %vm4991_vm4 = vmor %vm672_vm1, %vm673_vm2  ;;  %vm409_vm5 = vsmask.f32 3328  ;;  %vm410_vm6 = vsmask.f32 7440 }
  0x13   : > { %s349_s19 = sadd.s32 %s4974_s13, %s4799_s16  ;;  %vm5022_vm7 = vmor %vm409_vm5, %vm410_vm6  ;;  %s6442_s18 = smov (!%p5150_p7, %s352_s18), 9 }
  0x14   : > { %626 = vmatpush.bf16.msrb.mxu0 %v617_v5  ;;  %1225 = vmatpush.bf16.msrb.mxu2 %v1216_v9  ;;  %s4208_s20 = sshll.u32 %s349_s19, 2  ;;  %s6444_s11 = smov (!%p366_p8, %s363_s11), 9 }
  0x15   : > { %826 = vmatpush.bf16.msrb.mxu3 %v817_v7  ;;  %1142 = vmatpush.bf16.msrb.mxu1 %v1133_v11  ;;  %s4989_s30 = scalar_lea.vmem %s6419_s2, %s4208_s20  ;;  %s4801_s20 = smul.u32 20, %s6442_s18 }
  0x16   : > { %v403_v13 = vld [vmem:[%s4989_s30 + $0x14] sm:$0x1]  ;;  %v404_v14 = vld [vmem:[%s4989_s30 + $0x1c] sm:$0x1]  ;;  %v650_v15 = vld [vmem:[%s4989_s30 + $0x10] sm:$0xe] }
  0x17   : > { %v651_v16 = vld [vmem:[%s4989_s30 + $0x18] sm:$0xe]  ;;  %v4243_v17 = vrot.slane %v650_v15, 9  ;;  %v685_v18 = vrot.slane %v403_v13, 5  ;;  %v689_v19 = vrot.slane %v404_v14, 5  ;;  %v450_v20 = vshll.u32 %v403_v13, 16  ;;  %s359_s28 = sadd.s32 %s4801_s20, %s4974_s13 }
  0x18   : > { %v4244_v21 = vrot.slane %v651_v16, 9  ;;  %v392_v22 = vld [vmem:[%s4989_s30] sm:$0xf]  ;;  %v393_v23 = vld [vmem:[%s4989_s30 + $0x8] sm:$0xf]  ;;  %v464_v24 = vshll.u32 %v404_v14, 16 }
  0x19   : > { %v686_v25 = vsel %vm4991_vm4, %v4243_v17, %v685_v18  ;;  %v5004_v26 = vld [vmem:[%s4989_s30 + $0x4] sm:$0x1]  ;;  %v5007_v27 = vld [vmem:[%s4989_s30 + $0xc] sm:$0x1]  ;;  %v413_v28 = vshrl.u32 %v392_v22, 16  ;;  %v416_v29 = vshll.u32 %v392_v22, 16 }
  0x1a   : > { %v690_v30 = vsel %vm4991_vm4, %v4244_v21, %v689_v19  ;;  %v711_v31 = vunpack.c.l.b16 %v686_v25  ;;  %v422_v32 = vshll.u32 %v5004_v26, 16  ;;  %v427_v33 = vshrl.u32 %v393_v23, 16  ;;  %v394_v38 = vld [vmem:[%s4989_s30 + $0x10] sm:$0xf]  ;;  %v395_v41 = vld [vmem:[%s4989_s30 + $0x18] sm:$0xf] }
  0x1b   : > { %v712_v34 = vunpack.c.l.b16 %v690_v30  ;;  %v415_v35 = vrot.slane %v413_v28, 4  ;;  %v418_v36 = vrot.slane %v416_v29, 5  ;;  %v430_v37 = vshll.u32 %v393_v23, 16  ;;  %v4227_v42 = vld [vmem:[%s4989_s30 + $0x10] sm:$0xf]  ;;  %s4209_s29 = sshll.u32 %s359_s28, 2 }
  0x1c   : > { %v429_v39 = vrot.slane %v427_v33, 4  ;;  %v436_v40 = vshll.u32 %v5007_v27, 16  ;;  %v424_v45 = vrot.slane %v422_v32, 5  ;;  %v4761_v47 = vld [vmem:[%s4989_s30 + $0x14] sm:$0xf0]  ;;  %v441_v51 = vshrl.u32 %v394_v38, 16  ;;  %s5187_s9 = scalar_lea.vmem %s6420_s3, %s4209_s29 }
  0x1d   : > { %v718_v43 = vpack.c.b16 %v712_v34, %v711_v31  ;;  %v419_v44 = vor.u32 %v418_v36, %v415_v35  ;;  %v432_v46 = vrot.slane %v430_v37, 5  ;;  %v5018_v48 = vld [vmem:[%s4989_s30 + $0x24] sm:$0x1]  ;;  %v444_v52 = vshll.u32 %v394_v38, 16  ;;  %v5027_v54 = vld [vmem:[%s4989_s30 + $0x2c] sm:$0x1] }
  0x1e   : > { %v438_v50 = vrot.slane %v436_v40, 5  ;;  %v452_v53 = vrot.slane %v450_v20, 5  ;;  %v455_v57 = vshrl.u32 %v395_v41, 16  ;;  %v458_v58 = vshll.u32 %v395_v41, 16  ;;  %v652_v59 = vld [vmem:[%s4989_s30 + $0x20] sm:$0xe] }
  0x1f   : > { %4251 = vmatmul.msk.bf16.vlgmr.msra.gmra.mxu2 %vm538_vm3, %v718_v43  ;;  %v420_v55 = vrot.slane %v419_v44, 4  ;;  %v433_v56 = vor.u32 %v432_v46, %v429_v39  ;;  %v443_v60 = vrot.slane %v441_v51, 4  ;;  %v446_v61 = vrot.slane %v444_v52, 5  ;;  %v653_v0 = vld [vmem:[%s4989_s30 + $0x28] sm:$0xe]  ;;  %s4802_s12 = smul.u32 20, %s6444_s11 }
  0x20   : > { %v466_v62 = vrot.slane %v464_v24, 5  ;;  %v4228_v63 = vor.u32 %v4761_v47, %v4227_v42  ;;  %v457_v4 = vrot.slane %v455_v57, 4  ;;  %v460_v5 = vrot.slane %v458_v58, 5  ;;  %v396_v6 = vld [vmem:[%s4989_s30 + $0x20] sm:$0xf]  ;;  %s6446_s21 = smov (!%p376_p9, %s4866_s21), 7 }
  0x21   : > { %v425_v1 = vsel %vm5022_vm7, %v420_v55, %v424_v45  ;;  %v434_v3 = vrot.slane %v433_v56, 4  ;;  %v447_v8 = vor.u32 %v446_v61, %v443_v60  ;;  %v4245_v9 = vrot.slane %v652_v59, 9  ;;  %v397_v22 = vld [vmem:[%s4989_s30 + $0x28] sm:$0xf]  ;;  %v4231_v44 = vld [vmem:[%s4989_s30 + $0x20] sm:$0xf]  ;;  %s5612_s16 = sadd.s32 %s4802_s12, %s4974_s13 }
  0x22   : > { %v526_v7 = vunpack.c.l.b16 %v425_v1  ;;  %4238 = vmatmul.msk.bf16.vlgmr.msra.gmra.mxu1 %vm538_vm3, %v4228_v63  ;;  %v693_v10 = vrot.slane %v5018_v48, 5  ;;  %v461_v13 = vor.u32 %v460_v5, %v457_v4  ;;  %v4246_v14 = vrot.slane %v653_v0, 9  ;;  %v4762_v45 = vld [vmem:[%s4989_s30 + $0x24] sm:$0xf0]  ;;  %v407_v46 = vld [vmem:[%s4989_s30 + $0x34] sm:$0x1] }
  0x23   : > { %v439_v11 = vsel %vm5022_vm7, %v434_v3, %v438_v50  ;;  %v697_v15 = vrot.slane %v5027_v54, 5  ;;  %v448_v17 = vrot.slane %v447_v8, 4  ;;  %v469_v19 = vshrl.u32 %v396_v6, 16  ;;  %v654_v51 = vld [vmem:[%s4989_s30 + $0x30] sm:$0xe]  ;;  %s4210_s13 = sshll.u32 %s5612_s16, 2 }
  0x24   : > { %v527_v16 = vunpack.c.l.b16 %v439_v11  ;;  %v694_v18 = vsel %vm4991_vm4, %v4245_v9, %v693_v10  ;;  %v462_v20 = vrot.slane %v461_v13, 4  ;;  %v472_v23 = vshll.u32 %v396_v6, 16  ;;  %v655_v52 = vld [vmem:[%s4989_s30 + $0x38] sm:$0xe]  ;;  %v4223_v58 = vld [vmem:[%s4989_s30] sm:$0xf]  ;;  %s5648_s8 = scalar_lea.vmem %s6421_s4, %s4210_s13 }
  0x25   : > { %v698_v21 = vsel %vm4991_vm4, %v4246_v14, %v697_v15  ;;  %v453_v25 = vsel %vm5022_vm7, %v448_v17, %v452_v53  ;;  %v713_v28 = vunpack.c.l.b16 %v694_v18  ;;  %v471_v29 = vrot.slane %v469_v19, 4  ;;  %v399_v57 = vld [vmem:[%s4989_s30 + $0x38] sm:$0xf]  ;;  %v4760_v63 = vld [vmem:[%s4989_s30 + $0x4] sm:$0xf0]  ;;  %s4211_s17 = sshll.u32 %s6446_s21, 3 }
  0x26   : > { %v534_v24 = vpack.c.b16 %v527_v16, %v526_v7  ;;  %v467_v30 = vsel %vm5022_vm7, %v462_v20, %v466_v62  ;;  %v528_v31 = vunpack.c.l.b16 %v453_v25  ;;  %v714_v32 = vunpack.c.l.b16 %v698_v21  ;;  %v4299_v10 = vld [vmem:[%s6417_s0 + $0x8] sm:$0x3]  ;;  %v648_v18 = vld [vmem:[%s4989_s30] sm:$0xe]  ;;  %s4212_s18 = sshll.u32 %s6440_s22, 6  ;;  %s4214_s10 = sshll.u32 %s6440_s22, 3 }
  0x27   : > { %v474_v33 = vrot.slane %v472_v23, 5  ;;  %v529_v34 = vunpack.c.l.b16 %v467_v30  ;;  %v478_v35 = vshll.u32 %v5018_v48, 16  ;;  %v483_v36 = vshrl.u32 %v397_v22, 16  ;;  %v649_v19 = vld [vmem:[%s4989_s30 + $0x8] sm:$0xe]  ;;  %s388_s11 = sadd.s32 %s4214_s10, %s6446_s21 }
  0x28   : > { %4217 = vmatmul.msk.bf16.vlgmr.msra.gmra.mxu0 %vm538_vm3, %v534_v24  ;;  %v486_v37 = vshll.u32 %v397_v22, 16  ;;  %v492_v39 = vshll.u32 %v5027_v54, 16  ;;  %v719_v43 = vpack.c.b16 %v714_v32, %v713_v28  ;;  %v398_v54 = vld [vmem:[%s4989_s30 + $0x30] sm:$0xf]  ;;  %v4232_v56 = vor.u32 %v4762_v45, %v4231_v44  ;;  %v4283_v24 = vld [vmem:[%s4989_s30 + $0x8] sm:$0xf] }
  0x29   : > { %v475_v38 = vor.u32 %v474_v33, %v471_v29  ;;  %743 = vmatpush.bf16.msra.mxu0 %v4958_v2  ;;  %v535_v40 = vpack.c.b16 %v529_v34, %v528_v31  ;;  %v485_v41 = vrot.slane %v483_v36, 4  ;;  %v480_v48 = vrot.slane %v478_v35, 5  ;;  %v408_v2 = vld [vmem:[%s4989_s30 + $0x3c] sm:$0x1]  ;;  %v4285_v31 = vld [vmem:[%s4989_s30 + $0x10] sm:$0xf] }
  0x2a   : > { %v488_v42 = vrot.slane %v486_v37, 5  ;;  %v494_v53 = vrot.slane %v492_v39, 5  ;;  %v4247_v59 = vrot.slane %v654_v51, 9  ;;  %v701_v60 = vrot.slane %v407_v46, 5  ;;  %v4235_v36 = vld [vmem:[%s4989_s30 + $0x30] sm:$0xf] }
  0x2b   : > { %4218 = vmatmul.msk.bf16.vlgmr.msra.gmra.mxu3 %vm538_vm3, %v535_v40  ;;  %v476_v47 = vrot.slane %v475_v38, 4  ;;  %v4248_v61 = vrot.slane %v655_v52, 9  ;;  %v705_v0 = vrot.slane %v408_v2, 5  ;;  %v497_v1 = vshrl.u32 %v398_v54, 16  ;;  %v4417_v45 = vld [vmem:[%s6417_s0 + $0x14] sm:$0x3] }
  0x2c   : > { %v489_v50 = vor.u32 %v488_v42, %v485_v41  ;;  %v500_v3 = vshll.u32 %v398_v54, 16  ;;  %v511_v5 = vshrl.u32 %v399_v57, 16  ;;  %v514_v6 = vshll.u32 %v399_v57, 16  ;;  %v4396_v52 = vld [vmem:[%s6417_s0 + $0x12] sm:$0x3] }
  0x2d   : > { %v481_v62 = vsel %vm5022_vm7, %v476_v47, %v480_v48  ;;  %v4224_v8 = vor.u32 %v4760_v63, %v4223_v58  ;;  %v702_v9 = vsel %vm4991_vm4, %v4247_v59, %v701_v60  ;;  %v706_v13 = vsel %vm4991_vm4, %v4248_v61, %v705_v0  ;;  %v4304_v59 = vld [vmem:[%s4989_s30 + $0x8] sm:$0xe]  ;;  %v4305_v63 = vld [vmem:[%s4989_s30 + $0x10] sm:$0xe] }
  0x2e   : > { %v490_v55 = vrot.slane %v489_v50, 4  ;;  %v530_v7 = vunpack.c.l.b16 %v481_v62  ;;  %v499_v14 = vrot.slane %v497_v1, 4  ;;  %v502_v15 = vrot.slane %v500_v3, 5  ;;  %v4284_v50 = vld [vmem:[%s4989_s30 + $0xc] sm:$0x1] }
  0x2f   : > { %4252 = vmatmul.msk.bf16.gmra.mxu2 %vm538_vm3, %v719_v43  ;;  %v513_v16 = vrot.slane %v511_v5, 4  ;;  %v516_v17 = vrot.slane %v514_v6, 5  ;;  %v1011_v20 = vsel %vm551_vm0, %v4299_v10, 0  ;;  %v715_v21 = vunpack.c.l.b16 %v702_v9 }
  0x30   : > { %v495_v4 = vsel %vm5022_vm7, %v490_v55, %v494_v53  ;;  %v716_v22 = vunpack.c.l.b16 %v706_v13  ;;  %v506_v23 = vshll.u32 %v407_v46, 16  ;;  %v677_v25 = vrot.slane %v5004_v26, 5  ;;  %v4763_v26 = vld [vmem:[%s4989_s30 + $0x34] sm:$0xf0] }
  0x31   : > { %v531_v11 = vunpack.c.l.b16 %v495_v4  ;;  %v503_v29 = vor.u32 %v502_v15, %v499_v14  ;;  %v520_v30 = vshll.u32 %v408_v2, 16  ;;  %v681_v32 = vrot.slane %v5007_v27, 5  ;;  %v4370_v27 = vld [vmem:[%s6417_s0 + $0xe] sm:$0x3]  ;;  %v4286_v2 = vld [vmem:[%s4989_s30 + $0x14] sm:$0x1] }
  0x32   : > { %4239 = vmatmul.msk.bf16.gmra.mxu1 %vm538_vm3, %v4232_v56  ;;  %v517_v33 = vor.u32 %v516_v17, %v513_v16  ;;  %v4241_v34 = vrot.slane %v648_v18, 9  ;;  %v4242_v35 = vrot.slane %v649_v19, 9  ;;  %v873_v37 = vshrl.u32 %v4283_v24, 16  ;;  %v4336_v19 = vld [vmem:[%s4989_s30 + $0x10] sm:$0xf] }
  0x33   : > { %v536_v28 = vpack.c.b16 %v531_v11, %v530_v7  ;;  %v876_v38 = vshll.u32 %v4283_v24, 16  ;;  %v720_v39 = vpack.c.b16 %v716_v22, %v715_v21  ;;  %v508_v40 = vrot.slane %v506_v23, 5  ;;  %v4391_v11 = vld [vmem:[%s6417_s0 + $0x10] sm:$0x3] }
  0x34   : > { %v887_v41 = vshrl.u32 %v4285_v31, 16  ;;  %v890_v42 = vshll.u32 %v4285_v31, 16  ;;  %v504_v43 = vrot.slane %v503_v29, 4  ;;  %v522_v44 = vrot.slane %v520_v30, 5  ;;  %v4289_v29 = vld [vmem:[%s4989_s30 + $0x20] sm:$0xf] }
  0x35   : > { %v518_v46 = vrot.slane %v517_v33, 4  ;;  %v678_v47 = vsel %vm4991_vm4, %v4241_v34, %v677_v25  ;;  %v682_v48 = vsel %vm4991_vm4, %v4242_v35, %v681_v32  ;;  %v1410_v51 = vsel %vm551_vm0, %v4370_v27, 0  ;;  %v4306_v27 = vld [vmem:[%s4989_s30 + $0x18] sm:$0xe] }
  0x36   : > { %v4236_v53 = vor.u32 %v4763_v26, %v4235_v36  ;;  %v875_v54 = vrot.slane %v873_v37, 4  ;;  %v878_v55 = vrot.slane %v876_v38, 5  ;;  %1419 = vmatpush.bf16.msra.mxu3 %v1410_v51  ;;  %v1808_v56 = vsel %vm551_vm0, %v4417_v45, 0  ;;  %v4307_v45 = vld [vmem:[%s4989_s30 + $0x20] sm:$0xe] }
  0x37   : > { %v889_v57 = vrot.slane %v887_v41, 4  ;;  %v892_v58 = vrot.slane %v890_v42, 5  ;;  %v1614_v60 = vsel %vm551_vm0, %v4396_v52, 0  ;;  %v709_v61 = vunpack.c.l.b16 %v678_v47  ;;  %1817 = vmatpush.bf16.msra.mxu2 %v1808_v56  ;;  %v4290_v47 = vld [vmem:[%s4989_s30 + $0x24] sm:$0x1] }
  0x38   : > { %4237 = vmatmul.msk.bf16.vlgmr.msrb.gmra.mxu0 %vm538_vm3, %v4224_v8  ;;  %v710_v62 = vunpack.c.l.b16 %v682_v48  ;;  %1623 = vmatpush.bf16.msra.mxu1 %v1614_v60  ;;  %v509_v0 = vsel %vm5022_vm7, %v504_v43, %v508_v40  ;;  %v523_v1 = vsel %vm5022_vm7, %v518_v46, %v522_v44  ;;  %v879_v3 = vor.u32 %v878_v55, %v875_v54  ;;  %v4288_v46 = vld [vmem:[%s4989_s30 + $0x1c] sm:$0x1]  ;;  %v4764_v54 = vld [vmem:[%s4989_s30 + $0xc] sm:$0xf0] }
  0x39   : > { %1020 = vmatpush.bf16.msrb.mxu0 %v1011_v20  ;;  %v882_v4 = vshll.u32 %v4284_v50, 16  ;;  %v896_v5 = vshll.u32 %v4286_v2, 16  ;;  %v4312_v6 = vrot.slane %v4304_v59, 9  ;;  %v893_v7 = vor.u32 %v892_v58, %v889_v57  ;;  %v4768_v20 = vld [vmem:[%s4989_s30 + $0x14] sm:$0xf0] }
  0x3a   : > { %v1076_v8 = vrot.slane %v4284_v50, 5  ;;  %v4313_v9 = vrot.slane %v4305_v63, 9  ;;  %v1080_v10 = vrot.slane %v4286_v2, 5  ;;  %v532_v13 = vunpack.c.l.b16 %v509_v0  ;;  %v4265_v2 = vld [vmem:[%s4989_s30 + $0x8] sm:$0xf] }
  0x3b   : > { %4219 = vmatmul.msk.bf16.gmra.mxu3 %vm538_vm3, %v536_v28  ;;  %v533_v14 = vunpack.c.l.b16 %v523_v1  ;;  %v717_v15 = vpack.c.b16 %v710_v62, %v709_v61  ;;  %v884_v16 = vrot.slane %v882_v4, 5  ;;  %v898_v17 = vrot.slane %v896_v5, 5  ;;  %v4287_v28 = vld [vmem:[%s4989_s30 + $0x18] sm:$0xf]  ;;  %v4291_v59 = vld [vmem:[%s4989_s30 + $0x28] sm:$0xf] }
  0x3c   : > { %v1532_v18 = vsel %vm551_vm0, %v4391_v11, 0  ;;  %v880_v21 = vrot.slane %v879_v3, 4  ;;  %v894_v22 = vrot.slane %v893_v7, 4  ;;  %v1077_v23 = vsel %vm4991_vm4, %v4312_v6, %v1076_v8  ;;  %v4293_v60 = vld [vmem:[%s4989_s30 + $0x30] sm:$0xf] }
  0x3d   : > { %v1081_v24 = vsel %vm4991_vm4, %v4313_v9, %v1080_v10  ;;  %v537_v25 = vpack.c.b16 %v533_v14, %v532_v13  ;;  %v4337_v30 = vor.u32 %v4768_v20, %v4336_v19  ;;  %v1108_v31 = vunpack.c.l.b16 %v1077_v23  ;;  %v4340_v62 = vld [vmem:[%s4989_s30 + $0x20] sm:$0xf]  ;;  %v4769_v1 = vld [vmem:[%s4989_s30 + $0x24] sm:$0xf0]  ;;  %v4294_v23 = vld [vmem:[%s4989_s30 + $0x34] sm:$0x1] }
  0x3e   : > { %v1109_v32 = vunpack.c.l.b16 %v1081_v24  ;;  %v885_v33 = vsel %vm5022_vm7, %v880_v21, %v884_v16  ;;  %v899_v34 = vsel %vm5022_vm7, %v894_v22, %v898_v17  ;;  %v901_v35 = vshrl.u32 %v4287_v28, 16  ;;  %v4292_v22 = vld [vmem:[%s4989_s30 + $0x2c] sm:$0x1]  ;;  %v4308_v24 = vld [vmem:[%s4989_s30 + $0x28] sm:$0xe] }
  0x3f   : > { %4253 = vmatmul.msk.bf16.gmra.mxu2 %vm538_vm3, %v720_v39  ;;  %v904_v36 = vshll.u32 %v4287_v28, 16  ;;  %v915_v37 = vshrl.u32 %v4289_v29, 16  ;;  %v918_v38 = vshll.u32 %v4289_v29, 16  ;;  %v986_v39 = vunpack.c.l.b16 %v885_v33 }
  0x40   : > { %v987_v40 = vunpack.c.l.b16 %v899_v34  ;;  %v1116_v26 = vpack.c.b16 %v1109_v32, %v1108_v31  ;;  %v903_v41 = vrot.slane %v901_v35, 4  ;;  %v4314_v50 = vrot.slane %v4306_v27, 9 }
  0x41   : > { %v906_v42 = vrot.slane %v904_v36, 5  ;;  %v917_v43 = vrot.slane %v915_v37, 4  ;;  %v920_v44 = vrot.slane %v918_v38, 5  ;;  %v1084_v51 = vrot.slane %v4288_v46, 5  ;;  %v4269_v38 = vld [vmem:[%s4989_s30 + $0x18] sm:$0xf] }
  0x42   : > { %4240 = vmatmul.msk.bf16.gmra.mxu1 %vm538_vm3, %v4236_v53  ;;  %v994_v48 = vpack.c.b16 %v987_v40, %v986_v39  ;;  %v4315_v52 = vrot.slane %v4307_v45, 9  ;;  %v1088_v53 = vrot.slane %v4290_v47, 5  ;;  %v910_v56 = vshll.u32 %v4288_v46, 16  ;;  %v4765_v40 = vld [vmem:[%s4989_s30 + $0x1c] sm:$0xf0] }
  0x43   : > { %v907_v55 = vor.u32 %v906_v42, %v903_v41  ;;  %v921_v57 = vor.u32 %v920_v44, %v917_v43  ;;  %v924_v58 = vshll.u32 %v4290_v47, 16  ;;  %v4266_v61 = vor.u32 %v4764_v54, %v4265_v2  ;;  %v4295_v45 = vld [vmem:[%s4989_s30 + $0x38] sm:$0xf]  ;;  %v4297_v46 = vld [vmem:[%s4989_s30 + $0x40] sm:$0xf] }
  0x44   : > { %v1085_v63 = vsel %vm4991_vm4, %v4314_v50, %v1084_v51  ;;  %v1089_v0 = vsel %vm4991_vm4, %v4315_v52, %v1088_v53  ;;  %v912_v4 = vrot.slane %v910_v56, 5  ;;  %v929_v7 = vshrl.u32 %v4291_v59, 16  ;;  %v4770_v50 = vld [vmem:[%s4989_s30 + $0x34] sm:$0xf0] }
  0x45   : > { %v908_v3 = vrot.slane %v907_v55, 4  ;;  %v922_v5 = vrot.slane %v921_v57, 4  ;;  %v926_v6 = vrot.slane %v924_v58, 5  ;;  %v932_v8 = vshll.u32 %v4291_v59, 16 }
  0x46   : > { %v943_v9 = vshrl.u32 %v4293_v60, 16  ;;  %v946_v10 = vshll.u32 %v4293_v60, 16  ;;  %v1110_v11 = vunpack.c.l.b16 %v1085_v63  ;;  %v1111_v13 = vunpack.c.l.b16 %v1089_v0 }
  0x47   : > { %v4341_v14 = vor.u32 %v4769_v1, %v4340_v62  ;;  %v927_v16 = vsel %vm5022_vm7, %v922_v5, %v926_v6  ;;  %v931_v17 = vrot.slane %v929_v7, 4  ;;  %v938_v31 = vshll.u32 %v4292_v22, 16  ;;  %v4310_v5 = vld [vmem:[%s4989_s30 + $0x38] sm:$0xe]  ;;  %v4311_v6 = vld [vmem:[%s4989_s30 + $0x40] sm:$0xe] }
  0x48   : > { %4250 = vmatmul.msk.bf16.vlgmr.msra.gmra.mxu0 %vm538_vm3, %v717_v15  ;;  %v913_v15 = vsel %vm5022_vm7, %v908_v3, %v912_v4  ;;  %v945_v19 = vrot.slane %v943_v9, 4  ;;  %v948_v20 = vrot.slane %v946_v10, 5  ;;  %v1117_v21 = vpack.c.b16 %v1111_v13, %v1110_v11  ;;  %v4296_v3 = vld [vmem:[%s4989_s30 + $0x3c] sm:$0x1]  ;;  %v4298_v4 = vld [vmem:[%s4989_s30 + $0x44] sm:$0x1] }
  0x49   : > { %1541 = vmatpush.bf16.msra.mxu0 %v1532_v18  ;;  %v934_v18 = vrot.slane %v932_v8, 5  ;;  %v988_v28 = vunpack.c.l.b16 %v913_v15  ;;  %v989_v29 = vunpack.c.l.b16 %v927_v16  ;;  %v952_v33 = vshll.u32 %v4294_v23, 16  ;;  %v1653_v8 = vld [vmem:[%s5187_s9] sm:$0xf]  ;;  %v1655_v9 = vld [vmem:[%s5187_s9 + $0x8] sm:$0xf] }
  0x4a   : > { %v949_v32 = vor.u32 %v948_v20, %v945_v19  ;;  %v4316_v34 = vrot.slane %v4308_v24, 9  ;;  %v1092_v35 = vrot.slane %v4292_v22, 5  ;;  %v1096_v37 = vrot.slane %v4294_v23, 5  ;;  %v4273_v15 = vld [vmem:[%s4989_s30 + $0x28] sm:$0xf] }
  0x4b   : > { %4220 = vmatmul.msk.bf16.gmra.mxu3 %vm538_vm3, %v537_v25  ;;  %v4309_v25 = vld [vmem:[%s4989_s30 + $0x30] sm:$0xe]  ;;  %v995_v39 = vpack.c.b16 %v989_v29, %v988_v28  ;;  %v940_v41 = vrot.slane %v938_v31, 5  ;;  %v954_v43 = vrot.slane %v952_v33, 5  ;;  %v4270_v47 = vor.u32 %v4765_v40, %v4269_v38  ;;  %v4771_v28 = vld [vmem:[%s4989_s30 + $0x44] sm:$0xf0] }
  0x4c   : > { %v4317_v36 = vrot.slane %v4309_v25, 9  ;;  %v950_v42 = vrot.slane %v949_v32, 4  ;;  %v1093_v44 = vsel %vm4991_vm4, %v4316_v34, %v1092_v35  ;;  %v957_v54 = vshrl.u32 %v4295_v45, 16  ;;  %v4766_v20 = vld [vmem:[%s4989_s30 + $0x2c] sm:$0xf0] }
  0x4d   : > { %v1112_v53 = vunpack.c.l.b16 %v1093_v44  ;;  %v960_v55 = vshll.u32 %v4295_v45, 16  ;;  %v971_v56 = vshrl.u32 %v4297_v46, 16  ;;  %v974_v57 = vshll.u32 %v4297_v46, 16  ;;  %v4348_v25 = vld [vmem:[%s4989_s30 + $0x40] sm:$0xf] }
  0x4e   : > { %v1097_v27 = vsel %vm4991_vm4, %v4317_v36, %v1096_v37  ;;  %v955_v52 = vsel %vm5022_vm7, %v950_v42, %v954_v43  ;;  %v959_v62 = vrot.slane %v957_v54, 4  ;;  %v966_v11 = vshll.u32 %v4296_v3, 16  ;;  %v5206_v36 = vld [vmem:[%s5187_s9 + $0x4] sm:$0x1]  ;;  %v5209_v37 = vld [vmem:[%s5187_s9 + $0xc] sm:$0x1] }
  0x4f   : > { %4350 = vmatmul.msk.bf16.vlgmr.msrb.gmra.mxu2 %vm538_vm3, %v4337_v30  ;;  %v935_v30 = vor.u32 %v934_v18, %v931_v17  ;;  %v1113_v2 = vunpack.c.l.b16 %v1097_v27  ;;  %v991_v60 = vunpack.c.l.b16 %v955_v52  ;;  %v962_v63 = vrot.slane %v960_v55, 5  ;;  %v4501_v54 = vld [vmem:[%s6417_s0 + $0x1c] sm:$0x3]  ;;  %v4443_v55 = vld [vmem:[%s6417_s0 + $0x18] sm:$0x3] }
  0x50   : > { %v973_v0 = vrot.slane %v971_v56, 4  ;;  %v976_v1 = vrot.slane %v974_v57, 5  ;;  %v4318_v16 = vrot.slane %v4310_v5, 9  ;;  %v1100_v17 = vrot.slane %v4296_v3, 5 }
  0x51   : > { %v963_v10 = vor.u32 %v962_v63, %v959_v62  ;;  %v4319_v18 = vrot.slane %v4311_v6, 9  ;;  %v1104_v19 = vrot.slane %v4298_v4, 5  ;;  %v1673_v22 = vshll.u32 %v1653_v8, 16  ;;  %v4355_v63 = vld [vmem:[%s4989_s30 + $0x14] sm:$0x1] }
  0x52   : > { %4321 = vmatmul.msk.bf16.vlgmr.msrb.gmra.mxu1 %vm538_vm3, %v1116_v26  ;;  %v936_v26 = vrot.slane %v935_v30, 4  ;;  %v977_v13 = vor.u32 %v976_v1, %v973_v0  ;;  %v1684_v23 = vshrl.u32 %v1655_v9, 16  ;;  %v1687_v24 = vshll.u32 %v1655_v9, 16  ;;  %v1657_v1 = vld [vmem:[%s5187_s9 + $0x10] sm:$0xf] }
  0x53   : > { %v964_v29 = vrot.slane %v963_v10, 4  ;;  %v968_v30 = vrot.slane %v966_v11, 5  ;;  %v4274_v33 = vor.u32 %v4766_v20, %v4273_v15  ;;  %v1101_v34 = vsel %vm4991_vm4, %v4318_v16, %v1100_v17  ;;  %v4357_v10 = vld [vmem:[%s4989_s30 + $0x1c] sm:$0x1]  ;;  %v4767_v17 = vld [vmem:[%s4989_s30 + $0x3c] sm:$0xf0] }
  0x54   : > { %v941_v51 = vsel %vm5022_vm7, %v936_v26, %v940_v41  ;;  %v978_v31 = vrot.slane %v977_v13, 4  ;;  %v1105_v35 = vsel %vm4991_vm4, %v4319_v18, %v1104_v19  ;;  %v1686_v40 = vrot.slane %v1684_v23, 4  ;;  %v4354_v41 = vld [vmem:[%s4989_s30 + $0x10] sm:$0xf] }
  0x55   : > { %v990_v59 = vunpack.c.l.b16 %v941_v51  ;;  %v1689_v26 = vrot.slane %v1687_v24, 5  ;;  %v4349_v42 = vor.u32 %v4771_v28, %v4348_v25  ;;  %v969_v43 = vsel %vm5022_vm7, %v964_v29, %v968_v30  ;;  %v4375_v24 = vld [vmem:[%s4989_s30 + $0x10] sm:$0xe] }
  0x56   : > { %v1114_v27 = vunpack.c.l.b16 %v1101_v34  ;;  %v1115_v45 = vunpack.c.l.b16 %v1105_v35  ;;  %v1679_v46 = vshll.u32 %v5206_v36, 16  ;;  %v1275_v51 = vshll.u32 %v4354_v41, 16 }
  0x57   : > { %v996_v7 = vpack.c.b16 %v991_v60, %v990_v59  ;;  %v2329_v57 = vsel %vm551_vm0, %v4501_v54, 0  ;;  %v4480_v59 = vld [vmem:[%s6417_s0 + $0x1a] sm:$0x3]  ;;  %v992_v60 = vunpack.c.l.b16 %v969_v43  ;;  %v1698_v15 = vshrl.u32 %v1657_v1, 16 }
  0x58   : > { %4300 = vmatmul.msk.bf16.vlgmr.msrb.gmra.mxu0 %vm538_vm3, %v994_v48  ;;  %v4344_v48 = vld [vmem:[%s4989_s30 + $0x30] sm:$0xf]  ;;  %v1119_v62 = vpack.c.b16 %v1115_v45, %v1114_v27  ;;  %2338 = vmatpush.bf16.msrb.mxu2 %v2329_v57  ;;  %v2207_v0 = vsel %vm551_vm0, %v4480_v59, 0  ;;  %v1681_v3 = vrot.slane %v1679_v46, 5  ;;  %v1277_v11 = vrot.slane %v1275_v51, 5 }
  0x59   : > { %v4345_v58 = vor.u32 %v4770_v50, %v4344_v48  ;;  %v4356_v48 = vld [vmem:[%s4989_s30 + $0x18] sm:$0xf]  ;;  %v1272_v50 = vshrl.u32 %v4354_v41, 16  ;;  %2216 = vmatpush.bf16.msrb.mxu1 %v2207_v0  ;;  %v1701_v16 = vshll.u32 %v1657_v1, 16  ;;  %v1281_v18 = vshll.u32 %v4355_v63, 16 }
  0x5a   : > { %v1286_v6 = vshrl.u32 %v4356_v48, 16  ;;  %v1289_v13 = vshll.u32 %v4356_v48, 16  ;;  %v1295_v23 = vshll.u32 %v4357_v10, 16  ;;  %v1700_v34 = vrot.slane %v1698_v15, 4  ;;  %v5255_v27 = vld [vmem:[%s5187_s9 + $0x1c] sm:$0x1] }
  0x5b   : > { %4279 = vmatmul.msk.bf16.vlgmr.msrb.gmra.mxu3 %vm538_vm3, %v4266_v61  ;;  %v1118_v61 = vpack.c.b16 %v1113_v2, %v1112_v53  ;;  %v1690_v53 = vor.u32 %v1689_v26, %v1686_v40  ;;  %v4430_v2 = vld [vmem:[%s6417_s0 + $0x16] sm:$0x3]  ;;  %v1274_v5 = vrot.slane %v1272_v50, 4  ;;  %v1703_v35 = vrot.slane %v1701_v16, 5  ;;  %v4399_v57 = vld [vmem:[%s5187_s9] sm:$0xf] }
  0x5c   : > { %v1930_v56 = vsel %vm551_vm0, %v4430_v2, 0  ;;  %v1291_v30 = vrot.slane %v1289_v13, 5  ;;  %v1475_v43 = vrot.slane %v4355_v63, 5  ;;  %v4360_v2 = vld [vmem:[%s4989_s30 + $0x28] sm:$0xf] }
  0x5d   : > { %1939 = vmatpush.bf16.msrb.mxu3 %v1930_v56  ;;  %v1691_v9 = vrot.slane %v1690_v53, 4  ;;  %v1278_v29 = vor.u32 %v1277_v11, %v1274_v5  ;;  %v1704_v50 = vor.u32 %v1703_v35, %v1700_v34  ;;  %v4358_v53 = vld [vmem:[%s4989_s30 + $0x20] sm:$0xf]  ;;  %v4361_v15 = vld [vmem:[%s4989_s30 + $0x2c] sm:$0x1] }
  0x5e   : > { %v1300_v0 = vshrl.u32 %v4358_v53, 16  ;;  %v1303_v1 = vshll.u32 %v4358_v53, 16  ;;  %v1663_v16 = vld [vmem:[%s5187_s9 + $0x28] sm:$0xf]  ;;  %v5290_v53 = vld [vmem:[%s5187_s9 + $0x2c] sm:$0x1] }
  0x5f   : > { %4351 = vmatmul.msk.bf16.gmra.mxu2 %vm538_vm3, %v4341_v14  ;;  %v980_v14 = vshll.u32 %v4298_v4, 16  ;;  %v1279_v45 = vrot.slane %v1278_v29, 4  ;;  %v1705_v63 = vrot.slane %v1704_v50, 4 }
  0x61   : > { %v982_v32 = vrot.slane %v980_v14, 5  ;;  %v4277_v14 = vld [vmem:[%s4989_s30 + $0x38] sm:$0xf] }
  0x62   : > { %4322 = vmatmul.msk.bf16.gmra.mxu1 %vm538_vm3, %v1117_v21  ;;  %v1670_v21 = vshrl.u32 %v1653_v8, 16 }
  0x63   : > { %v983_v44 = vsel %vm5022_vm7, %v978_v31, %v982_v32  ;;  %v4278_v31 = vor.u32 %v4767_v17, %v4277_v14  ;;  %v4376_v32 = vld [vmem:[%s4989_s30 + $0x18] sm:$0xe]  ;;  %v4359_v14 = vld [vmem:[%s4989_s30 + $0x24] sm:$0x1] }
  0x64   : > { %v1672_v38 = vrot.slane %v1670_v21, 4  ;;  %v1309_v35 = vshll.u32 %v4359_v14, 16 }
  0x68   : > { %4301 = vmatmul.msk.bf16.gmra.mxu0 %vm538_vm3, %v995_v39  ;;  %v1675_v39 = vrot.slane %v1673_v22, 5  ;;  %v1288_v22 = vrot.slane %v1286_v6, 4 }
  0x6a   : > { %v1676_v52 = vor.u32 %v1675_v39, %v1672_v38  ;;  %v1283_v38 = vrot.slane %v1281_v18, 5  ;;  %v4383_v39 = vrot.slane %v4375_v24, 9  ;;  %v1292_v46 = vor.u32 %v1291_v30, %v1288_v22  ;;  %v4378_v24 = vld [vmem:[%s4989_s30 + $0x28] sm:$0xe] }
  0x6b   : > { %4280 = vmatmul.msk.bf16.gmra.mxu3 %vm538_vm3, %v4270_v47  ;;  %v1693_v47 = vshll.u32 %v5209_v37, 16  ;;  %v1302_v18 = vrot.slane %v1300_v0, 4 }
  0x6c   : > { %v1677_v8 = vrot.slane %v1676_v52, 4  ;;  %v1721_v52 = vshll.u32 %v5255_v27, 16  ;;  %v1476_v56 = vsel %vm4991_vm4, %v4383_v39, %v1475_v43  ;;  %v1284_v59 = vsel %vm5022_vm7, %v1279_v45, %v1283_v38 }
  0x6d   : > { %v1695_v4 = vrot.slane %v1693_v47, 5  ;;  %v4384_v47 = vrot.slane %v4376_v32, 9  ;;  %v1385_v13 = vunpack.c.l.b16 %v1284_v59  ;;  %v1743_v32 = vshll.u32 %v1663_v16, 16 }
  0x6e   : > { %v1682_v25 = vsel %vm5022_vm7, %v1677_v8, %v1681_v3  ;;  %v1314_v3 = vshrl.u32 %v4360_v2, 16  ;;  %v1723_v6 = vrot.slane %v1721_v52, 5  ;;  %v1507_v8 = vunpack.c.l.b16 %v1476_v56 }
  0x6f   : > { %4352 = vmatmul.msk.bf16.gmra.mxu2 %vm538_vm3, %v4345_v58  ;;  %v2013_v58 = vsel %vm551_vm0, %v4443_v55, 0  ;;  %v1696_v28 = vsel %vm5022_vm7, %v1691_v9, %v1695_v4  ;;  %v1783_v41 = vunpack.c.l.b16 %v1682_v25  ;;  %v1297_v55 = vrot.slane %v1295_v23, 5 }
  0x70   : > { %2022 = vmatpush.bf16.msrb.mxu0 %v2013_v58  ;;  %v4772_v58 = vld [vmem:[%s5187_s9 + $0x4] sm:$0xf0]  ;;  %v1323_v38 = vshll.u32 %v4361_v15, 16  ;;  %v1745_v50 = vrot.slane %v1743_v32, 5  ;;  %v1311_v52 = vrot.slane %v1309_v35, 5 }
  0x71   : > { %v4400_v4 = vor.u32 %v4772_v58, %v4399_v57  ;;  %v4364_v58 = vld [vmem:[%s4989_s30 + $0x38] sm:$0xf] }
  0x72   : > { %4323 = vmatmul.msk.bf16.gmra.mxu1 %vm538_vm3, %v1118_v61  ;;  %v993_v61 = vunpack.c.l.b16 %v983_v44  ;;  %v1479_v44 = vrot.slane %v4357_v10, 5  ;;  %v1661_v10 = vld [vmem:[%s5187_s9 + $0x20] sm:$0xf]  ;;  %v1325_v56 = vrot.slane %v1323_v38, 5  ;;  %v4379_v38 = vld [vmem:[%s4989_s30 + $0x30] sm:$0xe] }
  0x73   : > { %v1726_v25 = vshrl.u32 %v1661_v10, 16 }
  0x74   : > { %v997_v21 = vpack.c.b16 %v993_v61, %v992_v60  ;;  %v1293_v60 = vrot.slane %v1292_v46, 4  ;;  %v1480_v61 = vsel %vm4991_vm4, %v4384_v47, %v1479_v44  ;;  %v1487_v44 = vrot.slane %v4361_v15, 5  ;;  %v5286_v47 = vld [vmem:[%s5187_s9 + $0x24] sm:$0x1] }
  0x75   : > { %v1508_v9 = vunpack.c.l.b16 %v1480_v61  ;;  %v1728_v45 = vrot.slane %v1726_v25, 4  ;;  %v4403_v61 = vld [vmem:[%s5187_s9 + $0x10] sm:$0xf]  ;;  %v1735_v0 = vshll.u32 %v5286_v47, 16 }
  0x76   : > { %v1298_v11 = vsel %vm5022_vm7, %v1293_v60, %v1297_v55 }
  0x77   : > { %v1386_v29 = vunpack.c.l.b16 %v1298_v11  ;;  %v1515_v30 = vpack.c.b16 %v1508_v9, %v1507_v8  ;;  %v1737_v15 = vrot.slane %v1735_v0, 5  ;;  %v5329_v0 = vld [vmem:[%s5187_s9 + $0x34] sm:$0x1] }
  0x78   : > { %4302 = vmatmul.msk.bf16.gmra.mxu0 %vm538_vm3, %v996_v7  ;;  %v1659_v7 = vld [vmem:[%s5187_s9 + $0x18] sm:$0xf] }
  0x79   : > { %v1712_v19 = vshrl.u32 %v1659_v7, 16  ;;  %v1715_v20 = vshll.u32 %v1659_v7, 16  ;;  %v1317_v7 = vshll.u32 %v4360_v2, 16  ;;  %v4362_v2 = vld [vmem:[%s4989_s30 + $0x30] sm:$0xf] }
  0x7b   : > { %4281 = vmatmul.msk.bf16.gmra.mxu3 %vm538_vm3, %v4274_v33  ;;  %v5252_v33 = vld [vmem:[%s5187_s9 + $0x14] sm:$0x1]  ;;  %v1714_v40 = vrot.slane %v1712_v19, 4  ;;  %v1717_v26 = vrot.slane %v1715_v20, 5  ;;  %v1305_v19 = vrot.slane %v1303_v1, 5  ;;  %v1316_v20 = vrot.slane %v1314_v3, 4 }
  0x7c   : > { %v1707_v48 = vshll.u32 %v5252_v33, 16  ;;  %v1319_v23 = vrot.slane %v1317_v7, 5  ;;  %v1749_v3 = vshll.u32 %v5290_v53, 16  ;;  %v1345_v7 = vshll.u32 %v4364_v58, 16 }
  0x7d   : > { %v1718_v51 = vor.u32 %v1717_v26, %v1714_v40  ;;  %v1306_v26 = vor.u32 %v1305_v19, %v1302_v18 }
  0x7e   : > { %v1320_v43 = vor.u32 %v1319_v23, %v1316_v20  ;;  %v1751_v19 = vrot.slane %v1749_v3, 5  ;;  %v1347_v23 = vrot.slane %v1345_v7, 5 }
  0x7f   : > { %4353 = vmatmul.msk.bf16.gmra.mxu2 %vm538_vm3, %v4349_v42  ;;  %v1784_v42 = vunpack.c.l.b16 %v1696_v28  ;;  %v1719_v5 = vrot.slane %v1718_v51, 4  ;;  %v1729_v28 = vshll.u32 %v1661_v10, 16  ;;  %v1393_v51 = vpack.c.b16 %v1386_v29, %v1385_v13  ;;  %v4365_v29 = vld [vmem:[%s4989_s30 + $0x3c] sm:$0x1] }
  0x80   : > { %v1307_v55 = vrot.slane %v1306_v26, 4  ;;  %v1321_v59 = vrot.slane %v1320_v43, 4  ;;  %v4380_v26 = vld [vmem:[%s4989_s30 + $0x38] sm:$0xe] }
  0x81   : > { %v1791_v54 = vpack.c.b16 %v1784_v42, %v1783_v41  ;;  %v1724_v22 = vsel %vm5022_vm7, %v1719_v5, %v1723_v6  ;;  %v1483_v41 = vrot.slane %v4359_v14, 5  ;;  %v4386_v42 = vrot.slane %v4378_v24, 9  ;;  %v1665_v24 = vld [vmem:[%s5187_s9 + $0x30] sm:$0xf] }
  0x82   : > { %4324 = vmatmul.msk.bf16.gmra.mxu1 %vm538_vm3, %v1119_v62  ;;  %v1709_v62 = vrot.slane %v1707_v48, 5  ;;  %v1786_v40 = vunpack.c.l.b16 %v1724_v22  ;;  %v1731_v46 = vrot.slane %v1729_v28, 5  ;;  %v1331_v5 = vshll.u32 %v4362_v2, 16 }
  0x83   : > { %v1488_v60 = vsel %vm4991_vm4, %v4386_v42, %v1487_v44  ;;  %v1342_v6 = vshrl.u32 %v4364_v58, 16  ;;  %v1312_v8 = vsel %vm5022_vm7, %v1307_v55, %v1311_v52  ;;  %v1326_v11 = vsel %vm5022_vm7, %v1321_v59, %v1325_v56 }
  0x84   : > { %v1710_v17 = vsel %vm5022_vm7, %v1705_v63, %v1709_v62  ;;  %v4773_v62 = vld [vmem:[%s5187_s9 + $0x14] sm:$0xf0]  ;;  %v1732_v63 = vor.u32 %v1731_v46, %v1728_v45  ;;  %v1510_v13 = vunpack.c.l.b16 %v1488_v60  ;;  %v1387_v25 = vunpack.c.l.b16 %v1312_v8  ;;  %v4366_v8 = vld [vmem:[%s4989_s30 + $0x40] sm:$0xf] }
  0x85   : > { %v1785_v34 = vunpack.c.l.b16 %v1710_v17  ;;  %v4404_v10 = vor.u32 %v4773_v62, %v4403_v61  ;;  %v1344_v22 = vrot.slane %v1342_v6, 4  ;;  %v1388_v28 = vunpack.c.l.b16 %v1326_v11  ;;  %v4407_v11 = vld [vmem:[%s5187_s9 + $0x20] sm:$0xf] }
  0x86   : > { %v1733_v14 = vrot.slane %v1732_v63, 4  ;;  %v1757_v42 = vshll.u32 %v1665_v24, 16  ;;  %v1351_v44 = vshll.u32 %v4365_v29, 16  ;;  %v4387_v52 = vrot.slane %v4379_v38, 9 }
  0x87   : > { %v1348_v43 = vor.u32 %v1347_v23, %v1344_v22  ;;  %v4388_v56 = vrot.slane %v4380_v26, 9  ;;  %v1495_v59 = vrot.slane %v4365_v29, 5  ;;  %v1356_v22 = vshrl.u32 %v4366_v8, 16 }
  0x88   : > { %4303 = vmatmul.msk.bf16.gmra.mxu0 %vm538_vm3, %v997_v21  ;;  %v4377_v21 = vld [vmem:[%s4989_s30 + $0x20] sm:$0xe]  ;;  %v1738_v35 = vsel %vm5022_vm7, %v1733_v14, %v1737_v15  ;;  %v1759_v61 = vrot.slane %v1757_v42, 5  ;;  %v1353_v63 = vrot.slane %v1351_v44, 5  ;;  %v1763_v15 = vshll.u32 %v5329_v0, 16 }
  0x89   : > { %v4385_v39 = vrot.slane %v4377_v21, 9  ;;  %v1333_v21 = vrot.slane %v1331_v5, 5  ;;  %v1349_v62 = vrot.slane %v1348_v43, 4  ;;  %v1359_v23 = vshll.u32 %v4366_v8, 16 }
  0x8a   : > { %v1765_v38 = vrot.slane %v1763_v15, 5  ;;  %v1358_v43 = vrot.slane %v1356_v22, 4 }
  0x8b   : > { %4282 = vmatmul.msk.bf16.gmra.mxu3 %vm538_vm3, %v4278_v31  ;;  %v1740_v31 = vshrl.u32 %v1663_v16, 16  ;;  %v1484_v57 = vsel %vm4991_vm4, %v4385_v39, %v1483_v41  ;;  %v4363_v16 = vld [vmem:[%s4989_s30 + $0x34] sm:$0x1]  ;;  %v1754_v41 = vshrl.u32 %v1665_v24, 16  ;;  %v1361_v44 = vrot.slane %v1359_v23, 5 }
  0x8c   : > { %v1509_v9 = vunpack.c.l.b16 %v1484_v57  ;;  %v1491_v55 = vrot.slane %v4363_v16, 5 }
  0x8d   : > { %v1742_v48 = vrot.slane %v1740_v31, 4  ;;  %v1667_v31 = vld [vmem:[%s5187_s9 + $0x38] sm:$0xf]  ;;  %v1756_v60 = vrot.slane %v1754_v41, 4 }
  0x8e   : > { %v1516_v32 = vpack.c.b16 %v1510_v13, %v1509_v9  ;;  %v1768_v45 = vshrl.u32 %v1667_v31, 16  ;;  %v1771_v46 = vshll.u32 %v1667_v31, 16  ;;  %v1492_v7 = vsel %vm4991_vm4, %v4387_v52, %v1491_v55  ;;  %v4774_v13 = vld [vmem:[%s5187_s9 + $0x24] sm:$0xf0] }
  0x8f   : > { %4418 = vmatmul.msk.bf16.vlgmr.msra.gmra.mxu2 %vm538_vm3, %v1791_v54  ;;  %v1792_v54 = vpack.c.b16 %v1786_v40, %v1785_v34  ;;  %v1746_v1 = vor.u32 %v1745_v50, %v1742_v48  ;;  %v1394_v50 = vpack.c.b16 %v1388_v28, %v1387_v25  ;;  %v1760_v14 = vor.u32 %v1759_v61, %v1756_v60  ;;  %v4466_v60 = vld [vmem:[%s5187_s9 + $0x10] sm:$0xf] }
  0x90   : > { %v1773_v3 = vrot.slane %v1771_v46, 5  ;;  %v1511_v25 = vunpack.c.l.b16 %v1492_v7  ;;  %v4408_v29 = vor.u32 %v4774_v13, %v4407_v11  ;;  %v4367_v46 = vld [vmem:[%s4989_s30 + $0x44] sm:$0x1]  ;;  %v2083_v15 = vshrl.u32 %v4466_v60, 16 }
  0x91   : > { %v1747_v18 = vrot.slane %v1746_v1, 4  ;;  %v1770_v1 = vrot.slane %v1768_v45, 4 }
  0x92   : > { %4413 = vmatmul.msk.bf16.vlgmr.msra.gmra.mxu1 %vm538_vm3, %v4400_v4  ;;  %v1328_v4 = vshrl.u32 %v4362_v2, 16  ;;  %v1787_v2 = vunpack.c.l.b16 %v1738_v35  ;;  %v1761_v35 = vrot.slane %v1760_v14, 4  ;;  %v1499_v14 = vrot.slane %v4367_v46, 5 }
  0x93   : > { %v1752_v39 = vsel %vm5022_vm7, %v1747_v18, %v1751_v19  ;;  %v1774_v18 = vor.u32 %v1773_v3, %v1770_v1  ;;  %v4382_v1 = vld [vmem:[%s4989_s30 + $0x48] sm:$0xe] }
  0x94   : > { %v1330_v20 = vrot.slane %v1328_v4, 4  ;;  %v5332_v4 = vld [vmem:[%s5187_s9 + $0x3c] sm:$0x1] }
  0x95   : > { %v1777_v19 = vshll.u32 %v5332_v4, 16  ;;  %v1775_v26 = vrot.slane %v1774_v18, 4 }
  0x96   : > { %v1334_v40 = vor.u32 %v1333_v21, %v1330_v20  ;;  %v4368_v20 = vld [vmem:[%s4989_s30 + $0x48] sm:$0xf] }
  0x97   : > { %v1779_v41 = vrot.slane %v1777_v19, 5  ;;  %v1373_v42 = vshll.u32 %v4368_v20, 16  ;;  %v4390_v19 = vrot.slane %v4382_v1, 9 }
  0x98   : > { %4392 = vmatmul.msk.bf16.vlgmr.msra.gmra.mxu0 %vm538_vm3, %v1515_v30  ;;  %v1337_v30 = vshll.u32 %v4363_v16, 16  ;;  %v1335_v58 = vrot.slane %v1334_v40, 4  ;;  %v1354_v16 = vsel %vm5022_vm7, %v1349_v62, %v1353_v63  ;;  %v1362_v62 = vor.u32 %v1361_v44, %v1358_v43  ;;  %v4467_v44 = vld [vmem:[%s5187_s9 + $0x14] sm:$0x1] }
  0x99   : > { %v1365_v63 = vshll.u32 %v4367_v46, 16 }
  0x9b   : > { %4371 = vmatmul.msk.bf16.vlgmr.msra.gmra.mxu3 %vm538_vm3, %v1393_v51  ;;  %v1339_v51 = vrot.slane %v1337_v30, 5 }
  0x9d   : > { %v1340_v9 = vsel %vm5022_vm7, %v1335_v58, %v1339_v51 }
  0x9e   : > { %v5353_v24 = vunpack.c.l.b16 %v1340_v9 }
  0x9f   : > { %4419 = vmatmul.msk.bf16.gmra.mxu2 %vm538_vm3, %v1792_v54  ;;  %v5309_v17 = vpop.f32.mrf.mxu1  ;;  %v1788_v54 = vunpack.c.l.b16 %v1752_v39  ;;  %v1370_v39 = vshrl.u32 %v4368_v20, 16 }
  0xa1   : > { %v1793_v6 = vpack.c.b16 %v1788_v54, %v1787_v2  ;;  %v4369_v2 = vld [vmem:[%s4989_s30 + $0x4c] sm:$0x1]  ;;  %v4381_v54 = vld [vmem:[%s4989_s30 + $0x40] sm:$0xe]  ;;  %v1372_v58 = vrot.slane %v1370_v39, 4  ;;  %v2085_v39 = vrot.slane %v2083_v15, 4  ;;  %s380_s30 = sadd.s32 %s4212_s18, %s4211_s17 }
  0xa2   : > { %v5314_v34 = vpop.f32.mrf.mxu2  ;;  %4414 = vmatmul.msk.bf16.gmra.mxu1 %vm538_vm3, %v4404_v10  ;;  %v1496_v10 = vsel %vm4991_vm4, %v4388_v56, %v1495_v59  ;;  %v1780_v56 = vsel %vm5022_vm7, %v1775_v26, %v1779_v41  ;;  %v1375_v59 = vrot.slane %v1373_v42, 5  ;;  %v1379_v8 = vshll.u32 %v4369_v2, 16  ;;  %s4213_s19 = sshll.u32 %s380_s30, 3 }
  0xa3   : > { %v1512_v28 = vunpack.c.l.b16 %v1496_v10  ;;  %v4389_v9 = vrot.slane %v4381_v54, 9  ;;  %v1790_v13 = vunpack.c.l.b16 %v1780_v56  ;;  %v1503_v20 = vrot.slane %v4369_v2, 5 }
  0xa4   : > { %v1381_v41 = vrot.slane %v1379_v8, 5  ;;  %v2092_v54 = vshll.u32 %v4467_v44, 16  ;;  %v2276_v8 = vrot.slane %v4467_v44, 5 }
  0xa5   : > { %v5323_v48 = vpop.f32.mrf.mxu0  ;;  %v1517_v52 = vpack.c.b16 %v1512_v28, %v1511_v25  ;;  %v1363_v25 = vrot.slane %v1362_v62, 4  ;;  %v1367_v28 = vrot.slane %v1365_v63, 5  ;;  %v1500_v42 = vsel %vm4991_vm4, %v4389_v9, %v1499_v14 }
  0xa6   : > { %v1504_v43 = vsel %vm4991_vm4, %v4390_v19, %v1503_v20  ;;  %v1513_v1 = vunpack.c.l.b16 %v1500_v42 }
  0xa7   : > { %v5325_v57 = vpop.f32.mrf.mxu1  ;;  %v1368_v63 = vsel %vm5022_vm7, %v1363_v25, %v1367_v28  ;;  %v4468_v25 = vld [vmem:[%s5187_s9 + $0x18] sm:$0xf] }
  0xa8   : > { %4393 = vmatmul.msk.bf16.gmra.mxu0 %vm538_vm3, %v1516_v32  ;;  %v1390_v32 = vunpack.c.l.b16 %v1354_v16  ;;  %v2086_v16 = vshll.u32 %v4466_v60, 16  ;;  %v1881_v60 = vrot.slane %v5252_v33, 5  ;;  %v1391_v28 = vunpack.c.l.b16 %v1368_v63 }
  0xaa   : > { %v5334_v5 = vpop.f32.mrf.mxu2  ;;  %v1395_v55 = vpack.c.b16 %v1390_v32, %v5353_v24 }
  0xab   : > { %4372 = vmatmul.msk.bf16.gmra.mxu3 %vm538_vm3, %v1394_v50  ;;  %v4464_v50 = vld [vmem:[%s5187_s9 + $0x8] sm:$0xf] }
  0xac   : > { %v2072_v3 = vshll.u32 %v4464_v50, 16 }
  0xad   : > { %v5351_v21 = vpop.f32.mrf.mxu0 }
  0xae   : > { %v569_v30 = vpop.f32.mrf.mxu3  ;;  %v2074_v23 = vrot.slane %v2072_v3, 5 }
  0xaf   : > { %4420 = vmatmul.msk.bf16.gmra.mxu2 %vm538_vm3, %v1793_v6  ;;  %v5356_v31 = vpop.f32.mrf.mxu1  ;;  %v634_v40 = vadd.f32 %v5309_v17, %v569_v30  ;;  %v1766_v17 = vsel %vm5022_vm7, %v1761_v35, %v1765_v38  ;;  %v4775_v30 = vld [vmem:[%s5187_s9 + $0x34] sm:$0xf0]  ;;  %v4485_v38 = vld [vmem:[%s5187_s9 + $0x8] sm:$0xe] }
  0xb0   : > { %v1789_v7 = vunpack.c.l.b16 %v1766_v17 }
  0xb1   : > { %v5365_v51 = vadd.f32 %v5314_v34, %v634_v40  ;;  %v2069_v34 = vshrl.u32 %v4464_v50, 16  ;;  %v2088_v40 = vrot.slane %v2086_v16, 5  ;;  %v4486_v50 = vld [vmem:[%s5187_s9 + $0x10] sm:$0xe]  ;;  %v4551_v16 = vld [vmem:[%s6417_s0 + $0x20] sm:$0x3] }
  0xb2   : > { %v5359_v45 = vpop.f32.mrf.mxu2  ;;  %4415 = vmatmul.msk.bf16.gmra.mxu1 %vm538_vm3, %v4408_v29  ;;  %v4411_v29 = vld [vmem:[%s5187_s9 + $0x30] sm:$0xf]  ;;  %v1794_v35 = vpack.c.b16 %v1790_v13, %v1789_v7  ;;  %v4494_v7 = vrot.slane %v4486_v50, 9  ;;  %v2094_v13 = vrot.slane %v2092_v54, 5 }
  0xb3   : > { %v2071_v22 = vrot.slane %v2069_v34, 4  ;;  %v4412_v56 = vor.u32 %v4775_v30, %v4411_v29  ;;  %v2089_v34 = vor.u32 %v2088_v40, %v2085_v39  ;;  %v1847_v40 = vld [vmem:[%s5187_s9] sm:$0xe] }
  0xb5   : > { %v628_v61 = vpop.f32.mrf.mxu0  ;;  %v2075_v17 = vor.u32 %v2074_v23, %v2071_v22  ;;  %v2090_v19 = vrot.slane %v2089_v34, 4  ;;  %v2606_v22 = vsel %vm551_vm0, %v4551_v16, 0  ;;  %v4487_v16 = vld [vmem:[%s5187_s9 + $0x18] sm:$0xe] }
  0xb6   : > { %v5377_v6 = vadd.f32 %v628_v61, %v5323_v48  ;;  %v571_v10 = vpop.f32.mrf.mxu3  ;;  %v1376_v48 = vor.u32 %v1375_v59, %v1372_v58  ;;  %v4493_v58 = vrot.slane %v4485_v38, 9  ;;  %2615 = vmatpush.bf16.msra.mxu0 %v2606_v22  ;;  %v4471_v22 = vld [vmem:[%s5187_s9 + $0x24] sm:$0x1] }
  0xb7   : > { %v5379_v11 = vpop.f32.mrf.mxu1  ;;  %v636_v18 = vadd.f32 %v5325_v57, %v571_v10  ;;  %v4465_v57 = vld [vmem:[%s5187_s9 + $0xc] sm:$0x1]  ;;  %v2076_v33 = vrot.slane %v2075_v17, 4  ;;  %v2095_v17 = vsel %vm5022_vm7, %v2090_v19, %v2094_v13  ;;  %v1873_v13 = vrot.slane %v5206_v36, 5 }
  0xb8   : > { %4394 = vmatmul.msk.bf16.gmra.mxu0 %vm538_vm3, %v1517_v52  ;;  %v1377_v26 = vrot.slane %v1376_v48, 4  ;;  %v2078_v2 = vshll.u32 %v4465_v57, 16  ;;  %v2272_v59 = vrot.slane %v4465_v57, 5  ;;  %v1885_v57 = vrot.slane %v5255_v27, 5 }
  0xb9   : > { %v5388_v32 = vadd.f32 %v5334_v5, %v636_v18  ;;  %v4514_v5 = vld [vmem:[%s6417_s0 + $0x1e] sm:$0x3]  ;;  %v4572_v18 = vld [vmem:[%s6417_s0 + $0x22] sm:$0x3] }
  0xba   : > { %v5383_v24 = vpop.f32.mrf.mxu2  ;;  %v2412_v52 = vsel %vm551_vm0, %v4514_v5, 0  ;;  %v1382_v9 = vsel %vm5022_vm7, %v1377_v26, %v1381_v41  ;;  %v2080_v10 = vrot.slane %v2078_v2, 5  ;;  %v2273_v15 = vsel %vm4991_vm4, %v4493_v58, %v2272_v59  ;;  %v1849_v41 = vld [vmem:[%s5187_s9 + $0x10] sm:$0xe]  ;;  %v1848_v59 = vld [vmem:[%s5187_s9 + $0x8] sm:$0xe] }
  0xbb   : > { %4373 = vmatmul.msk.bf16.gmra.mxu3 %vm538_vm3, %v1395_v55  ;;  %v2728_v23 = vsel %vm551_vm0, %v4572_v18, 0  ;;  %v1392_v29 = vunpack.c.l.b16 %v1382_v9  ;;  %v2304_v39 = vunpack.c.l.b16 %v2273_v15  ;;  %v4424_v44 = vrot.slane %v1849_v41, 9 }
  0xbc   : > { %2421 = vmatpush.bf16.msra.mxu3 %v2412_v52  ;;  %v2081_v26 = vsel %vm5022_vm7, %v2076_v33, %v2080_v10  ;;  %2737 = vmatpush.bf16.msra.mxu1 %v2728_v23  ;;  %v2097_v5 = vshrl.u32 %v4468_v25, 16  ;;  %v4423_v15 = vrot.slane %v1848_v59, 9  ;;  %v4488_v23 = vld [vmem:[%s5187_s9 + $0x20] sm:$0xe] }
  0xbd   : > { %v630_v46 = vpop.f32.mrf.mxu0  ;;  %v1396_v58 = vpack.c.b16 %v1392_v29, %v1391_v28  ;;  %v2182_v63 = vunpack.c.l.b16 %v2081_v26 }
  0xbe   : > { %v5404_v55 = vadd.f32 %v630_v46, %v5351_v21  ;;  %v574_v61 = vpop.f32.mrf.mxu3  ;;  %v1514_v21 = vunpack.c.l.b16 %v1504_v43  ;;  %v1850_v43 = vld [vmem:[%s5187_s9 + $0x18] sm:$0xe]  ;;  %v2100_v46 = vshll.u32 %v4468_v25, 16 }
  0xbf   : > { %4421 = vmatmul.msk.bf16.gmra.mxu2 %vm538_vm3, %v1794_v35  ;;  %v5408_v62 = vpop.f32.mrf.mxu1  ;;  %v639_v3 = vadd.f32 %v5356_v31, %v574_v61  ;;  %v4577_v31 = vld [vmem:[%s6417_s0 + $0x24] sm:$0x3]  ;;  %v2277_v35 = vsel %vm4991_vm4, %v4494_v7, %v2276_v8  ;;  %v4425_v2 = vrot.slane %v1850_v43, 9  ;;  %v4422_v61 = vrot.slane %v1847_v40, 9  ;;  %v4446_v43 = vld [vmem:[%s5187_s9 + $0x8] sm:$0xf] }
  0xc0   : > { %v2810_v20 = vsel %vm551_vm0, %v4577_v31, 0  ;;  %v1518_v30 = vpack.c.b16 %v1514_v21, %v1513_v1  ;;  %v2305_v27 = vunpack.c.l.b16 %v2277_v35  ;;  %v2183_v21 = vunpack.c.l.b16 %v2095_v17  ;;  %v4469_v31 = vld [vmem:[%s5187_s9 + $0x1c] sm:$0x1] }
  0xc1   : > { %v5430_v48 = vadd.f32 %v5359_v45, %v639_v3  ;;  %2819 = vmatpush.bf16.msra.mxu2 %v2810_v20  ;;  %v4470_v45 = vld [vmem:[%s5187_s9 + $0x20] sm:$0xf]  ;;  %v1886_v1 = vsel %vm4991_vm4, %v4425_v2, %v1885_v57  ;;  %v2099_v7 = vrot.slane %v2097_v5, 4  ;;  %v2102_v8 = vrot.slane %v2100_v46, 5 }
  0xc2   : > { %v5415_v14 = vpop.f32.mrf.mxu2  ;;  %4416 = vmatmul.msk.bf16.gmra.mxu1 %vm538_vm3, %v4412_v56  ;;  %v2111_v54 = vshrl.u32 %v4470_v45, 16  ;;  %v2312_v9 = vpack.c.b16 %v2305_v27, %v2304_v39  ;;  %v1877_v20 = vrot.slane %v5209_v37, 5  ;;  %v2280_v57 = vrot.slane %v4469_v31, 5  ;;  %v4472_v27 = vld [vmem:[%s5187_s9 + $0x28] sm:$0xf] }
  0xc3   : > { %v2103_v29 = vor.u32 %v2102_v8, %v2099_v7  ;;  %v4496_v40 = vrot.slane %v4488_v23, 9  ;;  %v1874_v26 = vsel %vm4991_vm4, %v4422_v61, %v1873_v13  ;;  %v1889_v5 = vrot.slane %v5286_v47, 5  ;;  %v4474_v47 = vld [vmem:[%s5187_s9 + $0x30] sm:$0xf] }
  0xc4   : > { %v2113_v33 = vrot.slane %v2111_v54, 4  ;;  %v1878_v41 = vsel %vm4991_vm4, %v4423_v15, %v1877_v20  ;;  %v1893_v2 = vrot.slane %v5290_v53, 5  ;;  %v2125_v7 = vshrl.u32 %v4472_v27, 16 }
  0xc5   : > { %v745_v38 = vpop.f32.mrf.mxu0  ;;  %v1906_v59 = vunpack.c.l.b16 %v1878_v41  ;;  %v2128_v8 = vshll.u32 %v4472_v27, 16 }
  0xc6   : > { %v5445_v42 = vadd.f32 %v745_v38, %v5377_v6  ;;  %v576_v50 = vpop.f32.mrf.mxu3  ;;  %v1882_v6 = vsel %vm4991_vm4, %v4424_v44, %v1881_v60  ;;  %v2114_v60 = vshll.u32 %v4470_v45, 16  ;;  %v4495_v45 = vrot.slane %v4487_v16, 9  ;;  %v4776_v44 = vld [vmem:[%s5187_s9 + $0xc] sm:$0xf0] }
  0xc7   : > { %v5448_v52 = vpop.f32.mrf.mxu1  ;;  %v641_v56 = vadd.f32 %v5379_v11, %v576_v50  ;;  %v1907_v34 = vunpack.c.l.b16 %v1882_v6  ;;  %v1908_v11 = vunpack.c.l.b16 %v1886_v1  ;;  %v2120_v38 = vshll.u32 %v4471_v22, 16  ;;  %v1851_v1 = vld [vmem:[%s5187_s9 + $0x20] sm:$0xe] }
  0xc8   : > { %4395 = vmatmul.msk.bf16.gmra.mxu0 %vm538_vm3, %v1518_v30  ;;  %v2116_v25 = vrot.slane %v2114_v60, 5  ;;  %v2106_v30 = vshll.u32 %v4469_v31, 16  ;;  %v2281_v54 = vsel %vm4991_vm4, %v4495_v45, %v2280_v57  ;;  %v1905_v6 = vunpack.c.l.b16 %v1874_v26  ;;  %v4489_v26 = vld [vmem:[%s5187_s9 + $0x28] sm:$0xe] }
  0xc9   : > { %v5462_v10 = vadd.f32 %v5383_v24, %v641_v56  ;;  %v5468_v18 = vpack.c.b16 %v1908_v11, %v1907_v34  ;;  %v2190_v24 = vpack.c.b16 %v2183_v21, %v2182_v63  ;;  %v4447_v61 = vor.u32 %v4776_v44, %v4446_v43  ;;  %v1852_v34 = vld [vmem:[%s5187_s9 + $0x28] sm:$0xe]  ;;  %v4490_v44 = vld [vmem:[%s5187_s9 + $0x30] sm:$0xe] }
  0xca   : > { %v5459_v3 = vpop.f32.mrf.mxu2  ;;  %v2117_v37 = vor.u32 %v2116_v25, %v2113_v33  ;;  %v2108_v50 = vrot.slane %v2106_v30, 5  ;;  %v4426_v11 = vrot.slane %v1851_v1, 9  ;;  %v2306_v53 = vunpack.c.l.b16 %v2281_v54 }
  0xcb   : > { %4374 = vmatmul.msk.bf16.gmra.mxu3 %vm538_vm3, %v1396_v58  ;;  %v2122_v58 = vrot.slane %v2120_v38, 5  ;;  %v2139_v33 = vshrl.u32 %v4474_v47, 16  ;;  %v2130_v30 = vrot.slane %v2128_v8, 5  ;;  %v2142_v38 = vshll.u32 %v4474_v47, 16  ;;  %v4450_v47 = vld [vmem:[%s5187_s9 + $0x18] sm:$0xf] }
  0xcc   : > { %v2118_v56 = vrot.slane %v2117_v37, 4  ;;  %v1890_v16 = vsel %vm4991_vm4, %v4426_v11, %v1889_v5 }
  0xcd   : > { %v747_v19 = vpop.f32.mrf.mxu0  ;;  %v1909_v23 = vunpack.c.l.b16 %v1890_v16  ;;  %v2141_v37 = vrot.slane %v2139_v33, 4  ;;  %v2144_v41 = vrot.slane %v2142_v38, 5 }
  0xce   : > { %v5474_v28 = vadd.f32 %v747_v19, %v5404_v55  ;;  %v579_v36 = vpop.f32.mrf.mxu3  ;;  %v2284_v55 = vrot.slane %v4471_v22, 5  ;;  %v2123_v31 = vsel %vm5022_vm7, %v2118_v56, %v2122_v58  ;;  %v1913_v22 = vpack.c.b16 %v1906_v59, %v1905_v6 }
  0xcf   : > { %4502 = vmatmul.msk.bf16.vlgmr.msrb.gmra.mxu2 %vm538_vm3, %v2312_v9  ;;  %v5477_v35 = vpop.f32.mrf.mxu1  ;;  %v644_v39 = vadd.f32 %v5408_v62, %v579_v36  ;;  %v2104_v62 = vrot.slane %v2103_v29, 4  ;;  %v2127_v29 = vrot.slane %v2125_v7, 4  ;;  %v2185_v45 = vunpack.c.l.b16 %v2123_v31  ;;  %v4478_v31 = vld [vmem:[%s5187_s9 + $0x40] sm:$0xf] }
  0xd0   : > { %v2285_v63 = vsel %vm4991_vm4, %v4496_v40, %v2284_v55  ;;  %v4475_v55 = vld [vmem:[%s5187_s9 + $0x34] sm:$0x1]  ;;  %v4498_v59 = vrot.slane %v4490_v44, 9  ;;  %v2167_v38 = vshrl.u32 %v4478_v31, 16 }
  0xd1   : > { %v5492_v17 = vadd.f32 %v5415_v14, %v644_v39  ;;  %v4427_v14 = vrot.slane %v1852_v34, 9  ;;  %v2109_v9 = vsel %vm5022_vm7, %v2104_v62, %v2108_v50  ;;  %v2307_v15 = vunpack.c.l.b16 %v2285_v63  ;;  %v4777_v63 = vld [vmem:[%s5187_s9 + $0x1c] sm:$0xf0] }
  0xd2   : > { %v5487_v46 = vpop.f32.mrf.mxu2  ;;  %4481 = vmatmul.msk.bf16.vlgmr.msrb.gmra.mxu1 %vm538_vm3, %v2190_v24  ;;  %v2184_v24 = vunpack.c.l.b16 %v2109_v9  ;;  %v2131_v5 = vor.u32 %v2130_v30, %v2127_v29  ;;  %v2148_v50 = vshll.u32 %v4475_v55, 16  ;;  %v1901_v9 = vrot.slane %v5332_v4, 5 }
  0xd3   : > { %v1894_v19 = vsel %vm4991_vm4, %v4427_v14, %v1893_v2  ;;  %v2313_v39 = vpack.c.b16 %v2307_v15, %v2306_v53  ;;  %v2145_v2 = vor.u32 %v2144_v41, %v2141_v37  ;;  %v1897_v53 = vrot.slane %v5329_v0, 5  ;;  %v1854_v0 = vld [vmem:[%s5187_s9 + $0x38] sm:$0xe] }
  0xd4   : > { %v1910_v25 = vunpack.c.l.b16 %v1894_v19  ;;  %v2191_v27 = vpack.c.b16 %v2185_v45, %v2184_v24  ;;  %v2132_v1 = vrot.slane %v2131_v5, 4  ;;  %v2150_v14 = vrot.slane %v2148_v50, 5 }
  0xd5   : > { %v1022_v21 = vpop.f32.mrf.mxu0  ;;  %v2146_v11 = vrot.slane %v2145_v2, 4  ;;  %v4451_v33 = vor.u32 %v4777_v63, %v4450_v47  ;;  %v4479_v63 = vld [vmem:[%s5187_s9 + $0x44] sm:$0x1] }
  0xd6   : > { %v581_v60 = vpop.f32.mrf.mxu3  ;;  %v5516_v57 = vpack.c.b16 %v1910_v25, %v1909_v23  ;;  %v4429_v23 = vrot.slane %v1854_v0, 9 }
  0xd7   : > { %v5504_v13 = vpop.f32.mrf.mxu1  ;;  %v646_v20 = vadd.f32 %v5448_v52, %v581_v60  ;;  %v4473_v52 = vld [vmem:[%s5187_s9 + $0x2c] sm:$0x1]  ;;  %v2151_v19 = vsel %vm5022_vm7, %v2146_v11, %v2150_v14 }
  0xd8   : > { %4460 = vmatmul.msk.bf16.vlgmr.msrb.gmra.mxu0 %vm538_vm3, %v4447_v61  ;;  %v2134_v62 = vshll.u32 %v4473_v52, 16  ;;  %v2288_v6 = vrot.slane %v4473_v52, 5  ;;  %v2292_v61 = vrot.slane %v4475_v55, 5 }
  0xd9   : > { %v5520_v40 = vadd.f32 %v5459_v3, %v646_v20  ;;  %v4497_v3 = vrot.slane %v4489_v26, 9  ;;  %v1853_v20 = vld [vmem:[%s5187_s9 + $0x30] sm:$0xe]  ;;  %v2187_v26 = vunpack.c.l.b16 %v2151_v19 }
  0xda   : > { %v5514_v36 = vpop.f32.mrf.mxu2  ;;  %v2136_v34 = vrot.slane %v2134_v62, 5  ;;  %v2293_v15 = vsel %vm4991_vm4, %v4498_v59, %v2292_v61  ;;  %v4428_v4 = vrot.slane %v1853_v20, 9  ;;  %v4477_v61 = vld [vmem:[%s5187_s9 + $0x3c] sm:$0x1] }
  0xdb   : > { %4431 = vmatmul.msk.bf16.vlgmr.msrb.gmra.mxu3 %vm538_vm3, %v1913_v22  ;;  %v2289_v60 = vsel %vm4991_vm4, %v4497_v3, %v2288_v6  ;;  %v2309_v37 = vunpack.c.l.b16 %v2293_v15  ;;  %v2169_v3 = vrot.slane %v2167_v38, 4  ;;  %v2162_v14 = vshll.u32 %v4477_v61, 16 }
  0xdc   : > { %v2308_v45 = vunpack.c.l.b16 %v2289_v60  ;;  %v1898_v52 = vsel %vm4991_vm4, %v4428_v4, %v1897_v53  ;;  %v2300_v15 = vrot.slane %v4479_v63, 5 }
  0xdd   : > { %v1024_v43 = vpop.f32.mrf.mxu0  ;;  %v1911_v41 = vunpack.c.l.b16 %v1898_v52  ;;  %v2164_v0 = vrot.slane %v2162_v14, 5  ;;  %v4556_v14 = vld [vmem:[%s5187_s9 + $0x10] sm:$0xe] }
  0xde   : > { %v828_v54 = vpop.f32.mrf.mxu3  ;;  %v2314_v2 = vpack.c.b16 %v2309_v37, %v2308_v45 }
  0xdf   : > { %4503 = vmatmul.msk.bf16.gmra.mxu2 %vm538_vm3, %v2313_v39  ;;  %v5527_v56 = vpop.f32.mrf.mxu1  ;;  %v848_v58 = vadd.f32 %v828_v54, %v5445_v42  ;;  %v4476_v42 = vld [vmem:[%s5187_s9 + $0x38] sm:$0xf] }
  0xe0   : > { %v2153_v25 = vshrl.u32 %v4476_v42, 16  ;;  %v2156_v24 = vshll.u32 %v4476_v42, 16  ;;  %v2176_v42 = vshll.u32 %v4479_v63, 16 }
  0xe1   : > { %v1042_v7 = vadd.f32 %v1022_v21, %v848_v58  ;;  %v2137_v21 = vsel %vm5022_vm7, %v2132_v1, %v2136_v34  ;;  %v4491_v58 = vld [vmem:[%s5187_s9 + $0x38] sm:$0xe]  ;;  %v4492_v1 = vld [vmem:[%s5187_s9 + $0x40] sm:$0xe] }
  0xe2   : > { %v5532_v8 = vpop.f32.mrf.mxu2  ;;  %4482 = vmatmul.msk.bf16.gmra.mxu1 %vm538_vm3, %v2191_v27  ;;  %v2186_v55 = vunpack.c.l.b16 %v2137_v21  ;;  %v2158_v50 = vrot.slane %v2156_v24, 5  ;;  %v2170_v27 = vshll.u32 %v4478_v31, 16  ;;  %v4499_v53 = vrot.slane %v4491_v58, 9  ;;  %v4454_v31 = vld [vmem:[%s5187_s9 + $0x28] sm:$0xf] }
  0xe3   : > { %v1164_v22 = vadd.f32 %v5477_v35, %v1042_v7  ;;  %v1902_v35 = vsel %vm4991_vm4, %v4429_v23, %v1901_v9  ;;  %v4500_v60 = vrot.slane %v4492_v1, 9  ;;  %v4778_v21 = vld [vmem:[%s5187_s9 + $0x2c] sm:$0xf0]  ;;  %v2178_v4 = vrot.slane %v2176_v42, 5  ;;  %v4598_v58 = vld [vmem:[%s6417_s0 + $0x26] sm:$0x3] }
  0xe4   : > { %v1912_v44 = vunpack.c.l.b16 %v1902_v35  ;;  %v2172_v47 = vrot.slane %v2170_v27, 5  ;;  %v2192_v34 = vpack.c.b16 %v2187_v26, %v2186_v55  ;;  %v4455_v23 = vor.u32 %v4778_v21, %v4454_v31  ;;  %v4537_v26 = vld [vmem:[%s5187_s9 + $0x18] sm:$0xf] }
  0xe5   : > { %v1027_v16 = vpop.f32.mrf.mxu0  ;;  %v5566_v6 = vadd.f32 %v5487_v46, %v1164_v22  ;;  %v2482_v27 = vshrl.u32 %v4537_v26, 16  ;;  %v3004_v1 = vsel %vm551_vm0, %v4598_v58, 0  ;;  %v4564_v31 = vrot.slane %v4556_v14, 9 }
  0xe6   : > { %v830_v29 = vpop.f32.mrf.mxu3  ;;  %v5560_v54 = vpack.c.b16 %v1912_v44, %v1911_v41  ;;  %3013 = vmatpush.bf16.msrb.mxu3 %v3004_v1 }
  0xe7   : > { %v5550_v30 = vpop.f32.mrf.mxu1  ;;  %v849_v39 = vadd.f32 %v830_v29, %v5474_v28  ;;  %v2155_v28 = vrot.slane %v2153_v25, 4  ;;  %v2301_v25 = vsel %vm4991_vm4, %v4500_v60, %v2300_v15  ;;  %v4779_v60 = vld [vmem:[%s5187_s9 + $0x3c] sm:$0xf0] }
  0xe8   : > { %4461 = vmatmul.msk.bf16.gmra.mxu0 %vm538_vm3, %v4451_v33  ;;  %v2296_v33 = vrot.slane %v4477_v61, 5  ;;  %v2311_v35 = vunpack.c.l.b16 %v2301_v25  ;;  %v4538_v61 = vld [vmem:[%s5187_s9 + $0x1c] sm:$0x1] }
  0xe9   : > { %v1043_v5 = vadd.f32 %v1024_v43, %v849_v39  ;;  %v2159_v11 = vor.u32 %v2158_v50, %v2155_v28  ;;  %v2491_v15 = vshll.u32 %v4538_v61, 16 }
  0xea   : > { %v5558_v62 = vpop.f32.mrf.mxu2 }
  0xeb   : > { %4432 = vmatmul.msk.bf16.gmra.mxu3 %vm538_vm3, %v5468_v18  ;;  %v1165_v43 = vadd.f32 %v5504_v13, %v1043_v5  ;;  %v2173_v13 = vor.u32 %v2172_v47, %v2169_v3  ;;  %v2160_v20 = vrot.slane %v2159_v11, 4 }
  0xed   : > { %v1029_v59 = vpop.f32.mrf.mxu0  ;;  %v5574_v7 = vadd.f32 %v5514_v36, %v1165_v43  ;;  %v2174_v22 = vrot.slane %v2173_v13, 4  ;;  %v2165_v45 = vsel %vm5022_vm7, %v2160_v20, %v2164_v0 }
  0xee   : > { %v833_v18 = vpop.f32.mrf.mxu3  ;;  %v2188_v44 = vunpack.c.l.b16 %v2165_v45 }
  0xef   : > { %4504 = vmatmul.msk.bf16.gmra.mxu2 %vm538_vm3, %v2314_v2  ;;  %v5577_v46 = vpop.f32.mrf.mxu1  ;;  %v850_v9 = vadd.f32 %v833_v18, %v5365_v51  ;;  %v2297_v51 = vsel %vm4991_vm4, %v4499_v53, %v2296_v33  ;;  %v2179_v55 = vsel %vm5022_vm7, %v2174_v22, %v2178_v4  ;;  %v2485_v2 = vshll.u32 %v4537_v26, 16  ;;  %v4557_v18 = vld [vmem:[%s5187_s9 + $0x18] sm:$0xe]  ;;  %v4661_v4 = vld [vmem:[%s6417_s0 + $0x2c] sm:$0x3] }
  0xf0   : > { %v2310_v52 = vunpack.c.l.b16 %v2297_v51  ;;  %v2189_v50 = vunpack.c.l.b16 %v2179_v55  ;;  %v2675_v51 = vrot.slane %v4538_v61, 5  ;;  %v3403_v25 = vsel %vm551_vm0, %v4661_v4, 0 }
  0xf1   : > { %v1044_v19 = vadd.f32 %v1027_v16, %v850_v9  ;;  %v4535_v16 = vld [vmem:[%s5187_s9 + $0x10] sm:$0xf]  ;;  %v2487_v11 = vrot.slane %v2485_v2, 5  ;;  %v4458_v9 = vld [vmem:[%s5187_s9 + $0x38] sm:$0xf]  ;;  %3412 = vmatpush.bf16.msrb.mxu2 %v3403_v25 }
  0xf2   : > { %v5582_v36 = vpop.f32.mrf.mxu2  ;;  %4483 = vmatmul.msk.bf16.gmra.mxu1 %vm538_vm3, %v2192_v34  ;;  %v2468_v41 = vshrl.u32 %v4535_v16, 16  ;;  %v2315_v3 = vpack.c.b16 %v2311_v35, %v2310_v52  ;;  %v2193_v34 = vpack.c.b16 %v2189_v50, %v2188_v44  ;;  %v4580_v50 = vld [vmem:[%s5648_s8] sm:$0xf] }
  0xf3   : > { %v1166_v24 = vadd.f32 %v5527_v56, %v1044_v19  ;;  %v4565_v19 = vrot.slane %v4557_v18, 9  ;;  %v4539_v2 = vld [vmem:[%s5187_s9 + $0x20] sm:$0xf] }
  0xf4   : > { %v2499_v1 = vshll.u32 %v4539_v2, 16 }
  0xf5   : > { %v1032_v29 = vpop.f32.mrf.mxu0  ;;  %v5594_v37 = vadd.f32 %v5532_v8, %v1166_v24  ;;  %v2471_v8 = vshll.u32 %v4535_v16, 16  ;;  %v4459_v16 = vor.u32 %v4779_v60, %v4458_v9  ;;  %v4558_v60 = vld [vmem:[%s5187_s9 + $0x20] sm:$0xe] }
  0xf6   : > { %v835_v38 = vpop.f32.mrf.mxu3  ;;  %v4566_v4 = vrot.slane %v4558_v60, 9 }
  0xf7   : > { %v5596_v39 = vpop.f32.mrf.mxu1  ;;  %v851_v56 = vadd.f32 %v835_v38, %v5388_v32  ;;  %v2470_v32 = vrot.slane %v2468_v41, 4  ;;  %v2473_v63 = vrot.slane %v2471_v8, 5  ;;  %v2493_v41 = vrot.slane %v2491_v15, 5 }
  0xf8   : > { %4462 = vmatmul.msk.bf16.gmra.mxu0 %vm538_vm3, %v4455_v23  ;;  %v4624_v23 = vld [vmem:[%s6417_s0 + $0x2a] sm:$0x3]  ;;  %v2676_v8 = vsel %vm4991_vm4, %v4565_v19, %v2675_v51 }
  0xf9   : > { %v1045_v5 = vadd.f32 %v1029_v59, %v851_v56  ;;  %v4536_v59 = vld [vmem:[%s5187_s9 + $0x14] sm:$0x1]  ;;  %v4559_v19 = vld [vmem:[%s5187_s9 + $0x28] sm:$0xe] }
  0xfa   : > { %v5603_v28 = vpop.f32.mrf.mxu2  ;;  %v2477_v33 = vshll.u32 %v4536_v59, 16  ;;  %v2671_v21 = vrot.slane %v4536_v59, 5  ;;  %v4567_v51 = vrot.slane %v4559_v19, 9  ;;  %v4544_v19 = vld [vmem:[%s5187_s9 + $0x34] sm:$0x1] }
  0xfb   : > { %4433 = vmatmul.msk.bf16.gmra.mxu3 %vm538_vm3, %v5516_v57  ;;  %v1167_v47 = vadd.f32 %v5550_v30, %v1045_v5  ;;  %v2484_v57 = vrot.slane %v2482_v27, 4  ;;  %v4784_v27 = vld [vmem:[%s5648_s8 + $0x4] sm:$0xf0] }
  0xfc   : > { %v2479_v35 = vrot.slane %v2477_v33, 5  ;;  %v2672_v44 = vsel %vm4991_vm4, %v4564_v31, %v2671_v21  ;;  %v4581_v59 = vor.u32 %v4784_v27, %v4580_v50  ;;  %v4584_v50 = vld [vmem:[%s5648_s8 + $0x10] sm:$0xf] }
  0xfd   : > { %v1034_v43 = vpop.f32.mrf.mxu0  ;;  %v5620_v53 = vadd.f32 %v5558_v62, %v1167_v47  ;;  %v2474_v62 = vor.u32 %v2473_v63, %v2470_v32  ;;  %v2488_v22 = vor.u32 %v2487_v11, %v2484_v57  ;;  %v2703_v58 = vunpack.c.l.b16 %v2672_v44 }
  0xfe   : > { %v838_v30 = vpop.f32.mrf.mxu3  ;;  %v2704_v47 = vunpack.c.l.b16 %v2676_v8 }
  0xff   : > { %4505 = vmatmul.msk.bf16.gmra.mxu2 %vm538_vm3, %v2315_v3  ;;  %v5623_v13 = vpop.f32.mrf.mxu1  ;;  %v852_v42 = vadd.f32 %v838_v30, %v5430_v48  ;;  %v4611_v48 = vld [vmem:[%s6417_s0 + $0x28] sm:$0x3]  ;;  %v2475_v52 = vrot.slane %v2474_v62, 4 }
 0x100   : > { %v3126_v24 = vsel %vm551_vm0, %v4611_v48, 0  ;;  %v2711_v14 = vpack.c.b16 %v2704_v47, %v2703_v58 }
 0x101   : > { %v1046_v20 = vadd.f32 %v1032_v29, %v852_v42  ;;  %v3209_v29 = vsel %vm551_vm0, %v4624_v23, 0  ;;  %3135 = vmatpush.bf16.msrb.mxu0 %v3126_v24  ;;  %v2480_v61 = vsel %vm5022_vm7, %v2475_v52, %v2479_v35  ;;  %v4780_v24 = vld [vmem:[%s5187_s9 + $0x14] sm:$0xf0] }
 0x102   : > { %v5629_v0 = vpop.f32.mrf.mxu2  ;;  %4484 = vmatmul.msk.bf16.gmra.mxu1 %vm538_vm3, %v2193_v34  ;;  %v2581_v9 = vunpack.c.l.b16 %v2480_v61 }
 0x103   : > { %v1168_v45 = vadd.f32 %v5577_v46, %v1046_v20  ;;  %3218 = vmatpush.bf16.msrb.mxu1 %v3209_v29  ;;  %v2489_v46 = vrot.slane %v2488_v22, 4  ;;  %v4542_v22 = vld [vmem:[%s5187_s9 + $0x2c] sm:$0x1] }
 0x104   : > { %v2683_v25 = vrot.slane %v4542_v22, 5  ;;  %v2519_v35 = vshll.u32 %v4542_v22, 16 }
 0x105   : > { %v1037_v38 = vpop.f32.mrf.mxu0  ;;  %v5651_v55 = vadd.f32 %v5582_v36, %v1168_v45  ;;  %v4541_v36 = vld [vmem:[%s5187_s9 + $0x28] sm:$0xf]  ;;  %v2494_v63 = vsel %vm5022_vm7, %v2489_v46, %v2493_v41  ;;  %v4543_v46 = vld [vmem:[%s5187_s9 + $0x30] sm:$0xf] }
 0x106   : > { %v840_v26 = vpop.f32.mrf.mxu3  ;;  %v2510_v34 = vshrl.u32 %v4541_v36, 16  ;;  %v2513_v57 = vshll.u32 %v4541_v36, 16  ;;  %v2684_v27 = vsel %vm4991_vm4, %v4567_v51, %v2683_v25  ;;  %v4785_v36 = vld [vmem:[%s5648_s8 + $0x14] sm:$0xf0]  ;;  %v2524_v61 = vshrl.u32 %v4543_v46, 16 }
 0x107   : > { %v5653_v56 = vpop.f32.mrf.mxu1  ;;  %v853_v5 = vadd.f32 %v840_v26, %v5462_v10  ;;  %v2496_v10 = vshrl.u32 %v4539_v2, 16  ;;  %v4545_v2 = vld [vmem:[%s5187_s9 + $0x38] sm:$0xf] }
 0x108   : > { %4463 = vmatmul.msk.bf16.gmra.mxu0 %vm538_vm3, %v4459_v16  ;;  %v2512_v31 = vrot.slane %v2510_v34, 4  ;;  %v2515_v21 = vrot.slane %v2513_v57, 5  ;;  %v2706_v34 = vunpack.c.l.b16 %v2684_v27  ;;  %v2538_v57 = vshrl.u32 %v4545_v2, 16 }
 0x109   : > { %v1047_v3 = vadd.f32 %v1034_v43, %v853_v5  ;;  %v2498_v33 = vrot.slane %v2496_v10, 4 }
 0x10a   : > { %v5665_v32 = vpop.f32.mrf.mxu2  ;;  %v2516_v45 = vor.u32 %v2515_v21, %v2512_v31 }
 0x10b   : > { %4434 = vmatmul.msk.bf16.gmra.mxu3 %vm538_vm3, %v5560_v54  ;;  %v1169_v43 = vadd.f32 %v5596_v39, %v1047_v3  ;;  %v2582_v54 = vunpack.c.l.b16 %v2494_v63  ;;  %v2501_v39 = vrot.slane %v2499_v1, 5  ;;  %v2527_v63 = vshll.u32 %v4543_v46, 16  ;;  %v4547_v46 = vld [vmem:[%s5187_s9 + $0x40] sm:$0xf] }
 0x10c   : > { %v2517_v47 = vrot.slane %v2516_v45, 4  ;;  %v2687_v45 = vrot.slane %v4544_v19, 5  ;;  %v2552_v27 = vshrl.u32 %v4547_v46, 16 }
 0x10d   : > { %v1039_v11 = vpop.f32.mrf.mxu0  ;;  %v5675_v18 = vadd.f32 %v5603_v28, %v1169_v43  ;;  %v4540_v28 = vld [vmem:[%s5187_s9 + $0x24] sm:$0x1]  ;;  %v2589_v23 = vpack.c.b16 %v2582_v54, %v2581_v9  ;;  %v2502_v29 = vor.u32 %v2501_v39, %v2498_v33  ;;  %v2541_v43 = vshll.u32 %v4545_v2, 16 }
 0x10e   : > { %v843_v30 = vpop.f32.mrf.mxu3  ;;  %v2679_v48 = vrot.slane %v4540_v28, 5  ;;  %v2505_v16 = vshll.u32 %v4540_v28, 16  ;;  %v2526_v54 = vrot.slane %v2524_v61, 4  ;;  %v2529_v33 = vrot.slane %v2527_v63, 5  ;;  %v4546_v28 = vld [vmem:[%s5187_s9 + $0x3c] sm:$0x1] }
 0x10f   : > { %4594 = vmatmul.msk.bf16.vlgmr.msra.gmra.mxu2 %vm538_vm3, %v4581_v59  ;;  %v5678_v42 = vpop.f32.mrf.mxu1  ;;  %v854_v15 = vadd.f32 %v843_v30, %v5492_v17  ;;  %v4517_v17 = vld [vmem:[%s5187_s9 + $0x10] sm:$0xf]  ;;  %v2503_v3 = vrot.slane %v2502_v29, 4  ;;  %v2521_v59 = vrot.slane %v2519_v35, 5  ;;  %v2543_v39 = vrot.slane %v2541_v43, 5 }
 0x110   : > { %v2680_v26 = vsel %vm4991_vm4, %v4566_v4, %v2679_v48  ;;  %v4518_v8 = vor.u32 %v4780_v24, %v4517_v17  ;;  %v2507_v58 = vrot.slane %v2505_v16, 5  ;;  %v4560_v48 = vld [vmem:[%s5187_s9 + $0x30] sm:$0xe]  ;;  %v2530_v51 = vor.u32 %v2529_v33, %v2526_v54  ;;  %v4521_v35 = vld [vmem:[%s5187_s9 + $0x20] sm:$0xf] }
 0x111   : > { %v1048_v20 = vadd.f32 %v1037_v38, %v854_v15  ;;  %v2540_v15 = vrot.slane %v2538_v57, 4  ;;  %v2533_v17 = vshll.u32 %v4544_v19, 16  ;;  %v2547_v29 = vshll.u32 %v4546_v28, 16  ;;  %v4786_v57 = vld [vmem:[%s5648_s8 + $0x24] sm:$0xf0] }
 0x112   : > { %v5684_v62 = vpop.f32.mrf.mxu2  ;;  %4573 = vmatmul.msk.bf16.vlgmr.msra.gmra.mxu1 %vm538_vm3, %v2711_v14  ;;  %v4585_v14 = vor.u32 %v4785_v36, %v4584_v50  ;;  %v2508_v9 = vsel %vm5022_vm7, %v2503_v3, %v2507_v58  ;;  %v4568_v16 = vrot.slane %v4560_v48, 9  ;;  %v4781_v50 = vld [vmem:[%s5187_s9 + $0x24] sm:$0xf0]  ;;  %v2555_v2 = vshll.u32 %v4547_v46, 16 }
 0x113   : > { %v1170_v38 = vadd.f32 %v5623_v13, %v1048_v20  ;;  %v2583_v22 = vunpack.c.l.b16 %v2508_v9  ;;  %v2544_v24 = vor.u32 %v2543_v39, %v2540_v15  ;;  %v2535_v36 = vrot.slane %v2533_v17, 5 }
 0x115   : > { %v1543_v52 = vpop.f32.mrf.mxu0  ;;  %v5695_v41 = vadd.f32 %v5629_v0, %v1170_v38  ;;  %v2705_v0 = vunpack.c.l.b16 %v2680_v26  ;;  %v2691_v38 = vrot.slane %v4546_v28, 5  ;;  %v4548_v28 = vld [vmem:[%s5187_s9 + $0x44] sm:$0x1] }
 0x116   : > { %v845_v44 = vpop.f32.mrf.mxu3 }
 0x117   : > { %v5697_v5 = vpop.f32.mrf.mxu1  ;;  %v855_v13 = vadd.f32 %v845_v44, %v5520_v40  ;;  %v2712_v60 = vpack.c.b16 %v2706_v34, %v2705_v0  ;;  %v2549_v0 = vrot.slane %v2547_v29, 5  ;;  %v4588_v34 = vld [vmem:[%s5648_s8 + $0x20] sm:$0xf] }
 0x118   : > { %4552 = vmatmul.msk.bf16.vlgmr.msra.gmra.mxu0 %vm538_vm3, %v2589_v23  ;;  %v4561_v23 = vld [vmem:[%s5187_s9 + $0x38] sm:$0xe] }
 0x119   : > { %v1049_v10 = vadd.f32 %v1039_v11, %v855_v13  ;;  %v2522_v11 = vsel %vm5022_vm7, %v2517_v47, %v2521_v59  ;;  %v2531_v13 = vrot.slane %v2530_v51, 4  ;;  %v2545_v59 = vrot.slane %v2544_v24, 4  ;;  %v4562_v51 = vld [vmem:[%s5187_s9 + $0x40] sm:$0xe] }
 0x11a   : > { %v5706_v1 = vpop.f32.mrf.mxu2  ;;  %v2584_v4 = vunpack.c.l.b16 %v2522_v11 }
 0x11b   : > { %4531 = vmatmul.msk.bf16.vlgmr.msra.gmra.mxu3 %vm538_vm3, %v4518_v8  ;;  %v1171_v40 = vadd.f32 %v5653_v56, %v1049_v10  ;;  %v4522_v10 = vor.u32 %v4781_v50, %v4521_v35  ;;  %v2550_v15 = vsel %vm5022_vm7, %v2545_v59, %v2549_v0  ;;  %v4570_v35 = vrot.slane %v4562_v51, 9  ;;  %v4525_v59 = vld [vmem:[%s5187_s9 + $0x30] sm:$0xf] }
 0x11c   : > { %v2590_v26 = vpack.c.b16 %v2584_v4, %v2583_v22  ;;  %v2586_v48 = vunpack.c.l.b16 %v2550_v15 }
 0x11d   : > { %v1545_v30 = vpop.f32.mrf.mxu0  ;;  %v5715_v31 = vadd.f32 %v5665_v32, %v1171_v40  ;;  %v2557_v40 = vrot.slane %v2555_v2, 5  ;;  %v4647_v2 = vld [vmem:[%s5648_s8 + $0x10] sm:$0xf] }
 0x11e   : > { %v1421_v21 = vpop.f32.mrf.mxu3 }
 0x11f   : > { %4595 = vmatmul.msk.bf16.gmra.mxu2 %vm538_vm3, %v4585_v14  ;;  %v5718_v56 = vpop.f32.mrf.mxu1  ;;  %v1441_v20 = vadd.f32 %v1421_v21, %v5566_v6  ;;  %v4569_v6 = vrot.slane %v4561_v23, 9  ;;  %v2554_v14 = vrot.slane %v2552_v27, 4  ;;  %v4645_v27 = vld [vmem:[%s5648_s8 + $0x8] sm:$0xf] }
 0x121   : > { %v1563_v25 = vadd.f32 %v1543_v52, %v1441_v20  ;;  %v4549_v52 = vld [vmem:[%s5187_s9 + $0x48] sm:$0xf]  ;;  %v2692_v61 = vsel %vm4991_vm4, %v4569_v6, %v2691_v38  ;;  %v4550_v20 = vld [vmem:[%s5187_s9 + $0x4c] sm:$0x1]  ;;  %v2558_v22 = vor.u32 %v2557_v40, %v2554_v14  ;;  %v5783_v40 = vld [vmem:[%s5648_s8 + $0x14] sm:$0x1] }
 0x122   : > { %v5725_v32 = vpop.f32.mrf.mxu2  ;;  %4574 = vmatmul.msk.bf16.gmra.mxu1 %vm538_vm3, %v2712_v60  ;;  %v2569_v43 = vshll.u32 %v4549_v52, 16  ;;  %v2708_v33 = vunpack.c.l.b16 %v2692_v61  ;;  %v4589_v60 = vor.u32 %v4786_v57, %v4588_v34  ;;  %v2575_v6 = vshll.u32 %v4550_v20, 16  ;;  %v5780_v14 = vld [vmem:[%s5648_s8 + $0xc] sm:$0x1] }
 0x123   : > { %v1645_v44 = vadd.f32 %v5678_v42, %v1563_v25  ;;  %v2688_v42 = vsel %vm4991_vm4, %v4568_v16, %v2687_v45  ;;  %v2561_v16 = vshll.u32 %v4548_v28, 16  ;;  %v5767_v38 = vrot.slane %v2558_v22, 4 }
 0x124   : > { %v2707_v54 = vunpack.c.l.b16 %v2688_v42  ;;  %v2571_v21 = vrot.slane %v2569_v43, 5  ;;  %v2577_v42 = vrot.slane %v2575_v6, 5  ;;  %v3288_v22 = vshll.u32 %v5783_v40, 16 }
 0x125   : > { %v1548_v8 = vpop.f32.mrf.mxu0  ;;  %v5734_v3 = vadd.f32 %v5684_v62, %v1645_v44  ;;  %v2566_v62 = vshrl.u32 %v4549_v52, 16  ;;  %v2699_v52 = vrot.slane %v4550_v20, 5  ;;  %v2563_v0 = vrot.slane %v2561_v16, 5 }
 0x126   : > { %v1423_v58 = vpop.f32.mrf.mxu3  ;;  %v2713_v23 = vpack.c.b16 %v2708_v33, %v2707_v54 }
 0x127   : > { %v5736_v47 = vpop.f32.mrf.mxu1  ;;  %v1442_v63 = vadd.f32 %v1423_v58, %v5574_v7  ;;  %v2536_v7 = vsel %vm5022_vm7, %v2531_v13, %v2535_v36  ;;  %v2568_v39 = vrot.slane %v2566_v62, 4  ;;  %v3268_v13 = vshll.u32 %v4645_v27, 16 }
 0x128   : > { %4553 = vmatmul.msk.bf16.gmra.mxu0 %vm538_vm3, %v2590_v26  ;;  %v2585_v4 = vunpack.c.l.b16 %v2536_v7  ;;  %v2695_v26 = vrot.slane %v4548_v28, 5  ;;  %v3279_v36 = vshrl.u32 %v4647_v2, 16  ;;  %v3282_v58 = vshll.u32 %v4647_v2, 16  ;;  %v4787_v7 = vld [vmem:[%s5648_s8 + $0x34] sm:$0xf0] }
 0x129   : > { %v1564_v9 = vadd.f32 %v1545_v30, %v1442_v63  ;;  %v2572_v45 = vor.u32 %v2571_v21, %v2568_v39  ;;  %v3270_v57 = vrot.slane %v3268_v13, 5 }
 0x12a   : > { %v5746_v11 = vpop.f32.mrf.mxu2  ;;  %v2591_v46 = vpack.c.b16 %v2586_v48, %v2585_v4  ;;  %v3281_v62 = vrot.slane %v3279_v36, 4  ;;  %v3284_v43 = vrot.slane %v3282_v58, 5  ;;  %v2696_v15 = vsel %vm4991_vm4, %v4570_v35, %v2695_v26  ;;  %v2851_v4 = vld [vmem:[%s5648_s8 + $0x8] sm:$0xf]  ;;  %v5821_v36 = vld [vmem:[%s5648_s8 + $0x4] sm:$0x1] }
 0x12b   : > { %4532 = vmatmul.msk.bf16.gmra.mxu3 %vm538_vm3, %v4522_v10  ;;  %v1646_v19 = vadd.f32 %v5697_v5, %v1564_v9  ;;  %v4563_v5 = vld [vmem:[%s5187_s9 + $0x48] sm:$0xe]  ;;  %v4782_v10 = vld [vmem:[%s5187_s9 + $0x34] sm:$0xf0]  ;;  %v2849_v9 = vld [vmem:[%s5648_s8] sm:$0xf] }
 0x12c   : > { %v4571_v50 = vrot.slane %v4563_v5, 9  ;;  %v4526_v20 = vor.u32 %v4782_v10, %v4525_v59  ;;  %v2866_v48 = vshrl.u32 %v2849_v9, 16  ;;  %v2880_v26 = vshrl.u32 %v2851_v4, 16  ;;  %v5824_v58 = vld [vmem:[%s5648_s8 + $0xc] sm:$0x1] }
 0x12d   : > { %v5754_v30 = vpop.f32.mrf.mxu0  ;;  %v5760_v25 = vadd.f32 %v5706_v1, %v1646_v19  ;;  %v3274_v19 = vshll.u32 %v5780_v14, 16 }
 0x12e   : > { %v1426_v17 = vpop.f32.mrf.mxu3  ;;  %v2700_v39 = vsel %vm4991_vm4, %v4571_v50, %v2699_v52  ;;  %v3290_v50 = vrot.slane %v3288_v22, 5  ;;  %v2868_v52 = vrot.slane %v2866_v48, 4 }
 0x12f   : > { %4596 = vmatmul.msk.bf16.gmra.mxu2 %vm538_vm3, %v4589_v60  ;;  %v5763_v24 = vpop.f32.mrf.mxu1  ;;  %v1443_v29 = vadd.f32 %v1426_v17, %v5594_v37  ;;  %v3265_v37 = vshrl.u32 %v4645_v27, 16  ;;  %v2710_v16 = vunpack.c.l.b16 %v2700_v39  ;;  %v3276_v35 = vrot.slane %v3274_v19, 5  ;;  %v4753_v19 = vld [vmem:[%s6417_s0 + $0x34] sm:$0x3] }
 0x130   : > { %v3924_v22 = vsel %vm551_vm0, %v4753_v19, 0  ;;  %v4788_v19 = vld [vmem:[%s5648_s8 + $0xc] sm:$0xf0] }
 0x131   : > { %v1565_v1 = vadd.f32 %v1548_v8, %v1443_v29  ;;  %v2573_v8 = vrot.slane %v2572_v45, 4  ;;  %v3267_v34 = vrot.slane %v3265_v37, 4  ;;  %v2709_v29 = vunpack.c.l.b16 %v2696_v15  ;;  %v3043_v15 = vld [vmem:[%s5648_s8] sm:$0xe]  ;;  %3933 = vmatpush.bf16.msra.mxu2 %v3924_v22 }
 0x132   : > { %v5769_v44 = vpop.f32.mrf.mxu2  ;;  %4575 = vmatmul.msk.bf16.gmra.mxu1 %vm538_vm3, %v2713_v23  ;;  %v2869_v23 = vshll.u32 %v2849_v9, 16 }
 0x133   : > { %v1647_v61 = vadd.f32 %v5718_v56, %v1565_v1  ;;  %v4592_v56 = vld [vmem:[%s5648_s8 + $0x30] sm:$0xf]  ;;  %v3271_v21 = vor.u32 %v3270_v57, %v3267_v34  ;;  %v2578_v45 = vsel %vm5022_vm7, %v2573_v8, %v2577_v42  ;;  %v4682_v1 = vld [vmem:[%s6417_s0 + $0x2e] sm:$0x3]  ;;  %v2714_v13 = vpack.c.b16 %v2710_v16, %v2709_v29  ;;  %v5830_v8 = vld [vmem:[%s5187_s9 + $0x40] sm:$0xf] }
 0x134   : > { %v4593_v5 = vor.u32 %v4787_v7, %v4592_v56  ;;  %v2871_v27 = vrot.slane %v2869_v23, 5  ;;  %v5818_v37 = vunpack.c.l.b16 %v2578_v45  ;;  %v5833_v42 = vld [vmem:[%s5187_s9 + $0x44] sm:$0xf0]  ;;  %v3525_v10 = vsel %vm551_vm0, %v4682_v1, 0  ;;  %v4649_v23 = vld [vmem:[%s5648_s8 + $0x18] sm:$0xf] }
 0x135   : > { %v5776_v63 = vpop.f32.mrf.mxu0  ;;  %v5787_v54 = vadd.f32 %v5725_v32, %v1647_v61  ;;  %v3285_v32 = vor.u32 %v3284_v43, %v3281_v62  ;;  %v3272_v6 = vrot.slane %v3271_v21, 4  ;;  %v2882_v57 = vrot.slane %v2880_v26, 4  ;;  %3534 = vmatpush.bf16.msra.mxu3 %v3525_v10  ;;  %v3044_v29 = vld [vmem:[%s5648_s8 + $0x8] sm:$0xe]  ;;  %v4651_v16 = vld [vmem:[%s5648_s8 + $0x20] sm:$0xf] }
 0x136   : > { %v1428_v33 = vpop.f32.mrf.mxu3  ;;  %v2875_v56 = vshll.u32 %v5821_v36, 16  ;;  %v2889_v7 = vshll.u32 %v5824_v58, 16  ;;  %v3296_v45 = vshll.u32 %v4649_v23, 16  ;;  %v3307_v26 = vshrl.u32 %v4651_v16, 16  ;;  %s4215_s9 = sshll.u32 %s388_s11, 1 }
 0x137   : > { %v5789_v60 = vpop.f32.mrf.mxu1  ;;  %v1444_v28 = vadd.f32 %v1428_v33, %v5620_v53  ;;  %v2564_v53 = vsel %vm5022_vm7, %v5767_v38, %v2563_v0  ;;  %v3286_v38 = vrot.slane %v3285_v32, 4  ;;  %v3277_v61 = vsel %vm5022_vm7, %v3272_v6, %v3276_v35  ;;  %s390_s15 = scalar_lea.vmem %s6423_s6, %s4215_s9 }
 0x138   : > { %4554 = vmatmul.msk.bf16.gmra.mxu0 %vm538_vm3, %v2591_v46  ;;  %v5816_v2 = vunpack.c.l.b16 %v2564_v53  ;;  %v2872_v33 = vor.u32 %v2871_v27, %v2868_v52  ;;  %v5865_v32 = vunpack.c.l.b16 %v3277_v61  ;;  %v3293_v53 = vshrl.u32 %v4649_v23, 16  ;;  %v2853_v52 = vld [vmem:[%s5648_s8 + $0x10] sm:$0xf] }
 0x139   : > { %v1566_v51 = vadd.f32 %v5754_v30, %v1444_v28  ;;  %v2883_v30 = vshll.u32 %v2851_v4, 16  ;;  %v3291_v9 = vsel %vm5022_vm7, %v3286_v38, %v3290_v50  ;;  %v4732_v28 = vld [vmem:[%s6417_s0 + $0x32] sm:$0x3]  ;;  %v4603_v35 = vrot.slane %v3043_v15, 9 }
 0x13a   : > { %v5803_v17 = vpop.f32.mrf.mxu2  ;;  %v2592_v21 = vpack.c.b16 %v5818_v37, %v5816_v2  ;;  %v3802_v48 = vsel %vm551_vm0, %v4732_v28, 0  ;;  %v2873_v6 = vrot.slane %v2872_v33, 4  ;;  %v3069_v1 = vrot.slane %v5821_v36, 5 }
 0x13b   : > { %4533 = vmatmul.msk.bf16.gmra.mxu3 %vm538_vm3, %v4526_v20  ;;  %v2885_v62 = vrot.slane %v2883_v30, 5  ;;  %v1648_v43 = vadd.f32 %v5736_v47, %v1566_v51  ;;  %v3379_v51 = vunpack.c.l.b16 %v3291_v9  ;;  %3811 = vmatpush.bf16.msra.mxu1 %v3802_v48  ;;  %v3310_v30 = vshll.u32 %v4651_v16, 16 }
 0x13c   : > { %v3295_v38 = vrot.slane %v3293_v53, 4  ;;  %v3298_v50 = vrot.slane %v3296_v45, 5  ;;  %v2877_v10 = vrot.slane %v2875_v56, 5  ;;  %v2897_v9 = vshll.u32 %v2853_v52, 16 }
 0x13d   : > { %v5814_v46 = vpop.f32.mrf.mxu0  ;;  %v5863_v20 = vadd.f32 %v5746_v11, %v1648_v43  ;;  %v3312_v61 = vrot.slane %v3310_v30, 5  ;;  %v2894_v43 = vshrl.u32 %v2853_v52, 16  ;;  %v3386_v15 = vpack.c.b16 %v3379_v51, %v5865_v32 }
 0x13e   : > { %v1431_v59 = vpop.f32.mrf.mxu3  ;;  %v3070_v56 = vsel %vm4991_vm4, %v4603_v35, %v3069_v1 }
 0x13f   : > { %4597 = vmatmul.msk.bf16.gmra.mxu2 %vm538_vm3, %v4593_v5  ;;  %v5827_v0 = vpop.f32.mrf.mxu1  ;;  %v1445_v34 = vadd.f32 %v1431_v59, %v5651_v55  ;;  %v4530_v55 = vor.u32 %v5833_v42, %v5830_v8  ;;  %v2886_v5 = vor.u32 %v2885_v62, %v2882_v57  ;;  %v3073_v59 = vrot.slane %v5824_v58, 5  ;;  %v5882_v8 = vld [vmem:[%s5648_s8 + $0x1c] sm:$0x1]  ;;  %v2855_v62 = vld [vmem:[%s5648_s8 + $0x18] sm:$0xf] }
 0x140   : > { %v3309_v42 = vrot.slane %v3307_v26, 4  ;;  %v2891_v57 = vrot.slane %v2889_v7, 5  ;;  %v2908_v22 = vshrl.u32 %v2855_v62, 16  ;;  %v2896_v51 = vrot.slane %v2894_v43, 4  ;;  %v4655_v43 = vld [vmem:[%s5648_s8 + $0x30] sm:$0xf] }
 0x141   : > { %v1567_v39 = vadd.f32 %v5776_v63, %v1445_v34  ;;  %v4695_v63 = vld [vmem:[%s6417_s0 + $0x30] sm:$0x3]  ;;  %v2887_v34 = vrot.slane %v2886_v5, 4  ;;  %v2899_v5 = vrot.slane %v2897_v9, 5 }
 0x142   : > { %v5850_v47 = vpop.f32.mrf.mxu2  ;;  %4576 = vmatmul.msk.bf16.gmra.mxu1 %vm538_vm3, %v2714_v13  ;;  %v3608_v4 = vsel %vm551_vm0, %v4695_v63, 0  ;;  %v4604_v13 = vrot.slane %v3044_v29, 9  ;;  %v3299_v63 = vor.u32 %v3298_v50, %v3295_v38  ;;  %v3101_v29 = vunpack.c.l.b16 %v3070_v56  ;;  %v5920_v50 = vld [vmem:[%s5648_s8 + $0x1c] sm:$0x1] }
 0x143   : > { %3617 = vmatpush.bf16.msra.mxu0 %v3608_v4  ;;  %v1649_v27 = vadd.f32 %v5763_v24, %v1567_v39  ;;  %v5887_v24 = vld [vmem:[%s5648_s8 + $0x24] sm:$0x1]  ;;  %v4627_v39 = vld [vmem:[%s5648_s8 + $0x8] sm:$0xf]  ;;  %v2892_v32 = vsel %vm5022_vm7, %v2887_v34, %v2891_v57  ;;  %v2911_v4 = vshll.u32 %v2855_v62, 16 }
 0x144   : > { %v3074_v7 = vsel %vm4991_vm4, %v4604_v13, %v3073_v59  ;;  %v3316_v28 = vshll.u32 %v5887_v24, 16  ;;  %v4628_v23 = vor.u32 %v4788_v19, %v4627_v39  ;;  %v3300_v53 = vrot.slane %v3299_v63, 4 }
 0x145   : > { %v5873_v11 = vpop.f32.mrf.mxu0  ;;  %v3102_v16 = vunpack.c.l.b16 %v3074_v7  ;;  %v5917_v30 = vunpack.c.l.b16 %v2892_v32  ;;  %v2913_v13 = vrot.slane %v2911_v4, 5  ;;  %v5924_v59 = vadd.f32 %v5769_v44, %v1649_v27  ;;  %v4653_v27 = vld [vmem:[%s5648_s8 + $0x28] sm:$0xf] }
 0x146   : > { %v1433_v2 = vpop.f32.mrf.mxu3  ;;  %v3318_v38 = vrot.slane %v3316_v28, 5  ;;  %v2917_v44 = vshll.u32 %v5920_v50, 16  ;;  %v3338_v19 = vshll.u32 %v4655_v43, 16  ;;  %v3046_v28 = vld [vmem:[%s5648_s8 + $0x18] sm:$0xe] }
 0x147   : > { %v5878_v37 = vpop.f32.mrf.mxu1  ;;  %v1446_v36 = vadd.f32 %v1433_v2, %v5675_v18  ;;  %v3302_v18 = vshll.u32 %v5882_v8, 16  ;;  %v2910_v2 = vrot.slane %v2908_v22, 4  ;;  %v3109_v57 = vpack.c.b16 %v3102_v16, %v3101_v29 }
 0x148   : > { %4555 = vmatmul.msk.bf16.gmra.mxu0 %vm538_vm3, %v2592_v21  ;;  %v3313_v21 = vor.u32 %v3312_v61, %v3309_v42  ;;  %v2900_v42 = vor.u32 %v2899_v5, %v2896_v51  ;;  %v2919_v32 = vrot.slane %v2917_v44, 5 }
 0x149   : > { %v1568_v58 = vadd.f32 %v5814_v46, %v1446_v36  ;;  %v2878_v46 = vsel %vm5022_vm7, %v2873_v6, %v2877_v10  ;;  %v3304_v45 = vrot.slane %v3302_v18, 5  ;;  %v3045_v36 = vld [vmem:[%s5648_s8 + $0x10] sm:$0xe]  ;;  %v2914_v39 = vor.u32 %v2913_v13, %v2910_v2 }
 0x14a   : > { %v5891_v33 = vpop.f32.mrf.mxu2  ;;  %v5915_v26 = vunpack.c.l.b16 %v2878_v46  ;;  %v3314_v1 = vrot.slane %v3313_v21, 4  ;;  %v2901_v7 = vrot.slane %v2900_v42, 4  ;;  %v4605_v46 = vrot.slane %v3045_v36, 9 }
 0x14b   : > { %4534 = vmatmul.msk.bf16.gmra.mxu3 %vm538_vm3, %v4530_v55  ;;  %v5910_v55 = vld [vmem:[%s5648_s8 + $0x14] sm:$0x1]  ;;  %v1650_v10 = vadd.f32 %v5789_v60, %v1568_v58  ;;  %v3324_v60 = vshll.u32 %v4653_v27, 16 }
 0x14c   : > { %v2903_v61 = vshll.u32 %v5910_v55, 16  ;;  %v2987_v9 = vpack.c.b16 %v5917_v30, %v5915_v26  ;;  %v3319_v58 = vsel %vm5022_vm7, %v3314_v1, %v3318_v38  ;;  %v3077_v16 = vrot.slane %v5910_v55, 5  ;;  %v5960_v38 = vld [vmem:[%s5648_s8 + $0x34] sm:$0x1] }
 0x14d   : > { %v5907_v48 = vpop.f32.mrf.mxu0  ;;  %v5943_v63 = vadd.f32 %v5803_v17, %v1650_v10  ;;  %v3326_v4 = vrot.slane %v3324_v60, 5  ;;  %v3381_v17 = vunpack.c.l.b16 %v3319_v58  ;;  %v2915_v30 = vrot.slane %v2914_v39, 4 }
 0x14e   : > { %v1436_v35 = vpop.f32.mrf.mxu3  ;;  %v2905_v21 = vrot.slane %v2903_v61, 5  ;;  %v4606_v1 = vrot.slane %v3046_v28, 9  ;;  %v3078_v10 = vsel %vm4991_vm4, %v4605_v46, %v3077_v16 }
 0x14f   : > { %4662 = vmatmul.msk.bf16.vlgmr.msrb.gmra.mxu2 %vm538_vm3, %v3386_v15  ;;  %v5913_v6 = vpop.f32.mrf.mxu1  ;;  %v1447_v52 = vadd.f32 %v1436_v35, %v5695_v41  ;;  %v3305_v41 = vsel %vm5022_vm7, %v3300_v53, %v3304_v45  ;;  %v3321_v15 = vshrl.u32 %v4653_v27, 16  ;;  %v5954_v53 = vld [vmem:[%s5648_s8 + $0x2c] sm:$0x1]  ;;  %v3340_v35 = vrot.slane %v3338_v19, 5 }
 0x150   : > { %v3380_v56 = vunpack.c.l.b16 %v3305_v41  ;;  %v2906_v42 = vsel %vm5022_vm7, %v2901_v7, %v2905_v21  ;;  %v3330_v61 = vshll.u32 %v5954_v53, 16  ;;  %v3344_v41 = vshll.u32 %v5960_v38, 16  ;;  %v5984_v7 = vld [vmem:[%s5648_s8 + $0x24] sm:$0x1] }
 0x151   : > { %v1569_v34 = vadd.f32 %v5873_v11, %v1447_v52  ;;  %v3335_v11 = vshrl.u32 %v4655_v43, 16  ;;  %v3323_v22 = vrot.slane %v3321_v15, 4  ;;  %v5980_v43 = vunpack.c.l.b16 %v2906_v42  ;;  %v2859_v15 = vld [vmem:[%s5648_s8 + $0x28] sm:$0xf] }
 0x152   : > { %v5930_v62 = vpop.f32.mrf.mxu2  ;;  %4641 = vmatmul.msk.bf16.vlgmr.msrb.gmra.mxu1 %vm538_vm3, %v4628_v23  ;;  %v2857_v23 = vld [vmem:[%s5648_s8 + $0x20] sm:$0xf]  ;;  %v3387_v36 = vpack.c.b16 %v3381_v17, %v3380_v56  ;;  %v3103_v58 = vunpack.c.l.b16 %v3078_v10  ;;  %v3332_v56 = vrot.slane %v3330_v61, 5  ;;  %v2939_v17 = vshll.u32 %v2859_v15, 16 }
 0x153   : > { %v1651_v51 = vadd.f32 %v5827_v0, %v1569_v34  ;;  %v3337_v45 = vrot.slane %v3335_v11, 4  ;;  %v3081_v0 = vrot.slane %v5920_v50, 5  ;;  %v2922_v52 = vshrl.u32 %v2857_v23, 16  ;;  %v4631_v50 = vld [vmem:[%s5648_s8 + $0x18] sm:$0xf] }
 0x154   : > { %v2925_v2 = vshll.u32 %v2857_v23, 16  ;;  %v4789_v34 = vld [vmem:[%s5648_s8 + $0x1c] sm:$0xf0] }
 0x155   : > { %v5945_v18 = vpop.f32.mrf.mxu0  ;;  %v3082_v44 = vsel %vm4991_vm4, %v4606_v1, %v3081_v0  ;;  %v2924_v60 = vrot.slane %v2922_v52, 4  ;;  %v4632_v39 = vor.u32 %v4789_v34, %v4631_v50  ;;  %v5996_v16 = vadd.f32 %v5850_v47, %v1651_v51  ;;  %v3047_v52 = vld [vmem:[%s5648_s8 + $0x20] sm:$0xe]  ;;  %v3048_v50 = vld [vmem:[%s5648_s8 + $0x28] sm:$0xe] }
 0x156   : > { %v1438_v5 = vpop.f32.mrf.mxu3  ;;  %v2927_v11 = vrot.slane %v2925_v2, 5  ;;  %v3104_v46 = vunpack.c.l.b16 %v3082_v44  ;;  %v4607_v34 = vrot.slane %v3047_v52, 9  ;;  %v4659_v44 = vld [vmem:[%s5648_s8 + $0x40] sm:$0xf] }
 0x157   : > { %v5950_v29 = vpop.f32.mrf.mxu1  ;;  %v1448_v26 = vadd.f32 %v1438_v5, %v5715_v31  ;;  %v3327_v31 = vor.u32 %v3326_v4, %v3323_v22  ;;  %v3346_v22 = vrot.slane %v3344_v41, 5  ;;  %v5992_v4 = vld [vmem:[%s5648_s8 + $0x2c] sm:$0x1]  ;;  %v2936_v5 = vshrl.u32 %v2859_v15, 16 }
 0x158   : > { %4612 = vmatmul.msk.bf16.vlgmr.msrb.gmra.mxu0 %vm538_vm3, %v3109_v57  ;;  %v3341_v57 = vor.u32 %v3340_v35, %v3337_v45  ;;  %v2928_v45 = vor.u32 %v2927_v11, %v2924_v60  ;;  %v2931_v35 = vshll.u32 %v5984_v7, 16  ;;  %v2945_v0 = vshll.u32 %v5992_v4, 16 }
 0x159   : > { %v1570_v55 = vadd.f32 %v5907_v48, %v1448_v26  ;;  %v2920_v48 = vsel %vm5022_vm7, %v2915_v30, %v2919_v32  ;;  %v3328_v19 = vrot.slane %v3327_v31, 4  ;;  %v3110_v47 = vpack.c.b16 %v3104_v46, %v3103_v58 }
 0x15a   : > { %v5963_v13 = vpop.f32.mrf.mxu2  ;;  %v5989_v28 = vunpack.c.l.b16 %v2920_v48  ;;  %v3342_v32 = vrot.slane %v3341_v57, 4  ;;  %v2938_v2 = vrot.slane %v2936_v5, 4  ;;  %v6020_v10 = vrot.slane %v2931_v35, 5  ;;  %v4657_v48 = vld [vmem:[%s5648_s8 + $0x38] sm:$0xf] }
 0x15b   : > { %4599 = vmatmul.msk.bf16.vlgmr.msrb.gmra.mxu3 %vm538_vm3, %v2987_v9  ;;  %v1652_v26 = vadd.f32 %v5878_v37, %v1570_v55  ;;  %v2941_v55 = vrot.slane %v2939_v17, 5  ;;  %v6023_v41 = vrot.slane %v2945_v0, 5  ;;  %v3349_v60 = vshrl.u32 %v4657_v48, 16  ;;  %v6041_v17 = vld [vmem:[%s5648_s8 + $0x3c] sm:$0x1] }
 0x15c   : > { %v3347_v51 = vsel %vm5022_vm7, %v3342_v32, %v3346_v22  ;;  %v3352_v11 = vshll.u32 %v4657_v48, 16  ;;  %v3363_v58 = vshrl.u32 %v4659_v44, 16  ;;  %v2863_v0 = vld [vmem:[%s5648_s8 + $0x38] sm:$0xf] }
 0x15d   : > { %v5978_v27 = vpop.f32.mrf.mxu0  ;;  %v6011_v37 = vadd.f32 %v5891_v33, %v1652_v26  ;;  %v3383_v57 = vunpack.c.l.b16 %v3347_v51  ;;  %v3085_v33 = vrot.slane %v5984_v7, 5  ;;  %v4608_v7 = vrot.slane %v3048_v50, 9 }
 0x15e   : > { %v1941_v9 = vpop.f32.mrf.mxu3  ;;  %v3354_v46 = vrot.slane %v3352_v11, 5  ;;  %v3365_v32 = vrot.slane %v3363_v58, 4 }
 0x15f   : > { %4663 = vmatmul.msk.bf16.gmra.mxu2 %vm538_vm3, %v3387_v36  ;;  %v5987_v21 = vpop.f32.mrf.mxu1  ;;  %v1961_v23 = vadd.f32 %v1941_v9, %v5734_v3  ;;  %v3333_v3 = vsel %vm5022_vm7, %v3328_v19, %v3332_v56  ;;  %v6018_v36 = vrot.slane %v2928_v45, 4  ;;  %v2942_v56 = vor.u32 %v2941_v55, %v2938_v2  ;;  %v4635_v9 = vld [vmem:[%s5648_s8 + $0x28] sm:$0xf]  ;;  %v2861_v45 = vld [vmem:[%s5648_s8 + $0x30] sm:$0xf] }
 0x160   : > { %v3382_v61 = vunpack.c.l.b16 %v3333_v3  ;;  %v3086_v26 = vsel %vm4991_vm4, %v4607_v34, %v3085_v33  ;;  %v3358_v3 = vshll.u32 %v6041_v17, 16  ;;  %v2950_v55 = vshrl.u32 %v2861_v45, 16 }
 0x161   : > { %v2044_v30 = vadd.f32 %v5945_v18, %v1961_v23  ;;  %v2988_v18 = vpack.c.b16 %v5989_v28, %v5980_v43  ;;  %v3351_v28 = vrot.slane %v3349_v60, 4  ;;  %v2943_v52 = vrot.slane %v2942_v56, 4 }
 0x162   : > { %v6001_v1 = vpop.f32.mrf.mxu2  ;;  %4642 = vmatmul.msk.bf16.gmra.mxu1 %vm538_vm3, %v4632_v39  ;;  %v3366_v39 = vshll.u32 %v4659_v44, 16  ;;  %v3388_v35 = vpack.c.b16 %v3383_v57, %v3382_v61  ;;  %v2934_v61 = vsel %vm5022_vm7, %v6018_v36, %v6020_v10  ;;  %v3105_v50 = vunpack.c.l.b16 %v3086_v26 }
 0x163   : > { %v2238_v42 = vadd.f32 %v5913_v6, %v2044_v30  ;;  %v3355_v30 = vor.u32 %v3354_v46, %v3351_v28  ;;  %v2967_v60 = vshll.u32 %v2863_v0, 16  ;;  %v2948_v36 = vsel %vm5022_vm7, %v2943_v52, %v6023_v41 }
 0x164   : > { %v3368_v22 = vrot.slane %v3366_v39, 5  ;;  %v2862_v39 = vld [vmem:[%s5648_s8 + $0x34] sm:$0x1]  ;;  %v2952_v56 = vrot.slane %v2950_v55, 4 }
 0x165   : > { %v6016_v31 = vpop.f32.mrf.mxu0  ;;  %v6029_v43 = vadd.f32 %v5930_v62, %v2238_v42  ;;  %v3089_v62 = vrot.slane %v5992_v4, 5  ;;  %v4790_v4 = vld [vmem:[%s5648_s8 + $0x2c] sm:$0xf0]  ;;  %v2953_v42 = vshll.u32 %v2861_v45, 16  ;;  %v3356_v44 = vrot.slane %v3355_v30, 4 }
 0x166   : > { %v1943_v6 = vpop.f32.mrf.mxu3  ;;  %v4636_v34 = vor.u32 %v4790_v4, %v4635_v9  ;;  %v2983_v9 = vunpack.c.l.b16 %v2934_v61  ;;  %v2984_v45 = vunpack.c.l.b16 %v2948_v36  ;;  %v2959_v26 = vshll.u32 %v2862_v39, 16 }
 0x167   : > { %v6031_v15 = vpop.f32.mrf.mxu1  ;;  %v1962_v19 = vadd.f32 %v1943_v6, %v5760_v25  ;;  %v6044_v25 = vld [vmem:[%s5648_s8 + $0x44] sm:$0x1]  ;;  %v3360_v6 = vrot.slane %v3358_v3, 5 }
 0x168   : > { %4613 = vmatmul.msk.bf16.gmra.mxu0 %vm538_vm3, %v3110_v47  ;;  %v3369_v47 = vor.u32 %v3368_v22, %v3365_v32  ;;  %v3372_v51 = vshll.u32 %v6044_v25, 16  ;;  %v2969_v32 = vrot.slane %v2967_v60, 5  ;;  %v3050_v22 = vld [vmem:[%s5648_s8 + $0x38] sm:$0xe] }
 0x169   : > { %v2045_v23 = vadd.f32 %v5978_v27, %v1962_v19  ;;  %v3090_v27 = vsel %vm4991_vm4, %v4608_v7, %v3089_v62  ;;  %v2864_v19 = vld [vmem:[%s5648_s8 + $0x3c] sm:$0x1]  ;;  %v2955_v7 = vrot.slane %v2953_v42, 5  ;;  %v3361_v41 = vsel %vm5022_vm7, %v3356_v44, %v3360_v6 }
 0x16a   : > { %v6038_v5 = vpop.f32.mrf.mxu2  ;;  %v3106_v48 = vunpack.c.l.b16 %v3090_v27  ;;  %v3370_v10 = vrot.slane %v3369_v47, 4  ;;  %v3374_v58 = vrot.slane %v3372_v51, 5  ;;  %v2973_v30 = vshll.u32 %v2864_v19, 16 }
 0x16b   : > { %4600 = vmatmul.msk.bf16.gmra.mxu3 %vm538_vm3, %v2988_v18  ;;  %v2964_v18 = vshrl.u32 %v2863_v0, 16  ;;  %v2956_v52 = vor.u32 %v2955_v7, %v2952_v56  ;;  %v3093_v47 = vrot.slane %v2862_v39, 5  ;;  %v4610_v51 = vrot.slane %v3050_v22, 9  ;;  %v4717_v39 = vld [vmem:[%s5648_s8 + $0x14] sm:$0x1] }
 0x16c   : > { %v3375_v4 = vsel %vm5022_vm7, %v3370_v10, %v3374_v58  ;;  %v3097_v42 = vrot.slane %v2864_v19, 5  ;;  %v4639_v10 = vld [vmem:[%s5648_s8 + $0x38] sm:$0xf]  ;;  %v4791_v58 = vld [vmem:[%s5648_s8 + $0x3c] sm:$0xf0] }
 0x16d   : > { %v2031_v2 = vpop.f32.mrf.mxu0  ;;  %v2966_v46 = vrot.slane %v2964_v18, 4  ;;  %v4737_v19 = vld [vmem:[%s5648_s8 + $0x10] sm:$0xe]  ;;  %v4719_v56 = vld [vmem:[%s5648_s8 + $0x1c] sm:$0x1]  ;;  %v4640_v22 = vor.u32 %v4791_v58, %v4639_v10 }
 0x16e   : > { %v1946_v57 = vpop.f32.mrf.mxu3  ;;  %v3098_v36 = vsel %vm4991_vm4, %v4610_v51, %v3097_v42  ;;  %v3673_v51 = vshll.u32 %v4717_v39, 16  ;;  %v4666_v58 = vld [vmem:[%s5648_s8 + $0x8] sm:$0xe] }
 0x16f   : > { %4664 = vmatmul.msk.bf16.gmra.mxu2 %vm538_vm3, %v3388_v35  ;;  %v6061_v33 = vpop.f32.mrf.mxu1  ;;  %v1963_v11 = vadd.f32 %v1946_v57, %v5787_v54  ;;  %v3049_v54 = vld [vmem:[%s5648_s8 + $0x30] sm:$0xe]  ;;  %v3111_v35 = vpack.c.b16 %v3106_v48, %v3105_v50  ;;  %v2970_v55 = vor.u32 %v2969_v32, %v2966_v46  ;;  %v2989_v57 = vpack.c.b16 %v2984_v45, %v2983_v9 }
 0x170   : > { %v4609_v27 = vrot.slane %v3049_v54, 9  ;;  %v2961_v48 = vrot.slane %v2959_v26, 5  ;;  %v3108_v32 = vunpack.c.l.b16 %v3098_v36  ;;  %v4745_v45 = vrot.slane %v4737_v19, 9  ;;  %v4718_v26 = vld [vmem:[%s5648_s8 + $0x18] sm:$0xf] }
 0x171   : > { %v2046_v62 = vadd.f32 %v6016_v31, %v1963_v11  ;;  %v2239_v31 = vadd.f32 %v5950_v29, %v2045_v23  ;;  %v3384_v29 = vunpack.c.l.b16 %v3361_v41  ;;  %v2971_v60 = vrot.slane %v2970_v55, 4  ;;  %v4716_v41 = vld [vmem:[%s5648_s8 + $0x10] sm:$0xf] }
 0x172   : > { %v6070_v28 = vpop.f32.mrf.mxu2  ;;  %4643 = vmatmul.msk.bf16.gmra.mxu1 %vm538_vm3, %v4636_v34  ;;  %v3094_v11 = vsel %vm4991_vm4, %v4609_v27, %v3093_v47  ;;  %v3667_v47 = vshll.u32 %v4716_v41, 16 }
 0x173   : > { %v2240_v3 = vadd.f32 %v5987_v21, %v2046_v62  ;;  %v6082_v61 = vadd.f32 %v5963_v13, %v2239_v31  ;;  %v3385_v21 = vunpack.c.l.b16 %v3375_v4  ;;  %v2957_v13 = vrot.slane %v2956_v52, 4 }
 0x174   : > { %v3107_v46 = vunpack.c.l.b16 %v3094_v11  ;;  %v3871_v31 = vrot.slane %v4719_v56, 5 }
 0x175   : > { %v2034_v0 = vpop.f32.mrf.mxu0  ;;  %v6085_v50 = vadd.f32 %v6001_v1, %v2240_v3  ;;  %v2975_v1 = vrot.slane %v2973_v30, 5  ;;  %v2962_v9 = vsel %vm5022_vm7, %v2957_v13, %v2961_v48  ;;  %v3664_v3 = vshrl.u32 %v4716_v41, 16 }
 0x176   : > { %v1948_v34 = vpop.f32.mrf.mxu3  ;;  %v2985_v27 = vunpack.c.l.b16 %v2962_v9  ;;  %v3112_v42 = vpack.c.b16 %v3108_v32, %v3107_v46  ;;  %v3669_v13 = vrot.slane %v3667_v47, 5  ;;  %v3681_v48 = vshll.u32 %v4718_v26, 16  ;;  %v4739_v47 = vld [vmem:[%s5648_s8 + $0x20] sm:$0xe] }
 0x177   : > { %v6087_v18 = vpop.f32.mrf.mxu1  ;;  %v1964_v23 = vadd.f32 %v1948_v34, %v5863_v20  ;;  %v3389_v20 = vpack.c.b16 %v3385_v21, %v3384_v29  ;;  %v2976_v54 = vsel %vm5022_vm7, %v2971_v60, %v2975_v1  ;;  %v3666_v34 = vrot.slane %v3664_v3, 4 }
 0x178   : > { %4614 = vmatmul.msk.bf16.gmra.mxu0 %vm538_vm3, %v3111_v35  ;;  %v3867_v35 = vrot.slane %v4717_v39, 5  ;;  %v2986_v55 = vunpack.c.l.b16 %v2976_v54  ;;  %v3678_v29 = vshrl.u32 %v4718_v26, 16  ;;  %v3683_v36 = vrot.slane %v3681_v48, 5  ;;  %v4720_v48 = vld [vmem:[%s5648_s8 + $0x20] sm:$0xf] }
 0x179   : > { %v2047_v44 = vadd.f32 %v2031_v2, %v1964_v23  ;;  %v4738_v2 = vld [vmem:[%s5648_s8 + $0x18] sm:$0xe]  ;;  %v3670_v11 = vor.u32 %v3669_v13, %v3666_v34  ;;  %v3472_v41 = vrot.slane %v5783_v40, 5  ;;  %v4740_v34 = vld [vmem:[%s5648_s8 + $0x28] sm:$0xe] }
 0x17a   : > { %v6091_v6 = vpop.f32.mrf.mxu2  ;;  %v3680_v1 = vrot.slane %v3678_v29, 4  ;;  %v4792_v40 = vld [vmem:[%s5648_s8 + $0x14] sm:$0xf0] }
 0x17b   : > { %4601 = vmatmul.msk.bf16.gmra.mxu3 %vm538_vm3, %v2989_v57  ;;  %v2241_v7 = vadd.f32 %v6031_v15, %v2047_v44  ;;  %v4746_v15 = vrot.slane %v4738_v2, 9  ;;  %v3868_v57 = vsel %vm4991_vm4, %v4745_v45, %v3867_v35  ;;  %v3687_v44 = vshll.u32 %v4719_v56, 16 }
 0x17c   : > { %v3671_v39 = vrot.slane %v3670_v11, 4  ;;  %v3684_v19 = vor.u32 %v3683_v36, %v3680_v1  ;;  %v3899_v56 = vunpack.c.l.b16 %v3868_v57  ;;  %v4674_v45 = vrot.slane %v4666_v58, 9 }
 0x17d   : > { %v2036_v62 = vpop.f32.mrf.mxu0  ;;  %v6123_v60 = vadd.f32 %v6038_v5, %v2241_v7  ;;  %v3689_v2 = vrot.slane %v3687_v44, 5  ;;  %v4667_v5 = vld [vmem:[%s5648_s8 + $0x10] sm:$0xe]  ;;  %v3468_v35 = vrot.slane %v5780_v14, 5  ;;  %v4747_v57 = vrot.slane %v4739_v47, 9 }
 0x17e   : > { %v1951_v4 = vpop.f32.mrf.mxu3  ;;  %v4698_v14 = vld [vmem:[%s5648_s8 + $0x10] sm:$0xf]  ;;  %v3692_v11 = vshrl.u32 %v4720_v48, 16 }
 0x17f   : > { %4665 = vmatmul.msk.bf16.gmra.mxu2 %vm538_vm3, %v3389_v20  ;;  %v6112_v30 = vpop.f32.mrf.mxu1  ;;  %v1965_v52 = vadd.f32 %v1951_v4, %v5924_v59  ;;  %v3872_v59 = vsel %vm4991_vm4, %v4746_v15, %v3871_v31  ;;  %v4699_v44 = vor.u32 %v4792_v40, %v4698_v14 }
 0x180   : > { %v3900_v54 = vunpack.c.l.b16 %v3872_v59 }
 0x181   : > { %v2048_v21 = vadd.f32 %v2034_v0, %v1965_v52  ;;  %v3675_v0 = vrot.slane %v3673_v51, 5 }
 0x182   : > { %v6115_v23 = vpop.f32.mrf.mxu2  ;;  %4644 = vmatmul.msk.bf16.gmra.mxu1 %vm538_vm3, %v4640_v22  ;;  %v2990_v22 = vpack.c.b16 %v2986_v55, %v2985_v27  ;;  %v3907_v3 = vpack.c.b16 %v3900_v54, %v3899_v56  ;;  %v4721_v27 = vld [vmem:[%s5648_s8 + $0x24] sm:$0x1]  ;;  %v3469_v55 = vsel %vm4991_vm4, %v4674_v45, %v3468_v35 }
 0x183   : > { %v2242_v10 = vadd.f32 %v6061_v33, %v2048_v21  ;;  %v3676_v33 = vsel %vm5022_vm7, %v3671_v39, %v3675_v0  ;;  %v3875_v13 = vrot.slane %v4721_v27, 5  ;;  %v3695_v0 = vshll.u32 %v4720_v48, 16 }
 0x184   : > { %v3777_v31 = vunpack.c.l.b16 %v3676_v33  ;;  %v3701_v39 = vshll.u32 %v4721_v27, 16 }
 0x185   : > { %v2039_v20 = vpop.f32.mrf.mxu0  ;;  %v6128_v9 = vadd.f32 %v6070_v28, %v2242_v10  ;;  %v3685_v28 = vrot.slane %v3684_v19, 4  ;;  %v4748_v10 = vrot.slane %v4740_v34, 9  ;;  %v3500_v19 = vunpack.c.l.b16 %v3469_v55 }
 0x186   : > { %v1953_v46 = vpop.f32.mrf.mxu3  ;;  %v3697_v56 = vrot.slane %v3695_v0, 5  ;;  %v4725_v0 = vld [vmem:[%s5648_s8 + $0x34] sm:$0x1] }
 0x187   : > { %v6130_v32 = vpop.f32.mrf.mxu1  ;;  %v1966_v7 = vadd.f32 %v1953_v46, %v5943_v63  ;;  %v4675_v63 = vrot.slane %v4667_v5, 9  ;;  %v3690_v15 = vsel %vm5022_vm7, %v3685_v28, %v3689_v2  ;;  %v3694_v46 = vrot.slane %v3692_v11, 4 }
 0x188   : > { %4615 = vmatmul.msk.bf16.gmra.mxu0 %vm538_vm3, %v3112_v42  ;;  %v3778_v52 = vunpack.c.l.b16 %v3690_v15  ;;  %v4723_v42 = vld [vmem:[%s5648_s8 + $0x2c] sm:$0x1]  ;;  %v3703_v28 = vrot.slane %v3701_v39, 5  ;;  %v4727_v39 = vld [vmem:[%s5648_s8 + $0x3c] sm:$0x1] }
 0x189   : > { %v2049_v26 = vadd.f32 %v2036_v62, %v1966_v7  ;;  %v3473_v29 = vsel %vm4991_vm4, %v4675_v63, %v3472_v41  ;;  %v3879_v58 = vrot.slane %v4723_v42, 5  ;;  %v3876_v7 = vsel %vm4991_vm4, %v4747_v57, %v3875_v13 }
 0x18a   : > { %v6139_v4 = vpop.f32.mrf.mxu2  ;;  %v3785_v21 = vpack.c.b16 %v3778_v52, %v3777_v31  ;;  %v3501_v2 = vunpack.c.l.b16 %v3473_v29  ;;  %v3715_v45 = vshll.u32 %v4723_v42, 16  ;;  %v4669_v52 = vld [vmem:[%s5648_s8 + $0x20] sm:$0xe] }
 0x18b   : > { %4602 = vmatmul.msk.bf16.gmra.mxu3 %vm538_vm3, %v2990_v22  ;;  %v2243_v62 = vadd.f32 %v6087_v18, %v2049_v26  ;;  %v4722_v18 = vld [vmem:[%s5648_s8 + $0x28] sm:$0xf]  ;;  %v4677_v57 = vrot.slane %v4669_v52, 9 }
 0x18c   : > { %v3706_v22 = vshrl.u32 %v4722_v18, 16  ;;  %v3709_v33 = vshll.u32 %v4722_v18, 16  ;;  %v3717_v47 = vrot.slane %v3715_v45, 5  ;;  %v3508_v34 = vpack.c.b16 %v3501_v2, %v3500_v19  ;;  %v4742_v19 = vld [vmem:[%s5648_s8 + $0x38] sm:$0xe] }
 0x18d   : > { %v2041_v51 = vpop.f32.mrf.mxu0  ;;  %v6167_v35 = vadd.f32 %v6091_v6, %v2243_v62  ;;  %v3901_v6 = vunpack.c.l.b16 %v3876_v7  ;;  %v4724_v7 = vld [vmem:[%s5648_s8 + $0x30] sm:$0xf] }
 0x18e   : > { %v1956_v59 = vpop.f32.mrf.mxu3  ;;  %v3708_v41 = vrot.slane %v3706_v22, 4  ;;  %v3711_v26 = vrot.slane %v3709_v33, 5  ;;  %v3723_v45 = vshll.u32 %v4724_v7, 16 }
 0x18f   : > { %4754 = vmatmul.msk.bf16.vlgmr.msra.gmra.mxu2 %vm538_vm3, %v3907_v3  ;;  %v6157_v1 = vpop.f32.mrf.mxu1  ;;  %v1967_v36 = vadd.f32 %v1956_v59, %v5996_v16  ;;  %v3698_v16 = vor.u32 %v3697_v56, %v3694_v46  ;;  %v4668_v3 = vld [vmem:[%s5648_s8 + $0x18] sm:$0xe]  ;;  %v3480_v59 = vrot.slane %v5887_v24, 5 }
 0x190   : > { %v3712_v27 = vor.u32 %v3711_v26, %v3708_v41  ;;  %v4750_v41 = vrot.slane %v4742_v19, 9  ;;  %v3887_v26 = vrot.slane %v4727_v39, 5  ;;  %v3484_v19 = vrot.slane %v5954_v53, 5  ;;  %v4706_v53 = vld [vmem:[%s5648_s8 + $0x30] sm:$0xf] }
 0x191   : > { %v2050_v54 = vadd.f32 %v2039_v20, %v1967_v36  ;;  %v3880_v20 = vsel %vm4991_vm4, %v4748_v10, %v3879_v58  ;;  %v3699_v31 = vrot.slane %v3698_v16, 4  ;;  %v4741_v36 = vld [vmem:[%s5648_s8 + $0x30] sm:$0xe]  ;;  %v4793_v10 = vld [vmem:[%s5648_s8 + $0x24] sm:$0xf0]  ;;  %v3481_v2 = vsel %vm4991_vm4, %v4677_v57, %v3480_v59 }
 0x192   : > { %v6161_v5 = vpop.f32.mrf.mxu2  ;;  %4733 = vmatmul.msk.bf16.vlgmr.msra.gmra.mxu1 %vm538_vm3, %v3785_v21  ;;  %v3902_v62 = vunpack.c.l.b16 %v3880_v20  ;;  %v3713_v29 = vrot.slane %v3712_v27, 4  ;;  %v3476_v21 = vrot.slane %v5882_v8, 5  ;;  %v4702_v8 = vld [vmem:[%s5648_s8 + $0x20] sm:$0xf]  ;;  %v4749_v56 = vrot.slane %v4741_v36, 9 }
 0x193   : > { %v2244_v63 = vadd.f32 %v6112_v30, %v2050_v54  ;;  %v3704_v42 = vsel %vm5022_vm7, %v3699_v31, %v3703_v28  ;;  %v3883_v54 = vrot.slane %v4725_v0, 5  ;;  %v4703_v16 = vor.u32 %v4793_v10, %v4702_v8 }
 0x194   : > { %v3779_v18 = vunpack.c.l.b16 %v3704_v42  ;;  %v3908_v11 = vpack.c.b16 %v3902_v62, %v3901_v6  ;;  %v3720_v28 = vshrl.u32 %v4724_v7, 16  ;;  %v3725_v27 = vrot.slane %v3723_v45, 5  ;;  %v4794_v45 = vld [vmem:[%s5648_s8 + $0x34] sm:$0xf0] }
 0x195   : > { %v2617_v15 = vpop.f32.mrf.mxu0  ;;  %v6175_v14 = vadd.f32 %v6115_v23, %v2244_v63  ;;  %v4676_v23 = vrot.slane %v4668_v3, 9  ;;  %v3729_v63 = vshll.u32 %v4725_v0, 16  ;;  %v3503_v3 = vunpack.c.l.b16 %v3481_v2 }
 0x196   : > { %v1958_v40 = vpop.f32.mrf.mxu3  ;;  %v3722_v52 = vrot.slane %v3720_v28, 4  ;;  %v3884_v6 = vsel %vm4991_vm4, %v4749_v56, %v3883_v54  ;;  %v3488_v54 = vrot.slane %v5960_v38, 5  ;;  %v4743_v28 = vld [vmem:[%s5648_s8 + $0x40] sm:$0xe] }
 0x197   : > { %v6177_v55 = vpop.f32.mrf.mxu1  ;;  %v1968_v30 = vadd.f32 %v1958_v40, %v6011_v37  ;;  %v3718_v37 = vsel %vm5022_vm7, %v3713_v29, %v3717_v47  ;;  %v3477_v24 = vsel %vm4991_vm4, %v4676_v23, %v3476_v21 }
 0x198   : > { %4712 = vmatmul.msk.bf16.vlgmr.msra.gmra.mxu0 %vm538_vm3, %v4699_v44  ;;  %v3780_v44 = vunpack.c.l.b16 %v3718_v37  ;;  %v3502_v31 = vunpack.c.l.b16 %v3477_v24  ;;  %v4670_v37 = vld [vmem:[%s5648_s8 + $0x28] sm:$0xe] }
 0x199   : > { %v2051_v13 = vadd.f32 %v2041_v51, %v1968_v30  ;;  %v3731_v30 = vrot.slane %v3729_v63, 5 }
 0x19a   : > { %v6184_v48 = vpop.f32.mrf.mxu2  ;;  %v3786_v46 = vpack.c.b16 %v3780_v44, %v3779_v18  ;;  %v4671_v18 = vld [vmem:[%s5648_s8 + $0x30] sm:$0xe]  ;;  %v3509_v24 = vpack.c.b16 %v3503_v3, %v3502_v31  ;;  %v4751_v3 = vrot.slane %v4743_v28, 9 }
 0x19b   : > { %4683 = vmatmul.msk.bf16.vlgmr.msra.gmra.mxu3 %vm538_vm3, %v3508_v34  ;;  %v2245_v51 = vadd.f32 %v6130_v32, %v2051_v13  ;;  %v4726_v32 = vld [vmem:[%s5648_s8 + $0x38] sm:$0xf]  ;;  %v3743_v34 = vshll.u32 %v4727_v39, 16  ;;  %v4679_v2 = vrot.slane %v4671_v18, 9 }
 0x19c   : > { %v3734_v62 = vshrl.u32 %v4726_v32, 16  ;;  %v3737_v42 = vshll.u32 %v4726_v32, 16  ;;  %v4729_v32 = vld [vmem:[%s5648_s8 + $0x44] sm:$0x1] }
 0x19d   : > { %v2619_v58 = vpop.f32.mrf.mxu0  ;;  %v6213_v29 = vadd.f32 %v6139_v4, %v2245_v51  ;;  %v3745_v44 = vrot.slane %v3743_v34, 5  ;;  %v3903_v4 = vunpack.c.l.b16 %v3884_v6  ;;  %v3489_v63 = vsel %vm4991_vm4, %v4679_v2, %v3488_v54 }
 0x19e   : > { %v2423_v22 = vpop.f32.mrf.mxu3  ;;  %v3736_v23 = vrot.slane %v3734_v62, 4  ;;  %v3739_v21 = vrot.slane %v3737_v42, 5  ;;  %v4707_v62 = vor.u32 %v4794_v45, %v4706_v53 }
 0x19f   : > { %4755 = vmatmul.msk.bf16.gmra.mxu2 %vm538_vm3, %v3908_v11  ;;  %v6203_v33 = vpop.f32.mrf.mxu1  ;;  %v2443_v20 = vadd.f32 %v2423_v22, %v6029_v43  ;;  %v3726_v43 = vor.u32 %v3725_v27, %v3722_v52  ;;  %v3891_v52 = vrot.slane %v4729_v32, 5  ;;  %v4728_v27 = vld [vmem:[%s5648_s8 + $0x40] sm:$0xf] }
 0x1a0   : > { %v3740_v11 = vor.u32 %v3739_v21, %v3736_v23  ;;  %v3748_v42 = vshrl.u32 %v4728_v27, 16  ;;  %v3757_v23 = vshll.u32 %v4729_v32, 16 }
 0x1a1   : > { %v2637_v47 = vadd.f32 %v2617_v15, %v2443_v20  ;;  %v3888_v15 = vsel %vm4991_vm4, %v4750_v41, %v3887_v26  ;;  %v3727_v59 = vrot.slane %v3726_v43, 4  ;;  %v4731_v41 = vld [vmem:[%s5648_s8 + $0x4c] sm:$0x1]  ;;  %v4744_v26 = vld [vmem:[%s5648_s8 + $0x48] sm:$0xe]  ;;  %v3751_v43 = vshll.u32 %v4728_v27, 16 }
 0x1a2   : > { %v6207_v40 = vpop.f32.mrf.mxu2  ;;  %4734 = vmatmul.msk.bf16.gmra.mxu1 %vm538_vm3, %v3786_v46  ;;  %v3904_v10 = vunpack.c.l.b16 %v3888_v15  ;;  %v3741_v39 = vrot.slane %v3740_v11, 4  ;;  %v4752_v34 = vrot.slane %v4744_v26, 9  ;;  %v3895_v15 = vrot.slane %v4731_v41, 5 }
 0x1a3   : > { %v2759_v57 = vadd.f32 %v6157_v1, %v2637_v47  ;;  %v3732_v51 = vsel %vm5022_vm7, %v3727_v59, %v3731_v30  ;;  %v3750_v59 = vrot.slane %v3748_v42, 4  ;;  %v3492_v27 = vrot.slane %v6041_v17, 5  ;;  %v4710_v17 = vld [vmem:[%s5648_s8 + $0x40] sm:$0xf] }
 0x1a4   : > { %v3781_v7 = vunpack.c.l.b16 %v3732_v51  ;;  %v3909_v22 = vpack.c.b16 %v3904_v10, %v3903_v4  ;;  %v3759_v51 = vrot.slane %v3757_v23, 5 }
 0x1a5   : > { %v2622_v13 = vpop.f32.mrf.mxu0  ;;  %v6221_v0 = vadd.f32 %v6161_v5, %v2759_v57  ;;  %v4678_v5 = vrot.slane %v4670_v37, 9  ;;  %v3505_v57 = vunpack.c.l.b16 %v3489_v63  ;;  %v3753_v37 = vrot.slane %v3751_v43, 5 }
 0x1a6   : > { %v2425_v36 = vpop.f32.mrf.mxu3 }
 0x1a7   : > { %v6223_v8 = vpop.f32.mrf.mxu1  ;;  %v2444_v1 = vadd.f32 %v2425_v36, %v6082_v61  ;;  %v3746_v61 = vsel %vm5022_vm7, %v3741_v39, %v3745_v44  ;;  %v3485_v38 = vsel %vm4991_vm4, %v4678_v5, %v3484_v19  ;;  %v3892_v44 = vsel %vm4991_vm4, %v4751_v3, %v3891_v52 }
 0x1a8   : > { %4713 = vmatmul.msk.bf16.gmra.mxu0 %vm538_vm3, %v4703_v16  ;;  %v3782_v16 = vunpack.c.l.b16 %v3746_v61  ;;  %v3504_v21 = vunpack.c.l.b16 %v3485_v38  ;;  %v3754_v10 = vor.u32 %v3753_v37, %v3750_v59  ;;  %v4672_v38 = vld [vmem:[%s5648_s8 + $0x38] sm:$0xe] }
 0x1a9   : > { %v2638_v46 = vadd.f32 %v2619_v58, %v2444_v1  ;;  %v3771_v1 = vshll.u32 %v4731_v41, 16  ;;  %v4673_v41 = vld [vmem:[%s5648_s8 + $0x40] sm:$0xe]  ;;  %v4680_v52 = vrot.slane %v4672_v38, 9 }
 0x1aa   : > { %v6230_v56 = vpop.f32.mrf.mxu2  ;;  %v3787_v31 = vpack.c.b16 %v3782_v16, %v3781_v7  ;;  %v3755_v2 = vrot.slane %v3754_v10, 4  ;;  %v3510_v53 = vpack.c.b16 %v3505_v57, %v3504_v21 }
 0x1ab   : > { %4684 = vmatmul.msk.bf16.gmra.mxu3 %vm538_vm3, %v3509_v24  ;;  %v2760_v58 = vadd.f32 %v6177_v55, %v2638_v46  ;;  %v4730_v55 = vld [vmem:[%s5648_s8 + $0x48] sm:$0xf]  ;;  %v3896_v24 = vsel %vm4991_vm4, %v4752_v34, %v3895_v15  ;;  %v3773_v54 = vrot.slane %v3771_v1, 5 }
 0x1ac   : > { %v3762_v36 = vshrl.u32 %v4730_v55, 16  ;;  %v3765_v4 = vshll.u32 %v4730_v55, 16  ;;  %v3906_v16 = vunpack.c.l.b16 %v3896_v24  ;;  %v3760_v32 = vsel %vm5022_vm7, %v3755_v2, %v3759_v51  ;;  %v4795_v34 = vld [vmem:[%s5648_s8 + $0x44] sm:$0xf0]  ;;  %s6356_s8 = scalar_lea.vmem %s6422_s5, %s4213_s19 }
 0x1ad   : > { %v2624_v20 = vpop.f32.mrf.mxu0  ;;  %v3783_v26 = vunpack.c.l.b16 %v3760_v32  ;;  %v4711_v21 = vor.u32 %v4795_v34, %v4710_v17 }
 0x1ae   : > { %v2428_v47 = vpop.f32.mrf.mxu3  ;;  %v3764_v39 = vrot.slane %v3762_v36, 4  ;;  %v3767_v5 = vrot.slane %v3765_v4, 5 }
 0x1af   : > { %4756 = vmatmul.msk.bf16.gmra.mxu2 %vm538_vm3, %v3909_v22  ;;  %v6249_v6 = vpop.f32.mrf.mxu1  ;;  %v2445_v30 = vadd.f32 %v2428_v47, %v6085_v50  ;;  %v6257_v50 = vadd.f32 %v6184_v48, %v2760_v58  ;;  %v3905_v48 = vunpack.c.l.b16 %v3892_v44  ;;  %v3496_v47 = vrot.slane %v6044_v25, 5 }
 0x1b0   : > { %v3768_v46 = vor.u32 %v3767_v5, %v3764_v39 }
 0x1b1   : > { %v2639_v18 = vadd.f32 %v2622_v13, %v2445_v30  ;;  %v3910_v63 = vpack.c.b16 %v3906_v16, %v3905_v48 }
 0x1b2   : > { %v2831_v11 = vpop.f32.mrf.mxu2  ;;  %4735 = vmatmul.msk.bf16.gmra.mxu1 %vm538_vm3, %v3787_v31 }
 0x1b3   : > { %v2761_v13 = vadd.f32 %v6203_v33, %v2639_v18  ;;  %v3769_v33 = vrot.slane %v3768_v46, 4 }
 0x1b5   : > { %v2627_v19 = vpop.f32.mrf.mxu0  ;;  %v6263_v61 = vadd.f32 %v6207_v40, %v2761_v13  ;;  %v3774_v40 = vsel %vm5022_vm7, %v3769_v33, %v3773_v54 }
 0x1b6   : > { %v2430_v7 = vpop.f32.mrf.mxu3  ;;  %v3784_v31 = vunpack.c.l.b16 %v3774_v40 }
 0x1b7   : > { %v2751_v22 = vpop.f32.mrf.mxu1  ;;  %v2446_v28 = vadd.f32 %v2430_v7, %v6123_v60 }
 0x1b8   : > { %4714 = vmatmul.msk.bf16.gmra.mxu0 %vm538_vm3, %v4707_v62  ;;  %v3788_v62 = vpack.c.b16 %v3784_v31, %v3783_v26 }
 0x1b9   : > { %v2640_v45 = vadd.f32 %v2624_v20, %v2446_v28  ;;  %v4681_v20 = vrot.slane %v4673_v41, 9 }
 0x1ba   : > { %v2833_v58 = vpop.f32.mrf.mxu2 }
 0x1bb   : > { %4685 = vmatmul.msk.bf16.gmra.mxu3 %vm538_vm3, %v3510_v53  ;;  %v2762_v60 = vadd.f32 %v6223_v8, %v2640_v45  ;;  %v3493_v8 = vsel %vm4991_vm4, %v4680_v52, %v3492_v27  ;;  %v3497_v30 = vsel %vm4991_vm4, %v4681_v20, %v3496_v47 }
 0x1bc   : > { %v3507_v23 = vunpack.c.l.b16 %v3497_v30 }
 0x1bd   : > { %v2629_v3 = vpop.f32.mrf.mxu0  ;;  %v6278_v49 = vadd.f32 %v6230_v56, %v2762_v60  ;;  %v3506_v56 = vunpack.c.l.b16 %v3493_v8 }
 0x1be   : > { %v2433_v55 = vpop.f32.mrf.mxu3 }
 0x1bf   : > { %4757 = vmatmul.msk.bf16.gmra.mxu2 %vm538_vm3, %v3910_v63  ;;  %v2754_v42 = vpop.f32.mrf.mxu1  ;;  %v2447_v43 = vadd.f32 %v2433_v55, %v6128_v9  ;;  %v3511_v12 = vpack.c.b16 %v3507_v23, %v3506_v56 }
 0x1c1   : > { %v2641_v15 = vadd.f32 %v2627_v19, %v2447_v43 }
 0x1c2   : > { %v2836_v25 = vpop.f32.mrf.mxu2  ;;  %4736 = vmatmul.msk.bf16.gmra.mxu1 %vm538_vm3, %v3788_v62 }
 0x1c3   : > { %v2763_v57 = vadd.f32 %v6249_v6, %v2641_v15 }
 0x1c5   : > { %v2632_v59 = vpop.f32.mrf.mxu0  ;;  %v6290_v37 = vadd.f32 %v2831_v11, %v2763_v57 }
 0x1c6   : > { %v2435_v9 = vpop.f32.mrf.mxu3 }
 0x1c7   : > { %v2756_v18 = vpop.f32.mrf.mxu1  ;;  %v2448_v44 = vadd.f32 %v2435_v9, %v6167_v35 }
 0x1c8   : > { %4715 = vmatmul.msk.bf16.gmra.mxu0 %vm538_vm3, %v4711_v21 }
 0x1c9   : > { %v2642_v36 = vadd.f32 %v2629_v3, %v2448_v44 }
 0x1ca   : > { %v2838_v4 = vpop.f32.mrf.mxu2 }
 0x1cb   : > { %4686 = vmatmul.msk.bf16.gmra.mxu3 %vm538_vm3, %v3511_v12  ;;  %v2764_v10 = vadd.f32 %v2751_v22, %v2642_v36 }
 0x1cd   : > { %v2634_v51 = vpop.f32.mrf.mxu0  ;;  %v6295_v1 = vadd.f32 %v2833_v58, %v2764_v10 }
 0x1ce   : > { %v2438_v24 = vpop.f32.mrf.mxu3 }
 0x1cf   : > { %v3220_v6 = vpop.f32.mrf.mxu1  ;;  %v2449_v11 = vadd.f32 %v2438_v24, %v6175_v14  ;;  %v6351_v24 = vld [vmem:[%s6418_s1] ss:$0 sm:$0xff] }
 0x1d1   : > { %v2643_v39 = vadd.f32 %v2632_v59, %v2449_v11 }
 0x1d2   : > { %v3414_v5 = vpop.f32.mrf.mxu2 }
 0x1d3   : > { %v2765_v13 = vadd.f32 %v2754_v42, %v2643_v39 }
 0x1d5   : > { %v3137_v19 = vpop.f32.mrf.mxu0  ;;  %v6298_v35 = vadd.f32 %v2836_v25, %v2765_v13 }
 0x1d6   : > { %v2440_v2 = vpop.f32.mrf.mxu3 }
 0x1d7   : > { %v3222_v46 = vpop.f32.mrf.mxu1  ;;  %v2450_v54 = vadd.f32 %v2440_v2, %v6213_v29 }
 0x1d9   : > { %v2644_v7 = vadd.f32 %v2634_v51, %v2450_v54 }
 0x1da   : > { %v3416_v48 = vpop.f32.mrf.mxu2 }
 0x1db   : > { %v2766_v22 = vadd.f32 %v2756_v18, %v2644_v7 }
 0x1dd   : > { %v3139_v16 = vpop.f32.mrf.mxu0  ;;  %v6301_v32 = vadd.f32 %v2838_v4, %v2766_v22 }
 0x1de   : > { %v3015_v28 = vpop.f32.mrf.mxu3 }
 0x1df   : > { %v3225_v53 = vpop.f32.mrf.mxu1  ;;  %v3035_v17 = vadd.f32 %v3015_v28, %v6221_v0 }
 0x1e1   : > { %v3157_v25 = vadd.f32 %v3137_v19, %v3035_v17 }
 0x1e2   : > { %v6303_v33 = vpop.f32.mrf.mxu2 }
 0x1e3   : > { %v3240_v57 = vadd.f32 %v3220_v6, %v3157_v25 }
 0x1e5   : > { %v3142_v14 = vpop.f32.mrf.mxu0  ;;  %v3434_v18 = vadd.f32 %v3414_v5, %v3240_v57 }
 0x1e6   : > { %v3017_v45 = vpop.f32.mrf.mxu3 }
 0x1e7   : > { %v6305_v58 = vpop.f32.mrf.mxu1  ;;  %v3036_v21 = vadd.f32 %v3017_v45, %v6257_v50 }
 0x1e9   : > { %v3158_v9 = vadd.f32 %v3139_v16, %v3036_v21 }
 0x1ea   : > { %v6307_v38 = vpop.f32.mrf.mxu2 }
 0x1eb   : > { %v3241_v51 = vadd.f32 %v3222_v46, %v3158_v9 }
 0x1ed   : > { %v3144_v41 = vpop.f32.mrf.mxu0  ;;  %v3435_v39 = vadd.f32 %v3416_v48, %v3241_v51 }
 0x1ee   : > { %v3020_v40 = vpop.f32.mrf.mxu3 }
 0x1ef   : > { %v6309_v26 = vpop.f32.mrf.mxu1  ;;  %v3037_v4 = vadd.f32 %v3020_v40, %v6263_v61 }
 0x1f1   : > { %v3159_v6 = vadd.f32 %v3142_v14, %v3037_v4 }
 0x1f2   : > { %v6311_v29 = vpop.f32.mrf.mxu2 }
 0x1f3   : > { %v3242_v7 = vadd.f32 %v3225_v53, %v3159_v6 }
 0x1f5   : > { %v6313_v63 = vpop.f32.mrf.mxu0  ;;  %v3436_v14 = vadd.f32 %v6303_v33, %v3242_v7 }
 0x1f6   : > { %v3022_v31 = vpop.f32.mrf.mxu3 }
 0x1f7   : > { %v6315_v60 = vpop.f32.mrf.mxu1  ;;  %v3038_v2 = vadd.f32 %v3022_v31, %v6278_v49 }
 0x1f9   : > { %v3160_v16 = vadd.f32 %v3144_v41, %v3038_v2 }
 0x1fa   : > { %v6317_v3 = vpop.f32.mrf.mxu2 }
 0x1fb   : > { %v3243_v49 = vadd.f32 %v6305_v58, %v3160_v16 }
 0x1fd   : > { %v6319_v52 = vpop.f32.mrf.mxu0 }
 0x1fe   : > { %v3025_v27 = vpop.f32.mrf.mxu3 }
 0x1ff   : > { %v6321_v20 = vpop.f32.mrf.mxu1 }
 0x202   : > { %v6323_v47 = vpop.f32.mrf.mxu2 }
 0x205   : > { %v6325_v62 = vpop.f32.mrf.mxu0 }
 0x206   : > { %v6327_v55 = vpop.f32.mrf.mxu3 }
 0x207   : > { %v6329_v42 = vpop.f32.mrf.mxu1 }
 0x20a   : > { %v6333_v8 = vpop.f32.mrf.mxu2 }
 0x20d   : > { %v6331_v43 = vpop.f32.mrf.mxu0 }
 0x20e   : > { %v6335_v30 = vpop.f32.mrf.mxu3 }
 0x20f   : > { %v3813_v15 = vpop.f32.mrf.mxu1 }
 0x212   : > { %v3935_v23 = vpop.f32.mrf.mxu2 }
 0x215   : > { %v3619_v34 = vpop.f32.mrf.mxu0 }
 0x216   : > { %v6339_v56 = vpop.f32.mrf.mxu3 }
 0x217   : > { %v3815_v0 = vpop.f32.mrf.mxu1 }
 0x21a   : > { %v3937_v36 = vpop.f32.mrf.mxu2 }
 0x21d   : > { %v3621_v59 = vpop.f32.mrf.mxu0 }
 0x21e   : > { %v3536_v44 = vpop.f32.mrf.mxu3 }
 0x21f   : > { %v3556_v12 = vadd.f32 %v3536_v44, %v3434_v18  ;;  %v3818_v46 = vpop.f32.mrf.mxu1  ;;  %v3437_v18 = vadd.f32 %v6307_v38, %v3243_v49 }
 0x221   : > { %v3639_v10 = vadd.f32 %v3619_v34, %v3556_v12  ;;  %v3039_v34 = vadd.f32 %v3025_v27, %v6290_v37 }
 0x222   : > { %v3940_v22 = vpop.f32.mrf.mxu2 }
 0x223   : > { %v3833_v50 = vadd.f32 %v3813_v15, %v3639_v10  ;;  %v3161_v33 = vadd.f32 %v6313_v63, %v3039_v34 }
 0x225   : > { %v3955_v11 = vadd.f32 %v3935_v23, %v3833_v50  ;;  %v3624_v61 = vpop.f32.mrf.mxu0  ;;  %v3244_v58 = vadd.f32 %v6309_v26, %v3161_v33 }
 0x226   : > { %v3538_v5 = vpop.f32.mrf.mxu3 }
 0x227   : > { %v3967_v13 = vadd.f32 %v6351_v24, %v3955_v11  ;;  %v3557_v19 = vadd.f32 %v3538_v5, %v3435_v39  ;;  %v3820_v21 = vpop.f32.mrf.mxu1  ;;  %v3438_v11 = vadd.f32 %v6311_v29, %v3244_v58 }
 0x229   : > { %3975 = vst [vmem:[%s6356_s8] sm:$0xff] %v3967_v13  ;;  %v3640_v54 = vadd.f32 %v3621_v59, %v3557_v19  ;;  %v3997_v31 = vmul.f32 %v3967_v13, %v3967_v13 }
 0x22a   : > { %v3942_v59 = vpop.f32.mrf.mxu2 }
 0x22b   : > { %v3834_v48 = vadd.f32 %v3815_v0, %v3640_v54  ;;  %v3040_v0 = vadd.f32 %v6327_v55, %v6295_v1  ;;  %v3041_v1 = vadd.f32 %v6335_v30, %v6298_v35 }
 0x22d   : > { %v3956_v28 = vadd.f32 %v3937_v36, %v3834_v48  ;;  %v3626_v15 = vpop.f32.mrf.mxu0  ;;  %v3162_v38 = vadd.f32 %v6319_v52, %v3040_v0  ;;  %v3163_v54 = vadd.f32 %v6325_v62, %v3041_v1 }
 0x22e   : > { %v3541_v45 = vpop.f32.mrf.mxu3 }
 0x22f   : > { %v3968_v40 = vadd.f32 %v6351_v24, %v3956_v28  ;;  %v3558_v17 = vadd.f32 %v3541_v45, %v3436_v14  ;;  %v3823_v50 = vpop.f32.mrf.mxu1  ;;  %v3245_v2 = vadd.f32 %v6315_v60, %v3162_v38  ;;  %v3246_v14 = vadd.f32 %v6321_v20, %v3163_v54 }
 0x230   : > { %v3042_v60 = vadd.f32 %v6339_v56, %v6301_v32 }
 0x231   : > { %3976 = vst [vmem:[%s6356_s8 + $0x8] sm:$0xff] %v3968_v40  ;;  %v3983_v25 = vadd.f32 %v3968_v40, %v3967_v13  ;;  %v3998_v53 = vmul.f32 %v3968_v40, %v3968_v40  ;;  %v3641_v23 = vadd.f32 %v3624_v61, %v3558_v17  ;;  %v3440_v49 = vadd.f32 %v6323_v47, %v3246_v14 }
 0x232   : > { %v3945_v39 = vpop.f32.mrf.mxu2 }
 0x233   : > { %v4005_v41 = vadd.f32 %v3998_v53, %v3997_v31  ;;  %v3835_v57 = vadd.f32 %v3818_v46, %v3641_v23 }
 0x235   : > { %v3957_v9 = vadd.f32 %v3940_v22, %v3835_v57  ;;  %v3629_v10 = vpop.f32.mrf.mxu0  ;;  %v3439_v22 = vadd.f32 %v6317_v3, %v3245_v2  ;;  %v3164_v3 = vadd.f32 %v6331_v43, %v3042_v60 }
 0x236   : > { %v3543_v44 = vpop.f32.mrf.mxu3 }
 0x237   : > { %v3969_v37 = vadd.f32 %v6351_v24, %v3957_v9  ;;  %v3559_v27 = vadd.f32 %v3543_v44, %v3437_v18  ;;  %v3825_v48 = vpop.f32.mrf.mxu1 }
 0x239   : > { %3977 = vst [vmem:[%s6356_s8 + $0x10] sm:$0xff] %v3969_v37  ;;  %v3984_v12 = vadd.f32 %v3983_v25, %v3969_v37  ;;  %v3999_v36 = vmul.f32 %v3969_v37, %v3969_v37  ;;  %v3642_v4 = vadd.f32 %v3626_v15, %v3559_v27 }
 0x23a   : > { %v3947_v30 = vpop.f32.mrf.mxu2 }
 0x23b   : > { %v4006_v63 = vadd.f32 %v4005_v41, %v3999_v36  ;;  %v3836_v51 = vadd.f32 %v3820_v21, %v3642_v4  ;;  %v3247_v41 = vadd.f32 %v6329_v42, %v3164_v3 }
 0x23d   : > { %v3958_v6 = vadd.f32 %v3942_v59, %v3836_v51  ;;  %v3631_v29 = vpop.f32.mrf.mxu0  ;;  %v3441_v47 = vadd.f32 %v6333_v8, %v3247_v41 }
 0x23e   : > { %v3546_v5 = vpop.f32.mrf.mxu3 }
 0x23f   : > { %v3970_v26 = vadd.f32 %v6351_v24, %v3958_v6  ;;  %v3560_v61 = vadd.f32 %v3546_v5, %v3438_v11  ;;  %v3828_v23 = vpop.f32.mrf.mxu1 }
 0x241   : > { %3978 = vst [vmem:[%s6356_s8 + $0x18] sm:$0xff] %v3970_v26  ;;  %v3985_v55 = vadd.f32 %v3984_v12, %v3970_v26  ;;  %v4000_v13 = vmul.f32 %v3970_v26, %v3970_v26  ;;  %v3643_v19 = vadd.f32 %v3629_v10, %v3560_v61 }
 0x242   : > { %v3950_v57 = vpop.f32.mrf.mxu2 }
 0x243   : > { %v4007_v46 = vadd.f32 %v4006_v63, %v4000_v13  ;;  %v3837_v52 = vadd.f32 %v3823_v50, %v3643_v19 }
 0x245   : > { %v3959_v7 = vadd.f32 %v3945_v39, %v3837_v52  ;;  %v3634_v31 = vpop.f32.mrf.mxu0 }
 0x246   : > { %v3548_v16 = vpop.f32.mrf.mxu3 }
 0x247   : > { %v3971_v28 = vadd.f32 %v6351_v24, %v3959_v7  ;;  %v3561_v35 = vadd.f32 %v3548_v16, %v3439_v22  ;;  %v3830_v12 = vpop.f32.mrf.mxu1 }
 0x249   : > { %3979 = vst [vmem:[%s6356_s8 + $0x20] sm:$0xff] %v3971_v28  ;;  %v3986_v45 = vadd.f32 %v3985_v55, %v3971_v28  ;;  %v4001_v40 = vmul.f32 %v3971_v28, %v3971_v28  ;;  %v3644_v62 = vadd.f32 %v3631_v29, %v3561_v35 }
 0x24a   : > { %v3952_v4 = vpop.f32.mrf.mxu2 }
 0x24b   : > { %v4008_v17 = vadd.f32 %v4007_v46, %v4001_v40  ;;  %v3838_v34 = vadd.f32 %v3825_v48, %v3644_v62 }
 0x24d   : > { %v3960_v15 = vadd.f32 %v3947_v30, %v3838_v34  ;;  %v3636_v37 = vpop.f32.mrf.mxu0 }
 0x24e   : > { %v3551_v25 = vpop.f32.mrf.mxu3 }
 0x24f   : > { %v3972_v53 = vadd.f32 %v6351_v24, %v3960_v15  ;;  %v3562_v20 = vadd.f32 %v3551_v25, %v3440_v49 }
 0x251   : > { %3980 = vst [vmem:[%s6356_s8 + $0x28] sm:$0xff] %v3972_v53  ;;  %v3987_v32 = vadd.f32 %v3986_v45, %v3972_v53  ;;  %v4002_v56 = vmul.f32 %v3972_v53, %v3972_v53  ;;  %v3645_v21 = vadd.f32 %v3634_v31, %v3562_v20 }
 0x253   : > { %v4009_v33 = vadd.f32 %v4008_v17, %v4002_v56  ;;  %v3839_v59 = vadd.f32 %v3828_v23, %v3645_v21 }
 0x255   : > { %v3961_v43 = vadd.f32 %v3950_v57, %v3839_v59 }
 0x256   : > { %v3553_v9 = vpop.f32.mrf.mxu3 }
 0x257   : > { %v3973_v18 = vadd.f32 %v6351_v24, %v3961_v43  ;;  %v3563_v44 = vadd.f32 %v3553_v9, %v3441_v47 }
 0x259   : > { %3981 = vst [vmem:[%s6356_s8 + $0x30] sm:$0xff] %v3973_v18  ;;  %v3988_v27 = vadd.f32 %v3987_v32, %v3973_v18  ;;  %v4003_v58 = vmul.f32 %v3973_v18, %v3973_v18  ;;  %v3646_v0 = vadd.f32 %v3636_v37, %v3563_v44 }
 0x25b   : > { %v4010_v42 = vadd.f32 %v4009_v33, %v4003_v58  ;;  %v3840_v36 = vadd.f32 %v3830_v12, %v3646_v0 }
 0x25d   : > { %v3962_v10 = vadd.f32 %v3952_v4, %v3840_v36 }
 0x25f   : > { %v3974_v63 = vadd.f32 %v6351_v24, %v3962_v10 }
 0x261   : > { %3982 = vst [vmem:[%s6356_s8 + $0x38] sm:$0xff] %v3974_v63  ;;  %v3989_v8 = vadd.f32 %v3988_v27, %v3974_v63  ;;  %v4004_v51 = vmul.f32 %v3974_v63, %v3974_v63 }
 0x263   : > { %v3990_v50 = vrot.slane %v3989_v8, 4  ;;  %v4011_v38 = vadd.f32 %v4010_v42, %v4004_v51 }
 0x265   : > { %v3991_v6 = vadd.f32 %v3990_v50, %v3989_v8  ;;  %v4012_v11 = vrot.slane %v4011_v38, 4 }
 0x267   : > { %v3992_v39 = vrot.slane %v3991_v6, 2  ;;  %v4013_v5 = vadd.f32 %v4012_v11, %v4011_v38 }
 0x269   : > { %v3993_v26 = vadd.f32 %v3992_v39, %v3991_v6  ;;  %v4014_v61 = vrot.slane %v4013_v5, 2 }
 0x26b   : > { %v3994_v1 = vrot.slane %v3993_v26, 1  ;;  %v4015_v55 = vadd.f32 %v4014_v61, %v4013_v5 }
 0x26d   : > { %v3995_v24 = vadd.f32 %v3994_v1, %v3993_v26  ;;  %v4016_v13 = vrot.slane %v4015_v55, 1 }
 0x26f   : > { %3996 = vst [vmem:[%s390_s15] sm:$0x1] %v3995_v24  ;;  %v4017_v19 = vadd.f32 %v4016_v13, %v4015_v55 }
 0x271   : > { %4018 = vst [vmem:[%s390_s15 + $0x1] sm:$0x1] %v4017_v19 }
 0x272 PF: > { %s17_s25 = sadd.s32 1, %s4882_s25   ;;  %s6429_s21 = smov %s4874_s23 }
 0x273   : > { %p14_p10 = scmp.ge.s32.totalorder %s17_s25, 18   ;;  %s6430_s22 = smov %s4878_s24 }
 0x274   : > { %s6431_s23 = smov %s6434_s26  ;;  %s6432_s24 = smov %s6438_s27 }
 0x275   :  { %16 = sbr.rel (!%p14_p10) target bundleno = 3 (0x3), region = 120 }

// kernel: custom_conv_block_forward.7
= control target key start
LH: loop header
LB: loop body
LE: loop exit
PB: predicated region body
PF: predicated region fallthrough
CT: control target
= control target key end

     0   :  { %s1734_s0 = inlined_call_operand.vmem [shape: f32[16,64,128], index: 0, kind: input, shape index: {}]   ;;  %s1735_s1 = inlined_call_operand.vmem [shape: f32[1,1,128], index: 1, kind: input, shape index: {}]   ;;  %s1736_s2 = inlined_call_operand.vmem [shape: f32[1,1,128], index: 2, kind: input, shape index: {}]   ;;  %s1737_s3 = inlined_call_operand.vmem [shape: f32[16,64,128], index: 3, kind: output, shape index: {}]  }
   0x1   :  { %v14_v0 = vld [vmem:[%s1734_s0] sm:$0xff]  ;;  %v15_v3 = vld [vmem:[%s1734_s0 + $0x8] sm:$0xff]  ;;  %v16_v6 = vld [vmem:[%s1734_s0 + $0x10] sm:$0xff] }
   0x2   :  { %v696_v1 = vld [vmem:[%s1735_s1] ss:$0 sm:$0xff]  ;;  %v17_v7 = vld [vmem:[%s1734_s0 + $0x18] sm:$0xff]  ;;  %v19_v12 = vld [vmem:[%s1734_s0 + $0x28] sm:$0xff] }
   0x3   :  { %v701_v2 = vld [vmem:[%s1736_s2] ss:$0 sm:$0xff]  ;;  %v146_v4 = vmul.f32 %v696_v1, %v14_v0  ;;  %v147_v5 = vmul.f32 %v696_v1, %v15_v3  ;;  %v148_v9 = vmul.f32 %v696_v1, %v16_v6  ;;  %v149_v10 = vmul.f32 %v696_v1, %v17_v7  ;;  %v20_v13 = vld [vmem:[%s1734_s0 + $0x30] sm:$0xff]  ;;  %v21_v14 = vld [vmem:[%s1734_s0 + $0x38] sm:$0xff] }
   0x4   :  { %v18_v8 = vld [vmem:[%s1734_s0 + $0x20] sm:$0xff]  ;;  %v151_v17 = vmul.f32 %v696_v1, %v19_v12  ;;  %v152_v18 = vmul.f32 %v696_v1, %v20_v13  ;;  %v153_v22 = vmul.f32 %v696_v1, %v21_v14  ;;  %v23_v24 = vld [vmem:[%s1734_s0 + $0x48] sm:$0xff]  ;;  %v24_v29 = vld [vmem:[%s1734_s0 + $0x50] sm:$0xff] }
   0x5   :  { %v150_v11 = vmul.f32 %v696_v1, %v18_v8  ;;  %v278_v15 = vadd.f32 %v701_v2, %v146_v4  ;;  %v279_v16 = vadd.f32 %v701_v2, %v147_v5  ;;  %v280_v19 = vadd.f32 %v701_v2, %v148_v9  ;;  %v22_v23 = vld [vmem:[%s1734_s0 + $0x40] sm:$0xff]  ;;  %v25_v30 = vld [vmem:[%s1734_s0 + $0x58] sm:$0xff]  ;;  %v27_v35 = vld [vmem:[%s1734_s0 + $0x68] sm:$0xff] }
   0x6   :  { %v281_v20 = vadd.f32 %v701_v2, %v149_v10  ;;  %v283_v27 = vadd.f32 %v701_v2, %v151_v17  ;;  %v284_v28 = vadd.f32 %v701_v2, %v152_v18  ;;  %v26_v31 = vld [vmem:[%s1734_s0 + $0x60] sm:$0xff]  ;;  %v285_v34 = vadd.f32 %v701_v2, %v153_v22  ;;  %v28_v36 = vld [vmem:[%s1734_s0 + $0x70] sm:$0xff]  ;;  %v29_v41 = vld [vmem:[%s1734_s0 + $0x78] sm:$0xff] }
   0x7   :  { %v282_v21 = vadd.f32 %v701_v2, %v150_v11  ;;  %v406_v25 = vmax.f32 %v278_v15, 0.0  ;;  %v407_v26 = vmax.f32 %v279_v16, 0.0  ;;  %v408_v32 = vmax.f32 %v280_v19, 0.0  ;;  %v30_v54 = vld [vmem:[%s1734_s0 + $0x80] sm:$0xff]  ;;  %v31_v55 = vld [vmem:[%s1734_s0 + $0x88] sm:$0xff]  ;;  %v32_v58 = vld [vmem:[%s1734_s0 + $0x90] sm:$0xff] }
   0x8   :  { %v409_v33 = vmax.f32 %v281_v20, 0.0  ;;  %v411_v38 = vmax.f32 %v283_v27, 0.0  ;;  %v154_v39 = vmul.f32 %v696_v1, %v22_v23  ;;  %v155_v40 = vmul.f32 %v696_v1, %v23_v24  ;;  %v33_v59 = vld [vmem:[%s1734_s0 + $0x98] sm:$0xff]  ;;  %v34_v62 = vld [vmem:[%s1734_s0 + $0xa0] sm:$0xff]  ;;  %v35_v5 = vld [vmem:[%s1734_s0 + $0xa8] sm:$0xff] }
   0x9   :  { %534 = vst [vmem:[%s1737_s3] sm:$0xff] %v406_v25  ;;  %v410_v37 = vmax.f32 %v282_v21, 0.0  ;;  %v412_v42 = vmax.f32 %v284_v28, 0.0  ;;  %v156_v43 = vmul.f32 %v696_v1, %v24_v29  ;;  %v157_v44 = vmul.f32 %v696_v1, %v25_v30  ;;  %v36_v10 = vld [vmem:[%s1734_s0 + $0xb0] sm:$0xff]  ;;  %v37_v14 = vld [vmem:[%s1734_s0 + $0xb8] sm:$0xff]  ;;  %v38_v18 = vld [vmem:[%s1734_s0 + $0xc0] sm:$0xff] }
   0xa   :  { %535 = vst [vmem:[%s1737_s3 + $0x8] sm:$0xff] %v407_v26  ;;  %v158_v45 = vmul.f32 %v696_v1, %v26_v31  ;;  %v286_v46 = vadd.f32 %v701_v2, %v154_v39  ;;  %v287_v47 = vadd.f32 %v701_v2, %v155_v40  ;;  %v159_v48 = vmul.f32 %v696_v1, %v27_v35  ;;  %v39_v22 = vld [vmem:[%s1734_s0 + $0xc8] sm:$0xff]  ;;  %v40_v26 = vld [vmem:[%s1734_s0 + $0xd0] sm:$0xff]  ;;  %v41_v30 = vld [vmem:[%s1734_s0 + $0xd8] sm:$0xff] }
   0xb   :  { %536 = vst [vmem:[%s1737_s3 + $0x10] sm:$0xff] %v408_v32  ;;  %v160_v49 = vmul.f32 %v696_v1, %v28_v36  ;;  %v413_v50 = vmax.f32 %v285_v34, 0.0  ;;  %v288_v51 = vadd.f32 %v701_v2, %v156_v43  ;;  %v289_v52 = vadd.f32 %v701_v2, %v157_v44  ;;  %v42_v34 = vld [vmem:[%s1734_s0 + $0xe0] sm:$0xff] }
   0xc   :  { %537 = vst [vmem:[%s1737_s3 + $0x18] sm:$0xff] %v409_v33  ;;  %v161_v53 = vmul.f32 %v696_v1, %v29_v41  ;;  %v414_v56 = vmax.f32 %v286_v46, 0.0  ;;  %v290_v57 = vadd.f32 %v701_v2, %v158_v45  ;;  %v415_v60 = vmax.f32 %v287_v47, 0.0  ;;  %v45_v46 = vld [vmem:[%s1734_s0 + $0xf8] sm:$0xff] }
   0xd   :  { %538 = vst [vmem:[%s1737_s3 + $0x20] sm:$0xff] %v410_v37  ;;  %v291_v61 = vadd.f32 %v701_v2, %v159_v48  ;;  %v416_v63 = vmax.f32 %v288_v51, 0.0  ;;  %v292_v0 = vadd.f32 %v701_v2, %v160_v49  ;;  %v162_v3 = vmul.f32 %v696_v1, %v30_v54  ;;  %v47_v54 = vld [vmem:[%s1734_s0 + $0x108] sm:$0xff] }
   0xe   :  { %539 = vst [vmem:[%s1737_s3 + $0x28] sm:$0xff] %v411_v38  ;;  %v163_v4 = vmul.f32 %v696_v1, %v31_v55  ;;  %v417_v6 = vmax.f32 %v289_v52, 0.0  ;;  %v293_v7 = vadd.f32 %v701_v2, %v161_v53  ;;  %v164_v8 = vmul.f32 %v696_v1, %v32_v58  ;;  %v43_v38 = vld [vmem:[%s1734_s0 + $0xe8] sm:$0xff]  ;;  %v48_v58 = vld [vmem:[%s1734_s0 + $0x110] sm:$0xff] }
   0xf   :  { %540 = vst [vmem:[%s1737_s3 + $0x30] sm:$0xff] %v412_v42  ;;  %v165_v9 = vmul.f32 %v696_v1, %v33_v59  ;;  %v418_v11 = vmax.f32 %v290_v57, 0.0  ;;  %v294_v12 = vadd.f32 %v701_v2, %v162_v3  ;;  %v166_v13 = vmul.f32 %v696_v1, %v34_v62  ;;  %v44_v42 = vld [vmem:[%s1734_s0 + $0xf0] sm:$0xff]  ;;  %v49_v62 = vld [vmem:[%s1734_s0 + $0x118] sm:$0xff] }
  0x10   :  { %541 = vst [vmem:[%s1737_s3 + $0x38] sm:$0xff] %v413_v50  ;;  %v419_v15 = vmax.f32 %v291_v61, 0.0  ;;  %v295_v16 = vadd.f32 %v701_v2, %v163_v4  ;;  %v167_v17 = vmul.f32 %v696_v1, %v35_v5  ;;  %v420_v19 = vmax.f32 %v292_v0, 0.0  ;;  %v46_v50 = vld [vmem:[%s1734_s0 + $0x100] sm:$0xff] }
  0x11   :  { %542 = vst [vmem:[%s1737_s3 + $0x40] sm:$0xff] %v414_v56  ;;  %v296_v20 = vadd.f32 %v701_v2, %v164_v8  ;;  %v168_v21 = vmul.f32 %v696_v1, %v36_v10  ;;  %v421_v23 = vmax.f32 %v293_v7, 0.0  ;;  %v297_v24 = vadd.f32 %v701_v2, %v165_v9  ;;  %v50_v4 = vld [vmem:[%s1734_s0 + $0x120] sm:$0xff]  ;;  %v51_v8 = vld [vmem:[%s1734_s0 + $0x128] sm:$0xff] }
  0x12   :  { %543 = vst [vmem:[%s1737_s3 + $0x48] sm:$0xff] %v415_v60  ;;  %v169_v25 = vmul.f32 %v696_v1, %v37_v14  ;;  %v422_v27 = vmax.f32 %v294_v12, 0.0  ;;  %v298_v28 = vadd.f32 %v701_v2, %v166_v13  ;;  %v170_v29 = vmul.f32 %v696_v1, %v38_v18  ;;  %v52_v12 = vld [vmem:[%s1734_s0 + $0x130] sm:$0xff] }
  0x13   :  { %544 = vst [vmem:[%s1737_s3 + $0x50] sm:$0xff] %v416_v63  ;;  %v423_v31 = vmax.f32 %v295_v16, 0.0  ;;  %v299_v32 = vadd.f32 %v701_v2, %v167_v17  ;;  %v171_v33 = vmul.f32 %v696_v1, %v39_v22  ;;  %v424_v35 = vmax.f32 %v296_v20, 0.0  ;;  %v53_v16 = vld [vmem:[%s1734_s0 + $0x138] sm:$0xff]  ;;  %v54_v20 = vld [vmem:[%s1734_s0 + $0x140] sm:$0xff] }
  0x14   :  { %545 = vst [vmem:[%s1737_s3 + $0x58] sm:$0xff] %v417_v6  ;;  %v300_v36 = vadd.f32 %v701_v2, %v168_v21  ;;  %v172_v37 = vmul.f32 %v696_v1, %v40_v26  ;;  %v425_v39 = vmax.f32 %v297_v24, 0.0  ;;  %v301_v40 = vadd.f32 %v701_v2, %v169_v25  ;;  %v55_v24 = vld [vmem:[%s1734_s0 + $0x148] sm:$0xff] }
  0x15   :  { %546 = vst [vmem:[%s1737_s3 + $0x60] sm:$0xff] %v418_v11  ;;  %v173_v41 = vmul.f32 %v696_v1, %v41_v30  ;;  %v426_v43 = vmax.f32 %v298_v28, 0.0  ;;  %v302_v44 = vadd.f32 %v701_v2, %v170_v29  ;;  %v174_v45 = vmul.f32 %v696_v1, %v42_v34  ;;  %v56_v28 = vld [vmem:[%s1734_s0 + $0x150] sm:$0xff] }
  0x16   :  { %547 = vst [vmem:[%s1737_s3 + $0x68] sm:$0xff] %v419_v15  ;;  %v427_v47 = vmax.f32 %v299_v32, 0.0  ;;  %v303_v48 = vadd.f32 %v701_v2, %v171_v33  ;;  %v175_v49 = vmul.f32 %v696_v1, %v43_v38  ;;  %v428_v51 = vmax.f32 %v300_v36, 0.0  ;;  %v57_v32 = vld [vmem:[%s1734_s0 + $0x158] sm:$0xff]  ;;  %v58_v36 = vld [vmem:[%s1734_s0 + $0x160] sm:$0xff] }
  0x17   :  { %548 = vst [vmem:[%s1737_s3 + $0x70] sm:$0xff] %v420_v19  ;;  %v304_v52 = vadd.f32 %v701_v2, %v172_v37  ;;  %v176_v53 = vmul.f32 %v696_v1, %v44_v42  ;;  %v429_v55 = vmax.f32 %v301_v40, 0.0  ;;  %v305_v56 = vadd.f32 %v701_v2, %v173_v41  ;;  %v59_v40 = vld [vmem:[%s1734_s0 + $0x168] sm:$0xff] }
  0x18   :  { %549 = vst [vmem:[%s1737_s3 + $0x78] sm:$0xff] %v421_v23  ;;  %v177_v57 = vmul.f32 %v696_v1, %v45_v46  ;;  %v430_v59 = vmax.f32 %v302_v44, 0.0  ;;  %v306_v60 = vadd.f32 %v701_v2, %v174_v45  ;;  %v178_v61 = vmul.f32 %v696_v1, %v46_v50  ;;  %v60_v44 = vld [vmem:[%s1734_s0 + $0x170] sm:$0xff] }
  0x19   :  { %550 = vst [vmem:[%s1737_s3 + $0x80] sm:$0xff] %v422_v27  ;;  %v431_v63 = vmax.f32 %v303_v48, 0.0  ;;  %v307_v0 = vadd.f32 %v701_v2, %v175_v49  ;;  %v179_v3 = vmul.f32 %v696_v1, %v47_v54  ;;  %v432_v5 = vmax.f32 %v304_v52, 0.0  ;;  %v61_v48 = vld [vmem:[%s1734_s0 + $0x178] sm:$0xff]  ;;  %v62_v52 = vld [vmem:[%s1734_s0 + $0x180] sm:$0xff] }
  0x1a   :  { %551 = vst [vmem:[%s1737_s3 + $0x88] sm:$0xff] %v423_v31  ;;  %v308_v6 = vadd.f32 %v701_v2, %v176_v53  ;;  %v180_v7 = vmul.f32 %v696_v1, %v48_v58  ;;  %v433_v9 = vmax.f32 %v305_v56, 0.0  ;;  %v309_v10 = vadd.f32 %v701_v2, %v177_v57  ;;  %v63_v56 = vld [vmem:[%s1734_s0 + $0x188] sm:$0xff] }
  0x1b   :  { %552 = vst [vmem:[%s1737_s3 + $0x90] sm:$0xff] %v424_v35  ;;  %v181_v11 = vmul.f32 %v696_v1, %v49_v62  ;;  %v434_v13 = vmax.f32 %v306_v60, 0.0  ;;  %v310_v14 = vadd.f32 %v701_v2, %v178_v61  ;;  %v182_v15 = vmul.f32 %v696_v1, %v50_v4  ;;  %v64_v60 = vld [vmem:[%s1734_s0 + $0x190] sm:$0xff] }
  0x1c   :  { %553 = vst [vmem:[%s1737_s3 + $0x98] sm:$0xff] %v425_v39  ;;  %v435_v17 = vmax.f32 %v307_v0, 0.0  ;;  %v311_v18 = vadd.f32 %v701_v2, %v179_v3  ;;  %v183_v19 = vmul.f32 %v696_v1, %v51_v8  ;;  %v436_v21 = vmax.f32 %v308_v6, 0.0  ;;  %v65_v0 = vld [vmem:[%s1734_s0 + $0x198] sm:$0xff]  ;;  %v66_v6 = vld [vmem:[%s1734_s0 + $0x1a0] sm:$0xff] }
  0x1d   :  { %554 = vst [vmem:[%s1737_s3 + $0xa0] sm:$0xff] %v426_v43  ;;  %v312_v22 = vadd.f32 %v701_v2, %v180_v7  ;;  %v184_v23 = vmul.f32 %v696_v1, %v52_v12  ;;  %v437_v25 = vmax.f32 %v309_v10, 0.0  ;;  %v313_v26 = vadd.f32 %v701_v2, %v181_v11  ;;  %v67_v10 = vld [vmem:[%s1734_s0 + $0x1a8] sm:$0xff] }
  0x1e   :  { %555 = vst [vmem:[%s1737_s3 + $0xa8] sm:$0xff] %v427_v47  ;;  %v185_v27 = vmul.f32 %v696_v1, %v53_v16  ;;  %v438_v29 = vmax.f32 %v310_v14, 0.0  ;;  %v314_v30 = vadd.f32 %v701_v2, %v182_v15  ;;  %v186_v31 = vmul.f32 %v696_v1, %v54_v20  ;;  %v68_v14 = vld [vmem:[%s1734_s0 + $0x1b0] sm:$0xff] }
  0x1f   :  { %556 = vst [vmem:[%s1737_s3 + $0xb0] sm:$0xff] %v428_v51  ;;  %v439_v33 = vmax.f32 %v311_v18, 0.0  ;;  %v315_v34 = vadd.f32 %v701_v2, %v183_v19  ;;  %v187_v35 = vmul.f32 %v696_v1, %v55_v24  ;;  %v440_v37 = vmax.f32 %v312_v22, 0.0  ;;  %v69_v18 = vld [vmem:[%s1734_s0 + $0x1b8] sm:$0xff]  ;;  %v70_v22 = vld [vmem:[%s1734_s0 + $0x1c0] sm:$0xff] }
  0x20   :  { %557 = vst [vmem:[%s1737_s3 + $0xb8] sm:$0xff] %v429_v55  ;;  %v316_v38 = vadd.f32 %v701_v2, %v184_v23  ;;  %v188_v39 = vmul.f32 %v696_v1, %v56_v28  ;;  %v441_v41 = vmax.f32 %v313_v26, 0.0  ;;  %v317_v42 = vadd.f32 %v701_v2, %v185_v27  ;;  %v71_v26 = vld [vmem:[%s1734_s0 + $0x1c8] sm:$0xff] }
  0x21   :  { %558 = vst [vmem:[%s1737_s3 + $0xc0] sm:$0xff] %v430_v59  ;;  %v189_v43 = vmul.f32 %v696_v1, %v57_v32  ;;  %v442_v45 = vmax.f32 %v314_v30, 0.0  ;;  %v318_v46 = vadd.f32 %v701_v2, %v186_v31  ;;  %v190_v47 = vmul.f32 %v696_v1, %v58_v36  ;;  %v72_v30 = vld [vmem:[%s1734_s0 + $0x1d0] sm:$0xff] }
  0x22   :  { %559 = vst [vmem:[%s1737_s3 + $0xc8] sm:$0xff] %v431_v63  ;;  %v443_v49 = vmax.f32 %v315_v34, 0.0  ;;  %v319_v50 = vadd.f32 %v701_v2, %v187_v35  ;;  %v191_v51 = vmul.f32 %v696_v1, %v59_v40  ;;  %v444_v53 = vmax.f32 %v316_v38, 0.0  ;;  %v73_v34 = vld [vmem:[%s1734_s0 + $0x1d8] sm:$0xff]  ;;  %v74_v38 = vld [vmem:[%s1734_s0 + $0x1e0] sm:$0xff] }
  0x23   :  { %560 = vst [vmem:[%s1737_s3 + $0xd0] sm:$0xff] %v432_v5  ;;  %v320_v54 = vadd.f32 %v701_v2, %v188_v39  ;;  %v192_v55 = vmul.f32 %v696_v1, %v60_v44  ;;  %v445_v57 = vmax.f32 %v317_v42, 0.0  ;;  %v321_v58 = vadd.f32 %v701_v2, %v189_v43  ;;  %v75_v42 = vld [vmem:[%s1734_s0 + $0x1e8] sm:$0xff] }
  0x24   :  { %561 = vst [vmem:[%s1737_s3 + $0xd8] sm:$0xff] %v433_v9  ;;  %v193_v59 = vmul.f32 %v696_v1, %v61_v48  ;;  %v446_v61 = vmax.f32 %v318_v46, 0.0  ;;  %v322_v62 = vadd.f32 %v701_v2, %v190_v47  ;;  %v194_v63 = vmul.f32 %v696_v1, %v62_v52  ;;  %v76_v46 = vld [vmem:[%s1734_s0 + $0x1f0] sm:$0xff] }
  0x25   :  { %562 = vst [vmem:[%s1737_s3 + $0xe0] sm:$0xff] %v434_v13  ;;  %v447_v3 = vmax.f32 %v319_v50, 0.0  ;;  %v323_v4 = vadd.f32 %v701_v2, %v191_v51  ;;  %v195_v5 = vmul.f32 %v696_v1, %v63_v56  ;;  %v448_v7 = vmax.f32 %v320_v54, 0.0  ;;  %v77_v50 = vld [vmem:[%s1734_s0 + $0x1f8] sm:$0xff]  ;;  %v78_v54 = vld [vmem:[%s1734_s0 + $0x200] sm:$0xff] }
  0x26   :  { %563 = vst [vmem:[%s1737_s3 + $0xe8] sm:$0xff] %v435_v17  ;;  %v324_v8 = vadd.f32 %v701_v2, %v192_v55  ;;  %v196_v9 = vmul.f32 %v696_v1, %v64_v60  ;;  %v449_v11 = vmax.f32 %v321_v58, 0.0  ;;  %v325_v12 = vadd.f32 %v701_v2, %v193_v59  ;;  %v79_v58 = vld [vmem:[%s1734_s0 + $0x208] sm:$0xff] }
  0x27   :  { %564 = vst [vmem:[%s1737_s3 + $0xf0] sm:$0xff] %v436_v21  ;;  %v197_v13 = vmul.f32 %v696_v1, %v65_v0  ;;  %v450_v15 = vmax.f32 %v322_v62, 0.0  ;;  %v326_v16 = vadd.f32 %v701_v2, %v194_v63  ;;  %v198_v17 = vmul.f32 %v696_v1, %v66_v6  ;;  %v80_v62 = vld [vmem:[%s1734_s0 + $0x210] sm:$0xff] }
  0x28   :  { %565 = vst [vmem:[%s1737_s3 + $0xf8] sm:$0xff] %v437_v25  ;;  %v451_v19 = vmax.f32 %v323_v4, 0.0  ;;  %v327_v20 = vadd.f32 %v701_v2, %v195_v5  ;;  %v199_v21 = vmul.f32 %v696_v1, %v67_v10  ;;  %v452_v23 = vmax.f32 %v324_v8, 0.0  ;;  %v81_v4 = vld [vmem:[%s1734_s0 + $0x218] sm:$0xff]  ;;  %v82_v8 = vld [vmem:[%s1734_s0 + $0x220] sm:$0xff] }
  0x29   :  { %566 = vst [vmem:[%s1737_s3 + $0x100] sm:$0xff] %v438_v29  ;;  %v328_v24 = vadd.f32 %v701_v2, %v196_v9  ;;  %v200_v25 = vmul.f32 %v696_v1, %v68_v14  ;;  %v453_v27 = vmax.f32 %v325_v12, 0.0  ;;  %v329_v28 = vadd.f32 %v701_v2, %v197_v13  ;;  %v83_v12 = vld [vmem:[%s1734_s0 + $0x228] sm:$0xff] }
  0x2a   :  { %567 = vst [vmem:[%s1737_s3 + $0x108] sm:$0xff] %v439_v33  ;;  %v201_v29 = vmul.f32 %v696_v1, %v69_v18  ;;  %v454_v31 = vmax.f32 %v326_v16, 0.0  ;;  %v330_v32 = vadd.f32 %v701_v2, %v198_v17  ;;  %v202_v33 = vmul.f32 %v696_v1, %v70_v22  ;;  %v84_v16 = vld [vmem:[%s1734_s0 + $0x230] sm:$0xff] }
  0x2b   :  { %568 = vst [vmem:[%s1737_s3 + $0x110] sm:$0xff] %v440_v37  ;;  %v455_v35 = vmax.f32 %v327_v20, 0.0  ;;  %v331_v36 = vadd.f32 %v701_v2, %v199_v21  ;;  %v203_v37 = vmul.f32 %v696_v1, %v71_v26  ;;  %v456_v39 = vmax.f32 %v328_v24, 0.0  ;;  %v85_v20 = vld [vmem:[%s1734_s0 + $0x238] sm:$0xff]  ;;  %v86_v24 = vld [vmem:[%s1734_s0 + $0x240] sm:$0xff] }
  0x2c   :  { %569 = vst [vmem:[%s1737_s3 + $0x118] sm:$0xff] %v441_v41  ;;  %v332_v40 = vadd.f32 %v701_v2, %v200_v25  ;;  %v204_v41 = vmul.f32 %v696_v1, %v72_v30  ;;  %v457_v43 = vmax.f32 %v329_v28, 0.0  ;;  %v333_v44 = vadd.f32 %v701_v2, %v201_v29  ;;  %v87_v28 = vld [vmem:[%s1734_s0 + $0x248] sm:$0xff] }
  0x2d   :  { %570 = vst [vmem:[%s1737_s3 + $0x120] sm:$0xff] %v442_v45  ;;  %v205_v45 = vmul.f32 %v696_v1, %v73_v34  ;;  %v458_v47 = vmax.f32 %v330_v32, 0.0  ;;  %v334_v48 = vadd.f32 %v701_v2, %v202_v33  ;;  %v459_v51 = vmax.f32 %v331_v36, 0.0  ;;  %v88_v32 = vld [vmem:[%s1734_s0 + $0x250] sm:$0xff]  ;;  %v89_v36 = vld [vmem:[%s1734_s0 + $0x258] sm:$0xff] }
  0x2e   :  { %571 = vst [vmem:[%s1737_s3 + $0x128] sm:$0xff] %v443_v49  ;;  %v206_v49 = vmul.f32 %v696_v1, %v74_v38  ;;  %v335_v52 = vadd.f32 %v701_v2, %v203_v37  ;;  %v460_v55 = vmax.f32 %v332_v40, 0.0  ;;  %v336_v56 = vadd.f32 %v701_v2, %v204_v41  ;;  %v90_v40 = vld [vmem:[%s1734_s0 + $0x260] sm:$0xff] }
  0x2f   :  { %572 = vst [vmem:[%s1737_s3 + $0x130] sm:$0xff] %v444_v53  ;;  %v207_v53 = vmul.f32 %v696_v1, %v75_v42  ;;  %v461_v59 = vmax.f32 %v333_v44, 0.0  ;;  %v337_v60 = vadd.f32 %v701_v2, %v205_v45  ;;  %v462_v63 = vmax.f32 %v334_v48, 0.0  ;;  %v91_v44 = vld [vmem:[%s1734_s0 + $0x268] sm:$0xff]  ;;  %v92_v48 = vld [vmem:[%s1734_s0 + $0x270] sm:$0xff] }
  0x30   :  { %573 = vst [vmem:[%s1737_s3 + $0x138] sm:$0xff] %v445_v57  ;;  %v208_v57 = vmul.f32 %v696_v1, %v76_v46  ;;  %v338_v0 = vadd.f32 %v701_v2, %v206_v49  ;;  %v463_v5 = vmax.f32 %v335_v52, 0.0  ;;  %v464_v9 = vmax.f32 %v336_v56, 0.0  ;;  %v93_v52 = vld [vmem:[%s1734_s0 + $0x278] sm:$0xff]  ;;  %v94_v56 = vld [vmem:[%s1734_s0 + $0x280] sm:$0xff] }
  0x31   :  { %574 = vst [vmem:[%s1737_s3 + $0x140] sm:$0xff] %v446_v61  ;;  %v209_v61 = vmul.f32 %v696_v1, %v77_v50  ;;  %v339_v6 = vadd.f32 %v701_v2, %v207_v53  ;;  %v465_v13 = vmax.f32 %v337_v60, 0.0  ;;  %v95_v60 = vld [vmem:[%s1734_s0 + $0x288] sm:$0xff] }
  0x32   :  { %575 = vst [vmem:[%s1737_s3 + $0x148] sm:$0xff] %v447_v3  ;;  %v210_v3 = vmul.f32 %v696_v1, %v78_v54  ;;  %v340_v10 = vadd.f32 %v701_v2, %v208_v57  ;;  %v466_v17 = vmax.f32 %v338_v0, 0.0  ;;  %v96_v0 = vld [vmem:[%s1734_s0 + $0x290] sm:$0xff] }
  0x33   :  { %576 = vst [vmem:[%s1737_s3 + $0x150] sm:$0xff] %v448_v7  ;;  %v211_v7 = vmul.f32 %v696_v1, %v79_v58  ;;  %v341_v14 = vadd.f32 %v701_v2, %v209_v61  ;;  %v467_v21 = vmax.f32 %v339_v6, 0.0  ;;  %v97_v6 = vld [vmem:[%s1734_s0 + $0x298] sm:$0xff] }
  0x34   :  { %577 = vst [vmem:[%s1737_s3 + $0x158] sm:$0xff] %v449_v11  ;;  %v212_v11 = vmul.f32 %v696_v1, %v80_v62  ;;  %v342_v18 = vadd.f32 %v701_v2, %v210_v3  ;;  %v468_v25 = vmax.f32 %v340_v10, 0.0  ;;  %v98_v10 = vld [vmem:[%s1734_s0 + $0x2a0] sm:$0xff] }
  0x35   :  { %578 = vst [vmem:[%s1737_s3 + $0x160] sm:$0xff] %v450_v15  ;;  %v213_v15 = vmul.f32 %v696_v1, %v81_v4  ;;  %v343_v22 = vadd.f32 %v701_v2, %v211_v7  ;;  %v469_v29 = vmax.f32 %v341_v14, 0.0  ;;  %v99_v14 = vld [vmem:[%s1734_s0 + $0x2a8] sm:$0xff] }
  0x36   :  { %579 = vst [vmem:[%s1737_s3 + $0x168] sm:$0xff] %v451_v19  ;;  %v214_v19 = vmul.f32 %v696_v1, %v82_v8  ;;  %v344_v26 = vadd.f32 %v701_v2, %v212_v11  ;;  %v470_v33 = vmax.f32 %v342_v18, 0.0  ;;  %v100_v18 = vld [vmem:[%s1734_s0 + $0x2b0] sm:$0xff] }
  0x37   :  { %580 = vst [vmem:[%s1737_s3 + $0x170] sm:$0xff] %v452_v23  ;;  %v215_v23 = vmul.f32 %v696_v1, %v83_v12  ;;  %v345_v30 = vadd.f32 %v701_v2, %v213_v15  ;;  %v471_v37 = vmax.f32 %v343_v22, 0.0  ;;  %v101_v22 = vld [vmem:[%s1734_s0 + $0x2b8] sm:$0xff] }
  0x38   :  { %581 = vst [vmem:[%s1737_s3 + $0x178] sm:$0xff] %v453_v27  ;;  %v216_v27 = vmul.f32 %v696_v1, %v84_v16  ;;  %v346_v34 = vadd.f32 %v701_v2, %v214_v19  ;;  %v472_v41 = vmax.f32 %v344_v26, 0.0  ;;  %v102_v26 = vld [vmem:[%s1734_s0 + $0x2c0] sm:$0xff] }
  0x39   :  { %582 = vst [vmem:[%s1737_s3 + $0x180] sm:$0xff] %v454_v31  ;;  %v217_v31 = vmul.f32 %v696_v1, %v85_v20  ;;  %v347_v38 = vadd.f32 %v701_v2, %v215_v23  ;;  %v473_v45 = vmax.f32 %v345_v30, 0.0  ;;  %v103_v30 = vld [vmem:[%s1734_s0 + $0x2c8] sm:$0xff] }
  0x3a   :  { %583 = vst [vmem:[%s1737_s3 + $0x188] sm:$0xff] %v455_v35  ;;  %v218_v35 = vmul.f32 %v696_v1, %v86_v24  ;;  %v348_v42 = vadd.f32 %v701_v2, %v216_v27  ;;  %v474_v49 = vmax.f32 %v346_v34, 0.0  ;;  %v104_v34 = vld [vmem:[%s1734_s0 + $0x2d0] sm:$0xff] }
  0x3b   :  { %584 = vst [vmem:[%s1737_s3 + $0x190] sm:$0xff] %v456_v39  ;;  %v219_v39 = vmul.f32 %v696_v1, %v87_v28  ;;  %v349_v46 = vadd.f32 %v701_v2, %v217_v31  ;;  %v475_v53 = vmax.f32 %v347_v38, 0.0  ;;  %v105_v38 = vld [vmem:[%s1734_s0 + $0x2d8] sm:$0xff] }
  0x3c   :  { %585 = vst [vmem:[%s1737_s3 + $0x198] sm:$0xff] %v457_v43  ;;  %v220_v43 = vmul.f32 %v696_v1, %v88_v32  ;;  %v350_v50 = vadd.f32 %v701_v2, %v218_v35  ;;  %v476_v57 = vmax.f32 %v348_v42, 0.0  ;;  %v106_v42 = vld [vmem:[%s1734_s0 + $0x2e0] sm:$0xff] }
  0x3d   :  { %586 = vst [vmem:[%s1737_s3 + $0x1a0] sm:$0xff] %v458_v47  ;;  %v221_v47 = vmul.f32 %v696_v1, %v89_v36  ;;  %v351_v54 = vadd.f32 %v701_v2, %v219_v39  ;;  %v477_v61 = vmax.f32 %v349_v46, 0.0  ;;  %v107_v46 = vld [vmem:[%s1734_s0 + $0x2e8] sm:$0xff] }
  0x3e   :  { %587 = vst [vmem:[%s1737_s3 + $0x1a8] sm:$0xff] %v459_v51  ;;  %v222_v51 = vmul.f32 %v696_v1, %v90_v40  ;;  %v352_v58 = vadd.f32 %v701_v2, %v220_v43  ;;  %v478_v3 = vmax.f32 %v350_v50, 0.0  ;;  %v108_v50 = vld [vmem:[%s1734_s0 + $0x2f0] sm:$0xff] }
  0x3f   :  { %588 = vst [vmem:[%s1737_s3 + $0x1b0] sm:$0xff] %v460_v55  ;;  %v223_v55 = vmul.f32 %v696_v1, %v91_v44  ;;  %v353_v62 = vadd.f32 %v701_v2, %v221_v47  ;;  %v479_v7 = vmax.f32 %v351_v54, 0.0  ;;  %v109_v54 = vld [vmem:[%s1734_s0 + $0x2f8] sm:$0xff] }
  0x40   :  { %589 = vst [vmem:[%s1737_s3 + $0x1b8] sm:$0xff] %v461_v59  ;;  %v224_v59 = vmul.f32 %v696_v1, %v92_v48  ;;  %v354_v4 = vadd.f32 %v701_v2, %v222_v51  ;;  %v480_v11 = vmax.f32 %v352_v58, 0.0  ;;  %v110_v58 = vld [vmem:[%s1734_s0 + $0x300] sm:$0xff] }
  0x41   :  { %590 = vst [vmem:[%s1737_s3 + $0x1c0] sm:$0xff] %v462_v63  ;;  %v225_v63 = vmul.f32 %v696_v1, %v93_v52  ;;  %v355_v8 = vadd.f32 %v701_v2, %v223_v55  ;;  %v481_v15 = vmax.f32 %v353_v62, 0.0  ;;  %v111_v62 = vld [vmem:[%s1734_s0 + $0x308] sm:$0xff] }
  0x42   :  { %591 = vst [vmem:[%s1737_s3 + $0x1c8] sm:$0xff] %v463_v5  ;;  %v226_v5 = vmul.f32 %v696_v1, %v94_v56  ;;  %v356_v12 = vadd.f32 %v701_v2, %v224_v59  ;;  %v482_v19 = vmax.f32 %v354_v4, 0.0  ;;  %v112_v4 = vld [vmem:[%s1734_s0 + $0x310] sm:$0xff] }
  0x43   :  { %592 = vst [vmem:[%s1737_s3 + $0x1d0] sm:$0xff] %v464_v9  ;;  %v227_v9 = vmul.f32 %v696_v1, %v95_v60  ;;  %v357_v16 = vadd.f32 %v701_v2, %v225_v63  ;;  %v483_v23 = vmax.f32 %v355_v8, 0.0  ;;  %v113_v8 = vld [vmem:[%s1734_s0 + $0x318] sm:$0xff] }
  0x44   :  { %593 = vst [vmem:[%s1737_s3 + $0x1d8] sm:$0xff] %v465_v13  ;;  %v228_v13 = vmul.f32 %v696_v1, %v96_v0  ;;  %v358_v20 = vadd.f32 %v701_v2, %v226_v5  ;;  %v484_v27 = vmax.f32 %v356_v12, 0.0  ;;  %v114_v12 = vld [vmem:[%s1734_s0 + $0x320] sm:$0xff] }
  0x45   :  { %594 = vst [vmem:[%s1737_s3 + $0x1e0] sm:$0xff] %v466_v17  ;;  %v229_v17 = vmul.f32 %v696_v1, %v97_v6  ;;  %v359_v24 = vadd.f32 %v701_v2, %v227_v9  ;;  %v485_v31 = vmax.f32 %v357_v16, 0.0  ;;  %v115_v16 = vld [vmem:[%s1734_s0 + $0x328] sm:$0xff] }
  0x46   :  { %595 = vst [vmem:[%s1737_s3 + $0x1e8] sm:$0xff] %v467_v21  ;;  %v230_v21 = vmul.f32 %v696_v1, %v98_v10  ;;  %v360_v28 = vadd.f32 %v701_v2, %v228_v13  ;;  %v486_v35 = vmax.f32 %v358_v20, 0.0  ;;  %v116_v20 = vld [vmem:[%s1734_s0 + $0x330] sm:$0xff] }
  0x47   :  { %596 = vst [vmem:[%s1737_s3 + $0x1f0] sm:$0xff] %v468_v25  ;;  %v231_v25 = vmul.f32 %v696_v1, %v99_v14  ;;  %v361_v32 = vadd.f32 %v701_v2, %v229_v17  ;;  %v487_v39 = vmax.f32 %v359_v24, 0.0  ;;  %v117_v24 = vld [vmem:[%s1734_s0 + $0x338] sm:$0xff] }
  0x48   :  { %597 = vst [vmem:[%s1737_s3 + $0x1f8] sm:$0xff] %v469_v29  ;;  %v232_v29 = vmul.f32 %v696_v1, %v100_v18  ;;  %v362_v36 = vadd.f32 %v701_v2, %v230_v21  ;;  %v488_v43 = vmax.f32 %v360_v28, 0.0  ;;  %v118_v28 = vld [vmem:[%s1734_s0 + $0x340] sm:$0xff] }
  0x49   :  { %598 = vst [vmem:[%s1737_s3 + $0x200] sm:$0xff] %v470_v33  ;;  %v233_v33 = vmul.f32 %v696_v1, %v101_v22  ;;  %v363_v40 = vadd.f32 %v701_v2, %v231_v25  ;;  %v489_v47 = vmax.f32 %v361_v32, 0.0  ;;  %v119_v32 = vld [vmem:[%s1734_s0 + $0x348] sm:$0xff] }
  0x4a   :  { %599 = vst [vmem:[%s1737_s3 + $0x208] sm:$0xff] %v471_v37  ;;  %v234_v37 = vmul.f32 %v696_v1, %v102_v26  ;;  %v364_v44 = vadd.f32 %v701_v2, %v232_v29  ;;  %v490_v51 = vmax.f32 %v362_v36, 0.0  ;;  %v120_v36 = vld [vmem:[%s1734_s0 + $0x350] sm:$0xff] }
  0x4b   :  { %600 = vst [vmem:[%s1737_s3 + $0x210] sm:$0xff] %v472_v41  ;;  %v235_v41 = vmul.f32 %v696_v1, %v103_v30  ;;  %v365_v48 = vadd.f32 %v701_v2, %v233_v33  ;;  %v491_v55 = vmax.f32 %v363_v40, 0.0  ;;  %v121_v40 = vld [vmem:[%s1734_s0 + $0x358] sm:$0xff] }
  0x4c   :  { %601 = vst [vmem:[%s1737_s3 + $0x218] sm:$0xff] %v473_v45  ;;  %v236_v45 = vmul.f32 %v696_v1, %v104_v34  ;;  %v366_v52 = vadd.f32 %v701_v2, %v234_v37  ;;  %v492_v59 = vmax.f32 %v364_v44, 0.0  ;;  %v122_v44 = vld [vmem:[%s1734_s0 + $0x360] sm:$0xff] }
  0x4d   :  { %602 = vst [vmem:[%s1737_s3 + $0x220] sm:$0xff] %v474_v49  ;;  %v237_v49 = vmul.f32 %v696_v1, %v105_v38  ;;  %v367_v56 = vadd.f32 %v701_v2, %v235_v41  ;;  %v493_v63 = vmax.f32 %v365_v48, 0.0  ;;  %v123_v48 = vld [vmem:[%s1734_s0 + $0x368] sm:$0xff] }
  0x4e   :  { %603 = vst [vmem:[%s1737_s3 + $0x228] sm:$0xff] %v475_v53  ;;  %v238_v53 = vmul.f32 %v696_v1, %v106_v42  ;;  %v368_v60 = vadd.f32 %v701_v2, %v236_v45  ;;  %v494_v5 = vmax.f32 %v366_v52, 0.0  ;;  %v124_v52 = vld [vmem:[%s1734_s0 + $0x370] sm:$0xff] }
  0x4f   :  { %604 = vst [vmem:[%s1737_s3 + $0x230] sm:$0xff] %v476_v57  ;;  %v239_v57 = vmul.f32 %v696_v1, %v107_v46  ;;  %v369_v0 = vadd.f32 %v701_v2, %v237_v49  ;;  %v495_v9 = vmax.f32 %v367_v56, 0.0  ;;  %v1523_v46 = vld [vmem:[%s1736_s2] ss:$0 sm:$0xff]  ;;  %v125_v56 = vld [vmem:[%s1734_s0 + $0x378] sm:$0xff] }
  0x50   :  { %605 = vst [vmem:[%s1737_s3 + $0x238] sm:$0xff] %v477_v61  ;;  %v240_v61 = vmul.f32 %v696_v1, %v108_v50  ;;  %v370_v6 = vadd.f32 %v701_v2, %v238_v53  ;;  %v496_v13 = vmax.f32 %v368_v60, 0.0  ;;  %v126_v60 = vld [vmem:[%s1734_s0 + $0x380] sm:$0xff] }
  0x51   :  { %606 = vst [vmem:[%s1737_s3 + $0x240] sm:$0xff] %v478_v3  ;;  %v241_v3 = vmul.f32 %v696_v1, %v109_v54  ;;  %v371_v10 = vadd.f32 %v701_v2, %v239_v57  ;;  %v497_v17 = vmax.f32 %v369_v0, 0.0  ;;  %v127_v0 = vld [vmem:[%s1734_s0 + $0x388] sm:$0xff] }
  0x52   :  { %607 = vst [vmem:[%s1737_s3 + $0x248] sm:$0xff] %v479_v7  ;;  %v242_v7 = vmul.f32 %v696_v1, %v110_v58  ;;  %v372_v14 = vadd.f32 %v701_v2, %v240_v61  ;;  %v498_v21 = vmax.f32 %v370_v6, 0.0  ;;  %v128_v6 = vld [vmem:[%s1734_s0 + $0x390] sm:$0xff] }
  0x53   :  { %608 = vst [vmem:[%s1737_s3 + $0x250] sm:$0xff] %v480_v11  ;;  %v243_v11 = vmul.f32 %v696_v1, %v111_v62  ;;  %v373_v18 = vadd.f32 %v701_v2, %v241_v3  ;;  %v499_v25 = vmax.f32 %v371_v10, 0.0  ;;  %v129_v10 = vld [vmem:[%s1734_s0 + $0x398] sm:$0xff] }
  0x54   :  { %609 = vst [vmem:[%s1737_s3 + $0x258] sm:$0xff] %v481_v15  ;;  %v244_v15 = vmul.f32 %v696_v1, %v112_v4  ;;  %v374_v22 = vadd.f32 %v701_v2, %v242_v7  ;;  %v500_v29 = vmax.f32 %v372_v14, 0.0  ;;  %v130_v14 = vld [vmem:[%s1734_s0 + $0x3a0] sm:$0xff] }
  0x55   :  { %610 = vst [vmem:[%s1737_s3 + $0x260] sm:$0xff] %v482_v19  ;;  %v245_v19 = vmul.f32 %v696_v1, %v113_v8  ;;  %v375_v26 = vadd.f32 %v701_v2, %v243_v11  ;;  %v501_v33 = vmax.f32 %v373_v18, 0.0  ;;  %v131_v18 = vld [vmem:[%s1734_s0 + $0x3a8] sm:$0xff] }
  0x56   :  { %611 = vst [vmem:[%s1737_s3 + $0x268] sm:$0xff] %v483_v23  ;;  %v246_v23 = vmul.f32 %v696_v1, %v114_v12  ;;  %v376_v30 = vadd.f32 %v701_v2, %v244_v15  ;;  %v502_v37 = vmax.f32 %v374_v22, 0.0  ;;  %v132_v22 = vld [vmem:[%s1734_s0 + $0x3b0] sm:$0xff] }
  0x57   :  { %612 = vst [vmem:[%s1737_s3 + $0x270] sm:$0xff] %v484_v27  ;;  %v247_v27 = vmul.f32 %v696_v1, %v115_v16  ;;  %v377_v34 = vadd.f32 %v701_v2, %v245_v19  ;;  %v503_v41 = vmax.f32 %v375_v26, 0.0  ;;  %v133_v26 = vld [vmem:[%s1734_s0 + $0x3b8] sm:$0xff] }
  0x58   :  { %613 = vst [vmem:[%s1737_s3 + $0x278] sm:$0xff] %v485_v31  ;;  %v248_v31 = vmul.f32 %v696_v1, %v116_v20  ;;  %v378_v38 = vadd.f32 %v701_v2, %v246_v23  ;;  %v504_v45 = vmax.f32 %v376_v30, 0.0  ;;  %v134_v30 = vld [vmem:[%s1734_s0 + $0x3c0] sm:$0xff] }
  0x59   :  { %614 = vst [vmem:[%s1737_s3 + $0x280] sm:$0xff] %v486_v35  ;;  %v249_v35 = vmul.f32 %v696_v1, %v117_v24  ;;  %v379_v42 = vadd.f32 %v701_v2, %v247_v27  ;;  %v505_v49 = vmax.f32 %v377_v34, 0.0  ;;  %v135_v34 = vld [vmem:[%s1734_s0 + $0x3c8] sm:$0xff] }
  0x5a   :  { %615 = vst [vmem:[%s1737_s3 + $0x288] sm:$0xff] %v487_v39  ;;  %v250_v39 = vmul.f32 %v696_v1, %v118_v28  ;;  %v506_v53 = vmax.f32 %v378_v38, 0.0  ;;  %v136_v38 = vld [vmem:[%s1734_s0 + $0x3d0] sm:$0xff] }
  0x5b   :  { %616 = vst [vmem:[%s1737_s3 + $0x290] sm:$0xff] %v488_v43  ;;  %v251_v43 = vmul.f32 %v696_v1, %v119_v32  ;;  %v1529_v1 = vld [vmem:[%s1735_s1] ss:$0 sm:$0xff]  ;;  %v381_v50 = vadd.f32 %v1523_v46, %v249_v35  ;;  %v507_v57 = vmax.f32 %v379_v42, 0.0  ;;  %v137_v42 = vld [vmem:[%s1734_s0 + $0x3d8] sm:$0xff] }
  0x5c   :  { %617 = vst [vmem:[%s1737_s3 + $0x298] sm:$0xff] %v489_v47  ;;  %v380_v47 = vadd.f32 %v1523_v46, %v248_v31  ;;  %v252_v2 = vmul.f32 %v1529_v1, %v120_v36  ;;  %v382_v54 = vadd.f32 %v1523_v46, %v250_v39 }
  0x5d   :  { %618 = vst [vmem:[%s1737_s3 + $0x2a0] sm:$0xff] %v490_v51  ;;  %v253_v51 = vmul.f32 %v1529_v1, %v121_v40  ;;  %v383_v58 = vadd.f32 %v1523_v46, %v251_v43  ;;  %v509_v3 = vmax.f32 %v381_v50, 0.0  ;;  %v139_v50 = vld [vmem:[%s1734_s0 + $0x3e8] sm:$0xff] }
  0x5e   :  { %619 = vst [vmem:[%s1737_s3 + $0x2a8] sm:$0xff] %v491_v55  ;;  %v254_v55 = vmul.f32 %v1529_v1, %v122_v44  ;;  %v508_v61 = vmax.f32 %v380_v47, 0.0  ;;  %v384_v62 = vadd.f32 %v1523_v46, %v252_v2  ;;  %v510_v7 = vmax.f32 %v382_v54, 0.0  ;;  %v138_v47 = vld [vmem:[%s1734_s0 + $0x3e0] sm:$0xff]  ;;  %v140_v54 = vld [vmem:[%s1734_s0 + $0x3f0] sm:$0xff] }
  0x5f   :  { %620 = vst [vmem:[%s1737_s3 + $0x2b0] sm:$0xff] %v492_v59  ;;  %v255_v59 = vmul.f32 %v1529_v1, %v123_v48  ;;  %v385_v4 = vadd.f32 %v1523_v46, %v253_v51  ;;  %v511_v11 = vmax.f32 %v383_v58, 0.0  ;;  %v141_v58 = vld [vmem:[%s1734_s0 + $0x3f8] sm:$0xff] }
  0x60   :  { %621 = vst [vmem:[%s1737_s3 + $0x2b8] sm:$0xff] %v493_v63  ;;  %v256_v63 = vmul.f32 %v1529_v1, %v124_v52  ;;  %v386_v8 = vadd.f32 %v1523_v46, %v254_v55  ;;  %v512_v15 = vmax.f32 %v384_v62, 0.0 }
  0x61   :  { %622 = vst [vmem:[%s1737_s3 + $0x2c0] sm:$0xff] %v494_v5  ;;  %v257_v5 = vmul.f32 %v1529_v1, %v125_v56  ;;  %v387_v12 = vadd.f32 %v1523_v46, %v255_v59  ;;  %v513_v19 = vmax.f32 %v385_v4, 0.0 }
  0x62   :  { %623 = vst [vmem:[%s1737_s3 + $0x2c8] sm:$0xff] %v495_v9  ;;  %v258_v9 = vmul.f32 %v1529_v1, %v126_v60  ;;  %v388_v16 = vadd.f32 %v1523_v46, %v256_v63  ;;  %v514_v23 = vmax.f32 %v386_v8, 0.0 }
  0x63   :  { %624 = vst [vmem:[%s1737_s3 + $0x2d0] sm:$0xff] %v496_v13  ;;  %v259_v13 = vmul.f32 %v1529_v1, %v127_v0  ;;  %v389_v20 = vadd.f32 %v1523_v46, %v257_v5  ;;  %v515_v27 = vmax.f32 %v387_v12, 0.0  ;;  %v272_v0 = vmul.f32 %v1529_v1, %v140_v54 }
  0x64   :  { %625 = vst [vmem:[%s1737_s3 + $0x2d8] sm:$0xff] %v497_v17  ;;  %v260_v17 = vmul.f32 %v1529_v1, %v128_v6  ;;  %v390_v24 = vadd.f32 %v1523_v46, %v258_v9  ;;  %v516_v31 = vmax.f32 %v388_v16, 0.0  ;;  %v273_v5 = vmul.f32 %v1529_v1, %v141_v58 }
  0x65   :  { %626 = vst [vmem:[%s1737_s3 + $0x2e0] sm:$0xff] %v498_v21  ;;  %v261_v21 = vmul.f32 %v1529_v1, %v129_v10  ;;  %v391_v28 = vadd.f32 %v1523_v46, %v259_v13  ;;  %v517_v35 = vmax.f32 %v389_v20, 0.0 }
  0x66   :  { %627 = vst [vmem:[%s1737_s3 + $0x2e8] sm:$0xff] %v499_v25  ;;  %v262_v25 = vmul.f32 %v1529_v1, %v130_v14  ;;  %v392_v32 = vadd.f32 %v1523_v46, %v260_v17  ;;  %v518_v39 = vmax.f32 %v390_v24, 0.0  ;;  %v405_v12 = vadd.f32 %v1523_v46, %v273_v5 }
  0x67   :  { %628 = vst [vmem:[%s1737_s3 + $0x2f0] sm:$0xff] %v500_v29  ;;  %v263_v29 = vmul.f32 %v1529_v1, %v131_v18  ;;  %v393_v36 = vadd.f32 %v1523_v46, %v261_v21  ;;  %v519_v43 = vmax.f32 %v391_v28, 0.0 }
  0x68   :  { %629 = vst [vmem:[%s1737_s3 + $0x2f8] sm:$0xff] %v501_v33  ;;  %v264_v33 = vmul.f32 %v1529_v1, %v132_v22  ;;  %v394_v40 = vadd.f32 %v1523_v46, %v262_v25  ;;  %v520_v2 = vmax.f32 %v392_v32, 0.0 }
  0x69   :  { %630 = vst [vmem:[%s1737_s3 + $0x300] sm:$0xff] %v502_v37  ;;  %v265_v37 = vmul.f32 %v1529_v1, %v133_v26  ;;  %v395_v44 = vadd.f32 %v1523_v46, %v263_v29  ;;  %v521_v51 = vmax.f32 %v393_v36, 0.0 }
  0x6a   :  { %631 = vst [vmem:[%s1737_s3 + $0x308] sm:$0xff] %v503_v41  ;;  %v266_v41 = vmul.f32 %v1529_v1, %v134_v30  ;;  %v396_v48 = vadd.f32 %v1523_v46, %v264_v33  ;;  %v522_v55 = vmax.f32 %v394_v40, 0.0 }
  0x6b   :  { %632 = vst [vmem:[%s1737_s3 + $0x310] sm:$0xff] %v504_v45  ;;  %v267_v45 = vmul.f32 %v1529_v1, %v135_v34  ;;  %v397_v52 = vadd.f32 %v1523_v46, %v265_v37  ;;  %v523_v59 = vmax.f32 %v395_v44, 0.0 }
  0x6c   :  { %633 = vst [vmem:[%s1737_s3 + $0x318] sm:$0xff] %v505_v49  ;;  %v268_v49 = vmul.f32 %v1529_v1, %v136_v38  ;;  %v398_v56 = vadd.f32 %v1523_v46, %v266_v41  ;;  %v524_v62 = vmax.f32 %v396_v48, 0.0 }
  0x6d   :  { %634 = vst [vmem:[%s1737_s3 + $0x320] sm:$0xff] %v506_v53  ;;  %v269_v53 = vmul.f32 %v1529_v1, %v137_v42  ;;  %v399_v60 = vadd.f32 %v1523_v46, %v267_v45 }
  0x6e   :  { %635 = vst [vmem:[%s1737_s3 + $0x328] sm:$0xff] %v507_v57  ;;  %v270_v57 = vmul.f32 %v1529_v1, %v138_v47  ;;  %v400_v63 = vadd.f32 %v1523_v46, %v268_v49  ;;  %v526_v6 = vmax.f32 %v398_v56, 0.0 }
  0x6f   :  { %636 = vst [vmem:[%s1737_s3 + $0x330] sm:$0xff] %v508_v61  ;;  %v271_v61 = vmul.f32 %v1529_v1, %v139_v50  ;;  %v401_v4 = vadd.f32 %v1523_v46, %v269_v53  ;;  %v527_v8 = vmax.f32 %v399_v60, 0.0  ;;  %v404_v1 = vadd.f32 %v1523_v46, %v272_v0 }
  0x70   :  { %637 = vst [vmem:[%s1737_s3 + $0x338] sm:$0xff] %v509_v3  ;;  %v525_v3 = vmax.f32 %v397_v52, 0.0  ;;  %v528_v10 = vmax.f32 %v400_v63, 0.0 }
  0x71   :  { %638 = vst [vmem:[%s1737_s3 + $0x340] sm:$0xff] %v510_v7  ;;  %v402_v7 = vadd.f32 %v1523_v46, %v270_v57  ;;  %v403_v9 = vadd.f32 %v1523_v46, %v271_v61  ;;  %v533_v46 = vmax.f32 %v405_v12, 0.0 }
  0x72   :  { %639 = vst [vmem:[%s1737_s3 + $0x348] sm:$0xff] %v511_v11  ;;  %v529_v11 = vmax.f32 %v401_v4, 0.0 }
  0x73   :  { %640 = vst [vmem:[%s1737_s3 + $0x350] sm:$0xff] %v512_v15  ;;  %v530_v13 = vmax.f32 %v402_v7, 0.0  ;;  %v531_v14 = vmax.f32 %v403_v9, 0.0  ;;  %v532_v15 = vmax.f32 %v404_v1, 0.0 }
  0x74   :  { %641 = vst [vmem:[%s1737_s3 + $0x358] sm:$0xff] %v513_v19 }
  0x75   :  { %642 = vst [vmem:[%s1737_s3 + $0x360] sm:$0xff] %v514_v23 }
  0x76   :  { %643 = vst [vmem:[%s1737_s3 + $0x368] sm:$0xff] %v515_v27 }
  0x77   :  { %644 = vst [vmem:[%s1737_s3 + $0x370] sm:$0xff] %v516_v31 }
  0x78   :  { %645 = vst [vmem:[%s1737_s3 + $0x378] sm:$0xff] %v517_v35 }
  0x79   :  { %646 = vst [vmem:[%s1737_s3 + $0x380] sm:$0xff] %v518_v39 }
  0x7a   :  { %647 = vst [vmem:[%s1737_s3 + $0x388] sm:$0xff] %v519_v43 }
  0x7b   :  { %648 = vst [vmem:[%s1737_s3 + $0x390] sm:$0xff] %v520_v2 }
  0x7c   :  { %649 = vst [vmem:[%s1737_s3 + $0x398] sm:$0xff] %v521_v51 }
  0x7d   :  { %650 = vst [vmem:[%s1737_s3 + $0x3a0] sm:$0xff] %v522_v55 }
  0x7e   :  { %651 = vst [vmem:[%s1737_s3 + $0x3a8] sm:$0xff] %v523_v59 }
  0x7f   :  { %652 = vst [vmem:[%s1737_s3 + $0x3b0] sm:$0xff] %v524_v62 }
  0x80   :  { %653 = vst [vmem:[%s1737_s3 + $0x3b8] sm:$0xff] %v525_v3 }
  0x81   :  { %654 = vst [vmem:[%s1737_s3 + $0x3c0] sm:$0xff] %v526_v6 }
  0x82   :  { %655 = vst [vmem:[%s1737_s3 + $0x3c8] sm:$0xff] %v527_v8 }
  0x83   :  { %656 = vst [vmem:[%s1737_s3 + $0x3d0] sm:$0xff] %v528_v10 }
  0x84   :  { %657 = vst [vmem:[%s1737_s3 + $0x3d8] sm:$0xff] %v529_v11 }
  0x85   :  { %658 = vst [vmem:[%s1737_s3 + $0x3e0] sm:$0xff] %v530_v13 }
  0x86   :  { %659 = vst [vmem:[%s1737_s3 + $0x3e8] sm:$0xff] %v531_v14 }
  0x87   :  { %660 = vst [vmem:[%s1737_s3 + $0x3f0] sm:$0xff] %v532_v15 }
  0x88   :  { %661 = vst [vmem:[%s1737_s3 + $0x3f8] sm:$0xff] %v533_v46 }

// kernel: custom_conv_block_forward.6
= control target key start
LH: loop header
LB: loop body
LE: loop exit
PB: predicated region body
PF: predicated region fallthrough
CT: control target
= control target key end

     0   :  { %s7703_s21 = smov 0   ;;  %s7705_s22 = smov 0   ;;  %s9626_s0 = inlined_call_operand.vmem [shape: bf16[27,128,128], index: 0, kind: input, shape index: {}]   ;;  %s9627_s1 = inlined_call_operand.vmem [shape: f32[1,128], index: 1, kind: input, shape index: {}]   ;;  %s9628_s2 = inlined_call_operand.vmem [shape: bf16[2,10,10,10,128], index: 2, kind: input, shape index: {}, may-alias: {2,3,4}]   ;;  %s9629_s3 = inlined_call_operand.vmem [shape: bf16[2,10,10,10,128], index: 3, kind: input, shape index: {}, may-alias: {2,3,4}]   ;;  %s9630_s4 = inlined_call_operand.vmem [shape: bf16[2,10,10,10,128], index: 4, kind: input, shape index: {}, may-alias: {2,3,4}]   ;;  %s9631_s5 = inlined_call_operand.vmem [shape: f32[2,8,64,128], index: 5, kind: output, shape index: {0}]   ;;  %s9632_s6 = inlined_call_operand.vmem [shape: f32[2,8,2,128], index: 6, kind: output, shape index: {1}]  }
   0x1   :  { %s7707_s23 = smov 0   ;;  %s7709_s24 = smov 0  }
   0x2   :  { %s7711_s25 = smov 0  }
   0x3 LB: > { %s26_s26 = sadd.s32 1, %s7658_s23  ;;  %s29_s27 = sadd.s32 1, %s7662_s24  ;;  %s7666_s25 = sphi %s7711_s25, %s17_s25   ;;  %s7662_s24 = sphi %s7709_s24, %s9641_s24   ;;  %s7658_s23 = sphi %s7707_s23, %s9640_s23   ;;  %s7654_s22 = sphi %s7705_s22, %s9639_s22   ;;  %s7650_s21 = sphi %s7703_s21, %s9638_s21  }
   0x4   : > { %p27_p0 = scmp.ge.s32.totalorder %s26_s26, 8  ;;  %p5608_p1 = scmp.ge.s32.totalorder %s7666_s25, 1 }
   0x5   : > { %p277_p2 = scmp.lt.s32.totalorder %s7666_s25, 17 }
   0x6   : > { %s9643_s26 = smov (%p27_p0, %s26_s26), 0  ;;  %s9645_s27 = smov (!%p27_p0, %s29_s27), %s7662_s24 }
   0x7   : > { %p278_p3 = pnand %p5608_p1, %p277_p2  ;;  %p31_p4 = scmp.ge.s32.totalorder %s9645_s27, 2 }
   0x8   : > { %p343_p5 = scmp.lt.s32.totalorder (!%p278_p3), %s7654_s22, 1  ;;  %p345_p6 = scmp.lt.s32.totalorder (!%p278_p3), %s7650_s21, 9 }
   0x9   : > { %s9647_s27 = smov (%p31_p4, %s9645_s27), 0  ;;  %281 = sbr.rel (%p278_p3) target bundleno = 631 (0x277), region = 40 }
   0xa   : > { %s363_s29 = sadd.s32 (!%p278_p3), 2, %s7650_s21  ;;  %p376_p9 = scmp.lt.s32.totalorder (!%p278_p3), %s7650_s21, 7 }
   0xb   : > { %p8822_p8 = scmp.lt.s32.totalorder (!%p278_p3), %s363_s29, 9 }
   0xe   : > { %v7326_v0 = vld [vmem:[%s9626_s0 + $0x78] sm:$0xff]  ;;  %v7325_v3 = vld [vmem:[%s9626_s0 + $0x70] sm:$0xff]  ;;  %s9649_s22 = smov (!%p343_p5, %s7654_s22), 1  ;;  %v7324_v6 = vld [vmem:[%s9626_s0 + $0x68] sm:$0xff]  ;;  %vm423_vm0 = vsmask.f32 3328 }
   0xf   : > { %v7318_v1 = vld [vmem:[%s9626_s0 + $0x38] sm:$0xff]  ;;  %619 = vmatpush.bf16.msra.mxu0 %v7326_v0  ;;  %7559 = vmatpush.bf16.msra.mxu3 %v7326_v0  ;;  %v7317_v4 = vld [vmem:[%s9626_s0 + $0x30] sm:$0xff]  ;;  %s346_s16 = scalar_select %p345_p6, %s7650_s21, 9  ;;  %v7316_v7 = vld [vmem:[%s9626_s0 + $0x28] sm:$0xff]  ;;  %vm424_vm1 = vsmask.f32 7440 }
  0x10   : > { %v7334_v2 = vld [vmem:[%s9626_s0 + $0xb8] sm:$0xff]  ;;  %720 = vmatpush.bf16.msra.mxu1 %v7318_v1  ;;  %v7333_v5 = vld [vmem:[%s9626_s0 + $0xb0] sm:$0xff]  ;;  %s7758_s17 = smul.u32 200, %s9649_s22  ;;  %v7332_v8 = vld [vmem:[%s9626_s0 + $0xa8] sm:$0xff]  ;;  %vm773_vm2 = vcmask 1042432   ;;  %vm774_vm4 = vcmask 1046532  }
  0x11   : > { %889 = vmatpush.bf16.msra.mxu2 %v7334_v2  ;;  %s7583_s18 = smul.u32 20, %s346_s16  ;;  %v7323_v9 = vld [vmem:[%s9626_s0 + $0x60] sm:$0xff]  ;;  %v7322_v20 = vld [vmem:[%s9626_s0 + $0x58] sm:$0xff]  ;;  %vm7814_vm3 = vmor %vm423_vm0, %vm424_vm1  ;;  %s352_s16 = sadd.s32 1, %s7650_s21 }
  0x12   : > { %v7315_v10 = vld [vmem:[%s9626_s0 + $0x20] sm:$0xff]  ;;  %v7314_v35 = vld [vmem:[%s9626_s0 + $0x18] sm:$0xff]  ;;  %v7321_v50 = vld [vmem:[%s9626_s0 + $0x50] sm:$0xff]  ;;  %p355_p7 = scmp.lt.s32.totalorder %s352_s16, 9  ;;  %s9653_s29 = smov (!%p8822_p8, %s363_s29), 9 }
  0x13   : > { %620 = vmatpush.bf16.msra.mxu0 %v7325_v3  ;;  %7560 = vmatpush.bf16.msra.mxu3 %v7325_v3  ;;  %s349_s8 = sadd.s32 %s7758_s17, %s7583_s18  ;;  %v7331_v11 = vld [vmem:[%s9626_s0 + $0xa0] sm:$0xff]  ;;  %v7330_v36 = vld [vmem:[%s9626_s0 + $0x98] sm:$0xff]  ;;  %v7313_v56 = vld [vmem:[%s9626_s0 + $0x10] sm:$0xff]  ;;  %s7586_s18 = smul.u32 20, %s9653_s29 }
  0x14   : > { %721 = vmatpush.bf16.msra.mxu1 %v7317_v4  ;;  %s5609_s9 = sshll.u32 %s349_s8, 2  ;;  %v7329_v57 = vld [vmem:[%s9626_s0 + $0x90] sm:$0xff]  ;;  %vm7837_vm5 = vmor %vm773_vm2, %vm774_vm4  ;;  %s9651_s16 = smov (!%p355_p7, %s352_s16), 9 }
  0x15   : > { %890 = vmatpush.bf16.msra.mxu2 %v7333_v5  ;;  %s7782_s20 = scalar_lea.vmem %s9628_s2, %s5609_s9  ;;  %s7585_s28 = smul.u32 20, %s9651_s16 }
  0x16   : > { %v391_v12 = vld [vmem:[%s7782_s20] sm:$0xf]  ;;  %v392_v13 = vld [vmem:[%s7782_s20 + $0x8] sm:$0xf]  ;;  %v7787_v14 = vld [vmem:[%s7782_s20 + $0x4] sm:$0x1] }
  0x17   : > { %621 = vmatpush.bf16.msra.mxu0 %v7324_v6  ;;  %7561 = vmatpush.bf16.msra.mxu3 %v7324_v6  ;;  %v7790_v15 = vld [vmem:[%s7782_s20 + $0xc] sm:$0x1]  ;;  %v427_v16 = vshrl.u32 %v391_v12, 16  ;;  %v430_v17 = vshll.u32 %v391_v12, 16  ;;  %v436_v18 = vshll.u32 %v7787_v14, 16  ;;  %v441_v19 = vshrl.u32 %v392_v13, 16  ;;  %s8263_s16 = sadd.s32 %s7585_s28, %s7758_s17  ;;  %s8883_s28 = sadd.s32 %s7586_s18, %s7758_s17 }
  0x18   : > { %722 = vmatpush.bf16.msra.mxu1 %v7316_v7  ;;  %v444_v21 = vshll.u32 %v392_v13, 16  ;;  %v450_v22 = vshll.u32 %v7790_v15, 16  ;;  %v395_v23 = vld [vmem:[%s7782_s20 + $0x20] sm:$0xf]  ;;  %v396_v24 = vld [vmem:[%s7782_s20 + $0x28] sm:$0xf] }
  0x19   : > { %891 = vmatpush.bf16.msra.mxu2 %v7332_v8  ;;  %v429_v25 = vrot.slane %v427_v16, 4  ;;  %v432_v26 = vrot.slane %v430_v17, 5  ;;  %v438_v27 = vrot.slane %v436_v18, 5  ;;  %v443_v28 = vrot.slane %v441_v19, 4  ;;  %v7800_v29 = vld [vmem:[%s7782_s20 + $0x24] sm:$0x1] }
  0x1a   : > { %v446_v30 = vrot.slane %v444_v21, 5  ;;  %v452_v31 = vrot.slane %v450_v22, 5  ;;  %v7803_v32 = vld [vmem:[%s7782_s20 + $0x2c] sm:$0x1]  ;;  %v483_v33 = vshrl.u32 %v395_v23, 16  ;;  %v486_v34 = vshll.u32 %v395_v23, 16 }
  0x1b   : > { %622 = vmatpush.bf16.msra.mxu0 %v7323_v9  ;;  %7562 = vmatpush.bf16.msra.mxu3 %v7323_v9  ;;  %v433_v37 = vor.u32 %v432_v26, %v429_v25  ;;  %v492_v38 = vshll.u32 %v7800_v29, 16  ;;  %v497_v39 = vshrl.u32 %v396_v24, 16  ;;  %v500_v40 = vshll.u32 %v396_v24, 16  ;;  %v749_v49 = vld [vmem:[%s7782_s20] sm:$0xe]  ;;  %v7320_v6 = vld [vmem:[%s9626_s0 + $0x48] sm:$0xff] }
  0x1c   : > { %723 = vmatpush.bf16.msra.mxu1 %v7315_v10  ;;  %v447_v42 = vor.u32 %v446_v30, %v443_v28  ;;  %v485_v43 = vrot.slane %v483_v33, 4  ;;  %v488_v44 = vrot.slane %v486_v34, 5  ;;  %v506_v45 = vshll.u32 %v7803_v32, 16  ;;  %v750_v55 = vld [vmem:[%s7782_s20 + $0x8] sm:$0xe]  ;;  %v7319_v18 = vld [vmem:[%s9626_s0 + $0x40] sm:$0xff] }
  0x1d   : > { %892 = vmatpush.bf16.msra.mxu2 %v7331_v11  ;;  %v434_v46 = vrot.slane %v433_v37, 4  ;;  %v499_v47 = vrot.slane %v497_v39, 4  ;;  %v502_v48 = vrot.slane %v500_v40, 5  ;;  %v494_v53 = vrot.slane %v492_v38, 5  ;;  %v393_v2 = vld [vmem:[%s7782_s20 + $0x10] sm:$0xf] }
  0x1e   : > { %v448_v51 = vrot.slane %v447_v42, 4  ;;  %v489_v52 = vor.u32 %v488_v44, %v485_v43  ;;  %v508_v54 = vrot.slane %v506_v45, 5  ;;  %v5713_v60 = vrot.slane %v749_v49, 9  ;;  %v394_v9 = vld [vmem:[%s7782_s20 + $0x18] sm:$0xf]  ;;  %v7312_v12 = vld [vmem:[%s9626_s0 + $0x8] sm:$0xff] }
  0x1f   : > { %623 = vmatpush.bf16.msra.mxu0 %v7322_v20  ;;  %7563 = vmatpush.bf16.msra.mxu3 %v7322_v20  ;;  %v439_v58 = vsel %vm7814_vm3, %v434_v46, %v438_v27  ;;  %v503_v59 = vor.u32 %v502_v48, %v499_v47  ;;  %v778_v61 = vrot.slane %v7787_v14, 5  ;;  %v5714_v1 = vrot.slane %v750_v55, 9  ;;  %v7328_v13 = vld [vmem:[%s9626_s0 + $0x88] sm:$0xff]  ;;  %v397_v17 = vld [vmem:[%s7782_s20 + $0x30] sm:$0xf]  ;;  %v7311_v23 = vld [vmem:[%s9626_s0] sm:$0xff] }
  0x20   : > { %724 = vmatpush.bf16.msra.mxu1 %v7314_v35  ;;  %v453_v62 = vsel %vm7814_vm3, %v448_v51, %v452_v31  ;;  %v490_v63 = vrot.slane %v489_v52, 4  ;;  %v7842_v3 = vunpack.c.l.b16 %v439_v58  ;;  %v782_v5 = vrot.slane %v7790_v15, 5  ;;  %v7870_v19 = vld [vmem:[%s7782_s20 + $0x14] sm:$0x1]  ;;  %v7873_v20 = vld [vmem:[%s7782_s20 + $0x1c] sm:$0x1] }
  0x21   : > { %893 = vmatpush.bf16.msra.mxu2 %v7330_v36  ;;  %v504_v4 = vrot.slane %v503_v59, 4  ;;  %v7848_v7 = vunpack.c.l.b16 %v453_v62  ;;  %v455_v10 = vshrl.u32 %v393_v2, 16  ;;  %v458_v11 = vshll.u32 %v393_v2, 16  ;;  %v5667_v26 = vld [vmem:[%s7782_s20] sm:$0xf]  ;;  %v7354_v45 = vld [vmem:[%s9626_s0 + $0x138] sm:$0xff] }
  0x22   : > { %v495_v8 = vsel %vm7814_vm3, %v490_v63, %v494_v53  ;;  %v779_v15 = vsel %vm7837_vm5, %v5713_v60, %v778_v61  ;;  %v783_v16 = vsel %vm7837_vm5, %v5714_v1, %v782_v5  ;;  %v469_v27 = vshrl.u32 %v394_v9, 16  ;;  %v7880_v30 = vld [vmem:[%s7782_s20 + $0x34] sm:$0x1]  ;;  %v7327_v31 = vld [vmem:[%s9626_s0 + $0x80] sm:$0xff]  ;;  %v7307_v34 = vld [vmem:[%s7782_s20 + $0x4] sm:$0xf0] }
  0x23   : > { %624 = vmatpush.bf16.msra.mxu0 %v7321_v50  ;;  %7564 = vmatpush.bf16.msra.mxu3 %v7321_v50  ;;  %v509_v14 = vsel %vm7814_vm3, %v504_v4, %v508_v54  ;;  %v457_v21 = vrot.slane %v455_v10, 4  ;;  %v460_v22 = vrot.slane %v458_v11, 5  ;;  %v559_v24 = vunpack.c.l.b16 %v495_v8  ;;  %v398_v37 = vld [vmem:[%s7782_s20 + $0x38] sm:$0xf]  ;;  %v7892_v44 = vld [vmem:[%s7782_s20 + $0x3c] sm:$0x1] }
  0x24   : > { %725 = vmatpush.bf16.msra.mxu1 %v7313_v56  ;;  %v560_v25 = vunpack.c.l.b16 %v509_v14  ;;  %v472_v28 = vshll.u32 %v394_v9, 16  ;;  %v563_v33 = vpack.c.b16 %v7848_v7, %v7842_v3  ;;  %v825_v35 = vunpack.c.l.b16 %v779_v15  ;;  %v7346_v46 = vld [vmem:[%s9626_s0 + $0xf8] sm:$0xff]  ;;  %v751_v60 = vld [vmem:[%s7782_s20 + $0x10] sm:$0xe]  ;;  %s5610_s7 = sshll.u32 %s8263_s16, 2  ;;  %s5611_s17 = sshll.u32 %s8883_s28, 2 }
  0x25   : > { %894 = vmatpush.bf16.msra.mxu2 %v7329_v57  ;;  %v826_v36 = vunpack.c.l.b16 %v783_v16  ;;  %v511_v38 = vshrl.u32 %v397_v17, 16  ;;  %v464_v39 = vshll.u32 %v7870_v19, 16  ;;  %v471_v40 = vrot.slane %v469_v27, 4  ;;  %v7374_v57 = vld [vmem:[%s9626_s0 + $0x1b8] sm:$0xff]  ;;  %v7353_v3 = vld [vmem:[%s9626_s0 + $0x130] sm:$0xff]  ;;  %s8280_s10 = scalar_lea.vmem %s9629_s3, %s5610_s7  ;;  %s9655_s21 = smov (!%p376_p9, %s7650_s21), 7 }
  0x26   : > { %v474_v42 = vrot.slane %v472_v28, 5  ;;  %v478_v43 = vshll.u32 %v7873_v20, 16  ;;  %v461_v47 = vor.u32 %v460_v22, %v457_v21  ;;  %v514_v49 = vshll.u32 %v397_v17, 16  ;;  %v7362_v61 = vld [vmem:[%s9626_s0 + $0x178] sm:$0xff]  ;;  %v7345_v4 = vld [vmem:[%s9626_s0 + $0xf0] sm:$0xff]  ;;  %v7352_v21 = vld [vmem:[%s9626_s0 + $0x128] sm:$0xff] }
  0x27   : > { %625 = vmatpush.bf16.msra.mxu0 %v7320_v6  ;;  %7565 = vmatpush.bf16.msra.mxu3 %v7320_v6  ;;  %v513_v48 = vrot.slane %v511_v38, 4  ;;  %v520_v50 = vshll.u32 %v7880_v30, 16  ;;  %v565_v51 = vpack.c.b16 %v560_v25, %v559_v24  ;;  %v525_v53 = vshrl.u32 %v398_v37, 16  ;;  %v752_v2 = vld [vmem:[%s7782_s20 + $0x18] sm:$0xe]  ;;  %v7373_v17 = vld [vmem:[%s9626_s0 + $0x1b0] sm:$0xff] }
  0x28   : > { %726 = vmatpush.bf16.msra.mxu1 %v7312_v12  ;;  %v475_v52 = vor.u32 %v474_v42, %v471_v40  ;;  %v528_v54 = vshll.u32 %v398_v37, 16  ;;  %v5668_v55 = vor.u32 %v7307_v34, %v5667_v26  ;;  %v833_v56 = vpack.c.b16 %v826_v36, %v825_v35  ;;  %v5841_v22 = vld [vmem:[%s7782_s20 + $0x8] sm:$0xf]  ;;  %v5843_v26 = vld [vmem:[%s7782_s20 + $0x10] sm:$0xf]  ;;  %v7351_v37 = vld [vmem:[%s9626_s0 + $0x120] sm:$0xff] }
  0x29   : > { %895 = vmatpush.bf16.msra.mxu2 %v7328_v13  ;;  %v516_v58 = vrot.slane %v514_v49, 5  ;;  %v534_v59 = vshll.u32 %v7892_v44, 16  ;;  %v466_v62 = vrot.slane %v464_v39, 5  ;;  %v527_v63 = vrot.slane %v525_v53, 4  ;;  %v7360_v34 = vld [vmem:[%s9626_s0 + $0x168] sm:$0xff]  ;;  %v7343_v38 = vld [vmem:[%s9626_s0 + $0xe0] sm:$0xff] }
  0x2a   : > { %v530_v1 = vrot.slane %v528_v54, 5  ;;  %v462_v5 = vrot.slane %v461_v47, 4  ;;  %v480_v6 = vrot.slane %v478_v43, 5  ;;  %v522_v8 = vrot.slane %v520_v50, 5  ;;  %v5671_v47 = vld [vmem:[%s7782_s20 + $0x10] sm:$0xf] }
  0x2b   : > { %626 = vmatpush.bf16.msra.mxu0 %v7319_v18  ;;  %7566 = vmatpush.bf16.msra.mxu3 %v7319_v18  ;;  %v517_v7 = vor.u32 %v516_v58, %v513_v48  ;;  %v476_v9 = vrot.slane %v475_v52, 4  ;;  %v5715_v11 = vrot.slane %v751_v60, 9  ;;  %v786_v12 = vrot.slane %v7870_v19, 5  ;;  %v7361_v19 = vld [vmem:[%s9626_s0 + $0x170] sm:$0xff]  ;;  %v7308_v48 = vld [vmem:[%s7782_s20 + $0x14] sm:$0xf0] }
  0x2c   : > { %727 = vmatpush.bf16.msra.mxu1 %v7311_v23  ;;  %v531_v10 = vor.u32 %v530_v1, %v527_v63  ;;  %v536_v14 = vrot.slane %v534_v59, 5  ;;  %v5716_v15 = vrot.slane %v752_v2, 9  ;;  %v790_v16 = vrot.slane %v7873_v20, 5  ;;  %v7344_v20 = vld [vmem:[%s9626_s0 + $0xe8] sm:$0xff]  ;;  %v7359_v58 = vld [vmem:[%s9626_s0 + $0x160] sm:$0xff]  ;;  %v7350_v59 = vld [vmem:[%s9626_s0 + $0x118] sm:$0xff] }
  0x2d   : > { %896 = vmatpush.bf16.msra.mxu2 %v7327_v31  ;;  %v518_v13 = vrot.slane %v517_v7, 4  ;;  %v467_v23 = vsel %vm7814_vm3, %v462_v5, %v466_v62  ;;  %v481_v24 = vsel %vm7814_vm3, %v476_v9, %v480_v6  ;;  %v787_v25 = vsel %vm7837_vm5, %v5715_v11, %v786_v12  ;;  %v7962_v52 = vld [vmem:[%s7782_s20 + $0xc] sm:$0x1]  ;;  %v7342_v60 = vld [vmem:[%s9626_s0 + $0xd8] sm:$0xff]  ;;  %v753_v2 = vld [vmem:[%s7782_s20 + $0x20] sm:$0xe] }
  0x2e   : > { %627 = vmatmul.bf16.vlgmr.msra.gmra.mxu0 %v563_v33  ;;  %637 = vmatmul.bf16.vlgmr.msra.gmra.mxu3 %v565_v51  ;;  %v532_v18 = vrot.slane %v531_v10, 4  ;;  %v791_v31 = vsel %vm7837_vm5, %v5716_v15, %v790_v16  ;;  %v7372_v33 = vld [vmem:[%s9626_s0 + $0x1a8] sm:$0xff]  ;;  %v1078_v35 = vshrl.u32 %v5841_v22, 16  ;;  %v1081_v36 = vshll.u32 %v5841_v22, 16  ;;  %v7371_v51 = vld [vmem:[%s9626_s0 + $0x1a0] sm:$0xff]  ;;  %v7358_v9 = vld [vmem:[%s9626_s0 + $0x158] sm:$0xff] }
  0x2f   : > { %1270 = vmatpush.bf16.msrb.mxu0 %v7354_v45  ;;  %1024 = vmatpush.bf16.msrb.mxu3 %v7346_v46  ;;  %v523_v27 = vsel %vm7814_vm3, %v518_v13, %v522_v8  ;;  %v557_v39 = vunpack.c.l.b16 %v467_v23  ;;  %v558_v40 = vunpack.c.l.b16 %v481_v24  ;;  %v827_v42 = vunpack.c.l.b16 %v787_v25  ;;  %v7370_v8 = vld [vmem:[%s9626_s0 + $0x198] sm:$0xff]  ;;  %v7349_v10 = vld [vmem:[%s9626_s0 + $0x110] sm:$0xff]  ;;  %v5847_v22 = vld [vmem:[%s7782_s20 + $0x20] sm:$0xf]  ;;  %s5613_s18 = sshll.u32 %s9649_s22, 6  ;;  %s5615_s9 = sshll.u32 %s9649_s22, 3 }
  0x30   : > { %728 = vmatmul.bf16.vlgmr.msra.gmra.mxu1 %v5668_v55  ;;  %897 = vmatmul.bf16.vlgmr.msra.gmra.mxu2 %v833_v56  ;;  %v537_v28 = vsel %vm7814_vm3, %v532_v18, %v536_v14  ;;  %v1092_v43 = vshrl.u32 %v5843_v26, 16  ;;  %v561_v45 = vunpack.c.l.b16 %v523_v27  ;;  %v828_v49 = vunpack.c.l.b16 %v791_v31  ;;  %v7965_v56 = vld [vmem:[%s7782_s20 + $0x14] sm:$0x1]  ;;  %v7340_v23 = vld [vmem:[%s9626_s0 + $0xc8] sm:$0xff]  ;;  %s388_s11 = sadd.s32 %s5615_s9, %s9655_s21 }
  0x31   : > { %1579 = vmatpush.bf16.msrb.mxu2 %v7374_v57  ;;  %1444 = vmatpush.bf16.msrb.mxu1 %v7362_v61  ;;  %v562_v46 = vunpack.c.l.b16 %v537_v28  ;;  %v1095_v50 = vshll.u32 %v5843_v26, 16  ;;  %v1080_v53 = vrot.slane %v1078_v35, 4  ;;  %v1083_v54 = vrot.slane %v1081_v36, 5  ;;  %v7341_v11 = vld [vmem:[%s9626_s0 + $0xd0] sm:$0xff]  ;;  %v7347_v28 = vld [vmem:[%s9626_s0 + $0x100] sm:$0xff] }
  0x32   : > { %v1094_v55 = vrot.slane %v1092_v43, 4  ;;  %v564_v61 = vpack.c.b16 %v558_v40, %v557_v39  ;;  %v5672_v63 = vor.u32 %v7308_v48, %v5671_v47  ;;  %v834_v1 = vpack.c.b16 %v828_v49, %v827_v42  ;;  %v7339_v36 = vld [vmem:[%s9626_s0 + $0xc0] sm:$0xff]  ;;  %v7309_v40 = vld [vmem:[%s7782_s20 + $0x24] sm:$0xf0]  ;;  %v7390_v49 = vld [vmem:[%s9626_s0 + $0x238] sm:$0xff] }
  0x33   : > { %1271 = vmatpush.bf16.msrb.mxu0 %v7353_v3  ;;  %1025 = vmatpush.bf16.msrb.mxu3 %v7345_v4  ;;  %v1097_v57 = vrot.slane %v1095_v50, 5  ;;  %v566_v62 = vpack.c.b16 %v562_v46, %v561_v45  ;;  %v754_v3 = vld [vmem:[%s7782_s20 + $0x28] sm:$0xe]  ;;  %v1084_v4 = vor.u32 %v1083_v54, %v1080_v53  ;;  %v1087_v5 = vshll.u32 %v7962_v52, 16  ;;  %v5675_v39 = vld [vmem:[%s7782_s20 + $0x20] sm:$0xf] }
  0x34   : > { %v1101_v7 = vshll.u32 %v7965_v56, 16  ;;  %v5717_v12 = vrot.slane %v753_v2, 9  ;;  %v794_v13 = vrot.slane %v7800_v29, 5  ;;  %v5718_v14 = vrot.slane %v754_v3, 9  ;;  %v7357_v29 = vld [vmem:[%s9626_s0 + $0x150] sm:$0xff]  ;;  %v7382_v50 = vld [vmem:[%s9626_s0 + $0x1f8] sm:$0xff] }
  0x35   : > { %1580 = vmatpush.bf16.msrb.mxu2 %v7373_v17  ;;  %1445 = vmatpush.bf16.msrb.mxu1 %v7361_v19  ;;  %v1098_v6 = vor.u32 %v1097_v57, %v1094_v55  ;;  %v798_v15 = vrot.slane %v7803_v32, 5  ;;  %v1085_v16 = vrot.slane %v1084_v4, 4  ;;  %v1089_v17 = vrot.slane %v1087_v5, 5  ;;  %v7348_v32 = vld [vmem:[%s9626_s0 + $0x108] sm:$0xff]  ;;  %v7335_v46 = vld [vmem:[%s7782_s20 + $0xc] sm:$0xf0] }
  0x36   : > { %v1103_v19 = vrot.slane %v1101_v7, 5  ;;  %v795_v24 = vsel %vm7837_vm5, %v5717_v12, %v794_v13  ;;  %v1123_v35 = vshll.u32 %v5847_v22, 16  ;;  %v5795_v42 = vld [vmem:[%s7782_s20 + $0x8] sm:$0xf]  ;;  %v755_v3 = vld [vmem:[%s7782_s20 + $0x30] sm:$0xe] }
  0x37   : > { %1272 = vmatpush.bf16.msrb.mxu0 %v7352_v21  ;;  %1026 = vmatpush.bf16.msrb.mxu3 %v7344_v20  ;;  %v1099_v18 = vrot.slane %v1098_v6, 4  ;;  %v5845_v21 = vld [vmem:[%s7782_s20 + $0x18] sm:$0xf]  ;;  %v7369_v20 = vld [vmem:[%s9626_s0 + $0x190] sm:$0xff]  ;;  %v799_v25 = vsel %vm7837_vm5, %v5718_v14, %v798_v15  ;;  %v1090_v31 = vsel %vm7814_vm3, %v1085_v16, %v1089_v17  ;;  %v829_v43 = vunpack.c.l.b16 %v795_v24  ;;  %v5849_v12 = vld [vmem:[%s7782_s20 + $0x28] sm:$0xf] }
  0x38   : > { %v1106_v26 = vshrl.u32 %v5845_v21, 16  ;;  %v1109_v27 = vshll.u32 %v5845_v21, 16  ;;  %v830_v45 = vunpack.c.l.b16 %v799_v25  ;;  %v1206_v47 = vunpack.c.l.b16 %v1090_v31  ;;  %v7389_v7 = vld [vmem:[%s9626_s0 + $0x230] sm:$0xff]  ;;  %v7410_v17 = vld [vmem:[%s9626_s0 + $0x2b8] sm:$0xff]  ;;  %v7387_v31 = vld [vmem:[%s9626_s0 + $0x220] sm:$0xff] }
  0x39   : > { %1581 = vmatpush.bf16.msrb.mxu2 %v7372_v33  ;;  %1446 = vmatpush.bf16.msrb.mxu1 %v7360_v34  ;;  %v1104_v33 = vsel %vm7814_vm3, %v1099_v18, %v1103_v19  ;;  %v1120_v34 = vshrl.u32 %v5847_v22, 16  ;;  %v1125_v57 = vrot.slane %v1123_v35, 5  ;;  %v5851_v16 = vld [vmem:[%s7782_s20 + $0x30] sm:$0xf]  ;;  %v802_v18 = vrot.slane %v7880_v30, 5  ;;  %v7380_v22 = vld [vmem:[%s9626_s0 + $0x1e8] sm:$0xff] }
  0x3a   : > { %v1207_v48 = vunpack.c.l.b16 %v1104_v33  ;;  %v1108_v53 = vrot.slane %v1106_v26, 4  ;;  %v1111_v54 = vrot.slane %v1109_v27, 5  ;;  %v835_v2 = vpack.c.b16 %v830_v45, %v829_v43  ;;  %v7409_v30 = vld [vmem:[%s9626_s0 + $0x2b0] sm:$0xff]  ;;  %v7379_v33 = vld [vmem:[%s9626_s0 + $0x1e0] sm:$0xff] }
  0x3b   : > { %1273 = vmatpush.bf16.msrb.mxu0 %v7351_v37  ;;  %1027 = vmatpush.bf16.msrb.mxu3 %v7343_v38  ;;  %v7368_v37 = vld [vmem:[%s9626_s0 + $0x188] sm:$0xff]  ;;  %v1122_v55 = vrot.slane %v1120_v34, 4  ;;  %v806_v21 = vrot.slane %v7892_v44, 5  ;;  %v1148_v44 = vshrl.u32 %v5851_v16, 16  ;;  %v1151_v24 = vshll.u32 %v5851_v16, 16 }
  0x3c   : > { %v7356_v38 = vld [vmem:[%s9626_s0 + $0x148] sm:$0xff]  ;;  %v1112_v4 = vor.u32 %v1111_v54, %v1108_v53  ;;  %v7378_v53 = vld [vmem:[%s9626_s0 + $0x1d8] sm:$0xff] }
  0x3d   : > { %1582 = vmatpush.bf16.msrb.mxu2 %v7371_v51  ;;  %1447 = vmatpush.bf16.msrb.mxu1 %v7359_v58  ;;  %v8039_v51 = vld [vmem:[%s7782_s20 + $0x1c] sm:$0x1]  ;;  %v8042_v58 = vld [vmem:[%s7782_s20 + $0x24] sm:$0x1]  ;;  %v1126_v5 = vor.u32 %v1125_v57, %v1122_v55  ;;  %v7376_v16 = vld [vmem:[%s9626_s0 + $0x1c8] sm:$0xff] }
  0x3e   : > { %632 = vmatmul.bf16.gmra.mxu0 %v564_v61  ;;  %642 = vmatmul.bf16.gmra.mxu3 %v566_v62  ;;  %v5676_v61 = vor.u32 %v7309_v40, %v5675_v39  ;;  %v5796_v62 = vor.u32 %v7335_v46, %v5795_v42  ;;  %v1129_v6 = vshll.u32 %v8042_v58, 16  ;;  %v1113_v13 = vrot.slane %v1112_v4, 4  ;;  %v8095_v39 = vld [vmem:[%s7782_s20 + $0x2c] sm:$0x1]  ;;  %v5799_v46 = vld [vmem:[%s7782_s20 + $0x18] sm:$0xf] }
  0x3f   : > { %1274 = vmatpush.bf16.msrb.mxu0 %v7350_v59  ;;  %1028 = vmatpush.bf16.msrb.mxu3 %v7342_v60  ;;  %v7367_v59 = vld [vmem:[%s9626_s0 + $0x180] sm:$0xff]  ;;  %v1127_v14 = vrot.slane %v1126_v5, 4  ;;  %v1150_v40 = vrot.slane %v1148_v44, 4  ;;  %v1153_v42 = vrot.slane %v1151_v24, 5  ;;  %v1143_v55 = vshll.u32 %v8095_v39, 16 }
  0x40   : > { %733 = vmatmul.bf16.gmra.mxu1 %v5672_v63  ;;  %902 = vmatmul.bf16.gmra.mxu2 %v834_v1  ;;  %v7355_v60 = vld [vmem:[%s9626_s0 + $0x140] sm:$0xff]  ;;  %v1214_v63 = vpack.c.b16 %v1207_v48, %v1206_v47  ;;  %v1115_v1 = vshll.u32 %v8039_v51, 16  ;;  %v1131_v15 = vrot.slane %v1129_v6, 5  ;;  %v8100_v48 = vld [vmem:[%s7782_s20 + $0x34] sm:$0x1] }
  0x41   : > { %1583 = vmatpush.bf16.msrb.mxu2 %v7370_v8  ;;  %1448 = vmatpush.bf16.msrb.mxu1 %v7358_v9  ;;  %v7381_v8 = vld [vmem:[%s9626_s0 + $0x1f0] sm:$0xff]  ;;  %v756_v9 = vld [vmem:[%s7782_s20 + $0x38] sm:$0xe]  ;;  %v7336_v47 = vld [vmem:[%s7782_s20 + $0x1c] sm:$0xf0]  ;;  %v1145_v5 = vrot.slane %v1143_v55, 5 }
  0x42   : > { %v5720_v19 = vrot.slane %v756_v9, 9  ;;  %v1132_v26 = vsel %vm7814_vm3, %v1127_v14, %v1131_v15  ;;  %v5800_v57 = vor.u32 %v7336_v47, %v5799_v46  ;;  %v7401_v14 = vld [vmem:[%s9626_s0 + $0x270] sm:$0xff]  ;;  %v7384_v15 = vld [vmem:[%s9626_s0 + $0x208] sm:$0xff]  ;;  %v7383_v44 = vld [vmem:[%s9626_s0 + $0x200] sm:$0xff] }
  0x43   : > { %1275 = vmatpush.bf16.msrb.mxu0 %v7349_v10  ;;  %1029 = vmatpush.bf16.msrb.mxu3 %v7341_v11  ;;  %v5719_v10 = vrot.slane %v755_v3, 9  ;;  %v1117_v11 = vrot.slane %v1115_v1, 5  ;;  %v7385_v3 = vld [vmem:[%s9626_s0 + $0x210] sm:$0xff]  ;;  %v7375_v24 = vld [vmem:[%s9626_s0 + $0x1c0] sm:$0xff] }
  0x45   : > { %1584 = vmatpush.bf16.msrb.mxu2 %v7369_v20  ;;  %1449 = vmatpush.bf16.msrb.mxu1 %v7357_v29  ;;  %v7388_v20 = vld [vmem:[%s9626_s0 + $0x228] sm:$0xff]  ;;  %v7402_v29 = vld [vmem:[%s9626_s0 + $0x278] sm:$0xff]  ;;  %v1118_v25 = vsel %vm7814_vm3, %v1113_v13, %v1117_v11  ;;  %v803_v27 = vsel %vm7837_vm5, %v5719_v10, %v802_v18  ;;  %v1337_v11 = vrot.slane %v7965_v56, 5  ;;  %v7377_v13 = vld [vmem:[%s9626_s0 + $0x1d0] sm:$0xff] }
  0x46   : > { %v831_v43 = vunpack.c.l.b16 %v803_v27  ;;  %v7408_v56 = vld [vmem:[%s9626_s0 + $0x2a8] sm:$0xff] }
  0x47   : > { %1276 = vmatpush.bf16.msrb.mxu0 %v7348_v32  ;;  %1030 = vmatpush.bf16.msrb.mxu3 %v7340_v23  ;;  %v1134_v32 = vshrl.u32 %v5849_v12, 16  ;;  %v1137_v23 = vshll.u32 %v5849_v12, 16  ;;  %v5853_v12 = vld [vmem:[%s7782_s20 + $0x38] sm:$0xf] }
  0x49   : > { %1585 = vmatpush.bf16.msrb.mxu2 %v7368_v37  ;;  %1450 = vmatpush.bf16.msrb.mxu1 %v7356_v38  ;;  %v1136_v34 = vrot.slane %v1134_v32, 4  ;;  %v1139_v35 = vrot.slane %v1137_v23, 5  ;;  %v1208_v37 = vunpack.c.l.b16 %v1118_v25  ;;  %v1209_v38 = vunpack.c.l.b16 %v1132_v26  ;;  %v5803_v25 = vld [vmem:[%s7782_s20 + $0x28] sm:$0xf]  ;;  %v7337_v26 = vld [vmem:[%s7782_s20 + $0x2c] sm:$0xf0] }
  0x4a   : > { %v1165_v32 = vshll.u32 %v5853_v12, 16 }
  0x4b   : > { %1277 = vmatpush.bf16.msrb.mxu0 %v7347_v28  ;;  %1031 = vmatpush.bf16.msrb.mxu3 %v7339_v36  ;;  %v807_v28 = vsel %vm7837_vm5, %v5720_v19, %v806_v21  ;;  %v5679_v36 = vld [vmem:[%s7782_s20 + $0x30] sm:$0xf]  ;;  %v1140_v54 = vor.u32 %v1139_v35, %v1136_v34  ;;  %v8158_v34 = vld [vmem:[%s7782_s20 + $0x3c] sm:$0x1]  ;;  %v8161_v35 = vld [vmem:[%s7782_s20 + $0x44] sm:$0x1] }
  0x4c   : > { %v832_v45 = vunpack.c.l.b16 %v807_v28  ;;  %v1171_v47 = vshll.u32 %v8158_v34, 16 }
  0x4d   : > { %1586 = vmatpush.bf16.msrb.mxu2 %v7367_v59  ;;  %1451 = vmatpush.bf16.msrb.mxu1 %v7355_v60  ;;  %v1215_v59 = vpack.c.b16 %v1209_v38, %v1208_v37  ;;  %v1154_v60 = vor.u32 %v1153_v42, %v1150_v40  ;;  %v1141_v4 = vrot.slane %v1140_v54, 4  ;;  %v1167_v37 = vrot.slane %v1165_v32, 5  ;;  %v5995_v42 = vld [vmem:[%s7782_s20 + $0x10] sm:$0xf]  ;;  %v7338_v32 = vld [vmem:[%s7782_s20 + $0x3c] sm:$0xf0] }
  0x4e   : > { %1032 = vmatmul.bf16.vlgmr.msrb.gmra.mxu3 %v5796_v62  ;;  %1278 = vmatmul.bf16.vlgmr.msrb.gmra.mxu0 %v1214_v63  ;;  %v5905_v62 = vld [vmem:[%s7782_s20 + $0x8] sm:$0xe]  ;;  %v836_v1 = vpack.c.b16 %v832_v45, %v831_v43  ;;  %v7363_v43 = vld [vmem:[%s7782_s20 + $0x14] sm:$0xf0]  ;;  %v5804_v45 = vor.u32 %v7337_v26, %v5803_v25  ;;  %v5999_v26 = vld [vmem:[%s7782_s20 + $0x20] sm:$0xf] }
  0x4f   : > { %1999 = vmatpush.bf16.msra.mxu0 %v7390_v49  ;;  %1825 = vmatpush.bf16.msra.mxu3 %v7382_v50  ;;  %v7310_v49 = vld [vmem:[%s7782_s20 + $0x34] sm:$0xf0]  ;;  %v5913_v6 = vrot.slane %v5905_v62, 9  ;;  %v1146_v18 = vsel %vm7814_vm3, %v1141_v4, %v1145_v5  ;;  %v6041_v62 = vld [vmem:[%s7782_s20 + $0x10] sm:$0xf]  ;;  %v7399_v4 = vld [vmem:[%s9626_s0 + $0x260] sm:$0xff] }
  0x50   : > { %738 = vmatmul.bf16.gmra.mxu1 %v5676_v61  ;;  %907 = vmatmul.bf16.gmra.mxu2 %v835_v2  ;;  %v7386_v50 = vld [vmem:[%s9626_s0 + $0x218] sm:$0xff]  ;;  %v1157_v61 = vshll.u32 %v8100_v48, 16  ;;  %v5680_v63 = vor.u32 %v7310_v49, %v5679_v36  ;;  %v5906_v2 = vld [vmem:[%s7782_s20 + $0x10] sm:$0xe]  ;;  %v1210_v27 = vunpack.c.l.b16 %v1146_v18  ;;  %v1185_v49 = vshll.u32 %v8161_v35, 16 }
  0x51   : > { %2379 = vmatpush.bf16.msra.mxu2 %v7410_v17  ;;  %2133 = vmatpush.bf16.msra.mxu1 %v7402_v29  ;;  %v5914_v10 = vrot.slane %v5906_v2, 9  ;;  %v7400_v17 = vld [vmem:[%s9626_s0 + $0x268] sm:$0xff]  ;;  %v1162_v29 = vshrl.u32 %v5853_v12, 16  ;;  %v7406_v5 = vld [vmem:[%s9626_s0 + $0x298] sm:$0xff]  ;;  %v1633_v12 = vshrl.u32 %v6041_v62, 16 }
  0x52   : > { %v1159_v9 = vrot.slane %v1157_v61, 5  ;;  %v1187_v61 = vrot.slane %v1185_v49, 5  ;;  %v5807_v18 = vld [vmem:[%s7782_s20 + $0x38] sm:$0xf]  ;;  %v1349_v49 = vrot.slane %v8095_v39, 5  ;;  %v7428_v39 = vld [vmem:[%s9626_s0 + $0x328] sm:$0xff] }
  0x53   : > { %2000 = vmatpush.bf16.msra.mxu0 %v7389_v7  ;;  %1826 = vmatpush.bf16.msra.mxu3 %v7381_v8  ;;  %v1333_v7 = vrot.slane %v7962_v52, 5  ;;  %v1155_v8 = vrot.slane %v1154_v60, 4  ;;  %v5855_v52 = vld [vmem:[%s7782_s20 + $0x40] sm:$0xf]  ;;  %v1164_v36 = vrot.slane %v1162_v29, 4  ;;  %v1173_v60 = vrot.slane %v1171_v47, 5 }
  0x54   : > { %v1176_v23 = vshrl.u32 %v5855_v52, 16  ;;  %v5910_v47 = vld [vmem:[%s7782_s20 + $0x30] sm:$0xe] }
  0x55   : > { %2380 = vmatpush.bf16.msra.mxu2 %v7409_v30  ;;  %2134 = vmatpush.bf16.msra.mxu1 %v7401_v14  ;;  %v1160_v19 = vsel %vm7814_vm3, %v1155_v8, %v1159_v9  ;;  %v1334_v21 = vsel %vm7837_vm5, %v5913_v6, %v1333_v7  ;;  %v1179_v30 = vshll.u32 %v5855_v52, 16  ;;  %v1168_v54 = vor.u32 %v1167_v37, %v1164_v36  ;;  %v6043_v9 = vld [vmem:[%s7782_s20 + $0x18] sm:$0xf] }
  0x56   : > { %v1211_v28 = vunpack.c.l.b16 %v1160_v19  ;;  %v1178_v38 = vrot.slane %v1176_v23, 4  ;;  %v1341_v6 = vrot.slane %v8039_v51, 5  ;;  %v1345_v8 = vrot.slane %v8042_v58, 5  ;;  %v7398_v51 = vld [vmem:[%s9626_s0 + $0x258] sm:$0xff]  ;;  %v7405_v58 = vld [vmem:[%s9626_s0 + $0x290] sm:$0xff] }
  0x57   : > { %2001 = vmatpush.bf16.msra.mxu0 %v7388_v20  ;;  %1827 = vmatpush.bf16.msra.mxu3 %v7380_v22  ;;  %v1338_v20 = vsel %vm7837_vm5, %v5914_v10, %v1337_v11  ;;  %v7407_v22 = vld [vmem:[%s9626_s0 + $0x2a0] sm:$0xff]  ;;  %v1181_v40 = vrot.slane %v1179_v30, 5  ;;  %v7418_v10 = vld [vmem:[%s9626_s0 + $0x2f8] sm:$0xff]  ;;  %v7429_v11 = vld [vmem:[%s9626_s0 + $0x330] sm:$0xff] }
  0x58   : > { %v1216_v46 = vpack.c.b16 %v1211_v28, %v1210_v27  ;;  %v7364_v27 = vld [vmem:[%s7782_s20 + $0x24] sm:$0xf0] }
  0x59   : > { %2381 = vmatpush.bf16.msra.mxu2 %v7408_v56  ;;  %2135 = vmatpush.bf16.msra.mxu1 %v7400_v17  ;;  %v1182_v55 = vor.u32 %v1181_v40, %v1178_v38  ;;  %v1650_v56 = vshll.u32 %v6043_v9, 16  ;;  %v6000_v40 = vor.u32 %v7364_v27, %v5999_v26 }
  0x5b   : > { %2002 = vmatpush.bf16.msra.mxu0 %v7387_v31  ;;  %1828 = vmatpush.bf16.msra.mxu3 %v7379_v33  ;;  %v1380_v31 = vunpack.c.l.b16 %v1334_v21  ;;  %v1381_v33 = vunpack.c.l.b16 %v1338_v20  ;;  %v6042_v20 = vld [vmem:[%s7782_s20 + $0x14] sm:$0x1]  ;;  %v1652_v25 = vrot.slane %v1650_v56, 5 }
  0x5c   : > { %v1642_v28 = vshll.u32 %v6042_v20, 16 }
  0x5d   : > { %2382 = vmatpush.bf16.msra.mxu2 %v7407_v22  ;;  %2136 = vmatpush.bf16.msra.mxu1 %v7399_v4  ;;  %v1635_v22 = vrot.slane %v1633_v12, 4  ;;  %v1353_v4 = vrot.slane %v8100_v48, 5  ;;  %v7403_v12 = vld [vmem:[%s9626_s0 + $0x280] sm:$0xff] }
  0x5e   : > { %1037 = vmatmul.bf16.gmra.mxu3 %v5800_v57  ;;  %1283 = vmatmul.bf16.gmra.mxu0 %v1215_v59  ;;  %v5907_v57 = vld [vmem:[%s7782_s20 + $0x18] sm:$0xe]  ;;  %v5908_v59 = vld [vmem:[%s7782_s20 + $0x20] sm:$0xe] }
  0x5f   : > { %2003 = vmatpush.bf16.msra.mxu0 %v7386_v50  ;;  %1829 = vmatpush.bf16.msra.mxu3 %v7378_v53  ;;  %v1388_v50 = vpack.c.b16 %v1381_v33, %v1380_v31  ;;  %v5996_v53 = vor.u32 %v7363_v43, %v5995_v42  ;;  %v5915_v2 = vrot.slane %v5907_v57, 9  ;;  %v5916_v7 = vrot.slane %v5908_v59, 9  ;;  %v6105_v43 = vld [vmem:[%s7782_s20 + $0x10] sm:$0xe]  ;;  %v6045_v59 = vld [vmem:[%s7782_s20 + $0x20] sm:$0xf] }
  0x60   : > { %743 = vmatmul.bf16.gmra.mxu1 %v5680_v63  ;;  %912 = vmatmul.bf16.gmra.mxu2 %v836_v1  ;;  %v1169_v63 = vrot.slane %v1168_v54, 4  ;;  %v1183_v1 = vrot.slane %v1182_v55, 4  ;;  %v5808_v31 = vor.u32 %v7338_v32, %v5807_v18  ;;  %v6113_v55 = vrot.slane %v6105_v43, 9 }
  0x61   : > { %2383 = vmatpush.bf16.msra.mxu2 %v7406_v5  ;;  %v1346_v17 = vsel %vm7837_vm5, %v5916_v7, %v1345_v8  ;;  %2137 = vmatpush.bf16.msra.mxu1 %v7398_v51  ;;  %v1888_v57 = vrot.slane %v6042_v20, 5  ;;  %v6047_v5 = vld [vmem:[%s7782_s20 + $0x28] sm:$0xf]  ;;  %v7427_v8 = vld [vmem:[%s9626_s0 + $0x320] sm:$0xff]  ;;  %v8258_v20 = vld [vmem:[%s7782_s20 + $0x2c] sm:$0x1] }
  0x62   : > { %v1174_v14 = vsel %vm7814_vm3, %v1169_v63, %v1173_v60  ;;  %v1188_v52 = vsel %vm7814_vm3, %v1183_v1, %v1187_v61  ;;  %v1383_v30 = vunpack.c.l.b16 %v1346_v17  ;;  %v7417_v63 = vld [vmem:[%s9626_s0 + $0x2f0] sm:$0xff]  ;;  %v7416_v7 = vld [vmem:[%s9626_s0 + $0x2e8] sm:$0xff]  ;;  %v1684_v27 = vshll.u32 %v8258_v20, 16 }
  0x63   : > { %2004 = vmatpush.bf16.msra.mxu0 %v7385_v3  ;;  %1830 = vmatpush.bf16.msra.mxu3 %v7377_v13  ;;  %v7430_v3 = vld [vmem:[%s9626_s0 + $0x338] sm:$0xff]  ;;  %v1636_v13 = vshll.u32 %v6041_v62, 16  ;;  %v1212_v19 = vunpack.c.l.b16 %v1174_v14  ;;  %v1213_v21 = vunpack.c.l.b16 %v1188_v52  ;;  %v7397_v1 = vld [vmem:[%s9626_s0 + $0x250] sm:$0xff]  ;;  %v1889_v48 = vsel %vm7837_vm5, %v6113_v55, %v1888_v57  ;;  %v7396_v51 = vld [vmem:[%s9626_s0 + $0x248] sm:$0xff] }
  0x64   : > { %v1675_v14 = vshrl.u32 %v6047_v5, 16  ;;  %v1678_v52 = vshll.u32 %v6047_v5, 16  ;;  %v1935_v17 = vunpack.c.l.b16 %v1889_v48  ;;  %v1686_v55 = vrot.slane %v1684_v27, 5  ;;  %v2172_v5 = vld [vmem:[%s8280_s10 + $0x8] sm:$0xf] }
  0x65   : > { %v1638_v29 = vrot.slane %v1636_v13, 5  ;;  %2384 = vmatpush.bf16.msra.mxu2 %v7405_v58  ;;  %v1217_v33 = vpack.c.b16 %v1213_v21, %v1212_v19  ;;  %2138 = vmatpush.bf16.msra.mxu1 %v7397_v1  ;;  %v6046_v21 = vld [vmem:[%s7782_s20 + $0x24] sm:$0x1]  ;;  %v7426_v1 = vld [vmem:[%s9626_s0 + $0x318] sm:$0xff] }
  0x66   : > { %v1670_v26 = vshll.u32 %v6046_v21, 16 }
  0x67   : > { %2005 = vmatpush.bf16.msra.mxu0 %v7384_v15  ;;  %1831 = vmatpush.bf16.msra.mxu3 %v7376_v16  ;;  %v1647_v15 = vshrl.u32 %v6043_v9, 16  ;;  %v1342_v16 = vsel %vm7837_vm5, %v5915_v2, %v1341_v6  ;;  %v1639_v36 = vor.u32 %v1638_v29, %v1635_v22  ;;  %v7404_v6 = vld [vmem:[%s9626_s0 + $0x288] sm:$0xff] }
  0x68   : > { %v1382_v23 = vunpack.c.l.b16 %v1342_v16 }
  0x69   : > { %2385 = vmatpush.bf16.msra.mxu2 %v7404_v6  ;;  %2139 = vmatpush.bf16.msra.mxu1 %v7396_v51 }
  0x6a   : > { %v1389_v38 = vpack.c.b16 %v1383_v30, %v1382_v23  ;;  %v1677_v30 = vrot.slane %v1675_v14, 4  ;;  %v2201_v14 = vshrl.u32 %v2172_v5, 16 }
  0x6b   : > { %2006 = vmatpush.bf16.msra.mxu0 %v7383_v44  ;;  %1832 = vmatpush.bf16.msra.mxu3 %v7375_v24  ;;  %v6044_v44 = vld [vmem:[%s7782_s20 + $0x1c] sm:$0x1]  ;;  %v1649_v24 = vrot.slane %v1647_v15, 4 }
  0x6c   : > { %v1656_v37 = vshll.u32 %v6044_v44, 16  ;;  %v1892_v62 = vrot.slane %v6044_v44, 5  ;;  %v1680_v44 = vrot.slane %v1678_v52, 5  ;;  %v2204_v52 = vshll.u32 %v2172_v5, 16  ;;  %v7413_v5 = vld [vmem:[%s9626_s0 + $0x2d0] sm:$0xff] }
  0x6d   : > { %v1653_v42 = vor.u32 %v1652_v25, %v1649_v24  ;;  %2386 = vmatpush.bf16.msra.mxu2 %v7403_v12  ;;  %v6003_v24 = vld [vmem:[%s7782_s20 + $0x30] sm:$0xf]  ;;  %v7365_v25 = vld [vmem:[%s7782_s20 + $0x34] sm:$0xf0] }
  0x6e   : > { %1042 = vmatmul.bf16.gmra.mxu3 %v5804_v45  ;;  %1288 = vmatmul.bf16.gmra.mxu0 %v1216_v46  ;;  %v6106_v45 = vld [vmem:[%s7782_s20 + $0x18] sm:$0xe]  ;;  %v5909_v46 = vld [vmem:[%s7782_s20 + $0x28] sm:$0xe]  ;;  %v1658_v54 = vrot.slane %v1656_v37, 5  ;;  %v1681_v43 = vor.u32 %v1680_v44, %v1677_v30 }
  0x6f   : > { %2688 = vmatpush.bf16.msrb.mxu0 %v7430_v3  ;;  %2553 = vmatpush.bf16.msrb.mxu3 %v7418_v10  ;;  %v1654_v60 = vrot.slane %v1653_v42, 4  ;;  %v6114_v61 = vrot.slane %v6106_v45, 9  ;;  %v5917_v2 = vrot.slane %v5909_v46, 9  ;;  %v5918_v3 = vrot.slane %v5910_v47, 9  ;;  %v6107_v45 = vld [vmem:[%s7782_s20 + $0x20] sm:$0xe] }
  0x70   : > { %1452 = vmatmul.bf16.vlgmr.msrb.gmra.mxu1 %v1388_v50  ;;  %1587 = vmatmul.bf16.vlgmr.msrb.gmra.mxu2 %v5996_v53  ;;  %v1644_v50 = vrot.slane %v1642_v28, 5  ;;  %v1640_v53 = vrot.slane %v1639_v36, 4  ;;  %v1661_v10 = vshrl.u32 %v6045_v59, 16  ;;  %v5912_v36 = vld [vmem:[%s7782_s20 + $0x40] sm:$0xe]  ;;  %v6004_v42 = vor.u32 %v7365_v25, %v6003_v24  ;;  %v7446_v12 = vld [vmem:[%s9626_s0 + $0x3b8] sm:$0xff] }
  0x71   : > { %v1659_v13 = vsel %vm7814_vm3, %v1654_v60, %v1658_v54  ;;  %v1893_v58 = vsel %vm7837_vm5, %v6114_v61, %v1892_v62  ;;  %v1350_v15 = vsel %vm7837_vm5, %v5917_v2, %v1349_v49  ;;  %v1354_v56 = vsel %vm7837_vm5, %v5918_v3, %v1353_v4  ;;  %v6108_v46 = vld [vmem:[%s7782_s20 + $0x28] sm:$0xe]  ;;  %v6049_v62 = vld [vmem:[%s7782_s20 + $0x30] sm:$0xf]  ;;  %v2170_v4 = vld [vmem:[%s8280_s10] sm:$0xf]  ;;  %3108 = vmatpush.bf16.msrb.mxu2 %v7446_v12 }
  0x72   : > { %v1645_v9 = vsel %vm7814_vm3, %v1640_v53, %v1644_v50  ;;  %v1762_v18 = vunpack.c.l.b16 %v1659_v13  ;;  %v1936_v19 = vunpack.c.l.b16 %v1893_v58  ;;  %v1663_v22 = vrot.slane %v1661_v10, 4  ;;  %v6007_v44 = vld [vmem:[%s7782_s20 + $0x40] sm:$0xf]  ;;  %v6052_v24 = vld [vmem:[%s7782_s20 + $0x3c] sm:$0x1] }
  0x73   : > { %2689 = vmatpush.bf16.msrb.mxu0 %v7429_v11  ;;  %2554 = vmatpush.bf16.msrb.mxu3 %v7417_v63  ;;  %v1664_v11 = vshll.u32 %v6045_v59, 16  ;;  %v1761_v16 = vunpack.c.l.b16 %v1645_v9  ;;  %v1384_v32 = vunpack.c.l.b16 %v1350_v15  ;;  %v1385_v23 = vunpack.c.l.b16 %v1354_v56  ;;  %v6051_v63 = vld [vmem:[%s7782_s20 + $0x38] sm:$0xf]  ;;  %v7366_v25 = vld [vmem:[%s7782_s20 + $0x44] sm:$0xf0] }
  0x74   : > { %v1357_v47 = vrot.slane %v8158_v34, 5  ;;  %v1361_v49 = vrot.slane %v8161_v35, 5  ;;  %v5920_v53 = vrot.slane %v5912_v36, 9  ;;  %v1672_v54 = vrot.slane %v1670_v26, 5  ;;  %v2176_v12 = vld [vmem:[%s8280_s10 + $0x18] sm:$0xf] }
  0x75   : > { %v1666_v29 = vrot.slane %v1664_v11, 5  ;;  %v1769_v28 = vpack.c.b16 %v1762_v18, %v1761_v16  ;;  %v6115_v59 = vrot.slane %v6107_v45, 9  ;;  %v1896_v60 = vrot.slane %v6046_v21, 5  ;;  %v7414_v18 = vld [vmem:[%s9626_s0 + $0x2d8] sm:$0xff] }
  0x76   : > { %v6116_v61 = vrot.slane %v6108_v46, 9  ;;  %v1682_v34 = vrot.slane %v1681_v43, 4  ;;  %v1900_v35 = vrot.slane %v8258_v20, 5  ;;  %v1689_v2 = vshrl.u32 %v6049_v62, 16 }
  0x77   : > { %2690 = vmatpush.bf16.msrb.mxu0 %v7428_v39  ;;  %2555 = vmatpush.bf16.msrb.mxu3 %v7416_v7  ;;  %v1667_v37 = vor.u32 %v1666_v29, %v1663_v22  ;;  %v7415_v39 = vld [vmem:[%s9626_s0 + $0x2e0] sm:$0xff]  ;;  %v1692_v3 = vshll.u32 %v6049_v62, 16  ;;  %v1897_v7 = vsel %vm7837_vm5, %v6115_v59, %v1896_v60  ;;  %v1706_v9 = vshll.u32 %v6051_v63, 16  ;;  %v8314_v22 = vld [vmem:[%s7782_s20 + $0x34] sm:$0x1] }
  0x78   : > { %v1362_v10 = vsel %vm7837_vm5, %v5920_v53, %v1361_v49  ;;  %v1687_v11 = vsel %vm7814_vm3, %v1682_v34, %v1686_v55  ;;  %v1901_v51 = vsel %vm7837_vm5, %v6116_v61, %v1900_v35  ;;  %v2187_v13 = vshrl.u32 %v2170_v4, 16  ;;  %v6109_v49 = vld [vmem:[%s7782_s20 + $0x30] sm:$0xe] }
  0x79   : > { %v1668_v57 = vrot.slane %v1667_v37, 4  ;;  %v2190_v58 = vshll.u32 %v2170_v4, 16  ;;  %v1937_v56 = vunpack.c.l.b16 %v1897_v7  ;;  %v1691_v16 = vrot.slane %v1689_v2, 4  ;;  %v8321_v37 = vld [vmem:[%s8280_s10 + $0x4] sm:$0x1]  ;;  %v7445_v53 = vld [vmem:[%s9626_s0 + $0x3b0] sm:$0xff] }
  0x7a   : > { %v1764_v21 = vunpack.c.l.b16 %v1687_v11  ;;  %v1938_v20 = vunpack.c.l.b16 %v1901_v51  ;;  %v1387_v30 = vunpack.c.l.b16 %v1362_v10  ;;  %v2189_v26 = vrot.slane %v2187_v13, 4  ;;  %3109 = vmatpush.bf16.msrb.mxu2 %v7445_v53  ;;  %v6055_v4 = vld [vmem:[%s7782_s20 + $0x48] sm:$0xf]  ;;  %v2174_v10 = vld [vmem:[%s8280_s10 + $0x10] sm:$0xf] }
  0x7b   : > { %2691 = vmatpush.bf16.msrb.mxu0 %v7427_v8  ;;  %2556 = vmatpush.bf16.msrb.mxu3 %v7415_v39  ;;  %v1673_v6 = vsel %vm7814_vm3, %v1668_v57, %v1672_v54  ;;  %v1703_v8 = vshrl.u32 %v6051_v63, 16  ;;  %v2192_v27 = vrot.slane %v2190_v58, 5  ;;  %v1698_v36 = vshll.u32 %v8314_v22, 16  ;;  %v6110_v54 = vld [vmem:[%s7782_s20 + $0x38] sm:$0xe] }
  0x7c   : > { %v1763_v15 = vunpack.c.l.b16 %v1673_v6  ;;  %v1712_v45 = vshll.u32 %v6052_v24, 16  ;;  %v2196_v57 = vshll.u32 %v8321_v37, 16  ;;  %v6117_v63 = vrot.slane %v6109_v49, 9  ;;  %v7424_v6 = vld [vmem:[%s9626_s0 + $0x308] sm:$0xff]  ;;  %v8378_v49 = vld [vmem:[%s8280_s10 + $0x14] sm:$0x1] }
  0x7d   : > { %v1705_v29 = vrot.slane %v1703_v8, 4  ;;  %v2193_v55 = vor.u32 %v2192_v27, %v2189_v26  ;;  %v1700_v62 = vrot.slane %v1698_v36, 5  ;;  %v1904_v39 = vrot.slane %v8314_v22, 5  ;;  %v6187_v36 = vld [vmem:[%s8280_s10] sm:$0xf] }
  0x7e   : > { %1047 = vmatmul.bf16.gmra.mxu3 %v5808_v31  ;;  %1293 = vmatmul.bf16.gmra.mxu0 %v1217_v33  ;;  %v1943_v31 = vpack.c.b16 %v1936_v19, %v1935_v17  ;;  %v5911_v33 = vld [vmem:[%s7782_s20 + $0x38] sm:$0xe]  ;;  %v1694_v17 = vrot.slane %v1692_v3, 5  ;;  %v7425_v19 = vld [vmem:[%s9626_s0 + $0x310] sm:$0xff]  ;;  %v1714_v35 = vrot.slane %v1712_v45, 5  ;;  %v6118_v2 = vrot.slane %v6110_v54, 9 }
  0x7f   : > { %v5919_v50 = vrot.slane %v5911_v33, 9  ;;  %2692 = vmatpush.bf16.msrb.mxu0 %v7426_v1  ;;  %2557 = vmatpush.bf16.msrb.mxu3 %v7414_v18  ;;  %v6053_v1 = vld [vmem:[%s7782_s20 + $0x40] sm:$0xf]  ;;  %v1908_v3 = vrot.slane %v6052_v24, 5  ;;  %v2194_v7 = vrot.slane %v2193_v55, 4  ;;  %v2198_v8 = vrot.slane %v2196_v57, 5 }
  0x80   : > { %1457 = vmatmul.bf16.gmra.mxu1 %v1389_v38  ;;  %1592 = vmatmul.bf16.gmra.mxu2 %v6000_v40  ;;  %v7395_v38 = vld [vmem:[%s9626_s0 + $0x240] sm:$0xff]  ;;  %v1390_v40 = vpack.c.b16 %v1385_v23, %v1384_v32  ;;  %v1708_v32 = vrot.slane %v1706_v9, 5  ;;  %v1695_v33 = vor.u32 %v1694_v17, %v1691_v16  ;;  %v1717_v11 = vshrl.u32 %v6053_v1, 16  ;;  %v7437_v18 = vld [vmem:[%s9626_s0 + $0x370] sm:$0xff]  ;;  %v7412_v24 = vld [vmem:[%s9626_s0 + $0x2c8] sm:$0xff] }
  0x81   : > { %2140 = vmatpush.bf16.msra.mxu1 %v7395_v38  ;;  %v1358_v48 = vsel %vm7837_vm5, %v5919_v50, %v1357_v47  ;;  %v8324_v38 = vld [vmem:[%s8280_s10 + $0xc] sm:$0x1]  ;;  %v6008_v47 = vor.u32 %v7366_v25, %v6007_v44  ;;  %v7438_v50 = vld [vmem:[%s9626_s0 + $0x378] sm:$0xff]  ;;  %v1720_v51 = vshll.u32 %v6053_v1, 16  ;;  %v2215_v16 = vshrl.u32 %v2174_v10, 16  ;;  %v7423_v25 = vld [vmem:[%s9626_s0 + $0x300] sm:$0xff] }
  0x82   : > { %v1386_v23 = vunpack.c.l.b16 %v1358_v48  ;;  %v1709_v43 = vor.u32 %v1708_v32, %v1705_v29  ;;  %v2210_v60 = vshll.u32 %v8324_v38, 16  ;;  %v1696_v61 = vrot.slane %v1695_v33, 4  ;;  %v8382_v57 = vld [vmem:[%s8280_s10 + $0x1c] sm:$0x1]  ;;  %v6111_v1 = vld [vmem:[%s7782_s20 + $0x40] sm:$0xe] }
  0x83   : > { %2693 = vmatpush.bf16.msrb.mxu0 %v7425_v19  ;;  %2558 = vmatpush.bf16.msrb.mxu3 %v7413_v5  ;;  %v2218_v17 = vshll.u32 %v2174_v10, 16  ;;  %v7444_v19 = vld [vmem:[%s9626_s0 + $0x3a8] sm:$0xff]  ;;  %v2229_v22 = vshrl.u32 %v2176_v12, 16  ;;  %v2232_v29 = vshll.u32 %v2176_v12, 16  ;;  %v1722_v44 = vrot.slane %v1720_v51, 5  ;;  %v7443_v5 = vld [vmem:[%s9626_s0 + $0x3a0] sm:$0xff] }
  0x84   : > { %v1391_v46 = vpack.c.b16 %v1387_v30, %v1386_v23  ;;  %v1710_v34 = vrot.slane %v1709_v43, 4  ;;  %v2212_v48 = vrot.slane %v2210_v60, 5  ;;  %v1701_v13 = vsel %vm7814_vm3, %v1696_v61, %v1700_v62  ;;  %3110 = vmatpush.bf16.msrb.mxu2 %v7444_v19  ;;  %v6056_v43 = vld [vmem:[%s7782_s20 + $0x4c] sm:$0x1]  ;;  %v2178_v19 = vld [vmem:[%s8280_s10 + $0x20] sm:$0xf] }
  0x85   : > { %2934 = vmatpush.bf16.msrb.mxu1 %v7438_v50  ;;  %v1765_v32 = vunpack.c.l.b16 %v1701_v13  ;;  %v1719_v30 = vrot.slane %v1717_v11, 4  ;;  %v2217_v45 = vrot.slane %v2215_v16, 4  ;;  %v2231_v50 = vrot.slane %v2229_v22, 4  ;;  %v7466_v16 = vld [vmem:[%s9626_s0 + $0x438] sm:$0xff] }
  0x86   : > { %v1715_v58 = vsel %vm7814_vm3, %v1710_v34, %v1714_v35  ;;  %v2234_v53 = vrot.slane %v2232_v29, 5  ;;  %v1740_v62 = vshll.u32 %v6056_v43, 16  ;;  %v7411_v34 = vld [vmem:[%s9626_s0 + $0x2c0] sm:$0xff]  ;;  %v6119_v13 = vrot.slane %v6111_v1, 9 }
  0x87   : > { %2694 = vmatpush.bf16.msrb.mxu0 %v7424_v6  ;;  %v1766_v23 = vunpack.c.l.b16 %v1715_v58  ;;  %2559 = vmatpush.bf16.msrb.mxu3 %v7412_v24  ;;  %v1723_v54 = vor.u32 %v1722_v44, %v1719_v30  ;;  %v8436_v1 = vld [vmem:[%s8280_s10 + $0x24] sm:$0x1] }
  0x88   : > { %3111 = vmatpush.bf16.msrb.mxu2 %v7443_v5  ;;  %v1742_v12 = vrot.slane %v1740_v62, 5 }
  0x89   : > { %2935 = vmatpush.bf16.msrb.mxu1 %v7437_v18  ;;  %v1724_v10 = vrot.slane %v1723_v54, 4 }
  0x8b   : > { %2695 = vmatpush.bf16.msrb.mxu0 %v7423_v25  ;;  %2560 = vmatpush.bf16.msrb.mxu3 %v7411_v34 }
  0x8e   : > { %1833 = vmatmul.bf16.vlgmr.msra.gmra.mxu3 %v1769_v28  ;;  %2007 = vmatmul.bf16.vlgmr.msra.gmra.mxu0 %v1943_v31  ;;  %v2203_v28 = vrot.slane %v2201_v14, 4  ;;  %v2206_v31 = vrot.slane %v2204_v52, 5  ;;  %v1731_v14 = vshrl.u32 %v6055_v4, 16  ;;  %v1734_v52 = vshll.u32 %v6055_v4, 16  ;;  %v7436_v4 = vld [vmem:[%s9626_s0 + $0x368] sm:$0xff] }
  0x8f   : > { %2936 = vmatpush.bf16.msrb.mxu1 %v7436_v4  ;;  %3489 = vmatpush.bf16.msra.mxu0 %v7466_v16  ;;  %v2442_v16 = vrot.slane %v8321_v37, 5  ;;  %v2184_v37 = vld [vmem:[%s8280_s10 + $0x38] sm:$0xf] }
  0x90   : > { %1462 = vmatmul.bf16.gmra.mxu1 %v1390_v40  ;;  %1597 = vmatmul.bf16.gmra.mxu2 %v6004_v42  ;;  %v1770_v40 = vpack.c.b16 %v1764_v21, %v1763_v15  ;;  %v1944_v42 = vpack.c.b16 %v1938_v20, %v1937_v56  ;;  %v2207_v59 = vor.u32 %v2206_v31, %v2203_v28  ;;  %v8372_v28 = vld [vmem:[%s7782_s20 + $0x44] sm:$0x1]  ;;  %v1733_v31 = vrot.slane %v1731_v14, 4 }
  0x91   : > { %v1905_v15 = vsel %vm7837_vm5, %v6117_v63, %v1904_v39  ;;  %v1909_v56 = vsel %vm7837_vm5, %v6118_v2, %v1908_v3  ;;  %v2199_v21 = vsel %vm7814_vm3, %v2194_v7, %v2198_v8  ;;  %v1736_v33 = vrot.slane %v1734_v52, 5  ;;  %v6112_v7 = vld [vmem:[%s7782_s20 + $0x48] sm:$0xe]  ;;  %s8917_s20 = scalar_lea.vmem %s9630_s4, %s5611_s17 }
  0x92   : > { %v2208_v9 = vrot.slane %v2207_v59, 4  ;;  %v1939_v26 = vunpack.c.l.b16 %v1905_v15  ;;  %v1940_v27 = vunpack.c.l.b16 %v1909_v56  ;;  %v1726_v55 = vshll.u32 %v8372_v28, 16 }
  0x93   : > { %v1771_v59 = vpack.c.b16 %v1766_v23, %v1765_v32  ;;  %v1737_v61 = vor.u32 %v1736_v33, %v1733_v31  ;;  %v2224_v3 = vshll.u32 %v8378_v49, 16  ;;  %v2235_v8 = vor.u32 %v2234_v53, %v2231_v50 }
  0x94   : > { %v2213_v20 = vsel %vm7814_vm3, %v2208_v9, %v2212_v48  ;;  %v1945_v60 = vpack.c.b16 %v1940_v27, %v1939_v26  ;;  %v2238_v9 = vshll.u32 %v8382_v57, 16  ;;  %v1728_v11 = vrot.slane %v1726_v55, 5  ;;  %v7435_v27 = vld [vmem:[%s9626_s0 + $0x360] sm:$0xff]  ;;  %v6191_v55 = vld [vmem:[%s8280_s10 + $0x10] sm:$0xf] }
  0x95   : > { %v1738_v51 = vrot.slane %v1737_v61, 4  ;;  %v1912_v58 = vrot.slane %v8372_v28, 5  ;;  %v6120_v14 = vrot.slane %v6112_v7, 9  ;;  %v1916_v52 = vrot.slane %v6056_v43, 5  ;;  %v7442_v28 = vld [vmem:[%s9626_s0 + $0x398] sm:$0xff]  ;;  %2937 = vmatpush.bf16.msrb.mxu1 %v7435_v27  ;;  %v7433_v27 = vld [vmem:[%s9626_s0 + $0x350] sm:$0xff] }
  0x96   : > { %v2226_v56 = vrot.slane %v2224_v3, 5  ;;  %v2240_v18 = vrot.slane %v2238_v9, 5  ;;  %v1729_v29 = vsel %vm7814_vm3, %v1724_v10, %v1728_v11  ;;  %v2243_v26 = vshrl.u32 %v2178_v19, 16  ;;  %3112 = vmatpush.bf16.msrb.mxu2 %v7442_v28  ;;  %v7392_v61 = vld [vmem:[%s8280_s10 + $0x14] sm:$0xf0]  ;;  %v7441_v11 = vld [vmem:[%s9626_s0 + $0x390] sm:$0xff] }
  0x97   : > { %v1743_v32 = vsel %vm7814_vm3, %v1738_v51, %v1742_v12  ;;  %v1913_v23 = vsel %vm7837_vm5, %v6119_v13, %v1912_v58  ;;  %v1917_v24 = vsel %vm7837_vm5, %v6120_v14, %v1916_v52  ;;  %v7434_v10 = vld [vmem:[%s9626_s0 + $0x358] sm:$0xff]  ;;  %v2252_v13 = vshll.u32 %v8436_v1, 16  ;;  %v2417_v52 = vld [vmem:[%s8280_s10 + $0x8] sm:$0xe] }
  0x98   : > { %v1768_v50 = vunpack.c.l.b16 %v1743_v32  ;;  %v1941_v53 = vunpack.c.l.b16 %v1913_v23  ;;  %v1942_v54 = vunpack.c.l.b16 %v1917_v24  ;;  %v2245_v62 = vrot.slane %v2243_v26, 4 }
  0x99   : > { %2938 = vmatpush.bf16.msrb.mxu1 %v7434_v10  ;;  %v2254_v32 = vrot.slane %v2252_v13, 5  ;;  %v8500_v10 = vld [vmem:[%s8280_s10 + $0x3c] sm:$0x1] }
  0x9a   : > { %v1946_v5 = vpack.c.b16 %v1942_v54, %v1941_v53  ;;  %3113 = vmatpush.bf16.msrb.mxu2 %v7441_v11  ;;  %v7456_v53 = vld [vmem:[%s9626_s0 + $0x3e8] sm:$0xff]  ;;  %v7463_v54 = vld [vmem:[%s9626_s0 + $0x420] sm:$0xff] }
  0x9d   : > { %2939 = vmatpush.bf16.msrb.mxu1 %v7433_v27 }
  0x9e   : > { %1838 = vmatmul.bf16.gmra.mxu3 %v1770_v40  ;;  %2012 = vmatmul.bf16.gmra.mxu0 %v1944_v42  ;;  %v2315_v40 = vunpack.c.l.b16 %v2199_v21  ;;  %v2316_v42 = vunpack.c.l.b16 %v2213_v20  ;;  %v2180_v20 = vld [vmem:[%s8280_s10 + $0x28] sm:$0xf] }
  0xa0   : > { %1467 = vmatmul.bf16.gmra.mxu1 %v1391_v46  ;;  %1602 = vmatmul.bf16.gmra.mxu2 %v6008_v47  ;;  %v2220_v46 = vrot.slane %v2218_v17, 5  ;;  %v7391_v47 = vld [vmem:[%s8280_s10 + $0x4] sm:$0xf0]  ;;  %v2323_v39 = vpack.c.b16 %v2316_v42, %v2315_v40  ;;  %v2236_v17 = vrot.slane %v2235_v8, 4  ;;  %v2257_v40 = vshrl.u32 %v2180_v20, 16 }
  0xa1   : > { %v6188_v63 = vor.u32 %v7391_v47, %v6187_v36  ;;  %v2246_v36 = vshll.u32 %v2178_v19, 16  ;;  %v2260_v42 = vshll.u32 %v2180_v20, 16  ;;  %v1767_v47 = vunpack.c.l.b16 %v1729_v29  ;;  %v2182_v19 = vld [vmem:[%s8280_s10 + $0x30] sm:$0xf] }
  0xa2   : > { %v2221_v2 = vor.u32 %v2220_v46, %v2217_v45  ;;  %v2241_v33 = vsel %vm7814_vm3, %v2236_v17, %v2240_v18  ;;  %v7458_v45 = vld [vmem:[%s9626_s0 + $0x3f8] sm:$0xff]  ;;  %v7465_v46 = vld [vmem:[%s9626_s0 + $0x430] sm:$0xff]  ;;  %v6192_v8 = vor.u32 %v7392_v61, %v6191_v55  ;;  %v6282_v17 = vrot.slane %v2417_v52, 9  ;;  %v7432_v55 = vld [vmem:[%s9626_s0 + $0x348] sm:$0xff] }
  0xa3   : > { %3243 = vmatpush.bf16.msra.mxu3 %v7458_v45  ;;  %3490 = vmatpush.bf16.msra.mxu0 %v7465_v46  ;;  %v2248_v34 = vrot.slane %v2246_v36, 5  ;;  %v1772_v4 = vpack.c.b16 %v1768_v50, %v1767_v47  ;;  %v2446_v18 = vrot.slane %v8324_v38, 5  ;;  %v7457_v20 = vld [vmem:[%s9626_s0 + $0x3f0] sm:$0xff]  ;;  %v2271_v38 = vshrl.u32 %v2182_v19, 16  ;;  %v7431_v52 = vld [vmem:[%s9626_s0 + $0x340] sm:$0xff] }
  0xa4   : > { %v2222_v15 = vrot.slane %v2221_v2, 4  ;;  %v8439_v2 = vld [vmem:[%s8280_s10 + $0x2c] sm:$0x1]  ;;  %v2274_v26 = vshll.u32 %v2182_v19, 16  ;;  %v2285_v46 = vshrl.u32 %v2184_v37, 16  ;;  %v2288_v47 = vshll.u32 %v2184_v37, 16  ;;  %2940 = vmatpush.bf16.msrb.mxu1 %v7432_v55 }
  0xa5   : > { %v2249_v12 = vor.u32 %v2248_v34, %v2245_v62  ;;  %v2266_v14 = vshll.u32 %v8439_v2, 16  ;;  %v2447_v36 = vsel %vm7837_vm5, %v6282_v17, %v2446_v18  ;;  %v2273_v61 = vrot.slane %v2271_v38, 4 }
  0xa6   : > { %v2227_v25 = vsel %vm7814_vm3, %v2222_v15, %v2226_v56  ;;  %v2276_v62 = vrot.slane %v2274_v26, 5  ;;  %v2450_v26 = vrot.slane %v8378_v49, 5 }
  0xa7   : > { %v2250_v29 = vrot.slane %v2249_v12, 4  ;;  %3244 = vmatpush.bf16.msra.mxu3 %v7457_v20  ;;  %v2294_v20 = vshll.u32 %v8500_v10, 16 }
  0xa8   : > { %v2277_v13 = vor.u32 %v2276_v62, %v2273_v61  ;;  %2941 = vmatpush.bf16.msrb.mxu1 %v7431_v52  ;;  %v6367_v52 = vld [vmem:[%s8280_s10 + $0x18] sm:$0xf] }
  0xab   : > { %v628_v35 = vpop.f32.mrf.mxu0  ;;  %3245 = vmatpush.bf16.msra.mxu3 %v7456_v53 }
  0xad   : > { %v729_v6 = vpop.f32.mrf.mxu1 }
  0xae   : > { %v730_v48 = vadd.f32 %v729_v6, %v628_v35  ;;  %1843 = vmatmul.bf16.gmra.mxu3 %v1771_v59  ;;  %2017 = vmatmul.bf16.gmra.mxu0 %v1945_v60  ;;  %v2317_v59 = vunpack.c.l.b16 %v2227_v25  ;;  %v2318_v60 = vunpack.c.l.b16 %v2241_v33  ;;  %v2259_v35 = vrot.slane %v2257_v40, 4  ;;  %v7440_v40 = vld [vmem:[%s9626_s0 + $0x388] sm:$0xff] }
  0xaf   : > { %3114 = vmatpush.bf16.msrb.mxu2 %v7440_v40  ;;  %v2296_v40 = vrot.slane %v2294_v20, 5 }
  0xb0   : > { %2141 = vmatmul.bf16.vlgmr.msra.gmra.mxu1 %v6188_v63  ;;  %2387 = vmatmul.bf16.vlgmr.msra.gmra.mxu2 %v2323_v39  ;;  %v2262_v63 = vrot.slane %v2260_v42, 5  ;;  %v2324_v9 = vpack.c.b16 %v2318_v60, %v2317_v59  ;;  %v2490_v60 = vunpack.c.l.b16 %v2447_v36 }
  0xb1   : > { %v8402_v21 = vpop.f32.mrf.mxu3 }
  0xb2   : > { %v2263_v58 = vor.u32 %v2262_v63, %v2259_v35  ;;  %v6363_v63 = vld [vmem:[%s8280_s10 + $0x8] sm:$0xf] }
  0xb3   : > { %v898_v22 = vpop.f32.mrf.mxu2  ;;  %v630_v44 = vpop.f32.mrf.mxu0 }
  0xb4   : > { %v8411_v30 = vadd.f32 %v898_v22, %v730_v48  ;;  %v2416_v48 = vld [vmem:[%s8280_s10] sm:$0xe]  ;;  %v7464_v22 = vld [vmem:[%s9626_s0 + $0x428] sm:$0xff]  ;;  %v2264_v23 = vrot.slane %v2263_v58, 4 }
  0xb5   : > { %v731_v31 = vpop.f32.mrf.mxu1  ;;  %v6281_v56 = vrot.slane %v2416_v48, 9  ;;  %3491 = vmatpush.bf16.msra.mxu0 %v7464_v22  ;;  %v2418_v22 = vld [vmem:[%s8280_s10 + $0x10] sm:$0xe] }
  0xb6   : > { %v732_v43 = vadd.f32 %v731_v31, %v630_v44  ;;  %v2268_v44 = vrot.slane %v2266_v14, 5  ;;  %v7439_v14 = vld [vmem:[%s9626_s0 + $0x380] sm:$0xff]  ;;  %v6283_v38 = vrot.slane %v2418_v22, 9 }
  0xb7   : > { %v2443_v33 = vsel %vm7837_vm5, %v6281_v56, %v2442_v16  ;;  %3115 = vmatpush.bf16.msrb.mxu2 %v7439_v14 }
  0xb8   : > { %v2269_v45 = vsel %vm7814_vm3, %v2264_v23, %v2268_v44  ;;  %v2489_v59 = vunpack.c.l.b16 %v2443_v33  ;;  %v6409_v23 = vld [vmem:[%s8280_s10 + $0x8] sm:$0xf]  ;;  %v2278_v44 = vrot.slane %v2277_v13, 4  ;;  %v7455_v33 = vld [vmem:[%s9626_s0 + $0x3e0] sm:$0xff]  ;;  %v2451_v55 = vsel %vm7837_vm5, %v6283_v38, %v2450_v26 }
  0xb9   : > { %v8433_v39 = vpop.f32.mrf.mxu3  ;;  %v2320_v35 = vunpack.c.l.b16 %v2269_v45  ;;  %3492 = vmatpush.bf16.msra.mxu0 %v7463_v54  ;;  %3246 = vmatpush.bf16.msra.mxu3 %v7455_v33  ;;  %v6473_v26 = vld [vmem:[%s8280_s10 + $0x8] sm:$0xe] }
  0xbb   : > { %v900_v3 = vpop.f32.mrf.mxu2  ;;  %v633_v7 = vpop.f32.mrf.mxu0 }
  0xbc   : > { %v8441_v6 = vadd.f32 %v900_v3, %v732_v43  ;;  %v2255_v43 = vsel %vm7814_vm3, %v2250_v29, %v2254_v32  ;;  %v7419_v3 = vld [vmem:[%s8280_s10 + $0xc] sm:$0xf0]  ;;  %v2419_v29 = vld [vmem:[%s8280_s10 + $0x18] sm:$0xe] }
  0xbd   : > { %v734_v51 = vpop.f32.mrf.mxu1  ;;  %v2319_v34 = vunpack.c.l.b16 %v2255_v43  ;;  %v6364_v12 = vor.u32 %v7419_v3, %v6363_v63  ;;  %v6284_v27 = vrot.slane %v2419_v29, 9  ;;  %v2745_v43 = vshll.u32 %v6409_v23, 16  ;;  %v8543_v3 = vld [vmem:[%s8280_s10 + $0xc] sm:$0x1] }
  0xbe   : > { %v735_v15 = vadd.f32 %v734_v51, %v633_v7  ;;  %1848 = vmatmul.bf16.gmra.mxu3 %v1772_v4  ;;  %2022 = vmatmul.bf16.gmra.mxu0 %v1946_v5  ;;  %v8493_v4 = vld [vmem:[%s8280_s10 + $0x34] sm:$0x1]  ;;  %v6195_v5 = vld [vmem:[%s8280_s10 + $0x20] sm:$0xf]  ;;  %v7393_v7 = vld [vmem:[%s8280_s10 + $0x24] sm:$0xf0]  ;;  %v2497_v51 = vpack.c.b16 %v2490_v60, %v2489_v59 }
  0xbf   : > { %v2280_v58 = vshll.u32 %v8493_v4, 16  ;;  %v6196_v16 = vor.u32 %v7393_v7, %v6195_v5  ;;  %v2325_v17 = vpack.c.b16 %v2320_v35, %v2319_v34  ;;  %v7486_v60 = vld [vmem:[%s9626_s0 + $0x4b8] sm:$0xff]  ;;  %v2747_v35 = vrot.slane %v2745_v43, 5 }
  0xc0   : > { %2146 = vmatmul.bf16.gmra.mxu1 %v6192_v8  ;;  %2392 = vmatmul.bf16.gmra.mxu2 %v2324_v9  ;;  %v2287_v8 = vrot.slane %v2285_v46, 4  ;;  %v2290_v9 = vrot.slane %v2288_v47, 5  ;;  %v6413_v43 = vld [vmem:[%s8280_s10 + $0x18] sm:$0xf] }
  0xc1   : > { %v8462_v24 = vpop.f32.mrf.mxu3  ;;  %v2282_v37 = vrot.slane %v2280_v58, 5  ;;  %3797 = vmatpush.bf16.msra.mxu2 %v7486_v60  ;;  %v6481_v60 = vrot.slane %v6473_v26, 9  ;;  %v7452_v26 = vld [vmem:[%s9626_s0 + $0x3c8] sm:$0xff] }
  0xc2   : > { %v2291_v19 = vor.u32 %v2290_v9, %v2287_v8  ;;  %v7454_v8 = vld [vmem:[%s9626_s0 + $0x3d8] sm:$0xff]  ;;  %v7461_v9 = vld [vmem:[%s9626_s0 + $0x410] sm:$0xff] }
  0xc3   : > { %v903_v25 = vpop.f32.mrf.mxu2  ;;  %v635_v31 = vpop.f32.mrf.mxu0  ;;  %v2283_v54 = vsel %vm7814_vm3, %v2278_v44, %v2282_v37  ;;  %3247 = vmatpush.bf16.msra.mxu3 %v7454_v8 }
  0xc4   : > { %v8468_v28 = vadd.f32 %v903_v25, %v735_v15  ;;  %v6411_v25 = vld [vmem:[%s8280_s10 + $0x10] sm:$0xf]  ;;  %v2292_v36 = vrot.slane %v2291_v19, 4  ;;  %v2321_v58 = vunpack.c.l.b16 %v2283_v54  ;;  %v2751_v19 = vshll.u32 %v8543_v3, 16  ;;  %v6415_v54 = vld [vmem:[%s8280_s10 + $0x20] sm:$0xf] }
  0xc5   : > { %v736_v42 = vpop.f32.mrf.mxu1  ;;  %v2756_v46 = vshrl.u32 %v6411_v25, 16  ;;  %v2759_v47 = vshll.u32 %v6411_v25, 16 }
  0xc6   : > { %v737_v50 = vadd.f32 %v736_v42, %v635_v31  ;;  %v2454_v31 = vrot.slane %v8382_v57, 5  ;;  %v2742_v42 = vshrl.u32 %v6409_v23, 16 }
  0xc7   : > { %v2758_v5 = vrot.slane %v2756_v46, 4  ;;  %v2761_v7 = vrot.slane %v2759_v47, 5  ;;  %v2462_v46 = vrot.slane %v8439_v2, 5  ;;  %v2770_v2 = vshrl.u32 %v6413_v43, 16 }
  0xc8   : > { %v2455_v59 = vsel %vm7837_vm5, %v6284_v27, %v2454_v31  ;;  %v2744_v34 = vrot.slane %v2742_v42, 4  ;;  %v6474_v27 = vld [vmem:[%s8280_s10 + $0x10] sm:$0xe]  ;;  %v7474_v42 = vld [vmem:[%s9626_s0 + $0x478] sm:$0xff] }
  0xc9   : > { %v8497_v48 = vpop.f32.mrf.mxu3  ;;  %v2492_v13 = vunpack.c.l.b16 %v2455_v59  ;;  %v2762_v29 = vor.u32 %v2761_v7, %v2758_v5  ;;  %3663 = vmatpush.bf16.msra.mxu1 %v7474_v42  ;;  %v7460_v5 = vld [vmem:[%s9626_s0 + $0x408] sm:$0xff] }
  0xcb   : > { %v905_v11 = vpop.f32.mrf.mxu2  ;;  %v1279_v56 = vpop.f32.mrf.mxu0 }
  0xcc   : > { %v8509_v15 = vadd.f32 %v905_v11, %v737_v50  ;;  %v6199_v11 = vld [vmem:[%s8280_s10 + $0x30] sm:$0xf] }
  0xcd   : > { %v739_v18 = vpop.f32.mrf.mxu1 }
  0xce   : > { %v740_v32 = vadd.f32 %v739_v18, %v8402_v21  ;;  %2561 = vmatmul.bf16.vlgmr.msrb.gmra.mxu3 %v2497_v51  ;;  %2696 = vmatmul.bf16.vlgmr.msrb.gmra.mxu0 %v6364_v12  ;;  %v7462_v21 = vld [vmem:[%s9626_s0 + $0x418] sm:$0xff]  ;;  %v2491_v12 = vunpack.c.l.b16 %v2451_v55  ;;  %v2748_v18 = vor.u32 %v2747_v35, %v2744_v34  ;;  %v2763_v55 = vrot.slane %v2762_v29, 4 }
  0xcf   : > { %3493 = vmatpush.bf16.msra.mxu0 %v7462_v21  ;;  %v7394_v51 = vld [vmem:[%s8280_s10 + $0x34] sm:$0xf0]  ;;  %v2784_v35 = vshrl.u32 %v6415_v54, 16  ;;  %v8612_v29 = vld [vmem:[%s8280_s10 + $0x1c] sm:$0x1] }
  0xd0   : > { %2151 = vmatmul.bf16.gmra.mxu1 %v6196_v16  ;;  %2397 = vmatmul.bf16.gmra.mxu2 %v2325_v17  ;;  %v2420_v16 = vld [vmem:[%s8280_s10 + $0x20] sm:$0xe]  ;;  %v2421_v17 = vld [vmem:[%s8280_s10 + $0x28] sm:$0xe]  ;;  %v6200_v22 = vor.u32 %v7394_v51, %v6199_v11  ;;  %v2498_v37 = vpack.c.b16 %v2492_v13, %v2491_v12  ;;  %v2749_v47 = vrot.slane %v2748_v18, 4  ;;  %v7473_v18 = vld [vmem:[%s9626_s0 + $0x470] sm:$0xff] }
  0xd1   : > { %v1033_v45 = vpop.f32.mrf.mxu3  ;;  %v6285_v38 = vrot.slane %v2420_v16, 9  ;;  %v2786_v16 = vrot.slane %v2784_v35, 4  ;;  %3664 = vmatpush.bf16.msra.mxu1 %v7473_v18 }
  0xd2   : > { %v1053_v57 = vadd.f32 %v1033_v45, %v8411_v30  ;;  %v2297_v30 = vsel %vm7814_vm3, %v2292_v36, %v2296_v40  ;;  %v2458_v36 = vrot.slane %v8436_v1, 5  ;;  %v6286_v40 = vrot.slane %v2421_v17, 9 }
  0xd3   : > { %v908_v49 = vpop.f32.mrf.mxu2  ;;  %v1281_v53 = vpop.f32.mrf.mxu0  ;;  %v2322_v14 = vunpack.c.l.b16 %v2297_v30  ;;  %3494 = vmatpush.bf16.msra.mxu0 %v7461_v9  ;;  %v6482_v30 = vrot.slane %v6474_v27, 9  ;;  %v7459_v27 = vld [vmem:[%s9626_s0 + $0x400] sm:$0xff] }
  0xd4   : > { %v8526_v50 = vadd.f32 %v908_v49, %v740_v32  ;;  %v8539_v62 = vadd.f32 %v1279_v56, %v1053_v57  ;;  %v7420_v56 = vld [vmem:[%s8280_s10 + $0x1c] sm:$0xf0]  ;;  %v2753_v49 = vrot.slane %v2751_v19, 5  ;;  %v2463_v8 = vsel %vm7837_vm5, %v6286_v40, %v2462_v46 }
  0xd5   : > { %v741_v61 = vpop.f32.mrf.mxu1  ;;  %v6368_v25 = vor.u32 %v7420_v56, %v6367_v52  ;;  %v2326_v21 = vpack.c.b16 %v2322_v14, %v2321_v58  ;;  %v2772_v58 = vrot.slane %v2770_v2, 4  ;;  %v2466_v46 = vrot.slane %v8493_v4, 5  ;;  %v7451_v4 = vld [vmem:[%s9626_s0 + $0x3c0] sm:$0xff] }
  0xd6   : > { %v742_v63 = vadd.f32 %v741_v61, %v8433_v39  ;;  %v8554_v39 = vld [vmem:[%s8280_s10 + $0x14] sm:$0x1]  ;;  %v2997_v61 = vrot.slane %v8543_v3, 5  ;;  %v2459_v3 = vsel %vm7837_vm5, %v6285_v38, %v2458_v36  ;;  %v2754_v9 = vsel %vm7814_vm3, %v2749_v47, %v2753_v49  ;;  %v2422_v38 = vld [vmem:[%s8280_s10 + $0x30] sm:$0xe] }
  0xd7   : > { %v2765_v32 = vshll.u32 %v8554_v39, 16  ;;  %v3001_v34 = vrot.slane %v8554_v39, 5  ;;  %3495 = vmatpush.bf16.msra.mxu0 %v7460_v5  ;;  %v2470_v2 = vrot.slane %v8500_v10, 5  ;;  %v7483_v10 = vld [vmem:[%s9626_s0 + $0x4a0] sm:$0xff] }
  0xd8   : > { %v2998_v13 = vsel %vm7837_vm5, %v6481_v60, %v2997_v61 }
  0xd9   : > { %v1035_v20 = vpop.f32.mrf.mxu3  ;;  %v2767_v59 = vrot.slane %v2765_v32, 5  ;;  %v3002_v39 = vsel %vm7837_vm5, %v6482_v30, %v3001_v34  ;;  %v8615_v32 = vld [vmem:[%s8280_s10 + $0x24] sm:$0x1]  ;;  %v3044_v36 = vunpack.c.l.b16 %v2998_v13 }
  0xda   : > { %v1054_v44 = vadd.f32 %v1035_v20, %v8441_v6  ;;  %v7485_v6 = vld [vmem:[%s9626_s0 + $0x4b0] sm:$0xff]  ;;  %v2493_v20 = vunpack.c.l.b16 %v2459_v3  ;;  %v3045_v40 = vunpack.c.l.b16 %v3002_v39  ;;  %v2793_v47 = vshll.u32 %v8615_v32, 16 }
  0xdb   : > { %v910_v23 = vpop.f32.mrf.mxu2  ;;  %v1284_v33 = vpop.f32.mrf.mxu0  ;;  %3798 = vmatpush.bf16.msra.mxu2 %v7485_v6  ;;  %v2768_v11 = vsel %vm7814_vm3, %v2763_v55, %v2767_v59  ;;  %v2779_v6 = vshll.u32 %v8612_v29, 16  ;;  %3496 = vmatpush.bf16.msra.mxu0 %v7459_v27  ;;  %v6475_v59 = vld [vmem:[%s8280_s10 + $0x18] sm:$0xe]  ;;  %v3005_v39 = vrot.slane %v8612_v29, 5 }
  0xdc   : > { %v8565_v31 = vadd.f32 %v910_v23, %v742_v63  ;;  %v8576_v57 = vadd.f32 %v1281_v53, %v1054_v44  ;;  %v2773_v53 = vshll.u32 %v6413_v43, 16  ;;  %v2787_v63 = vshll.u32 %v6415_v54, 16 }
  0xdd   : > { %v744_v45 = vpop.f32.mrf.mxu1  ;;  %v2494_v44 = vunpack.c.l.b16 %v2463_v8  ;;  %v3052_v30 = vpack.c.b16 %v3045_v40, %v3044_v36  ;;  %v2781_v5 = vrot.slane %v2779_v6, 5 }
  0xde   : > { %v745_v1 = vadd.f32 %v744_v45, %v8462_v24  ;;  %2566 = vmatmul.bf16.gmra.mxu3 %v2498_v37  ;;  %2701 = vmatmul.bf16.gmra.mxu0 %v6368_v25  ;;  %v7453_v24 = vld [vmem:[%s9626_s0 + $0x3d0] sm:$0xff]  ;;  %v2775_v56 = vrot.slane %v2773_v53, 5  ;;  %v2789_v17 = vrot.slane %v2787_v63, 5  ;;  %v2870_v37 = vunpack.c.l.b16 %v2754_v9  ;;  %v6476_v53 = vld [vmem:[%s8280_s10 + $0x20] sm:$0xe] }
  0xdf   : > { %3248 = vmatpush.bf16.msra.mxu3 %v7453_v24  ;;  %v2871_v25 = vunpack.c.l.b16 %v2768_v11  ;;  %v6287_v45 = vrot.slane %v2422_v38, 9  ;;  %v2499_v54 = vpack.c.b16 %v2494_v44, %v2493_v20  ;;  %v2795_v9 = vrot.slane %v2793_v47, 5 }
  0xe0   : > { %2156 = vmatmul.bf16.gmra.mxu1 %v6200_v22  ;;  %2402 = vmatmul.bf16.gmra.mxu2 %v2326_v21  ;;  %v7421_v21 = vld [vmem:[%s8280_s10 + $0x2c] sm:$0xf0]  ;;  %v2776_v42 = vor.u32 %v2775_v56, %v2772_v58  ;;  %v2790_v43 = vor.u32 %v2789_v17, %v2786_v16  ;;  %v6483_v11 = vrot.slane %v6475_v59, 9  ;;  %v6484_v58 = vrot.slane %v6476_v53, 9  ;;  %v8689_v59 = vld [vmem:[%s8280_s10 + $0x2c] sm:$0x1] }
  0xe1   : > { %v1038_v7 = vpop.f32.mrf.mxu3  ;;  %v2878_v55 = vpack.c.b16 %v2871_v25, %v2870_v37  ;;  %v8648_v8 = vsel %vm7837_vm5, %v6287_v45, %v2466_v46  ;;  %v3009_v56 = vrot.slane %v8615_v32, 5  ;;  %v6419_v16 = vld [vmem:[%s8280_s10 + $0x30] sm:$0xf]  ;;  %v7471_v46 = vld [vmem:[%s9626_s0 + $0x460] sm:$0xff] }
  0xe2   : > { %v1055_v12 = vadd.f32 %v1038_v7, %v8468_v28  ;;  %v7484_v28 = vld [vmem:[%s9626_s0 + $0x4a8] sm:$0xff]  ;;  %v2777_v24 = vrot.slane %v2776_v42, 4  ;;  %v2791_v3 = vrot.slane %v2790_v43, 4  ;;  %v6609_v17 = vld [vmem:[%s8280_s10 + $0x10] sm:$0xf]  ;;  %v2495_v20 = vunpack.c.l.b16 %v8648_v8 }
  0xe3   : > { %v913_v51 = vpop.f32.mrf.mxu2  ;;  %v1286_v52 = vpop.f32.mrf.mxu0  ;;  %3799 = vmatpush.bf16.msra.mxu2 %v7484_v28  ;;  %3249 = vmatpush.bf16.msra.mxu3 %v7452_v26  ;;  %v2812_v32 = vshrl.u32 %v6419_v16, 16  ;;  %v3006_v25 = vsel %vm7837_vm5, %v6483_v11, %v3005_v39  ;;  %v3010_v38 = vsel %vm7837_vm5, %v6484_v58, %v3009_v56  ;;  %v3297_v26 = vshrl.u32 %v6609_v17, 16  ;;  %v6477_v39 = vld [vmem:[%s8280_s10 + $0x28] sm:$0xe] }
  0xe4   : > { %v8601_v14 = vadd.f32 %v913_v51, %v745_v1  ;;  %v8609_v22 = vadd.f32 %v1284_v33, %v1055_v12  ;;  %v6371_v33 = vld [vmem:[%s8280_s10 + $0x28] sm:$0xf]  ;;  %v2782_v29 = vsel %vm7814_vm3, %v2777_v24, %v2781_v5  ;;  %v2796_v37 = vsel %vm7814_vm3, %v2791_v3, %v2795_v9  ;;  %v7501_v24 = vld [vmem:[%s9626_s0 + $0x530] sm:$0xff]  ;;  %v8706_v9 = vld [vmem:[%s8280_s10 + $0x1c] sm:$0x1] }
  0xe5   : > { %v746_v19 = vpop.f32.mrf.mxu1  ;;  %v6372_v1 = vor.u32 %v7421_v21, %v6371_v33  ;;  %v6417_v12 = vld [vmem:[%s8280_s10 + $0x28] sm:$0xf]  ;;  %v3300_v21 = vshll.u32 %v6609_v17, 16  ;;  %v3047_v53 = vunpack.c.l.b16 %v3010_v38  ;;  %v8702_v5 = vld [vmem:[%s8280_s10 + $0x14] sm:$0x1]  ;;  %v2807_v8 = vshll.u32 %v8689_v59, 16 }
  0xe6   : > { %v747_v23 = vadd.f32 %v746_v19, %v8497_v48  ;;  %v2423_v48 = vld [vmem:[%s8280_s10 + $0x38] sm:$0xe]  ;;  %v2798_v18 = vshrl.u32 %v6417_v12, 16  ;;  %v2801_v28 = vshll.u32 %v6417_v12, 16 }
  0xe7   : > { %v6288_v34 = vrot.slane %v2423_v48, 9  ;;  %3250 = vmatpush.bf16.msra.mxu3 %v7451_v4  ;;  %3800 = vmatpush.bf16.msra.mxu2 %v7483_v10  ;;  %v6611_v19 = vld [vmem:[%s8280_s10 + $0x18] sm:$0xf]  ;;  %v8693_v4 = vld [vmem:[%s8280_s10 + $0x34] sm:$0x1]  ;;  %v3302_v3 = vrot.slane %v3300_v21, 5 }
  0xe8   : > { %v3311_v36 = vshrl.u32 %v6611_v19, 16  ;;  %v3314_v40 = vshll.u32 %v6611_v19, 16  ;;  %v2800_v43 = vrot.slane %v2798_v18, 4  ;;  %v2803_v45 = vrot.slane %v2801_v28, 5  ;;  %v6478_v19 = vld [vmem:[%s8280_s10 + $0x30] sm:$0xe] }
  0xe9   : > { %v1040_v49 = vpop.f32.mrf.mxu3  ;;  %v7470_v38 = vld [vmem:[%s9626_s0 + $0x458] sm:$0xff]  ;;  %v3013_v21 = vrot.slane %v8689_v59, 5 }
  0xea   : > { %v1056_v61 = vadd.f32 %v1040_v49, %v8509_v15  ;;  %v7472_v15 = vld [vmem:[%s9626_s0 + $0x468] sm:$0xff]  ;;  %v6375_v49 = vld [vmem:[%s8280_s10 + $0x38] sm:$0xf]  ;;  %v3316_v10 = vrot.slane %v3314_v40, 5 }
  0xeb   : > { %v915_v60 = vpop.f32.mrf.mxu2  ;;  %v1289_v63 = vpop.f32.mrf.mxu0  ;;  %3665 = vmatpush.bf16.msra.mxu1 %v7472_v15  ;;  %v3313_v15 = vrot.slane %v3311_v36, 4 }
  0xec   : > { %v8638_v35 = vadd.f32 %v915_v60, %v747_v23  ;;  %v8650_v51 = vadd.f32 %v1286_v52, %v1056_v61  ;;  %v2471_v52 = vsel %vm7837_vm5, %v6288_v34, %v2470_v2  ;;  %v2815_v23 = vshll.u32 %v6419_v16, 16 }
  0xed   : > { %v1453_v7 = vpop.f32.mrf.mxu1  ;;  %v2496_v6 = vunpack.c.l.b16 %v2471_v52  ;;  %v2814_v60 = vrot.slane %v2812_v32, 4  ;;  %v2873_v34 = vunpack.c.l.b16 %v2796_v37  ;;  %v3046_v2 = vunpack.c.l.b16 %v3006_v25 }
  0xee   : > { %v1473_v13 = vadd.f32 %v1453_v7, %v8539_v62  ;;  %2571 = vmatmul.bf16.gmra.mxu3 %v2499_v54  ;;  %2706 = vmatmul.bf16.gmra.mxu0 %v6372_v1  ;;  %v7502_v62 = vld [vmem:[%s9626_s0 + $0x538] sm:$0xff]  ;;  %v7422_v54 = vld [vmem:[%s8280_s10 + $0x3c] sm:$0xf0]  ;;  %v8684_v1 = vunpack.c.l.b16 %v2782_v29  ;;  %v2817_v61 = vrot.slane %v2815_v23, 5  ;;  %v2804_v7 = vor.u32 %v2803_v45, %v2800_v43 }
  0xef   : > { %4217 = vmatpush.bf16.msrb.mxu0 %v7502_v62  ;;  %3666 = vmatpush.bf16.msra.mxu1 %v7471_v46  ;;  %v2500_v11 = vpack.c.b16 %v2496_v6, %v2495_v20  ;;  %v6376_v56 = vor.u32 %v7422_v54, %v6375_v49  ;;  %v3053_v17 = vpack.c.b16 %v3047_v53, %v3046_v2  ;;  %v3306_v52 = vshll.u32 %v8702_v5, 16  ;;  %v6421_v45 = vld [vmem:[%s8280_s10 + $0x38] sm:$0xf]  ;;  %v6423_v54 = vld [vmem:[%s8280_s10 + $0x40] sm:$0xf] }
  0xf0   : > { %2942 = vmatmul.bf16.vlgmr.msrb.gmra.mxu1 %v2878_v55  ;;  %3116 = vmatmul.bf16.vlgmr.msrb.gmra.mxu2 %v3052_v30  ;;  %v2818_v12 = vor.u32 %v2817_v61, %v2814_v60  ;;  %v2879_v16 = vpack.c.b16 %v2873_v34, %v8684_v1  ;;  %v3317_v29 = vor.u32 %v3316_v10, %v3313_v15  ;;  %v3320_v32 = vshll.u32 %v8706_v9, 16  ;;  %v7500_v1 = vld [vmem:[%s9626_s0 + $0x528] sm:$0xff] }
  0xf1   : > { %v1043_v44 = vpop.f32.mrf.mxu3  ;;  %v2809_v37 = vrot.slane %v2807_v8, 5  ;;  %v6485_v25 = vrot.slane %v6477_v39, 9  ;;  %v6486_v6 = vrot.slane %v6478_v19, 9  ;;  %v3017_v43 = vrot.slane %v8693_v4, 5  ;;  %v6615_v34 = vld [vmem:[%s8280_s10 + $0x28] sm:$0xf] }
  0xf2   : > { %v1057_v27 = vadd.f32 %v1043_v44, %v8526_v50  ;;  %v7482_v50 = vld [vmem:[%s9626_s0 + $0x498] sm:$0xff]  ;;  %v2805_v44 = vrot.slane %v2804_v7, 4  ;;  %v3322_v49 = vrot.slane %v3320_v32, 5  ;;  %v7469_v8 = vld [vmem:[%s9626_s0 + $0x450] sm:$0xff]  ;;  %v3339_v39 = vshrl.u32 %v6615_v34, 16 }
  0xf3   : > { %v1588_v33 = vpop.f32.mrf.mxu2  ;;  %v1291_v42 = vpop.f32.mrf.mxu0  ;;  %3801 = vmatpush.bf16.msra.mxu2 %v7482_v50  ;;  %4218 = vmatpush.bf16.msrb.mxu0 %v7501_v24  ;;  %v3308_v50 = vrot.slane %v3306_v52, 5  ;;  %v8743_v61 = vsel %vm7837_vm5, %v6485_v25, %v3013_v21  ;;  %v8748_v53 = vsel %vm7837_vm5, %v6486_v6, %v3017_v43  ;;  %v2843_v24 = vshll.u32 %v6423_v54, 16  ;;  %v8774_v19 = vld [vmem:[%s8280_s10 + $0x3c] sm:$0x1]  ;;  %v7492_v25 = vld [vmem:[%s9626_s0 + $0x4e8] sm:$0xff] }
  0xf4   : > { %v8674_v48 = vadd.f32 %v1588_v33, %v1473_v13  ;;  %v8686_v55 = vadd.f32 %v1289_v63, %v1057_v27  ;;  %v7494_v63 = vld [vmem:[%s9626_s0 + $0x4f8] sm:$0xff]  ;;  %v2821_v13 = vshll.u32 %v8693_v4, 16  ;;  %v2819_v27 = vrot.slane %v2818_v12, 4  ;;  %3667 = vmatpush.bf16.msra.mxu1 %v7470_v38  ;;  %v7468_v38 = vld [vmem:[%s9626_s0 + $0x448] sm:$0xff]  ;;  %v8792_v21 = vld [vmem:[%s8280_s10 + $0x24] sm:$0x1] }
  0xf5   : > { %v1455_v47 = vpop.f32.mrf.mxu1  ;;  %4043 = vmatpush.bf16.msrb.mxu3 %v7494_v63  ;;  %v2810_v59 = vsel %vm7814_vm3, %v2805_v44, %v2809_v37  ;;  %v2829_v4 = vshll.u32 %v6421_v45, 16  ;;  %v2840_v63 = vshrl.u32 %v6423_v54, 16  ;;  %v2845_v37 = vrot.slane %v2843_v24, 5 }
  0xf6   : > { %v1474_v30 = vadd.f32 %v1455_v47, %v8576_v57  ;;  %v3299_v57 = vrot.slane %v3297_v26, 4  ;;  %v2823_v33 = vrot.slane %v2821_v13, 5  ;;  %v3318_v47 = vrot.slane %v3317_v29, 4  ;;  %v8761_v13 = vld [vmem:[%s8280_s10 + $0x10] sm:$0xf] }
  0xf7   : > { %4219 = vmatpush.bf16.msrb.mxu0 %v7500_v1  ;;  %v2831_v32 = vrot.slane %v2829_v4, 5  ;;  %v2842_v44 = vrot.slane %v2840_v63, 4 }
  0xf8   : > { %v3303_v62 = vor.u32 %v3302_v3, %v3299_v57  ;;  %v2824_v60 = vsel %vm7814_vm3, %v2819_v27, %v2823_v33  ;;  %v3323_v10 = vsel %vm7814_vm3, %v3318_v47, %v3322_v49  ;;  %3668 = vmatpush.bf16.msra.mxu1 %v7469_v8  ;;  %v8789_v33 = vld [vmem:[%s8280_s10 + $0x44] sm:$0x1]  ;;  %v2835_v47 = vshll.u32 %v8774_v19, 16 }
  0xf9   : > { %v1045_v58 = vpop.f32.mrf.mxu3  ;;  %v8768_v52 = vunpack.c.l.b16 %v2824_v60  ;;  %v3426_v27 = vunpack.c.l.b16 %v3323_v10  ;;  %v2849_v1 = vshll.u32 %v8789_v33, 16  ;;  %v6479_v10 = vld [vmem:[%s8280_s10 + $0x38] sm:$0xe] }
  0xfa   : > { %v1058_v18 = vadd.f32 %v1045_v58, %v8565_v31  ;;  %v7481_v31 = vld [vmem:[%s9626_s0 + $0x490] sm:$0xff]  ;;  %v3304_v46 = vrot.slane %v3303_v62, 4  ;;  %v3342_v58 = vshll.u32 %v6615_v34, 16 }
  0xfb   : > { %v1590_v28 = vpop.f32.mrf.mxu2  ;;  %v1294_v23 = vpop.f32.mrf.mxu0  ;;  %3802 = vmatpush.bf16.msra.mxu2 %v7481_v31  ;;  %v3048_v31 = vunpack.c.l.b16 %v8743_v61 }
  0xfc   : > { %v8715_v20 = vadd.f32 %v1590_v28, %v1474_v30  ;;  %v8724_v36 = vadd.f32 %v1291_v42, %v1058_v18  ;;  %v6613_v42 = vld [vmem:[%s8280_s10 + $0x20] sm:$0xf]  ;;  %v2826_v30 = vshrl.u32 %v6421_v45, 16  ;;  %v3309_v15 = vsel %vm7814_vm3, %v3304_v46, %v3308_v50  ;;  %v7447_v18 = vld [vmem:[%s8280_s10 + $0x14] sm:$0xf0]  ;;  %3669 = vmatpush.bf16.msra.mxu1 %v7468_v38 }
  0xfd   : > { %v1458_v26 = vpop.f32.mrf.mxu1  ;;  %v3325_v7 = vshrl.u32 %v6613_v42, 16  ;;  %v3341_v45 = vrot.slane %v3339_v39, 4  ;;  %v3344_v46 = vrot.slane %v3342_v58, 5  ;;  %v6564_v50 = vor.u32 %v7447_v18, %v8761_v13  ;;  %v6480_v58 = vld [vmem:[%s8280_s10 + $0x40] sm:$0xe] }
  0xfe   : > { %v1475_v40 = vadd.f32 %v1458_v26, %v8609_v22  ;;  %2576 = vmatmul.bf16.gmra.mxu3 %v2500_v11  ;;  %2711 = vmatmul.bf16.gmra.mxu0 %v6376_v56  ;;  %v7493_v22 = vld [vmem:[%s9626_s0 + $0x4f0] sm:$0xff]  ;;  %v7480_v56 = vld [vmem:[%s9626_s0 + $0x488] sm:$0xff]  ;;  %v2828_v62 = vrot.slane %v2826_v30, 4  ;;  %v3425_v26 = vunpack.c.l.b16 %v3309_v15  ;;  %v3334_v30 = vshll.u32 %v8792_v21, 16  ;;  %v6619_v18 = vld [vmem:[%s8280_s10 + $0x38] sm:$0xf] }
  0xff   : > { %4044 = vmatpush.bf16.msrb.mxu3 %v7493_v22  ;;  %3803 = vmatpush.bf16.msra.mxu2 %v7480_v56  ;;  %v3327_v6 = vrot.slane %v3325_v7, 4  ;;  %v2846_v22 = vor.u32 %v2845_v37, %v2842_v44  ;;  %v2837_v15 = vrot.slane %v2835_v47, 5  ;;  %v2851_v39 = vrot.slane %v2849_v1, 5 }
 0x100   : > { %2947 = vmatmul.bf16.gmra.mxu1 %v2879_v16  ;;  %3121 = vmatmul.bf16.gmra.mxu2 %v3053_v17  ;;  %v8766_v17 = vunpack.c.l.b16 %v2810_v59  ;;  %v3433_v61 = vpack.c.b16 %v3426_v27, %v3425_v26  ;;  %v3336_v56 = vrot.slane %v3334_v30, 5  ;;  %v6488_v44 = vrot.slane %v6480_v58, 9  ;;  %v7448_v30 = vld [vmem:[%s8280_s10 + $0x24] sm:$0xf0] }
 0x101   : > { %v1048_v2 = vpop.f32.mrf.mxu3  ;;  %v3025_v37 = vrot.slane %v8789_v33, 5 }
 0x102   : > { %v1059_v57 = vadd.f32 %v1048_v2, %v8601_v14  ;;  %v3328_v14 = vshll.u32 %v6613_v42, 16  ;;  %v2880_v54 = vpack.c.b16 %v8768_v52, %v8766_v17  ;;  %v2832_v42 = vor.u32 %v2831_v32, %v2828_v62  ;;  %v7479_v2 = vld [vmem:[%s9626_s0 + $0x480] sm:$0xff]  ;;  %v6617_v17 = vld [vmem:[%s8280_s10 + $0x30] sm:$0xf]  ;;  %v7498_v62 = vld [vmem:[%s9626_s0 + $0x518] sm:$0xff] }
 0x103   : > { %v1593_v3 = vpop.f32.mrf.mxu2  ;;  %v1296_v12 = vpop.f32.mrf.mxu0  ;;  %4045 = vmatpush.bf16.msrb.mxu3 %v7492_v25  ;;  %3804 = vmatpush.bf16.msra.mxu2 %v7479_v2  ;;  %v3021_v32 = vrot.slane %v8774_v19, 5  ;;  %v3353_v26 = vshrl.u32 %v6617_v17, 16  ;;  %v3356_v27 = vshll.u32 %v6617_v17, 16  ;;  %v3367_v19 = vshrl.u32 %v6619_v18, 16 }
 0x104   : > { %v8758_v11 = vadd.f32 %v1593_v3, %v1475_v40  ;;  %v8771_v28 = vadd.f32 %v1294_v23, %v1059_v57  ;;  %v7499_v23 = vld [vmem:[%s9626_s0 + $0x520] sm:$0xff]  ;;  %v8795_v40 = vld [vmem:[%s8280_s10 + $0x2c] sm:$0x1]  ;;  %v3330_v43 = vrot.slane %v3328_v14, 5  ;;  %v3345_v57 = vor.u32 %v3344_v46, %v3341_v45 }
 0x105   : > { %v1460_v16 = vpop.f32.mrf.mxu1  ;;  %4220 = vmatpush.bf16.msrb.mxu0 %v7499_v23  ;;  %v3348_v34 = vshll.u32 %v8795_v40, 16  ;;  %v2833_v13 = vrot.slane %v2832_v42, 4  ;;  %v2847_v14 = vrot.slane %v2846_v22, 4  ;;  %v3370_v46 = vshll.u32 %v6619_v18, 16 }
 0x106   : > { %v1476_v29 = vadd.f32 %v1460_v16, %v8650_v51  ;;  %v3049_v51 = vunpack.c.l.b16 %v8748_v53  ;;  %v7467_v53 = vld [vmem:[%s9626_s0 + $0x440] sm:$0xff]  ;;  %v3346_v52 = vrot.slane %v3345_v57, 4  ;;  %v3369_v57 = vrot.slane %v3367_v19, 4 }
 0x107   : > { %3670 = vmatpush.bf16.msra.mxu1 %v7467_v53  ;;  %v3350_v16 = vrot.slane %v3348_v34, 5  ;;  %v2838_v23 = vsel %vm7814_vm3, %v2833_v13, %v2837_v15  ;;  %v2852_v38 = vsel %vm7814_vm3, %v2847_v14, %v2851_v39  ;;  %v3355_v53 = vrot.slane %v3353_v26, 4  ;;  %v8875_v15 = vld [vmem:[%s8280_s10 + $0x3c] sm:$0x1]  ;;  %v6621_v26 = vld [vmem:[%s8280_s10 + $0x40] sm:$0xf] }
 0x108   : > { %v3054_v24 = vpack.c.b16 %v3049_v51, %v3048_v31  ;;  %v2876_v22 = vunpack.c.l.b16 %v2838_v23  ;;  %v2877_v1 = vunpack.c.l.b16 %v2852_v38 }
 0x109   : > { %v1050_v49 = vpop.f32.mrf.mxu3  ;;  %4221 = vmatpush.bf16.msrb.mxu0 %v7498_v62  ;;  %v3351_v45 = vsel %vm7814_vm3, %v3346_v52, %v3350_v16  ;;  %v7514_v62 = vld [vmem:[%s9626_s0 + $0x578] sm:$0xff] }
 0x10a   : > { %v1060_v59 = vadd.f32 %v1050_v49, %v8638_v35  ;;  %v3331_v35 = vor.u32 %v3330_v43, %v3327_v6  ;;  %v3026_v49 = vsel %vm7837_vm5, %v6488_v44, %v3025_v37  ;;  %v3428_v2 = vunpack.c.l.b16 %v3351_v45  ;;  %v6673_v37 = vld [vmem:[%s8280_s10 + $0x10] sm:$0xe] }
 0x10b   : > { %v1595_v60 = vpop.f32.mrf.mxu2  ;;  %v2008_v63 = vpop.f32.mrf.mxu0  ;;  %4352 = vmatpush.bf16.msrb.mxu1 %v7514_v62  ;;  %v6681_v19 = vrot.slane %v6673_v37, 9  ;;  %v3556_v45 = vrot.slane %v8706_v9, 5 }
 0x10c   : > { %v8811_v4 = vadd.f32 %v1595_v60, %v1476_v29  ;;  %v8815_v7 = vadd.f32 %v1296_v12, %v1060_v59  ;;  %v3332_v12 = vrot.slane %v3331_v35, 4  ;;  %v6487_v29 = vrot.slane %v6479_v10, 9  ;;  %v7490_v59 = vld [vmem:[%s9626_s0 + $0x4d8] sm:$0xff]  ;;  %v7497_v60 = vld [vmem:[%s9626_s0 + $0x510] sm:$0xff] }
 0x10d   : > { %v1463_v3 = vpop.f32.mrf.mxu1  ;;  %v8871_v35 = vld [vmem:[%s8280_s10 + $0x34] sm:$0x1]  ;;  %4222 = vmatpush.bf16.msrb.mxu0 %v7497_v60 }
 0x10e   : > { %v1477_v8 = vadd.f32 %v1463_v3, %v8686_v55  ;;  %3251 = vmatmul.bf16.vlgmr.msra.gmra.mxu3 %v6564_v50  ;;  %3497 = vmatmul.bf16.vlgmr.msra.gmra.mxu0 %v3433_v61  ;;  %v7491_v55 = vld [vmem:[%s9626_s0 + $0x4e0] sm:$0xff]  ;;  %v3337_v43 = vsel %vm7814_vm3, %v3332_v12, %v3336_v56  ;;  %v3022_v47 = vsel %vm7837_vm5, %v6487_v29, %v3021_v32  ;;  %v3372_v3 = vrot.slane %v3370_v46, 5  ;;  %v6623_v46 = vld [vmem:[%s8280_s10 + $0x48] sm:$0xf] }
 0x10f   : > { %4046 = vmatpush.bf16.msrb.mxu3 %v7491_v55  ;;  %v6567_v61 = vld [vmem:[%s8280_s10 + $0x20] sm:$0xf]  ;;  %v3427_v34 = vunpack.c.l.b16 %v3337_v43  ;;  %v3362_v16 = vshll.u32 %v8871_v35, 16  ;;  %v3376_v55 = vshll.u32 %v8875_v15, 16  ;;  %v3398_v60 = vshll.u32 %v6623_v46, 16 }
 0x110   : > { %2952 = vmatmul.bf16.gmra.mxu1 %v2880_v54  ;;  %3126 = vmatmul.bf16.gmra.mxu2 %v3054_v24  ;;  %v3051_v24 = vunpack.c.l.b16 %v3026_v49  ;;  %v6568_v13 = vor.u32 %v7448_v30, %v6567_v61  ;;  %v3373_v18 = vor.u32 %v3372_v3, %v3369_v57  ;;  %v7520_v61 = vld [vmem:[%s9626_s0 + $0x5a8] sm:$0xff]  ;;  %v7495_v3 = vld [vmem:[%s9626_s0 + $0x500] sm:$0xff] }
 0x111   : > { %v1834_v25 = vpop.f32.mrf.mxu3  ;;  %v3434_v58 = vpack.c.b16 %v3428_v2, %v3427_v34  ;;  %v3364_v38 = vrot.slane %v3362_v16, 5  ;;  %v6571_v34 = vld [vmem:[%s8280_s10 + $0x30] sm:$0xf]  ;;  %v7488_v57 = vld [vmem:[%s9626_s0 + $0x4c8] sm:$0xff]  ;;  %v8943_v16 = vld [vmem:[%s8280_s10 + $0x44] sm:$0x1] }
 0x112   : > { %v1854_v51 = vadd.f32 %v1834_v25, %v8674_v48  ;;  %v7522_v48 = vld [vmem:[%s9626_s0 + $0x5b8] sm:$0xff] }
 0x113   : > { %v1598_v31 = vpop.f32.mrf.mxu2  ;;  %v2010_v33 = vpop.f32.mrf.mxu0  ;;  %4598 = vmatpush.bf16.msrb.mxu2 %v7522_v48  ;;  %4047 = vmatpush.bf16.msrb.mxu3 %v7490_v59  ;;  %v6674_v25 = vld [vmem:[%s8280_s10 + $0x18] sm:$0xe]  ;;  %v3395_v59 = vshrl.u32 %v6623_v46, 16 }
 0x114   : > { %v8840_v6 = vadd.f32 %v1598_v31, %v1477_v8  ;;  %v8859_v54 = vadd.f32 %v2008_v63, %v1854_v51  ;;  %v3358_v63 = vrot.slane %v3356_v27, 5  ;;  %v2881_v8 = vpack.c.b16 %v2877_v1, %v2876_v22  ;;  %v7489_v27 = vld [vmem:[%s9626_s0 + $0x4d0] sm:$0xff] }
 0x115   : > { %v1465_v50 = vpop.f32.mrf.mxu1  ;;  %v3374_v31 = vrot.slane %v3373_v18, 4  ;;  %v3378_v51 = vrot.slane %v3376_v55, 5  ;;  %v6682_v43 = vrot.slane %v6674_v25, 9  ;;  %v3384_v22 = vshll.u32 %v6621_v26, 16  ;;  %v8946_v18 = vld [vmem:[%s8280_s10 + $0x4c] sm:$0x1] }
 0x116   : > { %v1478_v42 = vadd.f32 %v1465_v50, %v8724_v36  ;;  %v3050_v36 = vunpack.c.l.b16 %v3022_v47  ;;  %v3359_v56 = vor.u32 %v3358_v63, %v3355_v53 }
 0x117   : > { %4048 = vmatpush.bf16.msrb.mxu3 %v7489_v27  ;;  %v3379_v9 = vsel %vm7814_vm3, %v3374_v31, %v3378_v51  ;;  %v3557_v53 = vsel %vm7837_vm5, %v6682_v43, %v3556_v45  ;;  %v6676_v45 = vld [vmem:[%s8280_s10 + $0x28] sm:$0xe] }
 0x118   : > { %v3055_v52 = vpack.c.b16 %v3051_v24, %v3050_v36  ;;  %v3360_v23 = vrot.slane %v3359_v56, 4  ;;  %v7449_v24 = vld [vmem:[%s8280_s10 + $0x34] sm:$0xf0] }
 0x119   : > { %v1836_v10 = vpop.f32.mrf.mxu3  ;;  %v6572_v62 = vor.u32 %v7449_v24, %v6571_v34 }
 0x11a   : > { %v1855_v39 = vadd.f32 %v1836_v10, %v8715_v20  ;;  %v7521_v20 = vld [vmem:[%s9626_s0 + $0x5b0] sm:$0xff]  ;;  %v3365_v49 = vsel %vm7814_vm3, %v3360_v23, %v3364_v38  ;;  %v3390_v23 = vshll.u32 %v8943_v16, 16  ;;  %v7487_v38 = vld [vmem:[%s9626_s0 + $0x4c0] sm:$0xff] }
 0x11b   : > { %v1600_v14 = vpop.f32.mrf.mxu2  ;;  %v2013_v12 = vpop.f32.mrf.mxu0  ;;  %4599 = vmatpush.bf16.msrb.mxu2 %v7521_v20  ;;  %v3429_v10 = vunpack.c.l.b16 %v3365_v49  ;;  %4049 = vmatpush.bf16.msrb.mxu3 %v7488_v57 }
 0x11c   : > { %v8879_v17 = vadd.f32 %v1600_v14, %v1478_v42  ;;  %v8891_v32 = vadd.f32 %v2010_v33, %v1855_v39  ;;  %v3552_v33 = vrot.slane %v8702_v5, 5  ;;  %v3381_v42 = vshrl.u32 %v6621_v26, 16  ;;  %v7475_v14 = vld [vmem:[%s8917_s20 + $0x4] sm:$0xf0] }
 0x11d   : > { %v1468_v29 = vpop.f32.mrf.mxu1  ;;  %v3392_v49 = vrot.slane %v3390_v23, 5 }
 0x11e   : > { %v1479_v44 = vadd.f32 %v1468_v29, %v8771_v28  ;;  %3256 = vmatmul.bf16.gmra.mxu3 %v6568_v13  ;;  %3502 = vmatmul.bf16.gmra.mxu0 %v3434_v58  ;;  %v7496_v28 = vld [vmem:[%s9626_s0 + $0x508] sm:$0xff]  ;;  %v3553_v2 = vsel %vm7837_vm5, %v6681_v19, %v3552_v33  ;;  %v6755_v13 = vld [vmem:[%s8917_s20] sm:$0xf]  ;;  %v3383_v39 = vrot.slane %v3381_v42, 4  ;;  %v3386_v58 = vrot.slane %v3384_v22, 5 }
 0x11f   : > { %4223 = vmatpush.bf16.msrb.mxu0 %v7496_v28  ;;  %4600 = vmatpush.bf16.msrb.mxu2 %v7520_v61  ;;  %v3599_v56 = vunpack.c.l.b16 %v3553_v2  ;;  %v6756_v20 = vor.u32 %v7475_v14, %v6755_v13  ;;  %v3404_v28 = vshll.u32 %v8946_v18, 16  ;;  %v6675_v19 = vld [vmem:[%s8280_s10 + $0x20] sm:$0xe]  ;;  %v3560_v22 = vrot.slane %v8792_v21, 5  ;;  %v7518_v13 = vld [vmem:[%s9626_s0 + $0x598] sm:$0xff] }
 0x120   : > { %2957 = vmatmul.bf16.gmra.mxu1 %v2881_v8  ;;  %3131 = vmatmul.bf16.gmra.mxu2 %v3055_v52  ;;  %v3430_v8 = vunpack.c.l.b16 %v3379_v9  ;;  %v3400_v52 = vrot.slane %v3398_v60, 5  ;;  %v3387_v25 = vor.u32 %v3386_v58, %v3383_v39  ;;  %v7519_v33 = vld [vmem:[%s9626_s0 + $0x5a0] sm:$0xff]  ;;  %v6683_v42 = vrot.slane %v6675_v19, 9  ;;  %v3836_v9 = vld [vmem:[%s8917_s20 + $0x8] sm:$0xf] }
 0x121   : > { %v1839_v48 = vpop.f32.mrf.mxu3  ;;  %4050 = vmatpush.bf16.msrb.mxu3 %v7487_v38  ;;  %v3406_v60 = vrot.slane %v3404_v28, 5  ;;  %v3865_v2 = vshrl.u32 %v3836_v9, 16  ;;  %v9006_v38 = vld [vmem:[%s8917_s20 + $0xc] sm:$0x1]  ;;  %v6678_v28 = vld [vmem:[%s8280_s10 + $0x38] sm:$0xe] }
 0x122   : > { %v1856_v47 = vadd.f32 %v1839_v48, %v8758_v11  ;;  %v7513_v11 = vld [vmem:[%s9626_s0 + $0x570] sm:$0xff]  ;;  %v3435_v37 = vpack.c.b16 %v3430_v8, %v3429_v10  ;;  %v3561_v10 = vsel %vm7837_vm5, %v6683_v42, %v3560_v22 }
 0x123   : > { %v1603_v50 = vpop.f32.mrf.mxu2  ;;  %v2015_v5 = vpop.f32.mrf.mxu0  ;;  %4353 = vmatpush.bf16.msrb.mxu1 %v7513_v11  ;;  %4224 = vmatpush.bf16.msrb.mxu0 %v7495_v3  ;;  %v3564_v11 = vrot.slane %v8795_v40, 5 }
 0x124   : > { %v8910_v1 = vadd.f32 %v1603_v50, %v1479_v44  ;;  %v8930_v63 = vadd.f32 %v2013_v12, %v1856_v47  ;;  %v3397_v12 = vrot.slane %v3395_v59, 4  ;;  %4601 = vmatpush.bf16.msrb.mxu2 %v7519_v33  ;;  %v3834_v50 = vld [vmem:[%s8917_s20] sm:$0xf]  ;;  %v3388_v47 = vrot.slane %v3387_v25, 4 }
 0x125   : > { %v1470_v30 = vpop.f32.mrf.mxu1  ;;  %v3851_v61 = vshrl.u32 %v3834_v50, 16  ;;  %v3601_v25 = vunpack.c.l.b16 %v3561_v10 }
 0x126   : > { %v1480_v36 = vadd.f32 %v1470_v30, %v8815_v7  ;;  %v3600_v7 = vunpack.c.l.b16 %v3557_v53  ;;  %v3401_v27 = vor.u32 %v3400_v52, %v3397_v12  ;;  %v3854_v30 = vshll.u32 %v3834_v50, 16  ;;  %v8995_v12 = vld [vmem:[%s8917_s20 + $0x4] sm:$0x1] }
 0x127   : > { %v3868_v53 = vshll.u32 %v3836_v9, 16  ;;  %v3393_v24 = vsel %vm7814_vm3, %v3388_v47, %v3392_v49  ;;  %v3853_v58 = vrot.slane %v3851_v61, 4  ;;  %v3867_v52 = vrot.slane %v3865_v2, 4  ;;  %v4080_v9 = vld [vmem:[%s8917_s20] sm:$0xe] }
 0x128   : > { %v3607_v26 = vpack.c.b16 %v3600_v7, %v3599_v56  ;;  %v3402_v59 = vrot.slane %v3401_v27, 4  ;;  %v3856_v56 = vrot.slane %v3854_v30, 5  ;;  %4602 = vmatpush.bf16.msrb.mxu2 %v7518_v13  ;;  %v7476_v27 = vld [vmem:[%s8917_s20 + $0x14] sm:$0xf0]  ;;  %v6686_v61 = vrot.slane %v6678_v28, 9 }
 0x129   : > { %v1841_v55 = vpop.f32.mrf.mxu3  ;;  %v7510_v30 = vld [vmem:[%s9626_s0 + $0x558] sm:$0xff]  ;;  %v4106_v13 = vrot.slane %v8995_v12, 5 }
 0x12a   : > { %v1857_v44 = vadd.f32 %v1841_v55, %v8811_v4  ;;  %v7512_v4 = vld [vmem:[%s9626_s0 + $0x568] sm:$0xff]  ;;  %v3407_v3 = vsel %vm7814_vm3, %v3402_v59, %v3406_v60  ;;  %v3870_v55 = vrot.slane %v3868_v53, 5  ;;  %v3857_v19 = vor.u32 %v3856_v56, %v3853_v58 }
 0x12b   : > { %v1605_v29 = vpop.f32.mrf.mxu2  ;;  %v2018_v51 = vpop.f32.mrf.mxu0  ;;  %4354 = vmatpush.bf16.msrb.mxu1 %v7512_v4  ;;  %v3860_v4 = vshll.u32 %v8995_v12, 16  ;;  %v4081_v59 = vld [vmem:[%s8917_s20 + $0x8] sm:$0xe]  ;;  %v3572_v53 = vrot.slane %v8875_v15, 5  ;;  %v4110_v58 = vrot.slane %v9006_v38, 5 }
 0x12c   : > { %v8953_v31 = vadd.f32 %v1605_v29, %v1480_v36  ;;  %v8964_v46 = vadd.f32 %v2015_v5, %v1857_v44  ;;  %v6684_v5 = vrot.slane %v6676_v45, 9  ;;  %v6575_v29 = vld [vmem:[%s8280_s10 + $0x40] sm:$0xf]  ;;  %v7450_v44 = vld [vmem:[%s8280_s10 + $0x44] sm:$0xf0]  ;;  %v3871_v45 = vor.u32 %v3870_v55, %v3867_v52 }
 0x12d   : > { %v2142_v43 = vpop.f32.mrf.mxu1  ;;  %v7540_v52 = vld [vmem:[%s9626_s0 + $0x628] sm:$0xff] }
 0x12e   : > { %v2162_v48 = vadd.f32 %v2142_v43, %v8859_v54  ;;  %3261 = vmatmul.bf16.gmra.mxu3 %v6572_v62  ;;  %3507 = vmatmul.bf16.gmra.mxu0 %v3435_v37  ;;  %v7542_v54 = vld [vmem:[%s9626_s0 + $0x638] sm:$0xff]  ;;  %v3565_v8 = vsel %vm7837_vm5, %v6684_v5, %v3564_v11  ;;  %v3432_v37 = vunpack.c.l.b16 %v3407_v3  ;;  %v6576_v43 = vor.u32 %v7450_v44, %v6575_v29 }
 0x12f   : > { %4907 = vmatpush.bf16.msra.mxu0 %v7542_v54  ;;  %v7530_v62 = vld [vmem:[%s9626_s0 + $0x5f8] sm:$0xff]  ;;  %v3602_v23 = vunpack.c.l.b16 %v3565_v8  ;;  %v3568_v54 = vrot.slane %v8871_v35, 5  ;;  %v3872_v10 = vrot.slane %v3871_v45, 4 }
 0x130   : > { %3671 = vmatmul.bf16.vlgmr.msra.gmra.mxu1 %v3607_v26  ;;  %3805 = vmatmul.bf16.vlgmr.msra.gmra.mxu2 %v6756_v20  ;;  %v7541_v20 = vld [vmem:[%s9626_s0 + $0x630] sm:$0xff]  ;;  %v3840_v3 = vld [vmem:[%s8917_s20 + $0x18] sm:$0xf] }
 0x131   : > { %v1844_v34 = vpop.f32.mrf.mxu3  ;;  %v6677_v26 = vld [vmem:[%s8280_s10 + $0x30] sm:$0xe]  ;;  %4772 = vmatpush.bf16.msra.mxu3 %v7530_v62  ;;  %v3608_v42 = vpack.c.b16 %v3602_v23, %v3601_v25  ;;  %v3893_v56 = vshrl.u32 %v3840_v3, 16  ;;  %v3573_v62 = vsel %vm7837_vm5, %v6686_v61, %v3572_v53 }
 0x132   : > { %v1858_v21 = vadd.f32 %v1844_v34, %v8840_v6  ;;  %v7511_v6 = vld [vmem:[%s9626_s0 + $0x560] sm:$0xff]  ;;  %v6685_v22 = vrot.slane %v6677_v26, 9  ;;  %v3838_v34 = vld [vmem:[%s8917_s20 + $0x10] sm:$0xf] }
 0x133   : > { %v2388_v36 = vpop.f32.mrf.mxu2  ;;  %v2020_v40 = vpop.f32.mrf.mxu0  ;;  %4355 = vmatpush.bf16.msrb.mxu1 %v7511_v6  ;;  %4908 = vmatpush.bf16.msra.mxu0 %v7541_v20  ;;  %v6849_v6 = vrot.slane %v4080_v9, 9  ;;  %v3879_v15 = vshrl.u32 %v3838_v34, 16  ;;  %v3895_v28 = vrot.slane %v3893_v56, 4  ;;  %v7539_v9 = vld [vmem:[%s9626_s0 + $0x620] sm:$0xff]  ;;  %v4083_v56 = vld [vmem:[%s8917_s20 + $0x18] sm:$0xe] }
 0x134   : > { %v8977_v57 = vadd.f32 %v2388_v36, %v2162_v48  ;;  %v8991_v39 = vadd.f32 %v2018_v51, %v1858_v21  ;;  %v6759_v51 = vld [vmem:[%s8917_s20 + $0x10] sm:$0xf]  ;;  %v3874_v48 = vshll.u32 %v9006_v38, 16  ;;  %v3858_v21 = vrot.slane %v3857_v19, 4  ;;  %v7516_v19 = vld [vmem:[%s9626_s0 + $0x588] sm:$0xff] }
 0x135   : > { %v2144_v14 = vpop.f32.mrf.mxu1  ;;  %v6760_v11 = vor.u32 %v7476_v27, %v6759_v51  ;;  %v3862_v36 = vrot.slane %v3860_v4, 5  ;;  %v3569_v12 = vsel %vm7837_vm5, %v6685_v22, %v3568_v54  ;;  %v3881_v23 = vrot.slane %v3879_v15, 4  ;;  %v7509_v38 = vld [vmem:[%s9626_s0 + $0x550] sm:$0xff]  ;;  %v7528_v22 = vld [vmem:[%s9626_s0 + $0x5e8] sm:$0xff] }
 0x136   : > { %v2163_v7 = vadd.f32 %v2144_v14, %v8891_v32  ;;  %v3431_v32 = vunpack.c.l.b16 %v3393_v24  ;;  %v3876_v8 = vrot.slane %v3874_v48, 5  ;;  %v6850_v14 = vrot.slane %v4081_v59, 9  ;;  %v9064_v48 = vld [vmem:[%s8917_s20 + $0x14] sm:$0x1]  ;;  %v7508_v59 = vld [vmem:[%s9626_s0 + $0x548] sm:$0xff] }
 0x137   : > { %4356 = vmatpush.bf16.msrb.mxu1 %v7510_v30  ;;  %v3863_v20 = vsel %vm7814_vm3, %v3858_v21, %v3862_v36  ;;  %4909 = vmatpush.bf16.msra.mxu0 %v7540_v52  ;;  %v6680_v30 = vld [vmem:[%s8280_s10 + $0x48] sm:$0xe] }
 0x138   : > { %v3436_v49 = vpack.c.b16 %v3432_v37, %v3431_v32  ;;  %v3877_v29 = vsel %vm7814_vm3, %v3872_v10, %v3876_v8  ;;  %v4107_v37 = vsel %vm7837_vm5, %v6849_v6, %v4106_v13  ;;  %v4111_v25 = vsel %vm7837_vm5, %v6850_v14, %v4110_v58  ;;  %v4082_v6 = vld [vmem:[%s8917_s20 + $0x10] sm:$0xe] }
 0x139   : > { %v1846_v33 = vpop.f32.mrf.mxu3  ;;  %v4153_v54 = vunpack.c.l.b16 %v4107_v37  ;;  %v4154_v61 = vunpack.c.l.b16 %v4111_v25  ;;  %v3576_v8 = vrot.slane %v8943_v16, 5  ;;  %v6688_v15 = vrot.slane %v6680_v30, 9 }
 0x13a   : > { %v1859_v50 = vadd.f32 %v1846_v33, %v8879_v17  ;;  %v7517_v17 = vld [vmem:[%s9626_s0 + $0x590] sm:$0xff]  ;;  %v3603_v33 = vunpack.c.l.b16 %v3569_v12 }
 0x13b   : > { %v2390_v47 = vpop.f32.mrf.mxu2  ;;  %v2023_v5 = vpop.f32.mrf.mxu0  ;;  %4603 = vmatpush.bf16.msrb.mxu2 %v7517_v17  ;;  %4357 = vmatpush.bf16.msrb.mxu1 %v7509_v38  ;;  %v4161_v58 = vpack.c.b16 %v4154_v61, %v4153_v54 }
 0x13c   : > { %v9017_v60 = vadd.f32 %v2390_v47, %v2163_v7  ;;  %v9028_v24 = vadd.f32 %v2020_v40, %v1859_v50  ;;  %v3882_v40 = vshll.u32 %v3838_v34, 16  ;;  %v3896_v7 = vshll.u32 %v3840_v3, 16  ;;  %v9067_v50 = vld [vmem:[%s8917_s20 + $0x1c] sm:$0x1]  ;;  %4910 = vmatpush.bf16.msra.mxu0 %v7539_v9 }
 0x13d   : > { %v2147_v2 = vpop.f32.mrf.mxu1  ;;  %v3888_v34 = vshll.u32 %v9064_v48, 16  ;;  %v3902_v21 = vshll.u32 %v9067_v50, 16  ;;  %v4118_v38 = vrot.slane %v9067_v50, 5 }
 0x13e   : > { %v2164_v35 = vadd.f32 %v2147_v2, %v8930_v63  ;;  %3266 = vmatmul.bf16.gmra.mxu3 %v6576_v43  ;;  %3512 = vmatmul.bf16.gmra.mxu0 %v3436_v49  ;;  %v7529_v63 = vld [vmem:[%s9626_s0 + $0x5f0] sm:$0xff]  ;;  %v3884_v27 = vrot.slane %v3882_v40, 5  ;;  %v3604_v43 = vunpack.c.l.b16 %v3573_v62  ;;  %v3979_v49 = vunpack.c.l.b16 %v3863_v20  ;;  %v3842_v62 = vld [vmem:[%s8917_s20 + $0x20] sm:$0xf] }
 0x13f   : > { %4773 = vmatpush.bf16.msra.mxu3 %v7529_v63  ;;  %4604 = vmatpush.bf16.msrb.mxu2 %v7516_v19  ;;  %v3580_v40 = vrot.slane %v8946_v18, 5  ;;  %v7507_v63 = vld [vmem:[%s9626_s0 + $0x540] sm:$0xff]  ;;  %v3904_v18 = vrot.slane %v3902_v21, 5  ;;  %v6977_v19 = vld [vmem:[%s8917_s20 + $0x8] sm:$0xf]  ;;  %v9134_v21 = vld [vmem:[%s9626_s0 + $0x6b8] sm:$0xff] }
 0x140   : > { %3676 = vmatmul.bf16.gmra.mxu1 %v3608_v42  ;;  %3810 = vmatmul.bf16.gmra.mxu2 %v6760_v11  ;;  %v3980_v42 = vunpack.c.l.b16 %v3877_v29  ;;  %v7477_v11 = vld [vmem:[%s8917_s20 + $0x24] sm:$0xf0]  ;;  %v3885_v17 = vor.u32 %v3884_v27, %v3881_v23  ;;  %v3609_v53 = vpack.c.b16 %v3604_v43, %v3603_v33  ;;  %v6851_v29 = vrot.slane %v4082_v6, 9  ;;  %v9142_v6 = vld [vmem:[%s8917_s20 + $0x24] sm:$0x1] }
 0x141   : > { %v1849_v55 = vpop.f32.mrf.mxu3  ;;  %4358 = vmatpush.bf16.msrb.mxu1 %v7508_v59  ;;  %v6852_v23 = vrot.slane %v4083_v56, 9  ;;  %v3844_v27 = vld [vmem:[%s8917_s20 + $0x28] sm:$0xf]  ;;  %v4406_v59 = vshrl.u32 %v6977_v19, 16  ;;  %v7526_v56 = vld [vmem:[%s9626_s0 + $0x5d8] sm:$0xff] }
 0x142   : > { %v1860_v44 = vadd.f32 %v1849_v55, %v8910_v1  ;;  %v3898_v1 = vrot.slane %v3896_v7, 5  ;;  %v7515_v7 = vld [vmem:[%s9626_s0 + $0x580] sm:$0xff]  ;;  %v3886_v12 = vrot.slane %v3885_v17, 4  ;;  %v3890_v55 = vrot.slane %v3888_v34, 5 }
 0x143   : > { %v2393_v32 = vpop.f32.mrf.mxu2  ;;  %v2025_v26 = vpop.f32.mrf.mxu0  ;;  %4774 = vmatpush.bf16.msra.mxu3 %v7528_v22  ;;  %4605 = vmatpush.bf16.msrb.mxu2 %v7515_v7  ;;  %v3921_v22 = vshrl.u32 %v3844_v27, 16  ;;  %v3924_v9 = vshll.u32 %v3844_v27, 16  ;;  %v7537_v7 = vld [vmem:[%s9626_s0 + $0x610] sm:$0xff] }
 0x144   : > { %v9056_v51 = vadd.f32 %v2393_v32, %v2164_v35  ;;  %v9061_v45 = vadd.f32 %v2023_v5, %v1860_v44  ;;  %v6763_v5 = vld [vmem:[%s8917_s20 + $0x20] sm:$0xf]  ;;  %v3899_v2 = vor.u32 %v3898_v1, %v3895_v28  ;;  %v3987_v35 = vpack.c.b16 %v3980_v42, %v3979_v49 }
 0x145   : > { %v2149_v4 = vpop.f32.mrf.mxu1  ;;  %v6764_v3 = vor.u32 %v7477_v11, %v6763_v5  ;;  %v4114_v44 = vrot.slane %v9064_v48, 5  ;;  %4359 = vmatpush.bf16.msrb.mxu1 %v7507_v63  ;;  %v3907_v28 = vshrl.u32 %v3842_v62, 16  ;;  %v3910_v1 = vshll.u32 %v3842_v62, 16  ;;  %v3845_v63 = vld [vmem:[%s8917_s20 + $0x2c] sm:$0x1] }
 0x146   : > { %v2165_v47 = vadd.f32 %v2149_v4, %v8964_v46  ;;  %v6679_v46 = vld [vmem:[%s8280_s10 + $0x40] sm:$0xe]  ;;  %v7538_v4 = vld [vmem:[%s9626_s0 + $0x618] sm:$0xff]  ;;  %v3891_v43 = vsel %vm7814_vm3, %v3886_v12, %v3890_v55  ;;  %v4119_v42 = vsel %vm7837_vm5, %v6852_v23, %v4118_v38  ;;  %v4408_v12 = vrot.slane %v4406_v59, 4  ;;  %s5616_s10 = sshll.u32 %s388_s11, 1 }
 0x147   : > { %v6687_v10 = vrot.slane %v6679_v46, 9  ;;  %v4115_v50 = vsel %vm7837_vm5, %v6851_v29, %v4114_v44  ;;  %4911 = vmatpush.bf16.msra.mxu0 %v7538_v4  ;;  %v3909_v54 = vrot.slane %v3907_v28, 4  ;;  %v3912_v61 = vrot.slane %v3910_v1, 5  ;;  %5327 = vmatpush.bf16.msra.mxu2 %v9134_v21  ;;  %v9160_v44 = vld [vmem:[%s8917_s20 + $0x14] sm:$0x1]  ;;  %s390_s14 = scalar_lea.vmem %s9632_s6, %s5616_s10 }
 0x148   : > { %v4409_v46 = vshll.u32 %v6977_v19, 16  ;;  %v3916_v55 = vshll.u32 %v9142_v6, 16  ;;  %v3930_v27 = vshll.u32 %v3845_v63, 16  ;;  %v4084_v28 = vld [vmem:[%s8917_s20 + $0x20] sm:$0xe]  ;;  %v4122_v59 = vrot.slane %v9142_v6, 5 }
 0x149   : > { %v1851_v36 = vpop.f32.mrf.mxu3  ;;  %v9105_v25 = vsel %vm7837_vm5, %v6687_v10, %v3576_v8  ;;  %v4155_v10 = vunpack.c.l.b16 %v4115_v50  ;;  %v4085_v1 = vld [vmem:[%s8917_s20 + $0x28] sm:$0xe] }
 0x14a   : > { %v1861_v13 = vadd.f32 %v1851_v36, %v8953_v31  ;;  %v3900_v31 = vrot.slane %v3899_v2, 4  ;;  %v3605_v33 = vunpack.c.l.b16 %v9105_v25  ;;  %v3918_v50 = vrot.slane %v3916_v55, 5 }
 0x14b   : > { %v2395_v14 = vpop.f32.mrf.mxu2  ;;  %v2697_v16 = vpop.f32.mrf.mxu0  ;;  %4912 = vmatpush.bf16.msra.mxu0 %v7537_v7  ;;  %v6983_v7 = vld [vmem:[%s8917_s20 + $0x20] sm:$0xf] }
 0x14c   : > { %v9096_v52 = vadd.f32 %v2395_v14, %v2165_v47  ;;  %v9100_v32 = vadd.f32 %v2025_v26, %v1861_v13  ;;  %v3581_v26 = vsel %vm7837_vm5, %v6688_v15, %v3580_v40  ;;  %v3905_v48 = vsel %vm7814_vm3, %v3900_v31, %v3904_v18  ;;  %v6979_v47 = vld [vmem:[%s8917_s20 + $0x10] sm:$0xf]  ;;  %v7478_v14 = vld [vmem:[%s8917_s20 + $0x34] sm:$0xf0]  ;;  %v9156_v31 = vld [vmem:[%s8917_s20 + $0xc] sm:$0x1] }
 0x14d   : > { %v2152_v20 = vpop.f32.mrf.mxu1  ;;  %v3606_v34 = vunpack.c.l.b16 %v3581_v26  ;;  %v4420_v2 = vshrl.u32 %v6979_v47, 16  ;;  %v3923_v15 = vrot.slane %v3921_v22, 4  ;;  %v3926_v40 = vrot.slane %v3924_v9, 5 }
 0x14e   : > { %v2166_v37 = vadd.f32 %v2152_v20, %v8991_v39  ;;  %4051 = vmatmul.bf16.vlgmr.msrb.gmra.mxu3 %v3987_v35  ;;  %4225 = vmatmul.bf16.vlgmr.msrb.gmra.mxu0 %v4161_v58  ;;  %v7527_v39 = vld [vmem:[%s9626_s0 + $0x5e0] sm:$0xff]  ;;  %v3982_v35 = vunpack.c.l.b16 %v3905_v48  ;;  %v4156_v58 = vunpack.c.l.b16 %v4119_v42  ;;  %v9172_v42 = vld [vmem:[%s9626_s0 + $0x678] sm:$0xff]  ;;  %v6853_v9 = vrot.slane %v4084_v28, 9 }
 0x14f   : > { %4775 = vmatpush.bf16.msra.mxu3 %v7527_v39  ;;  %v4422_v62 = vrot.slane %v4420_v2, 4  ;;  %v3610_v18 = vpack.c.b16 %v3606_v34, %v3605_v33  ;;  %v3927_v38 = vor.u32 %v3926_v40, %v3923_v15  ;;  %v4126_v34 = vrot.slane %v3845_v63, 5  ;;  %7567 = vmatpush.bf16.msra.mxu1 %v9172_v42 }
 0x150   : > { %3681 = vmatmul.bf16.gmra.mxu1 %v3609_v53  ;;  %3815 = vmatmul.bf16.gmra.mxu2 %v6764_v3  ;;  %v4423_v53 = vshll.u32 %v6979_v47, 16  ;;  %v9137_v3 = vld [vmem:[%s8917_s20 + $0x30] sm:$0xf]  ;;  %v4162_v23 = vpack.c.b16 %v4156_v58, %v4155_v10  ;;  %v7536_v10 = vld [vmem:[%s9626_s0 + $0x608] sm:$0xff]  ;;  %v4123_v6 = vsel %vm7837_vm5, %v6853_v9, %v4122_v59 }
 0x151   : > { %v2562_v49 = vpop.f32.mrf.mxu3  ;;  %v6768_v29 = vor.u32 %v7478_v14, %v9137_v3  ;;  %4913 = vmatpush.bf16.msra.mxu0 %v7536_v10  ;;  %v9245_v10 = vld [vmem:[%s8917_s20 + $0x24] sm:$0x1] }
 0x152   : > { %v2582_v11 = vadd.f32 %v2562_v49, %v8977_v57  ;;  %v3981_v57 = vunpack.c.l.b16 %v3891_v43  ;;  %v4425_v20 = vrot.slane %v4423_v53, 5  ;;  %v4415_v43 = vshll.u32 %v9156_v31, 16 }
 0x153   : > { %v2398_v5 = vpop.f32.mrf.mxu2  ;;  %v2699_v17 = vpop.f32.mrf.mxu0  ;;  %4776 = vmatpush.bf16.msra.mxu3 %v7526_v56  ;;  %v4429_v49 = vshll.u32 %v9160_v44, 16 }
 0x154   : > { %v9129_v30 = vadd.f32 %v2398_v5, %v2166_v37  ;;  %v9139_v8 = vadd.f32 %v2697_v16, %v2582_v11  ;;  %v3913_v16 = vor.u32 %v3912_v61, %v3909_v54  ;;  %v3988_v25 = vpack.c.b16 %v3982_v35, %v3981_v57  ;;  %v3848_v57 = vld [vmem:[%s8917_s20 + $0x38] sm:$0xf]  ;;  %v7525_v35 = vld [vmem:[%s9626_s0 + $0x5d0] sm:$0xff] }
 0x155   : > { %v2154_v36 = vpop.f32.mrf.mxu1  ;;  %v4426_v47 = vor.u32 %v4425_v20, %v4422_v62  ;;  %v6854_v5 = vrot.slane %v4085_v1, 9  ;;  %v3928_v61 = vrot.slane %v3927_v38, 4  ;;  %v4417_v53 = vrot.slane %v4415_v43, 5 }
 0x156   : > { %v2167_v13 = vadd.f32 %v2154_v36, %v9028_v24  ;;  %v4411_v24 = vrot.slane %v4409_v46, 5  ;;  %v3914_v39 = vrot.slane %v3913_v16, 4  ;;  %v3932_v46 = vrot.slane %v3930_v27, 5  ;;  %v3846_v36 = vld [vmem:[%s8917_s20 + $0x30] sm:$0xf] }
 0x157   : > { %v4431_v3 = vrot.slane %v4429_v49, 5  ;;  %v4127_v15 = vsel %vm7837_vm5, %v6854_v5, %v4126_v34  ;;  %v3935_v40 = vshrl.u32 %v3846_v36, 16  ;;  %v3938_v56 = vshll.u32 %v3846_v36, 16  ;;  %4777 = vmatpush.bf16.msra.mxu3 %v7525_v35  ;;  %v9223_v27 = vld [vmem:[%s8917_s20 + $0x34] sm:$0x1] }
 0x158   : > { %v4412_v4 = vor.u32 %v4411_v24, %v4408_v12  ;;  %v3933_v58 = vsel %vm7814_vm3, %v3928_v61, %v3932_v46  ;;  %v3949_v24 = vshrl.u32 %v3848_v57, 16  ;;  %v3952_v55 = vshll.u32 %v3848_v57, 16  ;;  %v9236_v61 = vld [vmem:[%s8917_s20 + $0x3c] sm:$0x1] }
 0x159   : > { %v2564_v37 = vpop.f32.mrf.mxu3  ;;  %v4448_v1 = vshrl.u32 %v6983_v7, 16  ;;  %v3940_v43 = vrot.slane %v3938_v56, 5  ;;  %v4158_v49 = vunpack.c.l.b16 %v4127_v15  ;;  %v3944_v46 = vshll.u32 %v9223_v27, 16  ;;  %v9240_v34 = vld [vmem:[%s8917_s20 + $0x1c] sm:$0x1] }
 0x15a   : > { %v2583_v26 = vadd.f32 %v2564_v37, %v9017_v60  ;;  %v9177_v60 = vld [vmem:[%s9626_s0 + $0x6b0] sm:$0xff]  ;;  %v4413_v2 = vrot.slane %v4412_v4, 4  ;;  %v3937_v4 = vrot.slane %v3935_v40, 4  ;;  %v3951_v9 = vrot.slane %v3949_v24, 4  ;;  %v9262_v24 = vld [vmem:[%s9626_s0 + $0x6a0] sm:$0xff] }
 0x15b   : > { %v2400_v19 = vpop.f32.mrf.mxu2  ;;  %v2702_v33 = vpop.f32.mrf.mxu0  ;;  %5328 = vmatpush.bf16.msra.mxu2 %v9177_v60  ;;  %v3954_v59 = vrot.slane %v3952_v55, 5  ;;  %v4450_v36 = vrot.slane %v4448_v1, 4  ;;  %v3958_v15 = vshll.u32 %v9236_v61, 16  ;;  %v4086_v40 = vld [vmem:[%s8917_s20 + $0x30] sm:$0xe] }
 0x15c   : > { %v9166_v48 = vadd.f32 %v2400_v19, %v2167_v13  ;;  %v9180_v11 = vadd.f32 %v2699_v17, %v2583_v26  ;;  %v4427_v17 = vrot.slane %v4426_v47, 4  ;;  %v6981_v13 = vld [vmem:[%s8917_s20 + $0x18] sm:$0xf]  ;;  %v4451_v19 = vshll.u32 %v6983_v7, 16 }
 0x15d   : > { %v2157_v22 = vpop.f32.mrf.mxu1  ;;  %v4434_v37 = vshrl.u32 %v6981_v13, 16  ;;  %v4437_v28 = vshll.u32 %v6981_v13, 16  ;;  %v4157_v47 = vunpack.c.l.b16 %v4123_v6  ;;  %v3941_v35 = vor.u32 %v3940_v43, %v3937_v4 }
 0x15e   : > { %v2168_v54 = vadd.f32 %v2157_v22, %v9061_v45  ;;  %4056 = vmatmul.bf16.gmra.mxu3 %v3988_v25  ;;  %4230 = vmatmul.bf16.gmra.mxu0 %v4162_v23  ;;  %v3919_v45 = vsel %vm7814_vm3, %v3914_v39, %v3918_v50  ;;  %v7549_v25 = vld [vmem:[%s9626_s0 + $0x670] sm:$0xff]  ;;  %v3984_v39 = vunpack.c.l.b16 %v3933_v58  ;;  %v7535_v50 = vld [vmem:[%s9626_s0 + $0x600] sm:$0xff]  ;;  %v6931_v22 = vld [vmem:[%s8917_s20 + $0x8] sm:$0xf]  ;;  %v3955_v58 = vor.u32 %v3954_v59, %v3951_v9 }
 0x15f   : > { %v9204_v12 = vunpack.c.l.b16 %v3919_v45  ;;  %7568 = vmatpush.bf16.msra.mxu1 %v7549_v25  ;;  %4914 = vmatpush.bf16.msra.mxu0 %v7535_v50  ;;  %v4453_v45 = vrot.slane %v4451_v19, 5  ;;  %v3942_v19 = vrot.slane %v3941_v35, 4  ;;  %v3960_v43 = vrot.slane %v3958_v15, 5 }
 0x160   : > { %3686 = vmatmul.bf16.gmra.mxu1 %v3610_v18  ;;  %3820 = vmatmul.bf16.gmra.mxu2 %v6768_v29  ;;  %v4418_v18 = vsel %vm7814_vm3, %v4413_v2, %v4417_v53  ;;  %v4432_v29 = vsel %vm7814_vm3, %v4427_v17, %v4431_v3  ;;  %v4436_v2 = vrot.slane %v4434_v37, 4  ;;  %v4439_v53 = vrot.slane %v4437_v28, 5 }
 0x161   : > { %v2567_v14 = vpop.f32.mrf.mxu3  ;;  %v4534_v5 = vunpack.c.l.b16 %v4418_v18  ;;  %v3989_v3 = vpack.c.b16 %v3984_v39, %v9204_v12  ;;  %v4443_v12 = vshll.u32 %v9240_v34, 16  ;;  %v4087_v18 = vld [vmem:[%s8917_s20 + $0x38] sm:$0xe]  ;;  %v4454_v37 = vor.u32 %v4453_v45, %v4450_v36 }
 0x162   : > { %v2584_v16 = vadd.f32 %v2567_v14, %v9056_v51  ;;  %v9218_v51 = vld [vmem:[%s9626_s0 + $0x6a8] sm:$0xff]  ;;  %v4163_v14 = vpack.c.b16 %v4158_v49, %v4157_v47  ;;  %v4130_v39 = vrot.slane %v9223_v27, 5  ;;  %v3956_v4 = vrot.slane %v3955_v58, 4 }
 0x163   : > { %v2403_v63 = vpop.f32.mrf.mxu2  ;;  %v2704_v20 = vpop.f32.mrf.mxu0  ;;  %5329 = vmatpush.bf16.msra.mxu2 %v9218_v51  ;;  %5153 = vmatpush.bf16.msrb.mxu0 %v9172_v42  ;;  %v7523_v42 = vld [vmem:[%s9626_s0 + $0x5c0] sm:$0xff]  ;;  %v4455_v47 = vrot.slane %v4454_v37, 4 }
 0x164   : > { %v9206_v62 = vadd.f32 %v2403_v63, %v2168_v54  ;;  %v9220_v38 = vadd.f32 %v2702_v33, %v2584_v16  ;;  %v7524_v33 = vld [vmem:[%s9626_s0 + $0x5c8] sm:$0xff]  ;;  %v4535_v54 = vunpack.c.l.b16 %v4432_v29  ;;  %v3946_v16 = vrot.slane %v3944_v46, 5 }
 0x165   : > { %v2159_v23 = vpop.f32.mrf.mxu1  ;;  %4778 = vmatpush.bf16.msra.mxu3 %v7524_v33  ;;  %v4440_v29 = vor.u32 %v4439_v53, %v4436_v2  ;;  %v4134_v33 = vrot.slane %v9236_v61, 5 }
 0x166   : > { %v2169_v26 = vadd.f32 %v2159_v23, %v9100_v32  ;;  %v7503_v32 = vld [vmem:[%s8917_s20 + $0xc] sm:$0xf0]  ;;  %v4542_v63 = vpack.c.b16 %v4535_v54, %v4534_v5  ;;  %v4457_v23 = vshll.u32 %v9245_v10, 16  ;;  %v3961_v54 = vsel %vm7814_vm3, %v3956_v4, %v3960_v43 }
 0x167   : > { %v6932_v57 = vor.u32 %v7503_v32, %v6931_v22  ;;  %5154 = vmatpush.bf16.msrb.mxu0 %v7549_v25  ;;  %5330 = vmatpush.bf16.msra.mxu2 %v9262_v24  ;;  %v6985_v25 = vld [vmem:[%s8917_s20 + $0x28] sm:$0xf]  ;;  %v4441_v50 = vrot.slane %v4440_v29, 4  ;;  %v6987_v22 = vld [vmem:[%s8917_s20 + $0x30] sm:$0xf]  ;;  %v3947_v32 = vsel %vm7814_vm3, %v3942_v19, %v3946_v16  ;;  %v3986_v58 = vunpack.c.l.b16 %v3961_v54 }
 0x168   : > { %v4459_v49 = vrot.slane %v4457_v23, 5  ;;  %v4462_v61 = vshrl.u32 %v6985_v25, 16  ;;  %v4465_v46 = vshll.u32 %v6985_v25, 16  ;;  %v4476_v36 = vshrl.u32 %v6987_v22, 16 }
 0x169   : > { %v2569_v17 = vpop.f32.mrf.mxu3  ;;  %4779 = vmatpush.bf16.msra.mxu3 %v7523_v42  ;;  %v4479_v45 = vshll.u32 %v6987_v22, 16  ;;  %v6935_v42 = vld [vmem:[%s8917_s20 + $0x18] sm:$0xf] }
 0x16a   : > { %v2585_v13 = vadd.f32 %v2569_v17, %v9096_v52  ;;  %v7548_v52 = vld [vmem:[%s9626_s0 + $0x668] sm:$0xff]  ;;  %v9292_v17 = vld [vmem:[%s9626_s0 + $0x698] sm:$0xff]  ;;  %v4460_v35 = vsel %vm7814_vm3, %v4455_v47, %v4459_v49  ;;  %v4464_v16 = vrot.slane %v4462_v61, 4  ;;  %v7042_v49 = vld [vmem:[%s8917_s20 + $0x10] sm:$0xe]  ;;  %v4661_v61 = vrot.slane %v9156_v31, 5 }
 0x16b   : > { %v2405_v6 = vpop.f32.mrf.mxu2  ;;  %v2707_v7 = vpop.f32.mrf.mxu0  ;;  %7569 = vmatpush.bf16.msra.mxu1 %v7548_v52  ;;  %5155 = vmatpush.bf16.msrb.mxu0 %v7548_v52  ;;  %v4537_v52 = vunpack.c.l.b16 %v4460_v35 }
 0x16c   : > { %v9253_v56 = vadd.f32 %v2405_v6, %v2169_v26  ;;  %v9266_v28 = vadd.f32 %v2704_v20, %v2585_v13  ;;  %v6855_v26 = vrot.slane %v4086_v40, 9  ;;  %v6856_v20 = vrot.slane %v4087_v18, 9  ;;  %5331 = vmatpush.bf16.msra.mxu2 %v9292_v17 }
 0x16d   : > { %v2943_v55 = vpop.f32.mrf.mxu1  ;;  %7575 = vmatpush.bf16.msrb.mxu3 %v9134_v21  ;;  %v4481_v18 = vrot.slane %v4479_v45, 5 }
 0x16e   : > { %v2963_v1 = vadd.f32 %v2943_v55, %v9139_v8  ;;  %4061 = vmatmul.bf16.gmra.mxu3 %v3989_v3  ;;  %4235 = vmatmul.bf16.gmra.mxu0 %v4163_v14  ;;  %v4445_v8 = vrot.slane %v4443_v12, 5  ;;  %v4131_v9 = vsel %vm7837_vm5, %v6855_v26, %v4130_v39  ;;  %v4135_v21 = vsel %vm7837_vm5, %v6856_v20, %v4134_v33  ;;  %v9306_v55 = vld [vmem:[%s8917_s20 + $0x2c] sm:$0x1] }
 0x16f   : > { %v3985_v14 = vunpack.c.l.b16 %v3947_v32  ;;  %v4159_v15 = vunpack.c.l.b16 %v4131_v9  ;;  %v4160_v40 = vunpack.c.l.b16 %v4135_v21  ;;  %v4467_v12 = vrot.slane %v4465_v46, 5  ;;  %v6989_v32 = vld [vmem:[%s8917_s20 + $0x38] sm:$0xf]  ;;  %v6991_v9 = vld [vmem:[%s8917_s20 + $0x40] sm:$0xf] }
 0x170   : > { %4360 = vmatmul.bf16.vlgmr.msrb.gmra.mxu1 %v6932_v57  ;;  %4606 = vmatmul.bf16.vlgmr.msrb.gmra.mxu2 %v4542_v63  ;;  %v4446_v57 = vsel %vm7814_vm3, %v4441_v50, %v4445_v8  ;;  %v7504_v63 = vld [vmem:[%s8917_s20 + $0x1c] sm:$0xf0]  ;;  %v4471_v4 = vshll.u32 %v9306_v55, 16  ;;  %v7041_v50 = vld [vmem:[%s8917_s20 + $0x8] sm:$0xe]  ;;  %v7546_v8 = vld [vmem:[%s9626_s0 + $0x658] sm:$0xff] }
 0x171   : > { %v2572_v27 = vpop.f32.mrf.mxu3  ;;  %7576 = vmatpush.bf16.msrb.mxu3 %v9177_v60  ;;  %v4478_v60 = vrot.slane %v4476_v36, 4  ;;  %v3990_v37 = vpack.c.b16 %v3986_v58, %v3985_v14  ;;  %v6936_v23 = vor.u32 %v7504_v63, %v6935_v42  ;;  %v4164_v26 = vpack.c.b16 %v4160_v40, %v4159_v15  ;;  %v7552_v15 = vld [vmem:[%s9626_s0 + $0x688] sm:$0xff] }
 0x172   : > { %v2586_v59 = vadd.f32 %v2572_v27, %v9129_v30  ;;  %v7547_v30 = vld [vmem:[%s9626_s0 + $0x660] sm:$0xff]  ;;  %v4468_v39 = vor.u32 %v4467_v12, %v4464_v16  ;;  %v7049_v54 = vrot.slane %v7041_v50, 9  ;;  %v7050_v21 = vrot.slane %v7042_v49, 9 }
 0x173   : > { %v3117_v5 = vpop.f32.mrf.mxu2  ;;  %v2709_v53 = vpop.f32.mrf.mxu0  ;;  %7570 = vmatpush.bf16.msra.mxu1 %v7547_v30  ;;  %5156 = vmatpush.bf16.msrb.mxu0 %v7547_v30  ;;  %v4482_v25 = vor.u32 %v4481_v18, %v4478_v60  ;;  %v4490_v36 = vshrl.u32 %v6989_v32, 16  ;;  %v4504_v45 = vshrl.u32 %v6991_v9, 16  ;;  %v9358_v60 = vld [vmem:[%s8917_s20 + $0x44] sm:$0x1] }
 0x174   : > { %v9282_v2 = vadd.f32 %v3117_v5, %v2963_v1  ;;  %v9298_v6 = vadd.f32 %v2707_v7, %v2586_v59  ;;  %v4536_v7 = vunpack.c.l.b16 %v4446_v57  ;;  %v4469_v59 = vrot.slane %v4468_v39, 4  ;;  %v7531_v39 = vld [vmem:[%s8917_s20 + $0x14] sm:$0xf0] }
 0x175   : > { %v2945_v3 = vpop.f32.mrf.mxu1  ;;  %7577 = vmatpush.bf16.msrb.mxu3 %v9218_v51  ;;  %v4473_v5 = vrot.slane %v4471_v4, 5  ;;  %v4483_v46 = vrot.slane %v4482_v25, 4  ;;  %v4662_v31 = vsel %vm7837_vm5, %v7049_v54, %v4661_v61  ;;  %v4492_v63 = vrot.slane %v4490_v36, 4  ;;  %v6939_v4 = vld [vmem:[%s8917_s20 + $0x28] sm:$0xf] }
 0x176   : > { %v2964_v13 = vadd.f32 %v2945_v3, %v9180_v11  ;;  %v9309_v11 = vld [vmem:[%s8917_s20 + $0x34] sm:$0x1]  ;;  %v4543_v33 = vpack.c.b16 %v4537_v52, %v4536_v7  ;;  %v4507_v3 = vshll.u32 %v6991_v9, 16  ;;  %v4506_v12 = vrot.slane %v4504_v45, 4  ;;  %v9355_v52 = vld [vmem:[%s8917_s20 + $0x3c] sm:$0x1] }
 0x177   : > { %v4485_v51 = vshll.u32 %v9309_v11, 16  ;;  %7571 = vmatpush.bf16.msra.mxu1 %v7546_v8  ;;  %5157 = vmatpush.bf16.msrb.mxu0 %v7546_v8  ;;  %v4513_v25 = vshll.u32 %v9358_v60, 16  ;;  %v7543_v9 = vld [vmem:[%s9626_s0 + $0x640] sm:$0xff] }
 0x178   : > { %v4509_v18 = vrot.slane %v4507_v3, 5  ;;  %v4669_v3 = vrot.slane %v9240_v34, 5 }
 0x179   : > { %v2574_v29 = vpop.f32.mrf.mxu3  ;;  %7578 = vmatpush.bf16.msrb.mxu3 %v9262_v24  ;;  %v4665_v24 = vrot.slane %v9160_v44, 5 }
 0x17a   : > { %v2587_v1 = vadd.f32 %v2574_v29, %v9166_v48  ;;  %v7553_v48 = vld [vmem:[%s9626_s0 + $0x690] sm:$0xff]  ;;  %v7544_v29 = vld [vmem:[%s9626_s0 + $0x648] sm:$0xff]  ;;  %v4510_v50 = vor.u32 %v4509_v18, %v4506_v12 }
 0x17b   : > { %v3119_v19 = vpop.f32.mrf.mxu2  ;;  %v2712_v20 = vpop.f32.mrf.mxu0  ;;  %5332 = vmatpush.bf16.msra.mxu2 %v7553_v48 }
 0x17c   : > { %v9314_v43 = vadd.f32 %v3119_v19, %v2964_v13  ;;  %v9325_v22 = vadd.f32 %v2709_v53, %v2587_v1  ;;  %v4487_v53 = vrot.slane %v4485_v51, 5  ;;  %v7545_v13 = vld [vmem:[%s9626_s0 + $0x650] sm:$0xff]  ;;  %v4511_v45 = vrot.slane %v4510_v50, 4 }
 0x17d   : > { %v2948_v47 = vpop.f32.mrf.mxu1  ;;  %7579 = vmatpush.bf16.msrb.mxu3 %v9292_v17  ;;  %v4474_v17 = vsel %vm7814_vm3, %v4469_v59, %v4473_v5  ;;  %7572 = vmatpush.bf16.msra.mxu1 %v7545_v13 }
 0x17e   : > { %v2965_v27 = vadd.f32 %v2948_v47, %v9220_v38  ;;  %4066 = vmatmul.bf16.gmra.mxu3 %v3990_v37  ;;  %4240 = vmatmul.bf16.gmra.mxu0 %v4164_v26  ;;  %v4493_v38 = vshll.u32 %v6989_v32, 16  ;;  %v4488_v58 = vsel %vm7814_vm3, %v4483_v46, %v4487_v53  ;;  %v4708_v37 = vunpack.c.l.b16 %v4662_v31  ;;  %v7131_v26 = vld [vmem:[%s8917_s20 + $0x10] sm:$0xf]  ;;  %v7551_v32 = vld [vmem:[%s9626_s0 + $0x680] sm:$0xff] }
 0x17f   : > { %5158 = vmatpush.bf16.msrb.mxu0 %v7545_v13  ;;  %5333 = vmatpush.bf16.msra.mxu2 %v7552_v15  ;;  %v4538_v1 = vunpack.c.l.b16 %v4474_v17  ;;  %v4539_v19 = vunpack.c.l.b16 %v4488_v58  ;;  %v7132_v49 = vor.u32 %v7531_v39, %v7131_v26  ;;  %v7044_v46 = vld [vmem:[%s8917_s20 + $0x20] sm:$0xe]  ;;  %v7183_v13 = vld [vmem:[%s8917_s20 + $0x28] sm:$0xf] }
 0x180   : > { %4365 = vmatmul.bf16.gmra.mxu1 %v6936_v23  ;;  %4611 = vmatmul.bf16.gmra.mxu2 %v4543_v33  ;;  %v4495_v16 = vrot.slane %v4493_v38, 5  ;;  %v4499_v33 = vshll.u32 %v9355_v52, 16  ;;  %v7181_v31 = vld [vmem:[%s8917_s20 + $0x20] sm:$0xf]  ;;  %v5003_v12 = vshrl.u32 %v7183_v13, 16 }
 0x181   : > { %v2577_v30 = vpop.f32.mrf.mxu3  ;;  %7580 = vmatpush.bf16.msrb.mxu3 %v7553_v48  ;;  %7573 = vmatpush.bf16.msra.mxu1 %v7544_v29  ;;  %v4544_v61 = vpack.c.b16 %v4539_v19, %v4538_v1  ;;  %v7506_v1 = vld [vmem:[%s8917_s20 + $0x3c] sm:$0xf0] }
 0x182   : > { %v2588_v57 = vadd.f32 %v2577_v30, %v9206_v62  ;;  %v4666_v62 = vsel %vm7837_vm5, %v7050_v21, %v4665_v24  ;;  %v4501_v21 = vrot.slane %v4499_v33, 5  ;;  %v4515_v24 = vrot.slane %v4513_v25, 5  ;;  %v9406_v25 = vld [vmem:[%s8917_s20 + $0x24] sm:$0x1] }
 0x183   : > { %v3122_v35 = vpop.f32.mrf.mxu2  ;;  %v2714_v14 = vpop.f32.mrf.mxu0  ;;  %v4709_v23 = vunpack.c.l.b16 %v4666_v62  ;;  %5159 = vmatpush.bf16.msrb.mxu0 %v7544_v29  ;;  %5334 = vmatpush.bf16.msra.mxu2 %v7551_v32  ;;  %v5005_v50 = vrot.slane %v5003_v12, 4 }
 0x184   : > { %v9340_v44 = vadd.f32 %v3122_v35, %v2965_v27  ;;  %v9351_v42 = vadd.f32 %v2712_v20, %v2588_v57  ;;  %v4496_v20 = vor.u32 %v4495_v16, %v4492_v63  ;;  %v7043_v27 = vld [vmem:[%s8917_s20 + $0x18] sm:$0xe]  ;;  %v7052_v57 = vrot.slane %v7044_v46, 9 }
 0x185   : > { %v2950_v40 = vpop.f32.mrf.mxu1  ;;  %7581 = vmatpush.bf16.msrb.mxu3 %v7552_v15  ;;  %v4716_v47 = vpack.c.b16 %v4709_v23, %v4708_v37  ;;  %7574 = vmatpush.bf16.msra.mxu1 %v7543_v9  ;;  %v7051_v30 = vrot.slane %v7043_v27, 9  ;;  %v4673_v35 = vrot.slane %v9245_v10, 5  ;;  %v4989_v15 = vshrl.u32 %v7181_v31, 16  ;;  %v6943_v23 = vld [vmem:[%s8917_s20 + $0x38] sm:$0xf] }
 0x186   : > { %v2966_v7 = vadd.f32 %v2950_v40, %v9266_v28  ;;  %v7505_v28 = vld [vmem:[%s8917_s20 + $0x2c] sm:$0xf0]  ;;  %v4992_v40 = vshll.u32 %v7181_v31, 16 }
 0x187   : > { %v6940_v54 = vor.u32 %v7505_v28, %v6939_v4  ;;  %5160 = vmatpush.bf16.msrb.mxu0 %v7543_v9  ;;  %v4670_v34 = vsel %vm7837_vm5, %v7051_v30, %v4669_v3  ;;  %v4674_v10 = vsel %vm7837_vm5, %v7052_v57, %v4673_v35  ;;  %v7135_v4 = vld [vmem:[%s8917_s20 + $0x20] sm:$0xf]  ;;  %v7532_v28 = vld [vmem:[%s8917_s20 + $0x24] sm:$0xf0]  ;;  %v9420_v3 = vld [vmem:[%s8917_s20 + $0x14] sm:$0x1] }
 0x188   : > { %v4710_v26 = vunpack.c.l.b16 %v4670_v34  ;;  %v4711_v39 = vunpack.c.l.b16 %v4674_v10  ;;  %v4994_v33 = vrot.slane %v4992_v40, 5  ;;  %v9426_v35 = vld [vmem:[%s8917_s20 + $0x1c] sm:$0x1]  ;;  %v7241_v31 = vld [vmem:[%s8917_s20 + $0x10] sm:$0xe]  ;;  %v5216_v40 = vrot.slane %v9420_v3, 5 }
 0x189   : > { %v2579_v51 = vpop.f32.mrf.mxu3  ;;  %7582 = vmatpush.bf16.msrb.mxu3 %v7551_v32  ;;  %v7136_v32 = vor.u32 %v7532_v28, %v7135_v4  ;;  %v7187_v10 = vld [vmem:[%s8917_s20 + $0x38] sm:$0xf]  ;;  %v5220_v12 = vrot.slane %v9426_v35, 5 }
 0x18a   : > { %v2589_v8 = vadd.f32 %v2579_v51, %v9253_v56  ;;  %v4497_v56 = vrot.slane %v4496_v20, 4  ;;  %v4991_v20 = vrot.slane %v4989_v15, 4  ;;  %v9409_v51 = vld [vmem:[%s8917_s20 + $0x2c] sm:$0x1]  ;;  %v4717_v27 = vpack.c.b16 %v4711_v39, %v4710_v26 }
 0x18b   : > { %v3124_v48 = vpop.f32.mrf.mxu2  ;;  %v3498_v5 = vpop.f32.mrf.mxu0  ;;  %v5012_v46 = vshll.u32 %v9409_v51, 16  ;;  %v7249_v15 = vrot.slane %v7241_v31, 9 }
 0x18c   : > { %v9377_v59 = vadd.f32 %v3124_v48, %v2966_v7  ;;  %v9380_v36 = vadd.f32 %v2714_v14, %v2589_v8  ;;  %v4502_v17 = vsel %vm7814_vm3, %v4497_v56, %v4501_v21  ;;  %v5006_v7 = vshll.u32 %v7183_v13, 16  ;;  %v7045_v48 = vld [vmem:[%s8917_s20 + $0x28] sm:$0xe]  ;;  %v7046_v21 = vld [vmem:[%s8917_s20 + $0x30] sm:$0xe] }
 0x18d   : > { %v2953_v53 = vpop.f32.mrf.mxu1  ;;  %v4540_v29 = vunpack.c.l.b16 %v4502_v17  ;;  %v7242_v13 = vld [vmem:[%s8917_s20 + $0x18] sm:$0xe]  ;;  %v4681_v17 = vrot.slane %v9309_v11, 5 }
 0x18e   : > { %v2967_v38 = vadd.f32 %v2953_v53, %v9298_v6  ;;  %4780 = vmatmul.bf16.vlgmr.msra.gmra.mxu3 %v4716_v47  ;;  %4915 = vmatmul.bf16.vlgmr.msra.gmra.mxu0 %v7132_v49  ;;  %v4516_v6 = vsel %vm7814_vm3, %v4511_v45, %v4515_v24  ;;  %v5008_v8 = vrot.slane %v5006_v7, 5  ;;  %v6944_v49 = vor.u32 %v7506_v1, %v6943_v23 }
 0x18f   : > { %v4541_v19 = vunpack.c.l.b16 %v4516_v6  ;;  %v7053_v24 = vrot.slane %v7045_v48, 9  ;;  %v5031_v1 = vshrl.u32 %v7187_v10, 16 }
 0x190   : > { %4370 = vmatmul.bf16.gmra.mxu1 %v6940_v54  ;;  %4616 = vmatmul.bf16.gmra.mxu2 %v4544_v61  ;;  %v4995_v54 = vor.u32 %v4994_v33, %v4991_v20  ;;  %v4998_v61 = vshll.u32 %v9406_v25, 16  ;;  %v5009_v45 = vor.u32 %v5008_v8, %v5005_v50 }
 0x191   : > { %v3252_v14 = vpop.f32.mrf.mxu3 }
 0x192   : > { %v3272_v62 = vadd.f32 %v3252_v14, %v9282_v2  ;;  %v7054_v14 = vrot.slane %v7046_v21, 9  ;;  %v4996_v6 = vrot.slane %v4995_v54, 4  ;;  %v5033_v54 = vrot.slane %v5031_v1, 4 }
 0x193   : > { %v3127_v58 = vpop.f32.mrf.mxu2  ;;  %v3500_v16 = vpop.f32.mrf.mxu0 }
 0x194   : > { %v9396_v63 = vadd.f32 %v3127_v58, %v2967_v38  ;;  %v9398_v37 = vadd.f32 %v3498_v5, %v3272_v62  ;;  %v4677_v38 = vrot.slane %v9306_v55, 5  ;;  %v7185_v55 = vld [vmem:[%s8917_s20 + $0x30] sm:$0xf]  ;;  %v5000_v58 = vrot.slane %v4998_v61, 5 }
 0x195   : > { %v2955_v18 = vpop.f32.mrf.mxu1  ;;  %v5010_v62 = vrot.slane %v5009_v45, 4  ;;  %v5020_v11 = vshll.u32 %v7185_v55, 16  ;;  %v4682_v23 = vsel %vm7837_vm5, %v7054_v14, %v4681_v17  ;;  %v7048_v45 = vld [vmem:[%s8917_s20 + $0x40] sm:$0xe] }
 0x196   : > { %v2968_v2 = vadd.f32 %v2955_v18, %v9325_v22  ;;  %v4545_v22 = vpack.c.b16 %v4541_v19, %v4540_v29  ;;  %v4678_v34 = vsel %vm7837_vm5, %v7053_v24, %v4677_v38  ;;  %v5017_v18 = vshrl.u32 %v7185_v55, 16 }
 0x197   : > { %v5034_v19 = vshll.u32 %v7187_v10, 16  ;;  %v4712_v4 = vunpack.c.l.b16 %v4678_v34  ;;  %v5001_v28 = vsel %vm7814_vm3, %v4996_v6, %v5000_v58  ;;  %v7056_v34 = vrot.slane %v7048_v45, 9 }
 0x198   : > { %v4689_v58 = vrot.slane %v9358_v60, 5 }
 0x199   : > { %v3254_v47 = vpop.f32.mrf.mxu3  ;;  %v5036_v61 = vrot.slane %v5034_v19, 5  ;;  %v7179_v19 = vld [vmem:[%s8917_s20 + $0x18] sm:$0xf] }
 0x19a   : > { %v3273_v5 = vadd.f32 %v3254_v47, %v9314_v43  ;;  %v4713_v47 = vunpack.c.l.b16 %v4682_v23 }
 0x19b   : > { %v3129_v9 = vpop.f32.mrf.mxu2  ;;  %v3503_v56 = vpop.f32.mrf.mxu0 }
 0x19c   : > { %v9415_v53 = vadd.f32 %v3129_v9, %v2968_v2  ;;  %v9422_v57 = vadd.f32 %v3500_v16, %v3273_v5  ;;  %v7250_v16 = vrot.slane %v7242_v13, 9  ;;  %v7533_v9 = vld [vmem:[%s8917_s20 + $0x34] sm:$0xf0]  ;;  %v9457_v5 = vld [vmem:[%s8917_s20 + $0x34] sm:$0x1]  ;;  %v4718_v31 = vpack.c.b16 %v4713_v47, %v4712_v4 }
 0x19d   : > { %v2958_v30 = vpop.f32.mrf.mxu1  ;;  %v5026_v17 = vshll.u32 %v9457_v5, 16  ;;  %v7189_v4 = vld [vmem:[%s8917_s20 + $0x40] sm:$0xf] }
 0x19e   : > { %v2969_v43 = vadd.f32 %v2958_v30, %v9351_v42  ;;  %4785 = vmatmul.bf16.gmra.mxu3 %v4717_v27  ;;  %4920 = vmatmul.bf16.gmra.mxu0 %v7136_v32  ;;  %v5014_v42 = vrot.slane %v5012_v46, 5  ;;  %v5221_v50 = vsel %vm7837_vm5, %v7250_v16, %v5220_v12  ;;  %v5019_v27 = vrot.slane %v5017_v18, 4 }
 0x19f   : > { %v5022_v32 = vrot.slane %v5020_v11, 5  ;;  %v5091_v46 = vunpack.c.l.b16 %v5001_v28  ;;  %v5264_v38 = vunpack.c.l.b16 %v5221_v50  ;;  %v4685_v30 = vrot.slane %v9355_v52, 5  ;;  %v7244_v11 = vld [vmem:[%s8917_s20 + $0x28] sm:$0xe] }
 0x1a0   : > { %4375 = vmatmul.bf16.gmra.mxu1 %v6944_v49  ;;  %4621 = vmatmul.bf16.gmra.mxu2 %v4545_v22  ;;  %v5015_v33 = vsel %vm7814_vm3, %v5010_v62, %v5014_v42  ;;  %v7139_v49 = vld [vmem:[%s8917_s20 + $0x30] sm:$0xf]  ;;  %v7047_v22 = vld [vmem:[%s8917_s20 + $0x38] sm:$0xe]  ;;  %v5037_v62 = vor.u32 %v5036_v61, %v5033_v54  ;;  %v5028_v23 = vrot.slane %v5026_v17, 5  ;;  %v5228_v50 = vrot.slane %v9409_v51, 5 }
 0x1a1   : > { %v3257_v7 = vpop.f32.mrf.mxu3  ;;  %v5092_v21 = vunpack.c.l.b16 %v5015_v33  ;;  %v7140_v13 = vor.u32 %v7533_v9, %v7139_v49  ;;  %v5023_v14 = vor.u32 %v5022_v32, %v5019_v27  ;;  %v7191_v33 = vld [vmem:[%s8917_s20 + $0x48] sm:$0xf]  ;;  %v4975_v27 = vshrl.u32 %v7179_v19, 16  ;;  %v7143_v17 = vld [vmem:[%s8917_s20 + $0x40] sm:$0xf] }
 0x1a2   : > { %v3274_v2 = vadd.f32 %v3257_v7, %v9340_v44  ;;  %v5217_v44 = vsel %vm7837_vm5, %v7249_v15, %v5216_v40  ;;  %v7243_v7 = vld [vmem:[%s8917_s20 + $0x20] sm:$0xe]  ;;  %v5038_v1 = vrot.slane %v5037_v62, 4  ;;  %v4978_v32 = vshll.u32 %v7179_v19, 16 }
 0x1a3   : > { %v3132_v29 = vpop.f32.mrf.mxu2  ;;  %v3505_v39 = vpop.f32.mrf.mxu0  ;;  %v5263_v24 = vunpack.c.l.b16 %v5217_v44  ;;  %v5098_v10 = vpack.c.b16 %v5092_v21, %v5091_v46  ;;  %v5024_v60 = vrot.slane %v5023_v14, 4  ;;  %v7252_v44 = vrot.slane %v7244_v11, 9 }
 0x1a4   : > { %v9440_v26 = vadd.f32 %v3132_v29, %v2969_v43  ;;  %v9450_v8 = vadd.f32 %v3503_v56, %v3274_v2  ;;  %v7055_v56 = vrot.slane %v7047_v22, 9  ;;  %v7177_v29 = vld [vmem:[%s8917_s20 + $0x10] sm:$0xf]  ;;  %v4690_v2 = vsel %vm7837_vm5, %v7056_v34, %v4689_v58  ;;  %v9502_v58 = vld [vmem:[%s8917_s20 + $0x44] sm:$0x1] }
 0x1a5   : > { %v2960_v20 = vpop.f32.mrf.mxu1  ;;  %v5271_v15 = vpack.c.b16 %v5264_v38, %v5263_v24  ;;  %v4964_v47 = vshll.u32 %v7177_v29, 16  ;;  %v4715_v22 = vunpack.c.l.b16 %v4690_v2  ;;  %v5045_v9 = vshrl.u32 %v7189_v4, 16 }
 0x1a6   : > { %v2970_v48 = vadd.f32 %v2960_v20, %v9380_v36  ;;  %v9462_v36 = vld [vmem:[%s8917_s20 + $0x3c] sm:$0x1]  ;;  %v4686_v12 = vsel %vm7837_vm5, %v7055_v56, %v4685_v30  ;;  %v7251_v20 = vrot.slane %v7243_v7, 9  ;;  %v5048_v46 = vshll.u32 %v7189_v4, 16 }
 0x1a7   : > { %v5040_v40 = vshll.u32 %v9462_v36, 16  ;;  %v4714_v28 = vunpack.c.l.b16 %v4686_v12  ;;  %v5059_v21 = vshrl.u32 %v7191_v33, 16  ;;  %v5062_v24 = vshll.u32 %v7191_v33, 16 }
 0x1a8   : > { %v5029_v51 = vsel %vm7814_vm3, %v5024_v60, %v5028_v23  ;;  %v5229_v30 = vsel %vm7837_vm5, %v7252_v44, %v5228_v50  ;;  %v4980_v34 = vrot.slane %v4978_v32, 5  ;;  %v5047_v62 = vrot.slane %v5045_v9, 4 }
 0x1a9   : > { %v3259_v43 = vpop.f32.mrf.mxu3  ;;  %v4719_v60 = vpack.c.b16 %v4715_v22, %v4714_v28  ;;  %v4970_v2 = vshll.u32 %v9420_v3, 16  ;;  %v5054_v19 = vshll.u32 %v9502_v58, 16  ;;  %v7245_v3 = vld [vmem:[%s8917_s20 + $0x30] sm:$0xe]  ;;  %v7247_v22 = vld [vmem:[%s8917_s20 + $0x40] sm:$0xe] }
 0x1aa   : > { %v3275_v55 = vadd.f32 %v3259_v43, %v9377_v59 }
 0x1ab   : > { %v3134_v6 = vpop.f32.mrf.mxu2  ;;  %v3508_v52 = vpop.f32.mrf.mxu0 }
 0x1ac   : > { %v9467_v42 = vadd.f32 %v3134_v6, %v2970_v48  ;;  %v9473_v59 = vadd.f32 %v3505_v39, %v3275_v55  ;;  %v5042_v39 = vrot.slane %v5040_v40, 5  ;;  %v4961_v48 = vshrl.u32 %v7177_v29, 16  ;;  %v7534_v6 = vld [vmem:[%s8917_s20 + $0x44] sm:$0xf0] }
 0x1ad   : > { %v3672_v16 = vpop.f32.mrf.mxu1  ;;  %v4977_v55 = vrot.slane %v4975_v27, 4  ;;  %v5064_v40 = vrot.slane %v5062_v24, 5  ;;  %v7144_v11 = vor.u32 %v7534_v6, %v7143_v17  ;;  %v7248_v27 = vld [vmem:[%s8917_s20 + $0x48] sm:$0xe] }
 0x1ae   : > { %v3692_v18 = vadd.f32 %v3672_v16, %v9398_v37  ;;  %4790 = vmatmul.bf16.gmra.mxu3 %v4718_v31  ;;  %4925 = vmatmul.bf16.gmra.mxu0 %v7140_v13  ;;  %v5224_v37 = vrot.slane %v9406_v25, 5  ;;  %v5043_v45 = vsel %vm7814_vm3, %v5038_v1, %v5042_v39  ;;  %v4963_v31 = vrot.slane %v4961_v48, 4 }
 0x1af   : > { %v4966_v13 = vrot.slane %v4964_v47, 5  ;;  %v5093_v16 = vunpack.c.l.b16 %v5029_v51  ;;  %v5094_v12 = vunpack.c.l.b16 %v5043_v45  ;;  %v4981_v23 = vor.u32 %v4980_v34, %v4977_v55 }
 0x1b0   : > { %5166 = vmatmul.bf16.vlgmr.msra.gmra.mxu1 %v5098_v10  ;;  %5335 = vmatmul.bf16.vlgmr.msra.gmra.mxu2 %v5271_v15  ;;  %v5225_v56 = vsel %vm7837_vm5, %v7251_v20, %v5224_v37  ;;  %v5050_v10 = vrot.slane %v5048_v46, 5  ;;  %v5061_v15 = vrot.slane %v5059_v21, 4  ;;  %v4984_v1 = vshll.u32 %v9426_v35, 16 }
 0x1b1   : > { %v3262_v49 = vpop.f32.mrf.mxu3  ;;  %v5265_v7 = vunpack.c.l.b16 %v5225_v56  ;;  %v4967_v29 = vor.u32 %v4966_v13, %v4963_v31  ;;  %v5099_v50 = vpack.c.b16 %v5094_v12, %v5093_v16  ;;  %v4982_v9 = vrot.slane %v4981_v23, 4 }
 0x1b2   : > { %v3276_v54 = vadd.f32 %v3262_v49, %v9396_v63  ;;  %v5051_v20 = vor.u32 %v5050_v10, %v5047_v62  ;;  %v5065_v37 = vor.u32 %v5064_v40, %v5061_v15  ;;  %v5056_v21 = vrot.slane %v5054_v19, 5 }
 0x1b3   : > { %v3806_v61 = vpop.f32.mrf.mxu2  ;;  %v3510_v38 = vpop.f32.mrf.mxu0  ;;  %v4968_v49 = vrot.slane %v4967_v29, 4  ;;  %v5240_v45 = vrot.slane %v9502_v58, 5  ;;  %v5236_v13 = vrot.slane %v9462_v36, 5 }
 0x1b4   : > { %v9486_v25 = vadd.f32 %v3806_v61, %v3692_v18  ;;  %v9496_v43 = vadd.f32 %v3508_v52, %v3276_v54  ;;  %v5266_v52 = vunpack.c.l.b16 %v5229_v30  ;;  %v7192_v18 = vld [vmem:[%s8917_s20 + $0x4c] sm:$0x1]  ;;  %v4986_v54 = vrot.slane %v4984_v1, 5  ;;  %v7246_v61 = vld [vmem:[%s8917_s20 + $0x38] sm:$0xe]  ;;  %s5612_s20 = sshll.u32 %s9655_s21, 3 }
 0x1b5   : > { %v3674_v63 = vpop.f32.mrf.mxu1  ;;  %v5068_v28 = vshll.u32 %v7192_v18, 16  ;;  %v5052_v46 = vrot.slane %v5051_v20, 4  ;;  %v5066_v24 = vrot.slane %v5065_v37, 4  ;;  %v5244_v56 = vrot.slane %v7192_v18, 5  ;;  %s380_s28 = sadd.s32 %s5613_s18, %s5612_s20 }
 0x1b6   : > { %v3693_v14 = vadd.f32 %v3674_v63, %v9422_v57  ;;  %v5272_v48 = vpack.c.b16 %v5266_v52, %v5265_v7  ;;  %v7255_v63 = vrot.slane %v7247_v22, 9  ;;  %v7253_v30 = vrot.slane %v7245_v3, 9  ;;  %s5614_s16 = sshll.u32 %s380_s28, 3 }
 0x1b7   : > { %v5070_v51 = vrot.slane %v5068_v28, 5  ;;  %v7254_v31 = vrot.slane %v7246_v61, 9  ;;  %v4987_v34 = vsel %vm7814_vm3, %v4982_v9, %v4986_v54  ;;  %v5057_v10 = vsel %vm7814_vm3, %v5052_v46, %v5056_v21  ;;  %s9578_s8 = scalar_lea.vmem %s9631_s5, %s5614_s16 }
 0x1b8   : > { %v5090_v18 = vunpack.c.l.b16 %v4987_v34  ;;  %v5095_v29 = vunpack.c.l.b16 %v5057_v10 }
 0x1b9   : > { %v3264_v57 = vpop.f32.mrf.mxu3  ;;  %v5237_v16 = vsel %vm7837_vm5, %v7254_v31, %v5236_v13 }
 0x1ba   : > { %v3277_v4 = vadd.f32 %v3264_v57, %v9415_v53  ;;  %v4972_v53 = vrot.slane %v4970_v2, 5  ;;  %v5268_v23 = vunpack.c.l.b16 %v5237_v16 }
 0x1bb   : > { %v3808_v39 = vpop.f32.mrf.mxu2  ;;  %v3513_v44 = vpop.f32.mrf.mxu0 }
 0x1bc   : > { %v9509_v33 = vadd.f32 %v3808_v39, %v3693_v14  ;;  %v9514_v35 = vadd.f32 %v3510_v38, %v3277_v4  ;;  %v7256_v38 = vrot.slane %v7248_v27, 9  ;;  %v4973_v55 = vsel %vm7814_vm3, %v4968_v49, %v4972_v53 }
 0x1bd   : > { %v3677_v47 = vpop.f32.mrf.mxu1  ;;  %v5089_v52 = vunpack.c.l.b16 %v4973_v55 }
 0x1be   : > { %v3694_v32 = vadd.f32 %v3677_v47, %v9450_v8  ;;  %4795 = vmatmul.bf16.gmra.mxu3 %v4719_v60  ;;  %4930 = vmatmul.bf16.gmra.mxu0 %v7144_v11  ;;  %v5232_v8 = vrot.slane %v9457_v5, 5  ;;  %v5241_v5 = vsel %vm7837_vm5, %v7255_v63, %v5240_v45  ;;  %v5245_v36 = vsel %vm7837_vm5, %v7256_v38, %v5244_v56 }
 0x1bf   : > { %v5269_v60 = vunpack.c.l.b16 %v5241_v5  ;;  %v5270_v11 = vunpack.c.l.b16 %v5245_v36  ;;  %v5097_v4 = vpack.c.b16 %v5090_v18, %v5089_v52 }
 0x1c0   : > { %5171 = vmatmul.bf16.gmra.mxu1 %v5099_v50  ;;  %5340 = vmatmul.bf16.gmra.mxu2 %v5272_v48  ;;  %v5233_v40 = vsel %vm7837_vm5, %v7253_v30, %v5232_v8 }
 0x1c1   : > { %v3267_v14 = vpop.f32.mrf.mxu3  ;;  %v5267_v2 = vunpack.c.l.b16 %v5233_v40  ;;  %v5274_v39 = vpack.c.b16 %v5270_v11, %v5269_v60 }
 0x1c2   : > { %v3278_v17 = vadd.f32 %v3267_v14, %v9440_v26  ;;  %v5071_v26 = vsel %vm7814_vm3, %v5066_v24, %v5070_v51 }
 0x1c3   : > { %v3811_v6 = vpop.f32.mrf.mxu2  ;;  %v3515_v62 = vpop.f32.mrf.mxu0  ;;  %v5096_v57 = vunpack.c.l.b16 %v5071_v26  ;;  %v5273_v28 = vpack.c.b16 %v5268_v23, %v5267_v2 }
 0x1c4   : > { %v3828_v58 = vadd.f32 %v3811_v6, %v3694_v32  ;;  %v3524_v12 = vadd.f32 %v3513_v44, %v3278_v17 }
 0x1c5   : > { %v3679_v15 = vpop.f32.mrf.mxu1  ;;  %v5100_v37 = vpack.c.b16 %v5096_v57, %v5095_v29 }
 0x1c6   : > { %v3695_v7 = vadd.f32 %v3679_v15, %v9473_v59 }
 0x1c9   : > { %v3269_v1 = vpop.f32.mrf.mxu3 }
 0x1ca   : > { %v3279_v41 = vadd.f32 %v3269_v1, %v9467_v42 }
 0x1cb   : > { %v3813_v19 = vpop.f32.mrf.mxu2  ;;  %v4226_v0 = vpop.f32.mrf.mxu0 }
 0x1cc   : > { %v3829_v20 = vadd.f32 %v3813_v19, %v3695_v7  ;;  %v3525_v59 = vadd.f32 %v3515_v62, %v3279_v41 }
 0x1cd   : > { %v3682_v44 = vpop.f32.mrf.mxu1 }
 0x1ce   : > { %v3696_v50 = vadd.f32 %v3682_v44, %v9496_v43  ;;  %5161 = vmatmul.bf16.vlgmr.msrb.gmra.mxu0 %v5097_v4  ;;  %5350 = vmatmul.bf16.vlgmr.msrb.gmra.mxu3 %v5274_v39 }
 0x1d0   : > { %5176 = vmatmul.bf16.gmra.mxu1 %v5100_v37  ;;  %5345 = vmatmul.bf16.gmra.mxu2 %v5273_v28 }
 0x1d1   : > { %v4052_v48 = vpop.f32.mrf.mxu3 }
 0x1d2   : > { %v4072_v47 = vadd.f32 %v4052_v48, %v9486_v25 }
 0x1d3   : > { %v3816_v3 = vpop.f32.mrf.mxu2  ;;  %v4228_v49 = vpop.f32.mrf.mxu0 }
 0x1d4   : > { %v3830_v42 = vadd.f32 %v3816_v3, %v3696_v50  ;;  %v4246_v27 = vadd.f32 %v4226_v0, %v4072_v47 }
 0x1d5   : > { %v3684_v22 = vpop.f32.mrf.mxu1 }
 0x1d6   : > { %v3697_v32 = vadd.f32 %v3684_v22, %v9514_v35 }
 0x1d9   : > { %v4054_v53 = vpop.f32.mrf.mxu3 }
 0x1da   : > { %v4073_v54 = vadd.f32 %v4054_v53, %v9509_v33 }
 0x1db   : > { %v3818_v9 = vpop.f32.mrf.mxu2  ;;  %v4231_v43 = vpop.f32.mrf.mxu0 }
 0x1dc   : > { %v3831_v61 = vadd.f32 %v3818_v9, %v3697_v32  ;;  %v4247_v21 = vadd.f32 %v4228_v49, %v4073_v54 }
 0x1dd   : > { %v3687_v46 = vpop.f32.mrf.mxu1 }
 0x1de   : > { %v3698_v24 = vadd.f32 %v3687_v46, %v3524_v12 }
 0x1e1   : > { %v4057_v51 = vpop.f32.mrf.mxu3 }
 0x1e2   : > { %v4074_v56 = vadd.f32 %v4057_v51, %v3828_v58 }
 0x1e3   : > { %v3821_v45 = vpop.f32.mrf.mxu2  ;;  %v4233_v25 = vpop.f32.mrf.mxu0 }
 0x1e4   : > { %v3832_v63 = vadd.f32 %v3821_v45, %v3698_v24  ;;  %v4248_v30 = vadd.f32 %v4231_v43, %v4074_v56 }
 0x1e5   : > { %v3689_v38 = vpop.f32.mrf.mxu1 }
 0x1e6   : > { %v3699_v8 = vadd.f32 %v3689_v38, %v3525_v59 }
 0x1e9   : > { %v4059_v31 = vpop.f32.mrf.mxu3 }
 0x1ea   : > { %v4075_v35 = vadd.f32 %v4059_v31, %v3829_v20 }
 0x1eb   : > { %v3823_v13 = vpop.f32.mrf.mxu2  ;;  %v4236_v17 = vpop.f32.mrf.mxu0 }
 0x1ec   : > { %v3833_v14 = vadd.f32 %v3823_v13, %v3699_v8  ;;  %v4249_v33 = vadd.f32 %v4233_v25, %v4075_v35 }
 0x1ed   : > { %v4361_v6 = vpop.f32.mrf.mxu1 }
 0x1ee   : > { %v4381_v55 = vadd.f32 %v4361_v6, %v4246_v27 }
 0x1f1   : > { %v4062_v34 = vpop.f32.mrf.mxu3 }
 0x1f2   : > { %v4076_v62 = vadd.f32 %v4062_v34, %v3830_v42 }
 0x1f3   : > { %v4607_v10 = vpop.f32.mrf.mxu2  ;;  %v4238_v36 = vpop.f32.mrf.mxu0 }
 0x1f4   : > { %v9544_v5 = vadd.f32 %v4607_v10, %v4381_v55  ;;  %v9546_v15 = vadd.f32 %v4236_v17, %v4076_v62 }
 0x1f5   : > { %v4363_v58 = vpop.f32.mrf.mxu1 }
 0x1f6   : > { %v4382_v26 = vadd.f32 %v4363_v58, %v4247_v21 }
 0x1f9   : > { %v4064_v40 = vpop.f32.mrf.mxu3 }
 0x1fa   : > { %v4077_v16 = vadd.f32 %v4064_v40, %v3831_v61 }
 0x1fb   : > { %v4609_v12 = vpop.f32.mrf.mxu2  ;;  %v4241_v52 = vpop.f32.mrf.mxu0 }
 0x1fc   : > { %v9548_v7 = vadd.f32 %v4609_v12, %v4382_v26  ;;  %v9550_v60 = vadd.f32 %v4238_v36, %v4077_v16 }
 0x1fd   : > { %v4366_v18 = vpop.f32.mrf.mxu1 }
 0x1fe   : > { %v4383_v24 = vadd.f32 %v4366_v18, %v4248_v30  ;;  %v9573_v30 = vld [vmem:[%s9627_s1] ss:$0 sm:$0xff] }
 0x201   : > { %v4067_v11 = vpop.f32.mrf.mxu3 }
 0x202   : > { %v4078_v29 = vadd.f32 %v4067_v11, %v3832_v63 }
 0x203   : > { %v4612_v57 = vpop.f32.mrf.mxu2  ;;  %v4243_v2 = vpop.f32.mrf.mxu0 }
 0x204   : > { %v4252_v1 = vadd.f32 %v4241_v52, %v4078_v29  ;;  %v4629_v51 = vadd.f32 %v4612_v57, %v4383_v24 }
 0x205   : > { %v4368_v23 = vpop.f32.mrf.mxu1 }
 0x206   : > { %v4384_v8 = vadd.f32 %v4368_v23, %v4249_v33 }
 0x209   : > { %v4069_v41 = vpop.f32.mrf.mxu3 }
 0x20a   : > { %v4079_v19 = vadd.f32 %v4069_v41, %v3833_v14 }
 0x20b   : > { %v4614_v4 = vpop.f32.mrf.mxu2  ;;  %v4916_v39 = vpop.f32.mrf.mxu0 }
 0x20c   : > { %v9552_v0 = vadd.f32 %v4243_v2, %v4079_v19  ;;  %v4630_v13 = vadd.f32 %v4614_v4, %v4384_v8 }
 0x20d   : > { %v4371_v20 = vpop.f32.mrf.mxu1 }
 0x20e   : > { %v4385_v58 = vadd.f32 %v4371_v20, %v9546_v15 }
 0x211   : > { %v4781_v37 = vpop.f32.mrf.mxu3 }
 0x212   : > { %v4801_v10 = vadd.f32 %v4781_v37, %v9544_v5 }
 0x213   : > { %v4617_v28 = vpop.f32.mrf.mxu2  ;;  %v9554_v44 = vpop.f32.mrf.mxu0 }
 0x214   : > { %v4631_v16 = vadd.f32 %v4617_v28, %v4385_v58  ;;  %v4936_v29 = vadd.f32 %v4916_v39, %v4801_v10 }
 0x215   : > { %v9556_v59 = vpop.f32.mrf.mxu1 }
 0x216   : > { %v4386_v37 = vadd.f32 %v9556_v59, %v9550_v60 }
 0x219   : > { %v4783_v50 = vpop.f32.mrf.mxu3 }
 0x21a   : > { %v4802_v15 = vadd.f32 %v4783_v50, %v9548_v7 }
 0x21b   : > { %v9558_v48 = vpop.f32.mrf.mxu2  ;;  %v4921_v3 = vpop.f32.mrf.mxu0 }
 0x21c   : > { %v4937_v50 = vadd.f32 %v9554_v44, %v4802_v15 }
 0x21d   : > { %v4376_v47 = vpop.f32.mrf.mxu1 }
 0x21e   : > { %v4387_v36 = vadd.f32 %v4376_v47, %v4252_v1 }
 0x221   : > { %v4786_v42 = vpop.f32.mrf.mxu3 }
 0x222   : > { %v4803_v63 = vadd.f32 %v4786_v42, %v4629_v51  ;;  %v4632_v42 = vadd.f32 %v9558_v48, %v4386_v37 }
 0x223   : > { %v4622_v49 = vpop.f32.mrf.mxu2  ;;  %v4923_v22 = vpop.f32.mrf.mxu0 }
 0x224   : > { %v4938_v31 = vadd.f32 %v4921_v3, %v4803_v63  ;;  %v4633_v40 = vadd.f32 %v4622_v49, %v4387_v36 }
 0x225   : > { %v4378_v27 = vpop.f32.mrf.mxu1 }
 0x226   : > { %v4388_v1 = vadd.f32 %v4378_v27, %v9552_v0 }
 0x229   : > { %v4788_v32 = vpop.f32.mrf.mxu3 }
 0x22a   : > { %v4804_v6 = vadd.f32 %v4788_v32, %v4630_v13 }
 0x22b   : > { %v4624_v53 = vpop.f32.mrf.mxu2  ;;  %v4926_v9 = vpop.f32.mrf.mxu0 }
 0x22c   : > { %v4939_v26 = vadd.f32 %v4923_v22, %v4804_v6  ;;  %v4634_v39 = vadd.f32 %v4624_v53, %v4388_v1 }
 0x22d   : > { %v5167_v54 = vpop.f32.mrf.mxu1 }
 0x22e   : > { %v5184_v35 = vadd.f32 %v5167_v54, %v4938_v31 }
 0x231   : > { %v4791_v61 = vpop.f32.mrf.mxu3 }
 0x232   : > { %v4805_v57 = vadd.f32 %v4791_v61, %v4631_v16 }
 0x233   : > { %v5336_v43 = vpop.f32.mrf.mxu2  ;;  %v9560_v46 = vpop.f32.mrf.mxu0 }
 0x234   : > { %v4940_v28 = vadd.f32 %v4926_v9, %v4805_v57 }
 0x235   : > { %v5169_v21 = vpop.f32.mrf.mxu1 }
 0x236   : > { %v5185_v12 = vadd.f32 %v5169_v21, %v4939_v26 }
 0x239   : > { %v4793_v45 = vpop.f32.mrf.mxu3 }
 0x23a   : > { %v4806_v27 = vadd.f32 %v4793_v45, %v4632_v42 }
 0x23b   : > { %v9566_v56 = vpop.f32.mrf.mxu2  ;;  %v4931_v25 = vpop.f32.mrf.mxu0 }
 0x23c   : > { %v4941_v21 = vadd.f32 %v9560_v46, %v4806_v27 }
 0x23d   : > { %v5172_v38 = vpop.f32.mrf.mxu1 }
 0x23e   : > { %v5186_v49 = vadd.f32 %v5172_v38, %v4940_v28 }
 0x241   : > { %v4796_v14 = vpop.f32.mrf.mxu3 }
 0x242   : > { %v4807_v18 = vadd.f32 %v4796_v14, %v4633_v40 }
 0x243   : > { %v5341_v17 = vpop.f32.mrf.mxu2  ;;  %v4933_v34 = vpop.f32.mrf.mxu0 }
 0x244   : > { %v5358_v55 = vadd.f32 %v5341_v17, %v5184_v35  ;;  %v4942_v20 = vadd.f32 %v4931_v25, %v4807_v18 }
 0x245   : > { %v5174_v33 = vpop.f32.mrf.mxu1 }
 0x246   : > { %v5370_v62 = vadd.f32 %v9573_v30, %v5358_v55  ;;  %v5187_v51 = vadd.f32 %v5174_v33, %v4941_v21 }
 0x248   : > { %5378 = vst [vmem:[%s9578_s8 + $0x10] sm:$0xff] %v5370_v62  ;;  %v5400_v35 = vmul.f32 %v5370_v62, %v5370_v62 }
 0x249   : > { %v4798_v52 = vpop.f32.mrf.mxu3 }
 0x24a   : > { %v4808_v32 = vadd.f32 %v4798_v52, %v4634_v39 }
 0x24b   : > { %v5343_v11 = vpop.f32.mrf.mxu2  ;;  %v5162_v23 = vpop.f32.mrf.mxu0 }
 0x24c   : > { %v5359_v2 = vadd.f32 %v5343_v11, %v5185_v12  ;;  %v5182_v41 = vadd.f32 %v5162_v23, %v4936_v29 }
 0x24d   : > { %v5177_v19 = vpop.f32.mrf.mxu1 }
 0x24e   : > { %v5371_v5 = vadd.f32 %v9573_v30, %v5359_v2  ;;  %v5356_v4 = vadd.f32 %v5336_v43, %v5182_v41  ;;  %v5188_v47 = vadd.f32 %v5177_v19, %v4942_v20  ;;  %v4943_v43 = vadd.f32 %v4933_v34, %v4808_v32 }
 0x250   : > { %5379 = vst [vmem:[%s9578_s8 + $0x18] sm:$0xff] %v5371_v5  ;;  %v5368_v3 = vadd.f32 %v9573_v30, %v5356_v4  ;;  %v5401_v6 = vmul.f32 %v5371_v5, %v5371_v5 }
 0x251   : > { %v5351_v22 = vpop.f32.mrf.mxu3 }
 0x252   : > { %5376 = vst [vmem:[%s9578_s8] sm:$0xff] %v5368_v3  ;;  %v5362_v0 = vadd.f32 %v5351_v22, %v5188_v47  ;;  %v5398_v63 = vmul.f32 %v5368_v3, %v5368_v3 }
 0x253   : > { %v5346_v7 = vpop.f32.mrf.mxu2  ;;  %v5164_v59 = vpop.f32.mrf.mxu0 }
 0x254   : > { %v5360_v60 = vadd.f32 %v5346_v7, %v5186_v49  ;;  %v5374_v53 = vadd.f32 %v9573_v30, %v5362_v0  ;;  %v5183_v9 = vadd.f32 %v5164_v59, %v4937_v50 }
 0x255   : > { %v5179_v61 = vpop.f32.mrf.mxu1 }
 0x256   : > { %v5372_v54 = vadd.f32 %v9573_v30, %v5360_v60  ;;  %5382 = vst [vmem:[%s9578_s8 + $0x30] sm:$0xff] %v5374_v53  ;;  %v5357_v48 = vadd.f32 %v9566_v56, %v5183_v9  ;;  %v5189_v44 = vadd.f32 %v5179_v61, %v4943_v43  ;;  %v5404_v16 = vmul.f32 %v5374_v53, %v5374_v53 }
 0x258   : > { %5380 = vst [vmem:[%s9578_s8 + $0x20] sm:$0xff] %v5372_v54  ;;  %v5369_v24 = vadd.f32 %v9573_v30, %v5357_v48  ;;  %v5402_v33 = vmul.f32 %v5372_v54, %v5372_v54 }
 0x259   : > { %v5353_v45 = vpop.f32.mrf.mxu3 }
 0x25a   : > { %5377 = vst [vmem:[%s9578_s8 + $0x8] sm:$0xff] %v5369_v24  ;;  %v5384_v25 = vadd.f32 %v5369_v24, %v5368_v3  ;;  %v5399_v38 = vmul.f32 %v5369_v24, %v5369_v24  ;;  %v5363_v31 = vadd.f32 %v5353_v45, %v5189_v44 }
 0x25b   : > { %v5348_v8 = vpop.f32.mrf.mxu2 }
 0x25c   : > { %v5361_v13 = vadd.f32 %v5348_v8, %v5187_v51  ;;  %v5385_v56 = vadd.f32 %v5384_v25, %v5370_v62  ;;  %v5406_v14 = vadd.f32 %v5399_v38, %v5398_v63  ;;  %v5375_v46 = vadd.f32 %v9573_v30, %v5363_v31 }
 0x25e   : > { %v5373_v17 = vadd.f32 %v9573_v30, %v5361_v13  ;;  %v5407_v55 = vadd.f32 %v5406_v14, %v5400_v35  ;;  %v5386_v34 = vadd.f32 %v5385_v56, %v5371_v5  ;;  %5383 = vst [vmem:[%s9578_s8 + $0x38] sm:$0xff] %v5375_v46  ;;  %v5405_v18 = vmul.f32 %v5375_v46, %v5375_v46 }
 0x260   : > { %5381 = vst [vmem:[%s9578_s8 + $0x28] sm:$0xff] %v5373_v17  ;;  %v5387_v10 = vadd.f32 %v5386_v34, %v5372_v54  ;;  %v5408_v36 = vadd.f32 %v5407_v55, %v5401_v6  ;;  %v5403_v26 = vmul.f32 %v5373_v17, %v5373_v17 }
 0x262   : > { %v5388_v58 = vadd.f32 %v5387_v10, %v5373_v17  ;;  %v5409_v40 = vadd.f32 %v5408_v36, %v5402_v33 }
 0x264   : > { %v5410_v62 = vadd.f32 %v5409_v40, %v5403_v26  ;;  %v5389_v12 = vadd.f32 %v5388_v58, %v5374_v53 }
 0x266   : > { %v5390_v52 = vadd.f32 %v5389_v12, %v5375_v46  ;;  %v5411_v11 = vadd.f32 %v5410_v62, %v5404_v16 }
 0x268   : > { %v5391_v30 = vrot.slane %v5390_v52, 4  ;;  %v5412_v29 = vadd.f32 %v5411_v11, %v5405_v18 }
 0x26a   : > { %v5392_v57 = vadd.f32 %v5391_v30, %v5390_v52  ;;  %v5413_v2 = vrot.slane %v5412_v29, 4 }
 0x26c   : > { %v5393_v23 = vrot.slane %v5392_v57, 2  ;;  %v5414_v41 = vadd.f32 %v5413_v2, %v5412_v29 }
 0x26e   : > { %v5394_v19 = vadd.f32 %v5393_v23, %v5392_v57  ;;  %v5415_v5 = vrot.slane %v5414_v41, 2 }
 0x270   : > { %v5395_v15 = vrot.slane %v5394_v19, 1  ;;  %v5416_v1 = vadd.f32 %v5415_v5, %v5414_v41 }
 0x272   : > { %v5396_v4 = vadd.f32 %v5395_v15, %v5394_v19  ;;  %v5417_v20 = vrot.slane %v5416_v1, 1 }
 0x274   : > { %5397 = vst [vmem:[%s390_s14] sm:$0x1] %v5396_v4  ;;  %v5418_v37 = vadd.f32 %v5417_v20, %v5416_v1 }
 0x276   : > { %5419 = vst [vmem:[%s390_s14 + $0x1] sm:$0x1] %v5418_v37 }
 0x277 PF: > { %s17_s25 = sadd.s32 1, %s7666_s25   ;;  %s9638_s21 = smov %s7658_s23 }
 0x278   : > { %p14_p10 = scmp.ge.s32.totalorder %s17_s25, 18   ;;  %s9639_s22 = smov %s7662_s24 }
 0x279   : > { %s9640_s23 = smov %s9643_s26  ;;  %s9641_s24 = smov %s9647_s27 }
 0x27a   :  { %16 = sbr.rel (!%p14_p10) target bundleno = 3 (0x3), region = 120 }

</bundles_post_ra>
